<compile_context>
chip_gen: v5e
topology: v5e:2x2
jax: 0.10.0
libtpu: 0.0.40
codegen_flags: <defaults>
</compile_context>

<pallas_src>
import functools
import math

import jax
import jax.numpy as jnp
from jax.experimental import pallas as pl
from jax.experimental.pallas import tpu as pltpu


# ---------------------------------------------------------------------------
# Fused encoder kernel: one attention_block per (batch-tile, layer) grid step.
# ---------------------------------------------------------------------------
def _encoder_kernel(
    pep_in, ab_in,                               # (Bt, S, D) activations
    mha_wqkv, mha_bqkv, mha_wo, mha_bo,          # packed MHA params (per layer)
    ffn_w1, ffn_b1, ffn_w2, ffn_b2,              # packed FFN params (per layer)
    ln_g, ln_b,                                  # LayerNorm params (per layer)
    pep_out, ab_out,                             # carried stream state / outputs
    pep_att_out, a_att_out, b_att_out,           # lane-dense attention maps
    *, num_heads, seq_a):
  layer = pl.program_id(1)
  num_layers = pl.num_programs(1)

  # Carried state lives directly in the (block-revisited) output refs.
  @pl.when(layer == 0)
  def _():
    pep_out[...] = pep_in[...]
    ab_out[...] = ab_in[...]

  Bt, Sp, D = pep_out.shape
  Sz = ab_out.shape[1]
  Sa = seq_a
  Sb = Sz - Sa
  H = num_heads
  Dh = D // H
  scale = 1.0 / math.sqrt(Dh)

  gamma = ln_g[0]          # (1, D) f32
  beta = ln_b[0]           # (1, D) f32

  def layer_norm(x):       # x: (N, D) f32
    mu = jnp.mean(x, axis=-1, keepdims=True)
    xc = x - mu
    var = jnp.mean(xc * xc, axis=-1, keepdims=True)
    return xc * jax.lax.rsqrt(var + 1e-5) * gamma + beta

  def mm(x, w):            # bf16 MXU matmul, f32 accumulate (w is already bf16)
    return jnp.dot(x.astype(jnp.bfloat16), w, preferred_element_type=jnp.float32)

  def mha(idx, xq, xkv, sq, sk, fused_qkv):
    # xq: (Bt*sq, D) f32, xkv: (Bt*sk, D) f32
    wqkv = mha_wqkv[0, idx]          # (D, 3D) bf16 = [Wq | Wk | Wv]
    bqkv = mha_bqkv[0, idx]          # (1, 3D) f32
    wo = mha_wo[0, idx]              # (D, D)  bf16
    bo = mha_bo[0, idx]              # (1, D)  f32
    if fused_qkv:
      # Self-attention: single fused QKV projection (one MXU weight push).
      qkv = mm(xq, wqkv) + bqkv
      q = qkv[:, :D]
      k = qkv[:, D:2 * D]
      v = qkv[:, 2 * D:3 * D]
    else:
      # Cross-attention: Q from the query stream, fused KV from key/value.
      q = mm(xq, wqkv[:, :D]) + bqkv[:, :D]
      kv = mm(xkv, wqkv[:, D:]) + bqkv[:, D:]
      k = kv[:, :D]
      v = kv[:, D:]

    q3 = q.reshape(Bt, sq, D).astype(jnp.bfloat16)
    k3 = k.reshape(Bt, sk, D).astype(jnp.bfloat16)
    v3 = v.reshape(Bt, sk, D).astype(jnp.bfloat16)

    ctx_parts = []
    att_parts = []
    for h in range(H):               # static loop over heads; Bt-batched matmuls
      qh = q3[:, :, h * Dh:(h + 1) * Dh]
      kh = k3[:, :, h * Dh:(h + 1) * Dh]
      vh = v3[:, :, h * Dh:(h + 1) * Dh]
      s = jnp.einsum('bqd,bkd->bqk', qh, kh,
                     preferred_element_type=jnp.float32) * scale
      m = jnp.max(s, axis=-1, keepdims=True)
      e = jnp.exp(s - m)
      attn = e / jnp.sum(e, axis=-1, keepdims=True)   # exact softmax (returned)
      ctx_parts.append(jnp.einsum('bqk,bkd->bqd', attn.astype(jnp.bfloat16), vh,
                                  preferred_element_type=jnp.float32))
      att_parts.append(attn)                           # (Bt, sq, sk) f32
    ctx = jnp.concatenate(ctx_parts, axis=-1).reshape(Bt * sq, D)
    out = mm(ctx, wo) + bo
    return out, att_parts

  def ffn(idx, x):
    h1 = jnp.maximum(mm(x, ffn_w1[0, idx]) + ffn_b1[0, idx], 0.0)
    return mm(h1, ffn_w2[0, idx]) + ffn_b2[0, idx]

  # Load carried state; flatten to (Bt*S, D) so projection/FFN matmuls feed the
  # MXU Bt*S rows instead of S.
  pep = pep_out[...].reshape(Bt * Sp, D)
  ab = ab_out[...]
  a = ab[:, 0:Sa, :].reshape(Bt * Sa, D)
  b = ab[:, Sa:Sz, :].reshape(Bt * Sb, D)

  # --- self-attention sub-layers (dropout p=0.0 -> identity) ---
  o, _ = mha(0, pep, pep, Sp, Sp, fused_qkv=True)
  pep = layer_norm(pep + o)
  o, _ = mha(1, a, a, Sa, Sa, fused_qkv=True)
  a = layer_norm(a + o)
  o, _ = mha(2, b, b, Sb, Sb, fused_qkv=True)
  b = layer_norm(b + o)

  # z = cat(a, b): write a/b back into the contiguous state buffer, so z is
  # simply the buffer contents (no concat copy).
  ab_out[:, 0:Sa, :] = a.reshape(Bt, Sa, D)
  ab_out[:, Sa:Sz, :] = b.reshape(Bt, Sb, D)
  z = ab_out[...].reshape(Bt * Sz, D)

  # --- cross-attention sub-layers ---
  o, pep_att = mha(3, pep, z, Sp, Sz, fused_qkv=False)
  pep = layer_norm(pep + o)
  o, a_att = mha(4, a, pep, Sa, Sp, fused_qkv=False)
  a = layer_norm(a + o)
  o, b_att = mha(5, b, pep, Sb, Sp, fused_qkv=False)
  b = layer_norm(b + o)

  # --- feed-forward sub-layers ---
  pep = layer_norm(pep + ffn(0, pep))
  a = layer_norm(a + ffn(1, a))
  b = layer_norm(b + ffn(2, b))

  # Carry the state to the next layer in the output refs themselves.
  pep_out[...] = pep.reshape(Bt, Sp, D)
  ab_out[:, 0:Sa, :] = a.reshape(Bt, Sa, D)
  ab_out[:, Sa:Sz, :] = b.reshape(Bt, Sb, D)

  # Only the final layer packs (lane-dense (Sq, H*Sk)) and stores attention.
  @pl.when(layer == num_layers - 1)
  def _():
    pep_att_out[...] = jnp.concatenate(pep_att, axis=-1)
    a_att_out[...] = jnp.concatenate(a_att, axis=-1)
    b_att_out[...] = jnp.concatenate(b_att, axis=-1)


# ---------------------------------------------------------------------------
# Wrapper: single pallas_call for the whole encoder.
# ---------------------------------------------------------------------------
def transformer_encoder_fwd(packed, pep, a, b, *, num_heads, batch_tile=None):
  B, Sp, D = pep.shape
  Sa = a.shape[1]
  Sb = b.shape[1]
  Sz = Sa + Sb
  L = packed["mha_wqkv"].shape[0]
  F = packed["ffn_w1"].shape[-1]
  H = num_heads

  if batch_tile is None:
    batch_tile = min(B, 8)          # fill MXU rows & amortise weight DMA
  assert B % batch_tile == 0, "batch must be divisible by batch_tile"
  Bt = batch_tile
  Bn = B // Bt
  # NOTE(v7x): if Bn == 1 the second TensorCore idles; pick batch_tile so that
  # Bn >= 2 when the batch size allows.

  ab = jnp.concatenate([a, b], axis=1)          # contiguous a|b stream state

  def act_spec(S):
    return pl.BlockSpec((Bt, S, D), lambda bi, li: (bi, 0, 0))

  def w_spec(shape):
    nd = len(shape)
    return pl.BlockSpec((1,) + tuple(shape),
                        lambda bi, li, _nd=nd: (li,) + (0,) * _nd)

  kernel = functools.partial(_encoder_kernel, num_heads=H, seq_a=Sa)
  outs = pl.pallas_call(
      kernel,
      grid=(Bn, L),
      in_specs=[
          act_spec(Sp), act_spec(Sz),
          w_spec((6, D, 3 * D)), w_spec((6, 1, 3 * D)),
          w_spec((6, D, D)), w_spec((6, 1, D)),
          w_spec((3, D, F)), w_spec((3, 1, F)),
          w_spec((3, F, D)), w_spec((3, 1, D)),
          w_spec((1, D)), w_spec((1, D)),
      ],
      out_specs=(
          act_spec(Sp), act_spec(Sz),
          pl.BlockSpec((Bt, Sp, H * Sz), lambda bi, li: (bi, 0, 0)),
          pl.BlockSpec((Bt, Sa, H * Sp), lambda bi, li: (bi, 0, 0)),
          pl.BlockSpec((Bt, Sb, H * Sp), lambda bi, li: (bi, 0, 0)),
      ),
      out_shape=(
          jax.ShapeDtypeStruct((B, Sp, D), jnp.float32),
          jax.ShapeDtypeStruct((B, Sz, D), jnp.float32),
          jax.ShapeDtypeStruct((B, Sp, H * Sz), jnp.float32),
          jax.ShapeDtypeStruct((B, Sa, H * Sp), jnp.float32),
          jax.ShapeDtypeStruct((B, Sb, H * Sp), jnp.float32),
      ),
      compiler_params=pltpu.CompilerParams(
          dimension_semantics=("parallel", "arbitrary")),
  )(pep, ab,
    packed["mha_wqkv"], packed["mha_bqkv"], packed["mha_wo"], packed["mha_bo"],
    packed["ffn_w1"], packed["ffn_b1"], packed["ffn_w2"], packed["ffn_b2"],
    packed["ln_g"], packed["ln_b"])

  pep_o, ab_o, pep_att_f, a_att_f, b_att_f = outs
  a_o = ab_o[:, :Sa]
  b_o = ab_o[:, Sa:]
  # lane-dense (B, Sq, H*Sk) -> per-head (B, H, Sq, Sk)
  pep_att = pep_att_f.reshape(B, Sp, H, Sz).transpose(0, 2, 1, 3)
  a_att = a_att_f.reshape(B, Sa, H, Sp).transpose(0, 2, 1, 3)
  b_att = b_att_f.reshape(B, Sb, H, Sp).transpose(0, 2, 1, 3)
  return pep_o, a_o, b_o, pep_att, a_att, b_att


# ---------------------------------------------------------------------------
# Parameter construction + packing (layer-stacked, QKV fused, bf16 weights).
# ---------------------------------------------------------------------------
def _init_linear(key, fan_in, fan_out):
  kw, kb = jax.random.split(key)
  w = jax.random.normal(kw, (fan_in, fan_out), jnp.float32) * 0.05
  bias = jax.random.normal(kb, (1, fan_out), jnp.float32) * 0.01
  return w, bias


def _init_mha(key, d):
  keys = jax.random.split(key, 4)
  wq, bq = _init_linear(keys[0], d, d)
  wk, bk = _init_linear(keys[1], d, d)
  wv, bv = _init_linear(keys[2], d, d)
  wo, bo = _init_linear(keys[3], d, d)
  return dict(wq=wq, bq=bq, wk=wk, bk=bk, wv=wv, bv=bv, wo=wo, bo=bo)


def _init_ffn(key, d, f):
  k1, k2 = jax.random.split(key)
  w1, b1 = _init_linear(k1, d, f)
  w2, b2 = _init_linear(k2, f, d)
  return dict(w1=w1, b1=b1, w2=w2, b2=b2)


def init_attention_block(key, d, f):
  ks = jax.random.split(key, 9)
  return dict(
      sa1=_init_mha(ks[0], d), sa2=_init_mha(ks[1], d), sa3=_init_mha(ks[2], d),
      mha1=_init_mha(ks[3], d), mha2=_init_mha(ks[4], d), mha3=_init_mha(ks[5], d),
      ffn1=_init_ffn(ks[6], d, f), ffn2=_init_ffn(ks[7], d, f), ffn3=_init_ffn(ks[8], d, f),
      ln=dict(gamma=jnp.ones((1, d), jnp.float32),
              beta=jnp.zeros((1, d), jnp.float32)),
  )


def init_transformer_encoder(key, num_layers, d, f):
  keys = jax.random.split(key, num_layers)
  return [init_attention_block(k, d, f) for k in keys]


_MHA_NAMES = ("sa1", "sa2", "sa3", "mha1", "mha2", "mha3")
_FFN_NAMES = ("ffn1", "ffn2", "ffn3")


def pack_encoder_params(layers):
  bf16 = jnp.bfloat16

  def wqkv(p):
    return jnp.concatenate([p["wq"], p["wk"], p["wv"]], axis=1).astype(bf16)

  def bqkv(p):
    return jnp.concatenate([p["bq"], p["bk"], p["bv"]], axis=1)

  return dict(
      mha_wqkv=jnp.stack([jnp.stack([wqkv(l[n]) for n in _MHA_NAMES]) for l in layers]),
      mha_bqkv=jnp.stack([jnp.stack([bqkv(l[n]) for n in _MHA_NAMES]) for l in layers]),
      mha_wo=jnp.stack([jnp.stack([l[n]["wo"].astype(bf16) for n in _MHA_NAMES]) for l in layers]),
      mha_bo=jnp.stack([jnp.stack([l[n]["bo"] for n in _MHA_NAMES]) for l in layers]),
      ffn_w1=jnp.stack([jnp.stack([l[n]["w1"].astype(bf16) for n in _FFN_NAMES]) for l in layers]),
      ffn_b1=jnp.stack([jnp.stack([l[n]["b1"] for n in _FFN_NAMES]) for l in layers]),
      ffn_w2=jnp.stack([jnp.stack([l[n]["w2"].astype(bf16) for n in _FFN_NAMES]) for l in layers]),
      ffn_b2=jnp.stack([jnp.stack([l[n]["b2"] for n in _FFN_NAMES]) for l in layers]),
      ln_g=jnp.stack([l["ln"]["gamma"] for l in layers]),
      ln_b=jnp.stack([l["ln"]["beta"] for l in layers]),
  )


def _bf16_round(x):
  return x.astype(jnp.bfloat16).astype(jnp.float32)


def _round_layers_to_bf16(layers):
  # Reference sees the same bf16-rounded weight matrices the kernel uses
  # (biases / LN params stay f32, as in the kernel).
  out = []
  for l in layers:
    lq = {}
    for name, p in l.items():
      if name == "ln":
        lq[name] = p
      else:
        lq[name] = {k: (_bf16_round(v) if k.startswith("w") else v)
                    for k, v in p.items()}
    out.append(lq)
  return out


# ---------------------------------------------------------------------------
# Plain-JAX reference (numerical sanity check).
# ---------------------------------------------------------------------------
def _ref_mha(x_q, x_kv, p, num_heads):
  q = x_q @ p["wq"] + p["bq"]
  k = x_kv @ p["wk"] + p["bk"]
  v = x_kv @ p["wv"] + p["bv"]
  B, Sq, D = q.shape
  Sk = k.shape[1]
  dh = D // num_heads
  qh = q.reshape(B, Sq, num_heads, dh).transpose(0, 2, 1, 3)
  kh = k.reshape(B, Sk, num_heads, dh).transpose(0, 2, 1, 3)
  vh = v.reshape(B, Sk, num_heads, dh).transpose(0, 2, 1, 3)
  s = jnp.einsum("bhqd,bhkd->bhqk", qh, kh) / math.sqrt(dh)
  attn = jax.nn.softmax(s, axis=-1)
  ctx = jnp.einsum("bhqk,bhkd->bhqd", attn, vh)
  ctx = ctx.transpose(0, 2, 1, 3).reshape(B, Sq, D)
  return ctx @ p["wo"] + p["bo"], attn


def _ref_layer_norm(x, ln):
  mu = jnp.mean(x, axis=-1, keepdims=True)
  var = jnp.mean((x - mu) ** 2, axis=-1, keepdims=True)
  return (x - mu) * jax.lax.rsqrt(var + 1e-5) * ln["gamma"] + ln["beta"]


def _ref_ffn(x, p):
  return jnp.maximum(x @ p["w1"] + p["b1"], 0.0) @ p["w2"] + p["b2"]


def _ref_block(p, pep, a, b, num_heads):
  ln = p["ln"]
  pep_, _ = _ref_mha(pep, pep, p["sa1"], num_heads)
  pep = _ref_layer_norm(pep + pep_, ln)
  a_, _ = _ref_mha(a, a, p["sa2"], num_heads)
  a = _ref_layer_norm(a + a_, ln)
  b_, _ = _ref_mha(b, b, p["sa3"], num_heads)
  b = _ref_layer_norm(b + b_, ln)
  z = jnp.concatenate([a, b], axis=1)
  pep_, pep_att = _ref_mha(pep, z, p["mha1"], num_heads)
  pep = _ref_layer_norm(pep + pep_, ln)
  a_, a_att = _ref_mha(a, pep, p["mha2"], num_heads)
  a = _ref_layer_norm(a + a_, ln)
  b_, b_att = _ref_mha(b, pep, p["mha3"], num_heads)
  b = _ref_layer_norm(b + b_, ln)
  pep = _ref_layer_norm(pep + _ref_ffn(pep, p["ffn1"]), ln)
  a = _ref_layer_norm(a + _ref_ffn(a, p["ffn2"]), ln)
  b = _ref_layer_norm(b + _ref_ffn(b, p["ffn3"]), ln)
  return pep, a, b, pep_att, a_att, b_att


def _ref_encoder(layers, pep, a, b, num_heads):
  for p in layers:
    pep, a, b, pep_att, a_att, b_att = _ref_block(p, pep, a, b, num_heads)
  return pep, a, b, pep_att, a_att, b_att


# ---------------------------------------------------------------------------
# Main
# ---------------------------------------------------------------------------
if __name__ == "__main__":
  NUM_LAYERS = 2
  D = 32            # input_dim
  H = 4             # num_heads
  F = 64            # dim_feedforward
  B = 2
  S_PEP, S_A, S_B = 8, 8, 8

  key = jax.random.PRNGKey(0)
  k_par, k_pep, k_a, k_b = jax.random.split(key, 4)

  layers = init_transformer_encoder(k_par, NUM_LAYERS, D, F)
  packed = pack_encoder_params(layers)
  pep = jax.random.normal(k_pep, (B, S_PEP, D), jnp.float32)
  a = jax.random.normal(k_a, (B, S_A, D), jnp.float32)
  b = jax.random.normal(k_b, (B, S_B, D), jnp.float32)

  fwd = jax.jit(functools.partial(transformer_encoder_fwd, num_heads=H))
  pep_o, a_o, b_o, pep_att, a_att, b_att = fwd(packed, pep, a, b)
  jax.block_until_ready((pep_o, a_o, b_o, pep_att, a_att, b_att))

  assert pep_o.shape == (B, S_PEP, D)
  assert a_o.shape == (B, S_A, D)
  assert b_o.shape == (B, S_B, D)
  assert pep_att.shape == (B, H, S_PEP, S_A + S_B)
  assert a_att.shape == (B, H, S_A, S_PEP)
  assert b_att.shape == (B, H, S_B, S_PEP)

  # Numerical check against a plain-JAX f32 reference that uses the same
  # bf16-rounded weight matrices (isolates kernel error from quantization).
  refs = _ref_encoder(_round_layers_to_bf16(layers), pep, a, b, H)
  for got, want in zip((pep_o, a_o, b_o, pep_att, a_att, b_att), refs):
    err = float(jnp.max(jnp.abs(got - want)))
    assert err < 5e-2, f"max abs err too large: {err}"

  print("KERNEL_OK")
</pallas_src>

<mosaic_0001>
module attributes {stable_mosaic.version = 11 : i64} {
  func.func @_encoder_kernel(%arg0: i32, %arg1: i32, %arg2: memref<2x8x32xf32, #tpu.memory_space<vmem>>, %arg3: memref<2x16x32xf32, #tpu.memory_space<vmem>>, %arg4: memref<1x6x32x96xbf16, #tpu.memory_space<vmem>>, %arg5: memref<1x6x1x96xf32, #tpu.memory_space<vmem>>, %arg6: memref<1x6x32x32xbf16, #tpu.memory_space<vmem>>, %arg7: memref<1x6x1x32xf32, #tpu.memory_space<vmem>>, %arg8: memref<1x3x32x64xbf16, #tpu.memory_space<vmem>>, %arg9: memref<1x3x1x64xf32, #tpu.memory_space<vmem>>, %arg10: memref<1x3x64x32xbf16, #tpu.memory_space<vmem>>, %arg11: memref<1x3x1x32xf32, #tpu.memory_space<vmem>>, %arg12: memref<1x1x32xf32, #tpu.memory_space<vmem>>, %arg13: memref<1x1x32xf32, #tpu.memory_space<vmem>>, %arg14: memref<2x8x32xf32, #tpu.memory_space<vmem>>, %arg15: memref<2x16x32xf32, #tpu.memory_space<vmem>>, %arg16: memref<2x8x64xf32, #tpu.memory_space<vmem>>, %arg17: memref<2x8x32xf32, #tpu.memory_space<vmem>>, %arg18: memref<2x8x32xf32, #tpu.memory_space<vmem>>) attributes {dimension_semantics = [#tpu.dimension_semantics<parallel>, #tpu.dimension_semantics<arbitrary>], iteration_bounds = array<i64: 1, 2>, scalar_prefetch = 0 : i64, scratch_operands = 0 : i64, tpu.core_type = #tpu.core_type<tc>, window_params = [{transform_indices = @transform_0, window_bounds = array<i64: 2, 8, 32>}, {transform_indices = @transform_1, window_bounds = array<i64: 2, 16, 32>}, {transform_indices = @transform_2, window_bounds = array<i64: 1, 6, 32, 96>}, {transform_indices = @transform_3, window_bounds = array<i64: 1, 6, 1, 96>}, {transform_indices = @transform_4, window_bounds = array<i64: 1, 6, 32, 32>}, {transform_indices = @transform_5, window_bounds = array<i64: 1, 6, 1, 32>}, {transform_indices = @transform_6, window_bounds = array<i64: 1, 3, 32, 64>}, {transform_indices = @transform_7, window_bounds = array<i64: 1, 3, 1, 64>}, {transform_indices = @transform_8, window_bounds = array<i64: 1, 3, 64, 32>}, {transform_indices = @transform_9, window_bounds = array<i64: 1, 3, 1, 32>}, {transform_indices = @transform_10, window_bounds = array<i64: 1, 1, 32>}, {transform_indices = @transform_11, window_bounds = array<i64: 1, 1, 32>}, {transform_indices = @transform_12, window_bounds = array<i64: 2, 8, 32>}, {transform_indices = @transform_13, window_bounds = array<i64: 2, 16, 32>}, {transform_indices = @transform_14, window_bounds = array<i64: 2, 8, 64>}, {transform_indices = @transform_15, window_bounds = array<i64: 2, 8, 32>}, {transform_indices = @transform_16, window_bounds = array<i64: 2, 8, 32>}]} {
    %c0_i32 = arith.constant 0 : i32
    %0 = arith.cmpi eq, %arg1, %c0_i32 : i32
    %1 = arith.extui %0 : i1 to i32
    %c0_i32_0 = arith.constant 0 : i32
    %2 = arith.cmpi ne, %1, %c0_i32_0 : i32
    scf.if %2 {
      %c0_357 = arith.constant 0 : index
      %c0_358 = arith.constant 0 : index
      %c0_359 = arith.constant 0 : index
      %863 = vector.load %arg2[%c0_357, %c0_358, %c0_359] : memref<2x8x32xf32, #tpu.memory_space<vmem>>, vector<2x8x32xf32>
      %c0_360 = arith.constant 0 : index
      %c0_361 = arith.constant 0 : index
      %c0_362 = arith.constant 0 : index
      %864 = vector.load %arg14[%c0_360, %c0_361, %c0_362] : memref<2x8x32xf32, #tpu.memory_space<vmem>>, vector<2x8x32xf32>
      tpu.vector_store %arg14[%c0_360, %c0_361, %c0_362], %863 {strides = array<i32>} : memref<2x8x32xf32, #tpu.memory_space<vmem>>, vector<2x8x32xf32>,
      %c0_363 = arith.constant 0 : index
      %c0_364 = arith.constant 0 : index
      %c0_365 = arith.constant 0 : index
      %865 = vector.load %arg3[%c0_363, %c0_364, %c0_365] : memref<2x16x32xf32, #tpu.memory_space<vmem>>, vector<2x16x32xf32>
      %c0_366 = arith.constant 0 : index
      %c0_367 = arith.constant 0 : index
      %c0_368 = arith.constant 0 : index
      %866 = vector.load %arg15[%c0_366, %c0_367, %c0_368] : memref<2x16x32xf32, #tpu.memory_space<vmem>>, vector<2x16x32xf32>
      tpu.vector_store %arg15[%c0_366, %c0_367, %c0_368], %865 {strides = array<i32>} : memref<2x16x32xf32, #tpu.memory_space<vmem>>, vector<2x16x32xf32>,
    } else {
    }
    %c0 = arith.constant 0 : index
    %c0_1 = arith.constant 0 : index
    %c0_2 = arith.constant 0 : index
    %3 = vector.load %arg12[%c0, %c0_1, %c0_2] : memref<1x1x32xf32, #tpu.memory_space<vmem>>, vector<1x1x32xf32>
    %4 = vector.shape_cast %3 : vector<1x1x32xf32> to vector<1x32xf32>
    %c0_3 = arith.constant 0 : index
    %c0_4 = arith.constant 0 : index
    %c0_5 = arith.constant 0 : index
    %5 = vector.load %arg13[%c0_3, %c0_4, %c0_5] : memref<1x1x32xf32, #tpu.memory_space<vmem>>, vector<1x1x32xf32>
    %6 = vector.shape_cast %5 : vector<1x1x32xf32> to vector<1x32xf32>
    %c0_6 = arith.constant 0 : index
    %c0_7 = arith.constant 0 : index
    %c0_8 = arith.constant 0 : index
    %7 = vector.load %arg14[%c0_6, %c0_7, %c0_8] : memref<2x8x32xf32, #tpu.memory_space<vmem>>, vector<2x8x32xf32>
    %8 = vector.shape_cast %7 : vector<2x8x32xf32> to vector<16x32xf32>
    %c0_9 = arith.constant 0 : index
    %c0_10 = arith.constant 0 : index
    %c0_11 = arith.constant 0 : index
    %9 = vector.load %arg15[%c0_9, %c0_10, %c0_11] : memref<2x16x32xf32, #tpu.memory_space<vmem>>, vector<2x16x32xf32>
    %10 = vector.extract_strided_slice %9 {offsets = [0, 0, 0], sizes = [2, 8, 32], strides = [1, 1, 1]} : vector<2x16x32xf32> to vector<2x8x32xf32>
    %11 = vector.shape_cast %10 : vector<2x8x32xf32> to vector<16x32xf32>
    %12 = vector.extract_strided_slice %9 {offsets = [0, 8, 0], sizes = [2, 8, 32], strides = [1, 1, 1]} : vector<2x16x32xf32> to vector<2x8x32xf32>
    %13 = vector.shape_cast %12 : vector<2x8x32xf32> to vector<16x32xf32>
    %c0_12 = arith.constant 0 : index
    %c0_13 = arith.constant 0 : index
    %c0_14 = arith.constant 0 : index
    %c0_15 = arith.constant 0 : index
    %14 = vector.load %arg4[%c0_12, %c0_13, %c0_14, %c0_15] : memref<1x6x32x96xbf16, #tpu.memory_space<vmem>>, vector<1x1x32x96xbf16>
    %15 = vector.shape_cast %14 : vector<1x1x32x96xbf16> to vector<32x96xbf16>
    %c0_16 = arith.constant 0 : index
    %c0_17 = arith.constant 0 : index
    %c0_18 = arith.constant 0 : index
    %c0_19 = arith.constant 0 : index
    %16 = vector.load %arg5[%c0_16, %c0_17, %c0_18, %c0_19] : memref<1x6x1x96xf32, #tpu.memory_space<vmem>>, vector<1x1x1x96xf32>
    %17 = vector.shape_cast %16 : vector<1x1x1x96xf32> to vector<1x96xf32>
    %c0_20 = arith.constant 0 : index
    %c0_21 = arith.constant 0 : index
    %c0_22 = arith.constant 0 : index
    %c0_23 = arith.constant 0 : index
    %18 = vector.load %arg6[%c0_20, %c0_21, %c0_22, %c0_23] : memref<1x6x32x32xbf16, #tpu.memory_space<vmem>>, vector<1x1x32x32xbf16>
    %19 = vector.shape_cast %18 : vector<1x1x32x32xbf16> to vector<32x32xbf16>
    %c0_24 = arith.constant 0 : index
    %c0_25 = arith.constant 0 : index
    %c0_26 = arith.constant 0 : index
    %c0_27 = arith.constant 0 : index
    %20 = vector.load %arg7[%c0_24, %c0_25, %c0_26, %c0_27] : memref<1x6x1x32xf32, #tpu.memory_space<vmem>>, vector<1x1x1x32xf32>
    %21 = vector.shape_cast %20 : vector<1x1x1x32xf32> to vector<1x32xf32>
    %22 = arith.truncf %8 : vector<16x32xf32> to vector<16x32xbf16>
    %cst = arith.constant dense<0.000000e+00> : vector<16x96xf32>
    %23 = tpu.matmul %22, %15, %cst {dimension_numbers = #tpu.dot_dimension_numbers<[1], [0], [0], [1], [0, 0, 1, 1], [], []>} : vector<16x32xbf16>, vector<32x96xbf16>, vector<16x96xf32> -> vector<16x96xf32>
    %24 = vector.broadcast %17 : vector<1x96xf32> to vector<16x96xf32>
    %25 = arith.addf %23, %24 : vector<16x96xf32>
    %26 = vector.extract_strided_slice %25 {offsets = [0, 0], sizes = [16, 32], strides = [1, 1]} : vector<16x96xf32> to vector<16x32xf32>
    %27 = vector.extract_strided_slice %25 {offsets = [0, 32], sizes = [16, 32], strides = [1, 1]} : vector<16x96xf32> to vector<16x32xf32>
    %28 = vector.extract_strided_slice %25 {offsets = [0, 64], sizes = [16, 32], strides = [1, 1]} : vector<16x96xf32> to vector<16x32xf32>
    %29 = vector.shape_cast %26 : vector<16x32xf32> to vector<2x8x32xf32>
    %30 = arith.truncf %29 : vector<2x8x32xf32> to vector<2x8x32xbf16>
    %31 = vector.shape_cast %27 : vector<16x32xf32> to vector<2x8x32xf32>
    %32 = arith.truncf %31 : vector<2x8x32xf32> to vector<2x8x32xbf16>
    %33 = vector.shape_cast %28 : vector<16x32xf32> to vector<2x8x32xf32>
    %34 = arith.truncf %33 : vector<2x8x32xf32> to vector<2x8x32xbf16>
    %35 = vector.extract_strided_slice %30 {offsets = [0, 0, 0], sizes = [2, 8, 8], strides = [1, 1, 1]} : vector<2x8x32xbf16> to vector<2x8x8xbf16>
    %36 = vector.extract_strided_slice %32 {offsets = [0, 0, 0], sizes = [2, 8, 8], strides = [1, 1, 1]} : vector<2x8x32xbf16> to vector<2x8x8xbf16>
    %37 = vector.extract_strided_slice %34 {offsets = [0, 0, 0], sizes = [2, 8, 8], strides = [1, 1, 1]} : vector<2x8x32xbf16> to vector<2x8x8xbf16>
    "tpu.trace_start"() <{level = 10 : i32, message = "bqd,bkd->bqk"}> : () -> ()
    %cst_28 = arith.constant dense<0.000000e+00> : vector<2x8x8xf32>
    %38 = tpu.matmul %35, %36, %cst_28 {dimension_numbers = #tpu.dot_dimension_numbers<[2], [2], [1], [1], [0, 0, 0, 1, 1, 1], [0], [0]>} : vector<2x8x8xbf16>, vector<2x8x8xbf16>, vector<2x8x8xf32> -> vector<2x8x8xf32>
    "tpu.trace_stop"() : () -> ()
    %cst_29 = arith.constant 0.353553385 : f32
    %39 = vector.broadcast %cst_29 : f32 to vector<2x8x8xf32>
    %40 = arith.mulf %38, %39 : vector<2x8x8xf32>
    %cst_30 = arith.constant dense<0xFF800000> : vector<2x8xf32>
    %41 = vector.multi_reduction <maximumf>, %40, %cst_30 [2] : vector<2x8x8xf32> to vector<2x8xf32>
    %42 = vector.shape_cast %41 : vector<2x8xf32> to vector<2x8x1xf32>
    %43 = vector.broadcast %42 : vector<2x8x1xf32> to vector<2x8x8xf32>
    %44 = arith.subf %40, %43 : vector<2x8x8xf32>
    %45 = math.exp %44 : vector<2x8x8xf32>
    %cst_31 = arith.constant dense<0.000000e+00> : vector<2x8xf32>
    %46 = vector.multi_reduction <add>, %45, %cst_31 [2] : vector<2x8x8xf32> to vector<2x8xf32>
    %47 = vector.shape_cast %46 : vector<2x8xf32> to vector<2x8x1xf32>
    %48 = vector.broadcast %47 : vector<2x8x1xf32> to vector<2x8x8xf32>
    %49 = arith.divf %45, %48 : vector<2x8x8xf32>
    %50 = arith.truncf %49 : vector<2x8x8xf32> to vector<2x8x8xbf16>
    "tpu.trace_start"() <{level = 10 : i32, message = "bqk,bkd->bqd"}> : () -> ()
    %cst_32 = arith.constant dense<0.000000e+00> : vector<2x8x8xf32>
    %51 = tpu.matmul %50, %37, %cst_32 {dimension_numbers = #tpu.dot_dimension_numbers<[2], [1], [1], [2], [0, 0, 0, 1, 1, 2], [0], [0]>} : vector<2x8x8xbf16>, vector<2x8x8xbf16>, vector<2x8x8xf32> -> vector<2x8x8xf32>
    "tpu.trace_stop"() : () -> ()
    %52 = vector.extract_strided_slice %30 {offsets = [0, 0, 8], sizes = [2, 8, 8], strides = [1, 1, 1]} : vector<2x8x32xbf16> to vector<2x8x8xbf16>
    %53 = vector.extract_strided_slice %32 {offsets = [0, 0, 8], sizes = [2, 8, 8], strides = [1, 1, 1]} : vector<2x8x32xbf16> to vector<2x8x8xbf16>
    %54 = vector.extract_strided_slice %34 {offsets = [0, 0, 8], sizes = [2, 8, 8], strides = [1, 1, 1]} : vector<2x8x32xbf16> to vector<2x8x8xbf16>
    "tpu.trace_start"() <{level = 10 : i32, message = "bqd,bkd->bqk"}> : () -> ()
    %cst_33 = arith.constant dense<0.000000e+00> : vector<2x8x8xf32>
    %55 = tpu.matmul %52, %53, %cst_33 {dimension_numbers = #tpu.dot_dimension_numbers<[2], [2], [1], [1], [0, 0, 0, 1, 1, 1], [0], [0]>} : vector<2x8x8xbf16>, vector<2x8x8xbf16>, vector<2x8x8xf32> -> vector<2x8x8xf32>
    "tpu.trace_stop"() : () -> ()
    %cst_34 = arith.constant 0.353553385 : f32
    %56 = vector.broadcast %cst_34 : f32 to vector<2x8x8xf32>
    %57 = arith.mulf %55, %56 : vector<2x8x8xf32>
    %cst_35 = arith.constant dense<0xFF800000> : vector<2x8xf32>
    %58 = vector.multi_reduction <maximumf>, %57, %cst_35 [2] : vector<2x8x8xf32> to vector<2x8xf32>
    %59 = vector.shape_cast %58 : vector<2x8xf32> to vector<2x8x1xf32>
    %60 = vector.broadcast %59 : vector<2x8x1xf32> to vector<2x8x8xf32>
    %61 = arith.subf %57, %60 : vector<2x8x8xf32>
    %62 = math.exp %61 : vector<2x8x8xf32>
    %cst_36 = arith.constant dense<0.000000e+00> : vector<2x8xf32>
    %63 = vector.multi_reduction <add>, %62, %cst_36 [2] : vector<2x8x8xf32> to vector<2x8xf32>
    %64 = vector.shape_cast %63 : vector<2x8xf32> to vector<2x8x1xf32>
    %65 = vector.broadcast %64 : vector<2x8x1xf32> to vector<2x8x8xf32>
    %66 = arith.divf %62, %65 : vector<2x8x8xf32>
    %67 = arith.truncf %66 : vector<2x8x8xf32> to vector<2x8x8xbf16>
    "tpu.trace_start"() <{level = 10 : i32, message = "bqk,bkd->bqd"}> : () -> ()
    %cst_37 = arith.constant dense<0.000000e+00> : vector<2x8x8xf32>
    %68 = tpu.matmul %67, %54, %cst_37 {dimension_numbers = #tpu.dot_dimension_numbers<[2], [1], [1], [2], [0, 0, 0, 1, 1, 2], [0], [0]>} : vector<2x8x8xbf16>, vector<2x8x8xbf16>, vector<2x8x8xf32> -> vector<2x8x8xf32>
    "tpu.trace_stop"() : () -> ()
    %69 = vector.extract_strided_slice %30 {offsets = [0, 0, 16], sizes = [2, 8, 8], strides = [1, 1, 1]} : vector<2x8x32xbf16> to vector<2x8x8xbf16>
    %70 = vector.extract_strided_slice %32 {offsets = [0, 0, 16], sizes = [2, 8, 8], strides = [1, 1, 1]} : vector<2x8x32xbf16> to vector<2x8x8xbf16>
    %71 = vector.extract_strided_slice %34 {offsets = [0, 0, 16], sizes = [2, 8, 8], strides = [1, 1, 1]} : vector<2x8x32xbf16> to vector<2x8x8xbf16>
    "tpu.trace_start"() <{level = 10 : i32, message = "bqd,bkd->bqk"}> : () -> ()
    %cst_38 = arith.constant dense<0.000000e+00> : vector<2x8x8xf32>
    %72 = tpu.matmul %69, %70, %cst_38 {dimension_numbers = #tpu.dot_dimension_numbers<[2], [2], [1], [1], [0, 0, 0, 1, 1, 1], [0], [0]>} : vector<2x8x8xbf16>, vector<2x8x8xbf16>, vector<2x8x8xf32> -> vector<2x8x8xf32>
    "tpu.trace_stop"() : () -> ()
    %cst_39 = arith.constant 0.353553385 : f32
    %73 = vector.broadcast %cst_39 : f32 to vector<2x8x8xf32>
    %74 = arith.mulf %72, %73 : vector<2x8x8xf32>
    %cst_40 = arith.constant dense<0xFF800000> : vector<2x8xf32>
    %75 = vector.multi_reduction <maximumf>, %74, %cst_40 [2] : vector<2x8x8xf32> to vector<2x8xf32>
    %76 = vector.shape_cast %75 : vector<2x8xf32> to vector<2x8x1xf32>
    %77 = vector.broadcast %76 : vector<2x8x1xf32> to vector<2x8x8xf32>
    %78 = arith.subf %74, %77 : vector<2x8x8xf32>
    %79 = math.exp %78 : vector<2x8x8xf32>
    %cst_41 = arith.constant dense<0.000000e+00> : vector<2x8xf32>
    %80 = vector.multi_reduction <add>, %79, %cst_41 [2] : vector<2x8x8xf32> to vector<2x8xf32>
    %81 = vector.shape_cast %80 : vector<2x8xf32> to vector<2x8x1xf32>
    %82 = vector.broadcast %81 : vector<2x8x1xf32> to vector<2x8x8xf32>
    %83 = arith.divf %79, %82 : vector<2x8x8xf32>
    %84 = arith.truncf %83 : vector<2x8x8xf32> to vector<2x8x8xbf16>
    "tpu.trace_start"() <{level = 10 : i32, message = "bqk,bkd->bqd"}> : () -> ()
    %cst_42 = arith.constant dense<0.000000e+00> : vector<2x8x8xf32>
    %85 = tpu.matmul %84, %71, %cst_42 {dimension_numbers = #tpu.dot_dimension_numbers<[2], [1], [1], [2], [0, 0, 0, 1, 1, 2], [0], [0]>} : vector<2x8x8xbf16>, vector<2x8x8xbf16>, vector<2x8x8xf32> -> vector<2x8x8xf32>
    "tpu.trace_stop"() : () -> ()
    %86 = vector.extract_strided_slice %30 {offsets = [0, 0, 24], sizes = [2, 8, 8], strides = [1, 1, 1]} : vector<2x8x32xbf16> to vector<2x8x8xbf16>
    %87 = vector.extract_strided_slice %32 {offsets = [0, 0, 24], sizes = [2, 8, 8], strides = [1, 1, 1]} : vector<2x8x32xbf16> to vector<2x8x8xbf16>
    %88 = vector.extract_strided_slice %34 {offsets = [0, 0, 24], sizes = [2, 8, 8], strides = [1, 1, 1]} : vector<2x8x32xbf16> to vector<2x8x8xbf16>
    "tpu.trace_start"() <{level = 10 : i32, message = "bqd,bkd->bqk"}> : () -> ()
    %cst_43 = arith.constant dense<0.000000e+00> : vector<2x8x8xf32>
    %89 = tpu.matmul %86, %87, %cst_43 {dimension_numbers = #tpu.dot_dimension_numbers<[2], [2], [1], [1], [0, 0, 0, 1, 1, 1], [0], [0]>} : vector<2x8x8xbf16>, vector<2x8x8xbf16>, vector<2x8x8xf32> -> vector<2x8x8xf32>
    "tpu.trace_stop"() : () -> ()
    %cst_44 = arith.constant 0.353553385 : f32
    %90 = vector.broadcast %cst_44 : f32 to vector<2x8x8xf32>
    %91 = arith.mulf %89, %90 : vector<2x8x8xf32>
    %cst_45 = arith.constant dense<0xFF800000> : vector<2x8xf32>
    %92 = vector.multi_reduction <maximumf>, %91, %cst_45 [2] : vector<2x8x8xf32> to vector<2x8xf32>
    %93 = vector.shape_cast %92 : vector<2x8xf32> to vector<2x8x1xf32>
    %94 = vector.broadcast %93 : vector<2x8x1xf32> to vector<2x8x8xf32>
    %95 = arith.subf %91, %94 : vector<2x8x8xf32>
    %96 = math.exp %95 : vector<2x8x8xf32>
    %cst_46 = arith.constant dense<0.000000e+00> : vector<2x8xf32>
    %97 = vector.multi_reduction <add>, %96, %cst_46 [2] : vector<2x8x8xf32> to vector<2x8xf32>
    %98 = vector.shape_cast %97 : vector<2x8xf32> to vector<2x8x1xf32>
    %99 = vector.broadcast %98 : vector<2x8x1xf32> to vector<2x8x8xf32>
    %100 = arith.divf %96, %99 : vector<2x8x8xf32>
    %101 = arith.truncf %100 : vector<2x8x8xf32> to vector<2x8x8xbf16>
    "tpu.trace_start"() <{level = 10 : i32, message = "bqk,bkd->bqd"}> : () -> ()
    %cst_47 = arith.constant dense<0.000000e+00> : vector<2x8x8xf32>
    %102 = tpu.matmul %101, %88, %cst_47 {dimension_numbers = #tpu.dot_dimension_numbers<[2], [1], [1], [2], [0, 0, 0, 1, 1, 2], [0], [0]>} : vector<2x8x8xbf16>, vector<2x8x8xbf16>, vector<2x8x8xf32> -> vector<2x8x8xf32>
    "tpu.trace_stop"() : () -> ()
    %103 = tpu.concatenate %51, %68, %85, %102 in 2 : vector<2x8x8xf32>, vector<2x8x8xf32>, vector<2x8x8xf32>, vector<2x8x8xf32> -> vector<2x8x32xf32>
    %104 = vector.shape_cast %103 : vector<2x8x32xf32> to vector<16x32xf32>
    %105 = arith.truncf %104 : vector<16x32xf32> to vector<16x32xbf16>
    %cst_48 = arith.constant dense<0.000000e+00> : vector<16x32xf32>
    %106 = tpu.matmul %105, %19, %cst_48 {dimension_numbers = #tpu.dot_dimension_numbers<[1], [0], [0], [1], [0, 0, 1, 1], [], []>} : vector<16x32xbf16>, vector<32x32xbf16>, vector<16x32xf32> -> vector<16x32xf32>
    %107 = vector.broadcast %21 : vector<1x32xf32> to vector<16x32xf32>
    %108 = arith.addf %106, %107 : vector<16x32xf32>
    %109 = arith.addf %8, %108 : vector<16x32xf32>
    %cst_49 = arith.constant dense<0.000000e+00> : vector<16xf32>
    %110 = vector.multi_reduction <add>, %109, %cst_49 [1] : vector<16x32xf32> to vector<16xf32>
    %111 = vector.shape_cast %110 : vector<16xf32> to vector<16x1xf32>
    %cst_50 = arith.constant 3.200000e+01 : f32
    %112 = vector.broadcast %cst_50 : f32 to vector<16x1xf32>
    %113 = arith.divf %111, %112 : vector<16x1xf32>
    %114 = vector.broadcast %113 : vector<16x1xf32> to vector<16x32xf32>
    %115 = arith.subf %109, %114 : vector<16x32xf32>
    %116 = arith.mulf %115, %115 : vector<16x32xf32>
    %cst_51 = arith.constant dense<0.000000e+00> : vector<16xf32>
    %117 = vector.multi_reduction <add>, %116, %cst_51 [1] : vector<16x32xf32> to vector<16xf32>
    %118 = vector.shape_cast %117 : vector<16xf32> to vector<16x1xf32>
    %cst_52 = arith.constant 3.200000e+01 : f32
    %119 = vector.broadcast %cst_52 : f32 to vector<16x1xf32>
    %120 = arith.divf %118, %119 : vector<16x1xf32>
    %cst_53 = arith.constant 9.99999974E-6 : f32
    %121 = vector.broadcast %cst_53 : f32 to vector<16x1xf32>
    %122 = arith.addf %120, %121 : vector<16x1xf32>
    %123 = math.rsqrt %122 : vector<16x1xf32>
    %124 = vector.broadcast %123 : vector<16x1xf32> to vector<16x32xf32>
    %125 = arith.mulf %115, %124 : vector<16x32xf32>
    %126 = vector.broadcast %4 : vector<1x32xf32> to vector<16x32xf32>
    %127 = arith.mulf %125, %126 : vector<16x32xf32>
    %128 = vector.broadcast %6 : vector<1x32xf32> to vector<16x32xf32>
    %129 = arith.addf %127, %128 : vector<16x32xf32>
    %c0_54 = arith.constant 0 : index
    %c1 = arith.constant 1 : index
    %c0_55 = arith.constant 0 : index
    %c0_56 = arith.constant 0 : index
    %130 = vector.load %arg4[%c0_54, %c1, %c0_55, %c0_56] : memref<1x6x32x96xbf16, #tpu.memory_space<vmem>>, vector<1x1x32x96xbf16>
    %131 = vector.shape_cast %130 : vector<1x1x32x96xbf16> to vector<32x96xbf16>
    %c0_57 = arith.constant 0 : index
    %c1_58 = arith.constant 1 : index
    %c0_59 = arith.constant 0 : index
    %c0_60 = arith.constant 0 : index
    %132 = vector.load %arg5[%c0_57, %c1_58, %c0_59, %c0_60] : memref<1x6x1x96xf32, #tpu.memory_space<vmem>>, vector<1x1x1x96xf32>
    %133 = vector.shape_cast %132 : vector<1x1x1x96xf32> to vector<1x96xf32>
    %c0_61 = arith.constant 0 : index
    %c1_62 = arith.constant 1 : index
    %c0_63 = arith.constant 0 : index
    %c0_64 = arith.constant 0 : index
    %134 = vector.load %arg6[%c0_61, %c1_62, %c0_63, %c0_64] : memref<1x6x32x32xbf16, #tpu.memory_space<vmem>>, vector<1x1x32x32xbf16>
    %135 = vector.shape_cast %134 : vector<1x1x32x32xbf16> to vector<32x32xbf16>
    %c0_65 = arith.constant 0 : index
    %c1_66 = arith.constant 1 : index
    %c0_67 = arith.constant 0 : index
    %c0_68 = arith.constant 0 : index
    %136 = vector.load %arg7[%c0_65, %c1_66, %c0_67, %c0_68] : memref<1x6x1x32xf32, #tpu.memory_space<vmem>>, vector<1x1x1x32xf32>
    %137 = vector.shape_cast %136 : vector<1x1x1x32xf32> to vector<1x32xf32>
    %138 = arith.truncf %11 : vector<16x32xf32> to vector<16x32xbf16>
    %cst_69 = arith.constant dense<0.000000e+00> : vector<16x96xf32>
    %139 = tpu.matmul %138, %131, %cst_69 {dimension_numbers = #tpu.dot_dimension_numbers<[1], [0], [0], [1], [0, 0, 1, 1], [], []>} : vector<16x32xbf16>, vector<32x96xbf16>, vector<16x96xf32> -> vector<16x96xf32>
    %140 = vector.broadcast %133 : vector<1x96xf32> to vector<16x96xf32>
    %141 = arith.addf %139, %140 : vector<16x96xf32>
    %142 = vector.extract_strided_slice %141 {offsets = [0, 0], sizes = [16, 32], strides = [1, 1]} : vector<16x96xf32> to vector<16x32xf32>
    %143 = vector.extract_strided_slice %141 {offsets = [0, 32], sizes = [16, 32], strides = [1, 1]} : vector<16x96xf32> to vector<16x32xf32>
    %144 = vector.extract_strided_slice %141 {offsets = [0, 64], sizes = [16, 32], strides = [1, 1]} : vector<16x96xf32> to vector<16x32xf32>
    %145 = vector.shape_cast %142 : vector<16x32xf32> to vector<2x8x32xf32>
    %146 = arith.truncf %145 : vector<2x8x32xf32> to vector<2x8x32xbf16>
    %147 = vector.shape_cast %143 : vector<16x32xf32> to vector<2x8x32xf32>
    %148 = arith.truncf %147 : vector<2x8x32xf32> to vector<2x8x32xbf16>
    %149 = vector.shape_cast %144 : vector<16x32xf32> to vector<2x8x32xf32>
    %150 = arith.truncf %149 : vector<2x8x32xf32> to vector<2x8x32xbf16>
    %151 = vector.extract_strided_slice %146 {offsets = [0, 0, 0], sizes = [2, 8, 8], strides = [1, 1, 1]} : vector<2x8x32xbf16> to vector<2x8x8xbf16>
    %152 = vector.extract_strided_slice %148 {offsets = [0, 0, 0], sizes = [2, 8, 8], strides = [1, 1, 1]} : vector<2x8x32xbf16> to vector<2x8x8xbf16>
    %153 = vector.extract_strided_slice %150 {offsets = [0, 0, 0], sizes = [2, 8, 8], strides = [1, 1, 1]} : vector<2x8x32xbf16> to vector<2x8x8xbf16>
    "tpu.trace_start"() <{level = 10 : i32, message = "bqd,bkd->bqk"}> : () -> ()
    %cst_70 = arith.constant dense<0.000000e+00> : vector<2x8x8xf32>
    %154 = tpu.matmul %151, %152, %cst_70 {dimension_numbers = #tpu.dot_dimension_numbers<[2], [2], [1], [1], [0, 0, 0, 1, 1, 1], [0], [0]>} : vector<2x8x8xbf16>, vector<2x8x8xbf16>, vector<2x8x8xf32> -> vector<2x8x8xf32>
    "tpu.trace_stop"() : () -> ()
    %cst_71 = arith.constant 0.353553385 : f32
    %155 = vector.broadcast %cst_71 : f32 to vector<2x8x8xf32>
    %156 = arith.mulf %154, %155 : vector<2x8x8xf32>
    %cst_72 = arith.constant dense<0xFF800000> : vector<2x8xf32>
    %157 = vector.multi_reduction <maximumf>, %156, %cst_72 [2] : vector<2x8x8xf32> to vector<2x8xf32>
    %158 = vector.shape_cast %157 : vector<2x8xf32> to vector<2x8x1xf32>
    %159 = vector.broadcast %158 : vector<2x8x1xf32> to vector<2x8x8xf32>
    %160 = arith.subf %156, %159 : vector<2x8x8xf32>
    %161 = math.exp %160 : vector<2x8x8xf32>
    %cst_73 = arith.constant dense<0.000000e+00> : vector<2x8xf32>
    %162 = vector.multi_reduction <add>, %161, %cst_73 [2] : vector<2x8x8xf32> to vector<2x8xf32>
    %163 = vector.shape_cast %162 : vector<2x8xf32> to vector<2x8x1xf32>
    %164 = vector.broadcast %163 : vector<2x8x1xf32> to vector<2x8x8xf32>
    %165 = arith.divf %161, %164 : vector<2x8x8xf32>
    %166 = arith.truncf %165 : vector<2x8x8xf32> to vector<2x8x8xbf16>
    "tpu.trace_start"() <{level = 10 : i32, message = "bqk,bkd->bqd"}> : () -> ()
    %cst_74 = arith.constant dense<0.000000e+00> : vector<2x8x8xf32>
    %167 = tpu.matmul %166, %153, %cst_74 {dimension_numbers = #tpu.dot_dimension_numbers<[2], [1], [1], [2], [0, 0, 0, 1, 1, 2], [0], [0]>} : vector<2x8x8xbf16>, vector<2x8x8xbf16>, vector<2x8x8xf32> -> vector<2x8x8xf32>
    "tpu.trace_stop"() : () -> ()
    %168 = vector.extract_strided_slice %146 {offsets = [0, 0, 8], sizes = [2, 8, 8], strides = [1, 1, 1]} : vector<2x8x32xbf16> to vector<2x8x8xbf16>
    %169 = vector.extract_strided_slice %148 {offsets = [0, 0, 8], sizes = [2, 8, 8], strides = [1, 1, 1]} : vector<2x8x32xbf16> to vector<2x8x8xbf16>
    %170 = vector.extract_strided_slice %150 {offsets = [0, 0, 8], sizes = [2, 8, 8], strides = [1, 1, 1]} : vector<2x8x32xbf16> to vector<2x8x8xbf16>
    "tpu.trace_start"() <{level = 10 : i32, message = "bqd,bkd->bqk"}> : () -> ()
    %cst_75 = arith.constant dense<0.000000e+00> : vector<2x8x8xf32>
    %171 = tpu.matmul %168, %169, %cst_75 {dimension_numbers = #tpu.dot_dimension_numbers<[2], [2], [1], [1], [0, 0, 0, 1, 1, 1], [0], [0]>} : vector<2x8x8xbf16>, vector<2x8x8xbf16>, vector<2x8x8xf32> -> vector<2x8x8xf32>
    "tpu.trace_stop"() : () -> ()
    %cst_76 = arith.constant 0.353553385 : f32
    %172 = vector.broadcast %cst_76 : f32 to vector<2x8x8xf32>
    %173 = arith.mulf %171, %172 : vector<2x8x8xf32>
    %cst_77 = arith.constant dense<0xFF800000> : vector<2x8xf32>
    %174 = vector.multi_reduction <maximumf>, %173, %cst_77 [2] : vector<2x8x8xf32> to vector<2x8xf32>
    %175 = vector.shape_cast %174 : vector<2x8xf32> to vector<2x8x1xf32>
    %176 = vector.broadcast %175 : vector<2x8x1xf32> to vector<2x8x8xf32>
    %177 = arith.subf %173, %176 : vector<2x8x8xf32>
    %178 = math.exp %177 : vector<2x8x8xf32>
    %cst_78 = arith.constant dense<0.000000e+00> : vector<2x8xf32>
    %179 = vector.multi_reduction <add>, %178, %cst_78 [2] : vector<2x8x8xf32> to vector<2x8xf32>
    %180 = vector.shape_cast %179 : vector<2x8xf32> to vector<2x8x1xf32>
    %181 = vector.broadcast %180 : vector<2x8x1xf32> to vector<2x8x8xf32>
    %182 = arith.divf %178, %181 : vector<2x8x8xf32>
    %183 = arith.truncf %182 : vector<2x8x8xf32> to vector<2x8x8xbf16>
    "tpu.trace_start"() <{level = 10 : i32, message = "bqk,bkd->bqd"}> : () -> ()
    %cst_79 = arith.constant dense<0.000000e+00> : vector<2x8x8xf32>
    %184 = tpu.matmul %183, %170, %cst_79 {dimension_numbers = #tpu.dot_dimension_numbers<[2], [1], [1], [2], [0, 0, 0, 1, 1, 2], [0], [0]>} : vector<2x8x8xbf16>, vector<2x8x8xbf16>, vector<2x8x8xf32> -> vector<2x8x8xf32>
    "tpu.trace_stop"() : () -> ()
    %185 = vector.extract_strided_slice %146 {offsets = [0, 0, 16], sizes = [2, 8, 8], strides = [1, 1, 1]} : vector<2x8x32xbf16> to vector<2x8x8xbf16>
    %186 = vector.extract_strided_slice %148 {offsets = [0, 0, 16], sizes = [2, 8, 8], strides = [1, 1, 1]} : vector<2x8x32xbf16> to vector<2x8x8xbf16>
    %187 = vector.extract_strided_slice %150 {offsets = [0, 0, 16], sizes = [2, 8, 8], strides = [1, 1, 1]} : vector<2x8x32xbf16> to vector<2x8x8xbf16>
    "tpu.trace_start"() <{level = 10 : i32, message = "bqd,bkd->bqk"}> : () -> ()
    %cst_80 = arith.constant dense<0.000000e+00> : vector<2x8x8xf32>
    %188 = tpu.matmul %185, %186, %cst_80 {dimension_numbers = #tpu.dot_dimension_numbers<[2], [2], [1], [1], [0, 0, 0, 1, 1, 1], [0], [0]>} : vector<2x8x8xbf16>, vector<2x8x8xbf16>, vector<2x8x8xf32> -> vector<2x8x8xf32>
    "tpu.trace_stop"() : () -> ()
    %cst_81 = arith.constant 0.353553385 : f32
    %189 = vector.broadcast %cst_81 : f32 to vector<2x8x8xf32>
    %190 = arith.mulf %188, %189 : vector<2x8x8xf32>
    %cst_82 = arith.constant dense<0xFF800000> : vector<2x8xf32>
    %191 = vector.multi_reduction <maximumf>, %190, %cst_82 [2] : vector<2x8x8xf32> to vector<2x8xf32>
    %192 = vector.shape_cast %191 : vector<2x8xf32> to vector<2x8x1xf32>
    %193 = vector.broadcast %192 : vector<2x8x1xf32> to vector<2x8x8xf32>
    %194 = arith.subf %190, %193 : vector<2x8x8xf32>
    %195 = math.exp %194 : vector<2x8x8xf32>
    %cst_83 = arith.constant dense<0.000000e+00> : vector<2x8xf32>
    %196 = vector.multi_reduction <add>, %195, %cst_83 [2] : vector<2x8x8xf32> to vector<2x8xf32>
    %197 = vector.shape_cast %196 : vector<2x8xf32> to vector<2x8x1xf32>
    %198 = vector.broadcast %197 : vector<2x8x1xf32> to vector<2x8x8xf32>
    %199 = arith.divf %195, %198 : vector<2x8x8xf32>
    %200 = arith.truncf %199 : vector<2x8x8xf32> to vector<2x8x8xbf16>
    "tpu.trace_start"() <{level = 10 : i32, message = "bqk,bkd->bqd"}> : () -> ()
    %cst_84 = arith.constant dense<0.000000e+00> : vector<2x8x8xf32>
    %201 = tpu.matmul %200, %187, %cst_84 {dimension_numbers = #tpu.dot_dimension_numbers<[2], [1], [1], [2], [0, 0, 0, 1, 1, 2], [0], [0]>} : vector<2x8x8xbf16>, vector<2x8x8xbf16>, vector<2x8x8xf32> -> vector<2x8x8xf32>
    "tpu.trace_stop"() : () -> ()
    %202 = vector.extract_strided_slice %146 {offsets = [0, 0, 24], sizes = [2, 8, 8], strides = [1, 1, 1]} : vector<2x8x32xbf16> to vector<2x8x8xbf16>
    %203 = vector.extract_strided_slice %148 {offsets = [0, 0, 24], sizes = [2, 8, 8], strides = [1, 1, 1]} : vector<2x8x32xbf16> to vector<2x8x8xbf16>
    %204 = vector.extract_strided_slice %150 {offsets = [0, 0, 24], sizes = [2, 8, 8], strides = [1, 1, 1]} : vector<2x8x32xbf16> to vector<2x8x8xbf16>
    "tpu.trace_start"() <{level = 10 : i32, message = "bqd,bkd->bqk"}> : () -> ()
    %cst_85 = arith.constant dense<0.000000e+00> : vector<2x8x8xf32>
    %205 = tpu.matmul %202, %203, %cst_85 {dimension_numbers = #tpu.dot_dimension_numbers<[2], [2], [1], [1], [0, 0, 0, 1, 1, 1], [0], [0]>} : vector<2x8x8xbf16>, vector<2x8x8xbf16>, vector<2x8x8xf32> -> vector<2x8x8xf32>
    "tpu.trace_stop"() : () -> ()
    %cst_86 = arith.constant 0.353553385 : f32
    %206 = vector.broadcast %cst_86 : f32 to vector<2x8x8xf32>
    %207 = arith.mulf %205, %206 : vector<2x8x8xf32>
    %cst_87 = arith.constant dense<0xFF800000> : vector<2x8xf32>
    %208 = vector.multi_reduction <maximumf>, %207, %cst_87 [2] : vector<2x8x8xf32> to vector<2x8xf32>
    %209 = vector.shape_cast %208 : vector<2x8xf32> to vector<2x8x1xf32>
    %210 = vector.broadcast %209 : vector<2x8x1xf32> to vector<2x8x8xf32>
    %211 = arith.subf %207, %210 : vector<2x8x8xf32>
    %212 = math.exp %211 : vector<2x8x8xf32>
    %cst_88 = arith.constant dense<0.000000e+00> : vector<2x8xf32>
    %213 = vector.multi_reduction <add>, %212, %cst_88 [2] : vector<2x8x8xf32> to vector<2x8xf32>
    %214 = vector.shape_cast %213 : vector<2x8xf32> to vector<2x8x1xf32>
    %215 = vector.broadcast %214 : vector<2x8x1xf32> to vector<2x8x8xf32>
    %216 = arith.divf %212, %215 : vector<2x8x8xf32>
    %217 = arith.truncf %216 : vector<2x8x8xf32> to vector<2x8x8xbf16>
    "tpu.trace_start"() <{level = 10 : i32, message = "bqk,bkd->bqd"}> : () -> ()
    %cst_89 = arith.constant dense<0.000000e+00> : vector<2x8x8xf32>
    %218 = tpu.matmul %217, %204, %cst_89 {dimension_numbers = #tpu.dot_dimension_numbers<[2], [1], [1], [2], [0, 0, 0, 1, 1, 2], [0], [0]>} : vector<2x8x8xbf16>, vector<2x8x8xbf16>, vector<2x8x8xf32> -> vector<2x8x8xf32>
    "tpu.trace_stop"() : () -> ()
    %219 = tpu.concatenate %167, %184, %201, %218 in 2 : vector<2x8x8xf32>, vector<2x8x8xf32>, vector<2x8x8xf32>, vector<2x8x8xf32> -> vector<2x8x32xf32>
    %220 = vector.shape_cast %219 : vector<2x8x32xf32> to vector<16x32xf32>
    %221 = arith.truncf %220 : vector<16x32xf32> to vector<16x32xbf16>
    %cst_90 = arith.constant dense<0.000000e+00> : vector<16x32xf32>
    %222 = tpu.matmul %221, %135, %cst_90 {dimension_numbers = #tpu.dot_dimension_numbers<[1], [0], [0], [1], [0, 0, 1, 1], [], []>} : vector<16x32xbf16>, vector<32x32xbf16>, vector<16x32xf32> -> vector<16x32xf32>
    %223 = vector.broadcast %137 : vector<1x32xf32> to vector<16x32xf32>
    %224 = arith.addf %222, %223 : vector<16x32xf32>
    %225 = arith.addf %11, %224 : vector<16x32xf32>
    %cst_91 = arith.constant dense<0.000000e+00> : vector<16xf32>
    %226 = vector.multi_reduction <add>, %225, %cst_91 [1] : vector<16x32xf32> to vector<16xf32>
    %227 = vector.shape_cast %226 : vector<16xf32> to vector<16x1xf32>
    %cst_92 = arith.constant 3.200000e+01 : f32
    %228 = vector.broadcast %cst_92 : f32 to vector<16x1xf32>
    %229 = arith.divf %227, %228 : vector<16x1xf32>
    %230 = vector.broadcast %229 : vector<16x1xf32> to vector<16x32xf32>
    %231 = arith.subf %225, %230 : vector<16x32xf32>
    %232 = arith.mulf %231, %231 : vector<16x32xf32>
    %cst_93 = arith.constant dense<0.000000e+00> : vector<16xf32>
    %233 = vector.multi_reduction <add>, %232, %cst_93 [1] : vector<16x32xf32> to vector<16xf32>
    %234 = vector.shape_cast %233 : vector<16xf32> to vector<16x1xf32>
    %cst_94 = arith.constant 3.200000e+01 : f32
    %235 = vector.broadcast %cst_94 : f32 to vector<16x1xf32>
    %236 = arith.divf %234, %235 : vector<16x1xf32>
    %cst_95 = arith.constant 9.99999974E-6 : f32
    %237 = vector.broadcast %cst_95 : f32 to vector<16x1xf32>
    %238 = arith.addf %236, %237 : vector<16x1xf32>
    %239 = math.rsqrt %238 : vector<16x1xf32>
    %240 = vector.broadcast %239 : vector<16x1xf32> to vector<16x32xf32>
    %241 = arith.mulf %231, %240 : vector<16x32xf32>
    %242 = vector.broadcast %4 : vector<1x32xf32> to vector<16x32xf32>
    %243 = arith.mulf %241, %242 : vector<16x32xf32>
    %244 = vector.broadcast %6 : vector<1x32xf32> to vector<16x32xf32>
    %245 = arith.addf %243, %244 : vector<16x32xf32>
    %c0_96 = arith.constant 0 : index
    %c2 = arith.constant 2 : index
    %c0_97 = arith.constant 0 : index
    %c0_98 = arith.constant 0 : index
    %246 = vector.load %arg4[%c0_96, %c2, %c0_97, %c0_98] : memref<1x6x32x96xbf16, #tpu.memory_space<vmem>>, vector<1x1x32x96xbf16>
    %247 = vector.shape_cast %246 : vector<1x1x32x96xbf16> to vector<32x96xbf16>
    %c0_99 = arith.constant 0 : index
    %c2_100 = arith.constant 2 : index
    %c0_101 = arith.constant 0 : index
    %c0_102 = arith.constant 0 : index
    %248 = vector.load %arg5[%c0_99, %c2_100, %c0_101, %c0_102] : memref<1x6x1x96xf32, #tpu.memory_space<vmem>>, vector<1x1x1x96xf32>
    %249 = vector.shape_cast %248 : vector<1x1x1x96xf32> to vector<1x96xf32>
    %c0_103 = arith.constant 0 : index
    %c2_104 = arith.constant 2 : index
    %c0_105 = arith.constant 0 : index
    %c0_106 = arith.constant 0 : index
    %250 = vector.load %arg6[%c0_103, %c2_104, %c0_105, %c0_106] : memref<1x6x32x32xbf16, #tpu.memory_space<vmem>>, vector<1x1x32x32xbf16>
    %251 = vector.shape_cast %250 : vector<1x1x32x32xbf16> to vector<32x32xbf16>
    %c0_107 = arith.constant 0 : index
    %c2_108 = arith.constant 2 : index
    %c0_109 = arith.constant 0 : index
    %c0_110 = arith.constant 0 : index
    %252 = vector.load %arg7[%c0_107, %c2_108, %c0_109, %c0_110] : memref<1x6x1x32xf32, #tpu.memory_space<vmem>>, vector<1x1x1x32xf32>
    %253 = vector.shape_cast %252 : vector<1x1x1x32xf32> to vector<1x32xf32>
    %254 = arith.truncf %13 : vector<16x32xf32> to vector<16x32xbf16>
    %cst_111 = arith.constant dense<0.000000e+00> : vector<16x96xf32>
    %255 = tpu.matmul %254, %247, %cst_111 {dimension_numbers = #tpu.dot_dimension_numbers<[1], [0], [0], [1], [0, 0, 1, 1], [], []>} : vector<16x32xbf16>, vector<32x96xbf16>, vector<16x96xf32> -> vector<16x96xf32>
    %256 = vector.broadcast %249 : vector<1x96xf32> to vector<16x96xf32>
    %257 = arith.addf %255, %256 : vector<16x96xf32>
    %258 = vector.extract_strided_slice %257 {offsets = [0, 0], sizes = [16, 32], strides = [1, 1]} : vector<16x96xf32> to vector<16x32xf32>
    %259 = vector.extract_strided_slice %257 {offsets = [0, 32], sizes = [16, 32], strides = [1, 1]} : vector<16x96xf32> to vector<16x32xf32>
    %260 = vector.extract_strided_slice %257 {offsets = [0, 64], sizes = [16, 32], strides = [1, 1]} : vector<16x96xf32> to vector<16x32xf32>
    %261 = vector.shape_cast %258 : vector<16x32xf32> to vector<2x8x32xf32>
    %262 = arith.truncf %261 : vector<2x8x32xf32> to vector<2x8x32xbf16>
    %263 = vector.shape_cast %259 : vector<16x32xf32> to vector<2x8x32xf32>
    %264 = arith.truncf %263 : vector<2x8x32xf32> to vector<2x8x32xbf16>
    %265 = vector.shape_cast %260 : vector<16x32xf32> to vector<2x8x32xf32>
    %266 = arith.truncf %265 : vector<2x8x32xf32> to vector<2x8x32xbf16>
    %267 = vector.extract_strided_slice %262 {offsets = [0, 0, 0], sizes = [2, 8, 8], strides = [1, 1, 1]} : vector<2x8x32xbf16> to vector<2x8x8xbf16>
    %268 = vector.extract_strided_slice %264 {offsets = [0, 0, 0], sizes = [2, 8, 8], strides = [1, 1, 1]} : vector<2x8x32xbf16> to vector<2x8x8xbf16>
    %269 = vector.extract_strided_slice %266 {offsets = [0, 0, 0], sizes = [2, 8, 8], strides = [1, 1, 1]} : vector<2x8x32xbf16> to vector<2x8x8xbf16>
    "tpu.trace_start"() <{level = 10 : i32, message = "bqd,bkd->bqk"}> : () -> ()
    %cst_112 = arith.constant dense<0.000000e+00> : vector<2x8x8xf32>
    %270 = tpu.matmul %267, %268, %cst_112 {dimension_numbers = #tpu.dot_dimension_numbers<[2], [2], [1], [1], [0, 0, 0, 1, 1, 1], [0], [0]>} : vector<2x8x8xbf16>, vector<2x8x8xbf16>, vector<2x8x8xf32> -> vector<2x8x8xf32>
    "tpu.trace_stop"() : () -> ()
    %cst_113 = arith.constant 0.353553385 : f32
    %271 = vector.broadcast %cst_113 : f32 to vector<2x8x8xf32>
    %272 = arith.mulf %270, %271 : vector<2x8x8xf32>
    %cst_114 = arith.constant dense<0xFF800000> : vector<2x8xf32>
    %273 = vector.multi_reduction <maximumf>, %272, %cst_114 [2] : vector<2x8x8xf32> to vector<2x8xf32>
    %274 = vector.shape_cast %273 : vector<2x8xf32> to vector<2x8x1xf32>
    %275 = vector.broadcast %274 : vector<2x8x1xf32> to vector<2x8x8xf32>
    %276 = arith.subf %272, %275 : vector<2x8x8xf32>
    %277 = math.exp %276 : vector<2x8x8xf32>
    %cst_115 = arith.constant dense<0.000000e+00> : vector<2x8xf32>
    %278 = vector.multi_reduction <add>, %277, %cst_115 [2] : vector<2x8x8xf32> to vector<2x8xf32>
    %279 = vector.shape_cast %278 : vector<2x8xf32> to vector<2x8x1xf32>
    %280 = vector.broadcast %279 : vector<2x8x1xf32> to vector<2x8x8xf32>
    %281 = arith.divf %277, %280 : vector<2x8x8xf32>
    %282 = arith.truncf %281 : vector<2x8x8xf32> to vector<2x8x8xbf16>
    "tpu.trace_start"() <{level = 10 : i32, message = "bqk,bkd->bqd"}> : () -> ()
    %cst_116 = arith.constant dense<0.000000e+00> : vector<2x8x8xf32>
    %283 = tpu.matmul %282, %269, %cst_116 {dimension_numbers = #tpu.dot_dimension_numbers<[2], [1], [1], [2], [0, 0, 0, 1, 1, 2], [0], [0]>} : vector<2x8x8xbf16>, vector<2x8x8xbf16>, vector<2x8x8xf32> -> vector<2x8x8xf32>
    "tpu.trace_stop"() : () -> ()
    %284 = vector.extract_strided_slice %262 {offsets = [0, 0, 8], sizes = [2, 8, 8], strides = [1, 1, 1]} : vector<2x8x32xbf16> to vector<2x8x8xbf16>
    %285 = vector.extract_strided_slice %264 {offsets = [0, 0, 8], sizes = [2, 8, 8], strides = [1, 1, 1]} : vector<2x8x32xbf16> to vector<2x8x8xbf16>
    %286 = vector.extract_strided_slice %266 {offsets = [0, 0, 8], sizes = [2, 8, 8], strides = [1, 1, 1]} : vector<2x8x32xbf16> to vector<2x8x8xbf16>
    "tpu.trace_start"() <{level = 10 : i32, message = "bqd,bkd->bqk"}> : () -> ()
    %cst_117 = arith.constant dense<0.000000e+00> : vector<2x8x8xf32>
    %287 = tpu.matmul %284, %285, %cst_117 {dimension_numbers = #tpu.dot_dimension_numbers<[2], [2], [1], [1], [0, 0, 0, 1, 1, 1], [0], [0]>} : vector<2x8x8xbf16>, vector<2x8x8xbf16>, vector<2x8x8xf32> -> vector<2x8x8xf32>
    "tpu.trace_stop"() : () -> ()
    %cst_118 = arith.constant 0.353553385 : f32
    %288 = vector.broadcast %cst_118 : f32 to vector<2x8x8xf32>
    %289 = arith.mulf %287, %288 : vector<2x8x8xf32>
    %cst_119 = arith.constant dense<0xFF800000> : vector<2x8xf32>
    %290 = vector.multi_reduction <maximumf>, %289, %cst_119 [2] : vector<2x8x8xf32> to vector<2x8xf32>
    %291 = vector.shape_cast %290 : vector<2x8xf32> to vector<2x8x1xf32>
    %292 = vector.broadcast %291 : vector<2x8x1xf32> to vector<2x8x8xf32>
    %293 = arith.subf %289, %292 : vector<2x8x8xf32>
    %294 = math.exp %293 : vector<2x8x8xf32>
    %cst_120 = arith.constant dense<0.000000e+00> : vector<2x8xf32>
    %295 = vector.multi_reduction <add>, %294, %cst_120 [2] : vector<2x8x8xf32> to vector<2x8xf32>
    %296 = vector.shape_cast %295 : vector<2x8xf32> to vector<2x8x1xf32>
    %297 = vector.broadcast %296 : vector<2x8x1xf32> to vector<2x8x8xf32>
    %298 = arith.divf %294, %297 : vector<2x8x8xf32>
    %299 = arith.truncf %298 : vector<2x8x8xf32> to vector<2x8x8xbf16>
    "tpu.trace_start"() <{level = 10 : i32, message = "bqk,bkd->bqd"}> : () -> ()
    %cst_121 = arith.constant dense<0.000000e+00> : vector<2x8x8xf32>
    %300 = tpu.matmul %299, %286, %cst_121 {dimension_numbers = #tpu.dot_dimension_numbers<[2], [1], [1], [2], [0, 0, 0, 1, 1, 2], [0], [0]>} : vector<2x8x8xbf16>, vector<2x8x8xbf16>, vector<2x8x8xf32> -> vector<2x8x8xf32>
    "tpu.trace_stop"() : () -> ()
    %301 = vector.extract_strided_slice %262 {offsets = [0, 0, 16], sizes = [2, 8, 8], strides = [1, 1, 1]} : vector<2x8x32xbf16> to vector<2x8x8xbf16>
    %302 = vector.extract_strided_slice %264 {offsets = [0, 0, 16], sizes = [2, 8, 8], strides = [1, 1, 1]} : vector<2x8x32xbf16> to vector<2x8x8xbf16>
    %303 = vector.extract_strided_slice %266 {offsets = [0, 0, 16], sizes = [2, 8, 8], strides = [1, 1, 1]} : vector<2x8x32xbf16> to vector<2x8x8xbf16>
    "tpu.trace_start"() <{level = 10 : i32, message = "bqd,bkd->bqk"}> : () -> ()
    %cst_122 = arith.constant dense<0.000000e+00> : vector<2x8x8xf32>
    %304 = tpu.matmul %301, %302, %cst_122 {dimension_numbers = #tpu.dot_dimension_numbers<[2], [2], [1], [1], [0, 0, 0, 1, 1, 1], [0], [0]>} : vector<2x8x8xbf16>, vector<2x8x8xbf16>, vector<2x8x8xf32> -> vector<2x8x8xf32>
    "tpu.trace_stop"() : () -> ()
    %cst_123 = arith.constant 0.353553385 : f32
    %305 = vector.broadcast %cst_123 : f32 to vector<2x8x8xf32>
    %306 = arith.mulf %304, %305 : vector<2x8x8xf32>
    %cst_124 = arith.constant dense<0xFF800000> : vector<2x8xf32>
    %307 = vector.multi_reduction <maximumf>, %306, %cst_124 [2] : vector<2x8x8xf32> to vector<2x8xf32>
    %308 = vector.shape_cast %307 : vector<2x8xf32> to vector<2x8x1xf32>
    %309 = vector.broadcast %308 : vector<2x8x1xf32> to vector<2x8x8xf32>
    %310 = arith.subf %306, %309 : vector<2x8x8xf32>
    %311 = math.exp %310 : vector<2x8x8xf32>
    %cst_125 = arith.constant dense<0.000000e+00> : vector<2x8xf32>
    %312 = vector.multi_reduction <add>, %311, %cst_125 [2] : vector<2x8x8xf32> to vector<2x8xf32>
    %313 = vector.shape_cast %312 : vector<2x8xf32> to vector<2x8x1xf32>
    %314 = vector.broadcast %313 : vector<2x8x1xf32> to vector<2x8x8xf32>
    %315 = arith.divf %311, %314 : vector<2x8x8xf32>
    %316 = arith.truncf %315 : vector<2x8x8xf32> to vector<2x8x8xbf16>
    "tpu.trace_start"() <{level = 10 : i32, message = "bqk,bkd->bqd"}> : () -> ()
    %cst_126 = arith.constant dense<0.000000e+00> : vector<2x8x8xf32>
    %317 = tpu.matmul %316, %303, %cst_126 {dimension_numbers = #tpu.dot_dimension_numbers<[2], [1], [1], [2], [0, 0, 0, 1, 1, 2], [0], [0]>} : vector<2x8x8xbf16>, vector<2x8x8xbf16>, vector<2x8x8xf32> -> vector<2x8x8xf32>
    "tpu.trace_stop"() : () -> ()
    %318 = vector.extract_strided_slice %262 {offsets = [0, 0, 24], sizes = [2, 8, 8], strides = [1, 1, 1]} : vector<2x8x32xbf16> to vector<2x8x8xbf16>
    %319 = vector.extract_strided_slice %264 {offsets = [0, 0, 24], sizes = [2, 8, 8], strides = [1, 1, 1]} : vector<2x8x32xbf16> to vector<2x8x8xbf16>
    %320 = vector.extract_strided_slice %266 {offsets = [0, 0, 24], sizes = [2, 8, 8], strides = [1, 1, 1]} : vector<2x8x32xbf16> to vector<2x8x8xbf16>
    "tpu.trace_start"() <{level = 10 : i32, message = "bqd,bkd->bqk"}> : () -> ()
    %cst_127 = arith.constant dense<0.000000e+00> : vector<2x8x8xf32>
    %321 = tpu.matmul %318, %319, %cst_127 {dimension_numbers = #tpu.dot_dimension_numbers<[2], [2], [1], [1], [0, 0, 0, 1, 1, 1], [0], [0]>} : vector<2x8x8xbf16>, vector<2x8x8xbf16>, vector<2x8x8xf32> -> vector<2x8x8xf32>
    "tpu.trace_stop"() : () -> ()
    %cst_128 = arith.constant 0.353553385 : f32
    %322 = vector.broadcast %cst_128 : f32 to vector<2x8x8xf32>
    %323 = arith.mulf %321, %322 : vector<2x8x8xf32>
    %cst_129 = arith.constant dense<0xFF800000> : vector<2x8xf32>
    %324 = vector.multi_reduction <maximumf>, %323, %cst_129 [2] : vector<2x8x8xf32> to vector<2x8xf32>
    %325 = vector.shape_cast %324 : vector<2x8xf32> to vector<2x8x1xf32>
    %326 = vector.broadcast %325 : vector<2x8x1xf32> to vector<2x8x8xf32>
    %327 = arith.subf %323, %326 : vector<2x8x8xf32>
    %328 = math.exp %327 : vector<2x8x8xf32>
    %cst_130 = arith.constant dense<0.000000e+00> : vector<2x8xf32>
    %329 = vector.multi_reduction <add>, %328, %cst_130 [2] : vector<2x8x8xf32> to vector<2x8xf32>
    %330 = vector.shape_cast %329 : vector<2x8xf32> to vector<2x8x1xf32>
    %331 = vector.broadcast %330 : vector<2x8x1xf32> to vector<2x8x8xf32>
    %332 = arith.divf %328, %331 : vector<2x8x8xf32>
    %333 = arith.truncf %332 : vector<2x8x8xf32> to vector<2x8x8xbf16>
    "tpu.trace_start"() <{level = 10 : i32, message = "bqk,bkd->bqd"}> : () -> ()
    %cst_131 = arith.constant dense<0.000000e+00> : vector<2x8x8xf32>
    %334 = tpu.matmul %333, %320, %cst_131 {dimension_numbers = #tpu.dot_dimension_numbers<[2], [1], [1], [2], [0, 0, 0, 1, 1, 2], [0], [0]>} : vector<2x8x8xbf16>, vector<2x8x8xbf16>, vector<2x8x8xf32> -> vector<2x8x8xf32>
    "tpu.trace_stop"() : () -> ()
    %335 = tpu.concatenate %283, %300, %317, %334 in 2 : vector<2x8x8xf32>, vector<2x8x8xf32>, vector<2x8x8xf32>, vector<2x8x8xf32> -> vector<2x8x32xf32>
    %336 = vector.shape_cast %335 : vector<2x8x32xf32> to vector<16x32xf32>
    %337 = arith.truncf %336 : vector<16x32xf32> to vector<16x32xbf16>
    %cst_132 = arith.constant dense<0.000000e+00> : vector<16x32xf32>
    %338 = tpu.matmul %337, %251, %cst_132 {dimension_numbers = #tpu.dot_dimension_numbers<[1], [0], [0], [1], [0, 0, 1, 1], [], []>} : vector<16x32xbf16>, vector<32x32xbf16>, vector<16x32xf32> -> vector<16x32xf32>
    %339 = vector.broadcast %253 : vector<1x32xf32> to vector<16x32xf32>
    %340 = arith.addf %338, %339 : vector<16x32xf32>
    %341 = arith.addf %13, %340 : vector<16x32xf32>
    %cst_133 = arith.constant dense<0.000000e+00> : vector<16xf32>
    %342 = vector.multi_reduction <add>, %341, %cst_133 [1] : vector<16x32xf32> to vector<16xf32>
    %343 = vector.shape_cast %342 : vector<16xf32> to vector<16x1xf32>
    %cst_134 = arith.constant 3.200000e+01 : f32
    %344 = vector.broadcast %cst_134 : f32 to vector<16x1xf32>
    %345 = arith.divf %343, %344 : vector<16x1xf32>
    %346 = vector.broadcast %345 : vector<16x1xf32> to vector<16x32xf32>
    %347 = arith.subf %341, %346 : vector<16x32xf32>
    %348 = arith.mulf %347, %347 : vector<16x32xf32>
    %cst_135 = arith.constant dense<0.000000e+00> : vector<16xf32>
    %349 = vector.multi_reduction <add>, %348, %cst_135 [1] : vector<16x32xf32> to vector<16xf32>
    %350 = vector.shape_cast %349 : vector<16xf32> to vector<16x1xf32>
    %cst_136 = arith.constant 3.200000e+01 : f32
    %351 = vector.broadcast %cst_136 : f32 to vector<16x1xf32>
    %352 = arith.divf %350, %351 : vector<16x1xf32>
    %cst_137 = arith.constant 9.99999974E-6 : f32
    %353 = vector.broadcast %cst_137 : f32 to vector<16x1xf32>
    %354 = arith.addf %352, %353 : vector<16x1xf32>
    %355 = math.rsqrt %354 : vector<16x1xf32>
    %356 = vector.broadcast %355 : vector<16x1xf32> to vector<16x32xf32>
    %357 = arith.mulf %347, %356 : vector<16x32xf32>
    %358 = vector.broadcast %4 : vector<1x32xf32> to vector<16x32xf32>
    %359 = arith.mulf %357, %358 : vector<16x32xf32>
    %360 = vector.broadcast %6 : vector<1x32xf32> to vector<16x32xf32>
    %361 = arith.addf %359, %360 : vector<16x32xf32>
    %362 = vector.shape_cast %245 : vector<16x32xf32> to vector<2x8x32xf32>
    %c0_138 = arith.constant 0 : index
    %c0_139 = arith.constant 0 : index
    %c0_140 = arith.constant 0 : index
    %363 = vector.load %arg15[%c0_138, %c0_139, %c0_140] : memref<2x16x32xf32, #tpu.memory_space<vmem>>, vector<2x8x32xf32>
    tpu.vector_store %arg15[%c0_138, %c0_139, %c0_140], %362 {strides = array<i32>} : memref<2x16x32xf32, #tpu.memory_space<vmem>>, vector<2x8x32xf32>,
    %364 = vector.shape_cast %361 : vector<16x32xf32> to vector<2x8x32xf32>
    %c0_141 = arith.constant 0 : index
    %c8 = arith.constant 8 : index
    %c0_142 = arith.constant 0 : index
    %365 = vector.load %arg15[%c0_141, %c8, %c0_142] : memref<2x16x32xf32, #tpu.memory_space<vmem>>, vector<2x8x32xf32>
    tpu.vector_store %arg15[%c0_141, %c8, %c0_142], %364 {strides = array<i32>} : memref<2x16x32xf32, #tpu.memory_space<vmem>>, vector<2x8x32xf32>,
    %c0_143 = arith.constant 0 : index
    %c0_144 = arith.constant 0 : index
    %c0_145 = arith.constant 0 : index
    %366 = vector.load %arg15[%c0_143, %c0_144, %c0_145] : memref<2x16x32xf32, #tpu.memory_space<vmem>>, vector<2x16x32xf32>
    %367 = vector.shape_cast %366 : vector<2x16x32xf32> to vector<32x32xf32>
    %c0_146 = arith.constant 0 : index
    %c3 = arith.constant 3 : index
    %c0_147 = arith.constant 0 : index
    %c0_148 = arith.constant 0 : index
    %368 = vector.load %arg4[%c0_146, %c3, %c0_147, %c0_148] : memref<1x6x32x96xbf16, #tpu.memory_space<vmem>>, vector<1x1x32x96xbf16>
    %369 = vector.shape_cast %368 : vector<1x1x32x96xbf16> to vector<32x96xbf16>
    %c0_149 = arith.constant 0 : index
    %c3_150 = arith.constant 3 : index
    %c0_151 = arith.constant 0 : index
    %c0_152 = arith.constant 0 : index
    %370 = vector.load %arg5[%c0_149, %c3_150, %c0_151, %c0_152] : memref<1x6x1x96xf32, #tpu.memory_space<vmem>>, vector<1x1x1x96xf32>
    %371 = vector.shape_cast %370 : vector<1x1x1x96xf32> to vector<1x96xf32>
    %c0_153 = arith.constant 0 : index
    %c3_154 = arith.constant 3 : index
    %c0_155 = arith.constant 0 : index
    %c0_156 = arith.constant 0 : index
    %372 = vector.load %arg6[%c0_153, %c3_154, %c0_155, %c0_156] : memref<1x6x32x32xbf16, #tpu.memory_space<vmem>>, vector<1x1x32x32xbf16>
    %373 = vector.shape_cast %372 : vector<1x1x32x32xbf16> to vector<32x32xbf16>
    %c0_157 = arith.constant 0 : index
    %c3_158 = arith.constant 3 : index
    %c0_159 = arith.constant 0 : index
    %c0_160 = arith.constant 0 : index
    %374 = vector.load %arg7[%c0_157, %c3_158, %c0_159, %c0_160] : memref<1x6x1x32xf32, #tpu.memory_space<vmem>>, vector<1x1x1x32xf32>
    %375 = vector.shape_cast %374 : vector<1x1x1x32xf32> to vector<1x32xf32>
    %376 = vector.extract_strided_slice %369 {offsets = [0, 0], sizes = [32, 32], strides = [1, 1]} : vector<32x96xbf16> to vector<32x32xbf16>
    %377 = arith.truncf %129 : vector<16x32xf32> to vector<16x32xbf16>
    %cst_161 = arith.constant dense<0.000000e+00> : vector<16x32xf32>
    %378 = tpu.matmul %377, %376, %cst_161 {dimension_numbers = #tpu.dot_dimension_numbers<[1], [0], [0], [1], [0, 0, 1, 1], [], []>} : vector<16x32xbf16>, vector<32x32xbf16>, vector<16x32xf32> -> vector<16x32xf32>
    %379 = vector.extract_strided_slice %371 {offsets = [0, 0], sizes = [1, 32], strides = [1, 1]} : vector<1x96xf32> to vector<1x32xf32>
    %380 = vector.broadcast %379 : vector<1x32xf32> to vector<16x32xf32>
    %381 = arith.addf %378, %380 : vector<16x32xf32>
    %382 = vector.extract_strided_slice %369 {offsets = [0, 32], sizes = [32, 64], strides = [1, 1]} : vector<32x96xbf16> to vector<32x64xbf16>
    %383 = arith.truncf %367 : vector<32x32xf32> to vector<32x32xbf16>
    %cst_162 = arith.constant dense<0.000000e+00> : vector<32x64xf32>
    %384 = tpu.matmul %383, %382, %cst_162 {dimension_numbers = #tpu.dot_dimension_numbers<[1], [0], [0], [1], [0, 0, 1, 1], [], []>} : vector<32x32xbf16>, vector<32x64xbf16>, vector<32x64xf32> -> vector<32x64xf32>
    %385 = vector.extract_strided_slice %371 {offsets = [0, 32], sizes = [1, 64], strides = [1, 1]} : vector<1x96xf32> to vector<1x64xf32>
    %386 = vector.broadcast %385 : vector<1x64xf32> to vector<32x64xf32>
    %387 = arith.addf %384, %386 : vector<32x64xf32>
    %388 = vector.extract_strided_slice %387 {offsets = [0, 0], sizes = [32, 32], strides = [1, 1]} : vector<32x64xf32> to vector<32x32xf32>
    %389 = vector.extract_strided_slice %387 {offsets = [0, 32], sizes = [32, 32], strides = [1, 1]} : vector<32x64xf32> to vector<32x32xf32>
    %390 = vector.shape_cast %381 : vector<16x32xf32> to vector<2x8x32xf32>
    %391 = arith.truncf %390 : vector<2x8x32xf32> to vector<2x8x32xbf16>
    %392 = vector.shape_cast %388 : vector<32x32xf32> to vector<2x16x32xf32>
    %393 = arith.truncf %392 : vector<2x16x32xf32> to vector<2x16x32xbf16>
    %394 = vector.shape_cast %389 : vector<32x32xf32> to vector<2x16x32xf32>
    %395 = arith.truncf %394 : vector<2x16x32xf32> to vector<2x16x32xbf16>
    %396 = vector.extract_strided_slice %391 {offsets = [0, 0, 0], sizes = [2, 8, 8], strides = [1, 1, 1]} : vector<2x8x32xbf16> to vector<2x8x8xbf16>
    %397 = vector.extract_strided_slice %393 {offsets = [0, 0, 0], sizes = [2, 16, 8], strides = [1, 1, 1]} : vector<2x16x32xbf16> to vector<2x16x8xbf16>
    %398 = vector.extract_strided_slice %395 {offsets = [0, 0, 0], sizes = [2, 16, 8], strides = [1, 1, 1]} : vector<2x16x32xbf16> to vector<2x16x8xbf16>
    "tpu.trace_start"() <{level = 10 : i32, message = "bqd,bkd->bqk"}> : () -> ()
    %cst_163 = arith.constant dense<0.000000e+00> : vector<2x8x16xf32>
    %399 = tpu.matmul %396, %397, %cst_163 {dimension_numbers = #tpu.dot_dimension_numbers<[2], [2], [1], [1], [0, 0, 0, 1, 1, 1], [0], [0]>} : vector<2x8x8xbf16>, vector<2x16x8xbf16>, vector<2x8x16xf32> -> vector<2x8x16xf32>
    "tpu.trace_stop"() : () -> ()
    %cst_164 = arith.constant 0.353553385 : f32
    %400 = vector.broadcast %cst_164 : f32 to vector<2x8x16xf32>
    %401 = arith.mulf %399, %400 : vector<2x8x16xf32>
    %cst_165 = arith.constant dense<0xFF800000> : vector<2x8xf32>
    %402 = vector.multi_reduction <maximumf>, %401, %cst_165 [2] : vector<2x8x16xf32> to vector<2x8xf32>
    %403 = vector.shape_cast %402 : vector<2x8xf32> to vector<2x8x1xf32>
    %404 = vector.broadcast %403 : vector<2x8x1xf32> to vector<2x8x16xf32>
    %405 = arith.subf %401, %404 : vector<2x8x16xf32>
    %406 = math.exp %405 : vector<2x8x16xf32>
    %cst_166 = arith.constant dense<0.000000e+00> : vector<2x8xf32>
    %407 = vector.multi_reduction <add>, %406, %cst_166 [2] : vector<2x8x16xf32> to vector<2x8xf32>
    %408 = vector.shape_cast %407 : vector<2x8xf32> to vector<2x8x1xf32>
    %409 = vector.broadcast %408 : vector<2x8x1xf32> to vector<2x8x16xf32>
    %410 = arith.divf %406, %409 : vector<2x8x16xf32>
    %411 = arith.truncf %410 : vector<2x8x16xf32> to vector<2x8x16xbf16>
    "tpu.trace_start"() <{level = 10 : i32, message = "bqk,bkd->bqd"}> : () -> ()
    %cst_167 = arith.constant dense<0.000000e+00> : vector<2x8x8xf32>
    %412 = tpu.matmul %411, %398, %cst_167 {dimension_numbers = #tpu.dot_dimension_numbers<[2], [1], [1], [2], [0, 0, 0, 1, 1, 2], [0], [0]>} : vector<2x8x16xbf16>, vector<2x16x8xbf16>, vector<2x8x8xf32> -> vector<2x8x8xf32>
    "tpu.trace_stop"() : () -> ()
    %413 = vector.extract_strided_slice %391 {offsets = [0, 0, 8], sizes = [2, 8, 8], strides = [1, 1, 1]} : vector<2x8x32xbf16> to vector<2x8x8xbf16>
    %414 = vector.extract_strided_slice %393 {offsets = [0, 0, 8], sizes = [2, 16, 8], strides = [1, 1, 1]} : vector<2x16x32xbf16> to vector<2x16x8xbf16>
    %415 = vector.extract_strided_slice %395 {offsets = [0, 0, 8], sizes = [2, 16, 8], strides = [1, 1, 1]} : vector<2x16x32xbf16> to vector<2x16x8xbf16>
    "tpu.trace_start"() <{level = 10 : i32, message = "bqd,bkd->bqk"}> : () -> ()
    %cst_168 = arith.constant dense<0.000000e+00> : vector<2x8x16xf32>
    %416 = tpu.matmul %413, %414, %cst_168 {dimension_numbers = #tpu.dot_dimension_numbers<[2], [2], [1], [1], [0, 0, 0, 1, 1, 1], [0], [0]>} : vector<2x8x8xbf16>, vector<2x16x8xbf16>, vector<2x8x16xf32> -> vector<2x8x16xf32>
    "tpu.trace_stop"() : () -> ()
    %cst_169 = arith.constant 0.353553385 : f32
    %417 = vector.broadcast %cst_169 : f32 to vector<2x8x16xf32>
    %418 = arith.mulf %416, %417 : vector<2x8x16xf32>
    %cst_170 = arith.constant dense<0xFF800000> : vector<2x8xf32>
    %419 = vector.multi_reduction <maximumf>, %418, %cst_170 [2] : vector<2x8x16xf32> to vector<2x8xf32>
    %420 = vector.shape_cast %419 : vector<2x8xf32> to vector<2x8x1xf32>
    %421 = vector.broadcast %420 : vector<2x8x1xf32> to vector<2x8x16xf32>
    %422 = arith.subf %418, %421 : vector<2x8x16xf32>
    %423 = math.exp %422 : vector<2x8x16xf32>
    %cst_171 = arith.constant dense<0.000000e+00> : vector<2x8xf32>
    %424 = vector.multi_reduction <add>, %423, %cst_171 [2] : vector<2x8x16xf32> to vector<2x8xf32>
    %425 = vector.shape_cast %424 : vector<2x8xf32> to vector<2x8x1xf32>
    %426 = vector.broadcast %425 : vector<2x8x1xf32> to vector<2x8x16xf32>
    %427 = arith.divf %423, %426 : vector<2x8x16xf32>
    %428 = arith.truncf %427 : vector<2x8x16xf32> to vector<2x8x16xbf16>
    "tpu.trace_start"() <{level = 10 : i32, message = "bqk,bkd->bqd"}> : () -> ()
    %cst_172 = arith.constant dense<0.000000e+00> : vector<2x8x8xf32>
    %429 = tpu.matmul %428, %415, %cst_172 {dimension_numbers = #tpu.dot_dimension_numbers<[2], [1], [1], [2], [0, 0, 0, 1, 1, 2], [0], [0]>} : vector<2x8x16xbf16>, vector<2x16x8xbf16>, vector<2x8x8xf32> -> vector<2x8x8xf32>
    "tpu.trace_stop"() : () -> ()
    %430 = vector.extract_strided_slice %391 {offsets = [0, 0, 16], sizes = [2, 8, 8], strides = [1, 1, 1]} : vector<2x8x32xbf16> to vector<2x8x8xbf16>
    %431 = vector.extract_strided_slice %393 {offsets = [0, 0, 16], sizes = [2, 16, 8], strides = [1, 1, 1]} : vector<2x16x32xbf16> to vector<2x16x8xbf16>
    %432 = vector.extract_strided_slice %395 {offsets = [0, 0, 16], sizes = [2, 16, 8], strides = [1, 1, 1]} : vector<2x16x32xbf16> to vector<2x16x8xbf16>
    "tpu.trace_start"() <{level = 10 : i32, message = "bqd,bkd->bqk"}> : () -> ()
    %cst_173 = arith.constant dense<0.000000e+00> : vector<2x8x16xf32>
    %433 = tpu.matmul %430, %431, %cst_173 {dimension_numbers = #tpu.dot_dimension_numbers<[2], [2], [1], [1], [0, 0, 0, 1, 1, 1], [0], [0]>} : vector<2x8x8xbf16>, vector<2x16x8xbf16>, vector<2x8x16xf32> -> vector<2x8x16xf32>
    "tpu.trace_stop"() : () -> ()
    %cst_174 = arith.constant 0.353553385 : f32
    %434 = vector.broadcast %cst_174 : f32 to vector<2x8x16xf32>
    %435 = arith.mulf %433, %434 : vector<2x8x16xf32>
    %cst_175 = arith.constant dense<0xFF800000> : vector<2x8xf32>
    %436 = vector.multi_reduction <maximumf>, %435, %cst_175 [2] : vector<2x8x16xf32> to vector<2x8xf32>
    %437 = vector.shape_cast %436 : vector<2x8xf32> to vector<2x8x1xf32>
    %438 = vector.broadcast %437 : vector<2x8x1xf32> to vector<2x8x16xf32>
    %439 = arith.subf %435, %438 : vector<2x8x16xf32>
    %440 = math.exp %439 : vector<2x8x16xf32>
    %cst_176 = arith.constant dense<0.000000e+00> : vector<2x8xf32>
    %441 = vector.multi_reduction <add>, %440, %cst_176 [2] : vector<2x8x16xf32> to vector<2x8xf32>
    %442 = vector.shape_cast %441 : vector<2x8xf32> to vector<2x8x1xf32>
    %443 = vector.broadcast %442 : vector<2x8x1xf32> to vector<2x8x16xf32>
    %444 = arith.divf %440, %443 : vector<2x8x16xf32>
    %445 = arith.truncf %444 : vector<2x8x16xf32> to vector<2x8x16xbf16>
    "tpu.trace_start"() <{level = 10 : i32, message = "bqk,bkd->bqd"}> : () -> ()
    %cst_177 = arith.constant dense<0.000000e+00> : vector<2x8x8xf32>
    %446 = tpu.matmul %445, %432, %cst_177 {dimension_numbers = #tpu.dot_dimension_numbers<[2], [1], [1], [2], [0, 0, 0, 1, 1, 2], [0], [0]>} : vector<2x8x16xbf16>, vector<2x16x8xbf16>, vector<2x8x8xf32> -> vector<2x8x8xf32>
    "tpu.trace_stop"() : () -> ()
    %447 = vector.extract_strided_slice %391 {offsets = [0, 0, 24], sizes = [2, 8, 8], strides = [1, 1, 1]} : vector<2x8x32xbf16> to vector<2x8x8xbf16>
    %448 = vector.extract_strided_slice %393 {offsets = [0, 0, 24], sizes = [2, 16, 8], strides = [1, 1, 1]} : vector<2x16x32xbf16> to vector<2x16x8xbf16>
    %449 = vector.extract_strided_slice %395 {offsets = [0, 0, 24], sizes = [2, 16, 8], strides = [1, 1, 1]} : vector<2x16x32xbf16> to vector<2x16x8xbf16>
    "tpu.trace_start"() <{level = 10 : i32, message = "bqd,bkd->bqk"}> : () -> ()
    %cst_178 = arith.constant dense<0.000000e+00> : vector<2x8x16xf32>
    %450 = tpu.matmul %447, %448, %cst_178 {dimension_numbers = #tpu.dot_dimension_numbers<[2], [2], [1], [1], [0, 0, 0, 1, 1, 1], [0], [0]>} : vector<2x8x8xbf16>, vector<2x16x8xbf16>, vector<2x8x16xf32> -> vector<2x8x16xf32>
    "tpu.trace_stop"() : () -> ()
    %cst_179 = arith.constant 0.353553385 : f32
    %451 = vector.broadcast %cst_179 : f32 to vector<2x8x16xf32>
    %452 = arith.mulf %450, %451 : vector<2x8x16xf32>
    %cst_180 = arith.constant dense<0xFF800000> : vector<2x8xf32>
    %453 = vector.multi_reduction <maximumf>, %452, %cst_180 [2] : vector<2x8x16xf32> to vector<2x8xf32>
    %454 = vector.shape_cast %453 : vector<2x8xf32> to vector<2x8x1xf32>
    %455 = vector.broadcast %454 : vector<2x8x1xf32> to vector<2x8x16xf32>
    %456 = arith.subf %452, %455 : vector<2x8x16xf32>
    %457 = math.exp %456 : vector<2x8x16xf32>
    %cst_181 = arith.constant dense<0.000000e+00> : vector<2x8xf32>
    %458 = vector.multi_reduction <add>, %457, %cst_181 [2] : vector<2x8x16xf32> to vector<2x8xf32>
    %459 = vector.shape_cast %458 : vector<2x8xf32> to vector<2x8x1xf32>
    %460 = vector.broadcast %459 : vector<2x8x1xf32> to vector<2x8x16xf32>
    %461 = arith.divf %457, %460 : vector<2x8x16xf32>
    %462 = arith.truncf %461 : vector<2x8x16xf32> to vector<2x8x16xbf16>
    "tpu.trace_start"() <{level = 10 : i32, message = "bqk,bkd->bqd"}> : () -> ()
    %cst_182 = arith.constant dense<0.000000e+00> : vector<2x8x8xf32>
    %463 = tpu.matmul %462, %449, %cst_182 {dimension_numbers = #tpu.dot_dimension_numbers<[2], [1], [1], [2], [0, 0, 0, 1, 1, 2], [0], [0]>} : vector<2x8x16xbf16>, vector<2x16x8xbf16>, vector<2x8x8xf32> -> vector<2x8x8xf32>
    "tpu.trace_stop"() : () -> ()
    %464 = tpu.concatenate %412, %429, %446, %463 in 2 : vector<2x8x8xf32>, vector<2x8x8xf32>, vector<2x8x8xf32>, vector<2x8x8xf32> -> vector<2x8x32xf32>
    %465 = vector.shape_cast %464 : vector<2x8x32xf32> to vector<16x32xf32>
    %466 = arith.truncf %465 : vector<16x32xf32> to vector<16x32xbf16>
    %cst_183 = arith.constant dense<0.000000e+00> : vector<16x32xf32>
    %467 = tpu.matmul %466, %373, %cst_183 {dimension_numbers = #tpu.dot_dimension_numbers<[1], [0], [0], [1], [0, 0, 1, 1], [], []>} : vector<16x32xbf16>, vector<32x32xbf16>, vector<16x32xf32> -> vector<16x32xf32>
    %468 = vector.broadcast %375 : vector<1x32xf32> to vector<16x32xf32>
    %469 = arith.addf %467, %468 : vector<16x32xf32>
    %470 = arith.addf %129, %469 : vector<16x32xf32>
    %cst_184 = arith.constant dense<0.000000e+00> : vector<16xf32>
    %471 = vector.multi_reduction <add>, %470, %cst_184 [1] : vector<16x32xf32> to vector<16xf32>
    %472 = vector.shape_cast %471 : vector<16xf32> to vector<16x1xf32>
    %cst_185 = arith.constant 3.200000e+01 : f32
    %473 = vector.broadcast %cst_185 : f32 to vector<16x1xf32>
    %474 = arith.divf %472, %473 : vector<16x1xf32>
    %475 = vector.broadcast %474 : vector<16x1xf32> to vector<16x32xf32>
    %476 = arith.subf %470, %475 : vector<16x32xf32>
    %477 = arith.mulf %476, %476 : vector<16x32xf32>
    %cst_186 = arith.constant dense<0.000000e+00> : vector<16xf32>
    %478 = vector.multi_reduction <add>, %477, %cst_186 [1] : vector<16x32xf32> to vector<16xf32>
    %479 = vector.shape_cast %478 : vector<16xf32> to vector<16x1xf32>
    %cst_187 = arith.constant 3.200000e+01 : f32
    %480 = vector.broadcast %cst_187 : f32 to vector<16x1xf32>
    %481 = arith.divf %479, %480 : vector<16x1xf32>
    %cst_188 = arith.constant 9.99999974E-6 : f32
    %482 = vector.broadcast %cst_188 : f32 to vector<16x1xf32>
    %483 = arith.addf %481, %482 : vector<16x1xf32>
    %484 = math.rsqrt %483 : vector<16x1xf32>
    %485 = vector.broadcast %484 : vector<16x1xf32> to vector<16x32xf32>
    %486 = arith.mulf %476, %485 : vector<16x32xf32>
    %487 = vector.broadcast %4 : vector<1x32xf32> to vector<16x32xf32>
    %488 = arith.mulf %486, %487 : vector<16x32xf32>
    %489 = vector.broadcast %6 : vector<1x32xf32> to vector<16x32xf32>
    %490 = arith.addf %488, %489 : vector<16x32xf32>
    %c0_189 = arith.constant 0 : index
    %c4 = arith.constant 4 : index
    %c0_190 = arith.constant 0 : index
    %c0_191 = arith.constant 0 : index
    %491 = vector.load %arg4[%c0_189, %c4, %c0_190, %c0_191] : memref<1x6x32x96xbf16, #tpu.memory_space<vmem>>, vector<1x1x32x96xbf16>
    %492 = vector.shape_cast %491 : vector<1x1x32x96xbf16> to vector<32x96xbf16>
    %c0_192 = arith.constant 0 : index
    %c4_193 = arith.constant 4 : index
    %c0_194 = arith.constant 0 : index
    %c0_195 = arith.constant 0 : index
    %493 = vector.load %arg5[%c0_192, %c4_193, %c0_194, %c0_195] : memref<1x6x1x96xf32, #tpu.memory_space<vmem>>, vector<1x1x1x96xf32>
    %494 = vector.shape_cast %493 : vector<1x1x1x96xf32> to vector<1x96xf32>
    %c0_196 = arith.constant 0 : index
    %c4_197 = arith.constant 4 : index
    %c0_198 = arith.constant 0 : index
    %c0_199 = arith.constant 0 : index
    %495 = vector.load %arg6[%c0_196, %c4_197, %c0_198, %c0_199] : memref<1x6x32x32xbf16, #tpu.memory_space<vmem>>, vector<1x1x32x32xbf16>
    %496 = vector.shape_cast %495 : vector<1x1x32x32xbf16> to vector<32x32xbf16>
    %c0_200 = arith.constant 0 : index
    %c4_201 = arith.constant 4 : index
    %c0_202 = arith.constant 0 : index
    %c0_203 = arith.constant 0 : index
    %497 = vector.load %arg7[%c0_200, %c4_201, %c0_202, %c0_203] : memref<1x6x1x32xf32, #tpu.memory_space<vmem>>, vector<1x1x1x32xf32>
    %498 = vector.shape_cast %497 : vector<1x1x1x32xf32> to vector<1x32xf32>
    %499 = vector.extract_strided_slice %492 {offsets = [0, 0], sizes = [32, 32], strides = [1, 1]} : vector<32x96xbf16> to vector<32x32xbf16>
    %500 = arith.truncf %245 : vector<16x32xf32> to vector<16x32xbf16>
    %cst_204 = arith.constant dense<0.000000e+00> : vector<16x32xf32>
    %501 = tpu.matmul %500, %499, %cst_204 {dimension_numbers = #tpu.dot_dimension_numbers<[1], [0], [0], [1], [0, 0, 1, 1], [], []>} : vector<16x32xbf16>, vector<32x32xbf16>, vector<16x32xf32> -> vector<16x32xf32>
    %502 = vector.extract_strided_slice %494 {offsets = [0, 0], sizes = [1, 32], strides = [1, 1]} : vector<1x96xf32> to vector<1x32xf32>
    %503 = vector.broadcast %502 : vector<1x32xf32> to vector<16x32xf32>
    %504 = arith.addf %501, %503 : vector<16x32xf32>
    %505 = vector.extract_strided_slice %492 {offsets = [0, 32], sizes = [32, 64], strides = [1, 1]} : vector<32x96xbf16> to vector<32x64xbf16>
    %506 = arith.truncf %490 : vector<16x32xf32> to vector<16x32xbf16>
    %cst_205 = arith.constant dense<0.000000e+00> : vector<16x64xf32>
    %507 = tpu.matmul %506, %505, %cst_205 {dimension_numbers = #tpu.dot_dimension_numbers<[1], [0], [0], [1], [0, 0, 1, 1], [], []>} : vector<16x32xbf16>, vector<32x64xbf16>, vector<16x64xf32> -> vector<16x64xf32>
    %508 = vector.extract_strided_slice %494 {offsets = [0, 32], sizes = [1, 64], strides = [1, 1]} : vector<1x96xf32> to vector<1x64xf32>
    %509 = vector.broadcast %508 : vector<1x64xf32> to vector<16x64xf32>
    %510 = arith.addf %507, %509 : vector<16x64xf32>
    %511 = vector.extract_strided_slice %510 {offsets = [0, 0], sizes = [16, 32], strides = [1, 1]} : vector<16x64xf32> to vector<16x32xf32>
    %512 = vector.extract_strided_slice %510 {offsets = [0, 32], sizes = [16, 32], strides = [1, 1]} : vector<16x64xf32> to vector<16x32xf32>
    %513 = vector.shape_cast %504 : vector<16x32xf32> to vector<2x8x32xf32>
    %514 = arith.truncf %513 : vector<2x8x32xf32> to vector<2x8x32xbf16>
    %515 = vector.shape_cast %511 : vector<16x32xf32> to vector<2x8x32xf32>
    %516 = arith.truncf %515 : vector<2x8x32xf32> to vector<2x8x32xbf16>
    %517 = vector.shape_cast %512 : vector<16x32xf32> to vector<2x8x32xf32>
    %518 = arith.truncf %517 : vector<2x8x32xf32> to vector<2x8x32xbf16>
    %519 = vector.extract_strided_slice %514 {offsets = [0, 0, 0], sizes = [2, 8, 8], strides = [1, 1, 1]} : vector<2x8x32xbf16> to vector<2x8x8xbf16>
    %520 = vector.extract_strided_slice %516 {offsets = [0, 0, 0], sizes = [2, 8, 8], strides = [1, 1, 1]} : vector<2x8x32xbf16> to vector<2x8x8xbf16>
    %521 = vector.extract_strided_slice %518 {offsets = [0, 0, 0], sizes = [2, 8, 8], strides = [1, 1, 1]} : vector<2x8x32xbf16> to vector<2x8x8xbf16>
    "tpu.trace_start"() <{level = 10 : i32, message = "bqd,bkd->bqk"}> : () -> ()
    %cst_206 = arith.constant dense<0.000000e+00> : vector<2x8x8xf32>
    %522 = tpu.matmul %519, %520, %cst_206 {dimension_numbers = #tpu.dot_dimension_numbers<[2], [2], [1], [1], [0, 0, 0, 1, 1, 1], [0], [0]>} : vector<2x8x8xbf16>, vector<2x8x8xbf16>, vector<2x8x8xf32> -> vector<2x8x8xf32>
    "tpu.trace_stop"() : () -> ()
    %cst_207 = arith.constant 0.353553385 : f32
    %523 = vector.broadcast %cst_207 : f32 to vector<2x8x8xf32>
    %524 = arith.mulf %522, %523 : vector<2x8x8xf32>
    %cst_208 = arith.constant dense<0xFF800000> : vector<2x8xf32>
    %525 = vector.multi_reduction <maximumf>, %524, %cst_208 [2] : vector<2x8x8xf32> to vector<2x8xf32>
    %526 = vector.shape_cast %525 : vector<2x8xf32> to vector<2x8x1xf32>
    %527 = vector.broadcast %526 : vector<2x8x1xf32> to vector<2x8x8xf32>
    %528 = arith.subf %524, %527 : vector<2x8x8xf32>
    %529 = math.exp %528 : vector<2x8x8xf32>
    %cst_209 = arith.constant dense<0.000000e+00> : vector<2x8xf32>
    %530 = vector.multi_reduction <add>, %529, %cst_209 [2] : vector<2x8x8xf32> to vector<2x8xf32>
    %531 = vector.shape_cast %530 : vector<2x8xf32> to vector<2x8x1xf32>
    %532 = vector.broadcast %531 : vector<2x8x1xf32> to vector<2x8x8xf32>
    %533 = arith.divf %529, %532 : vector<2x8x8xf32>
    %534 = arith.truncf %533 : vector<2x8x8xf32> to vector<2x8x8xbf16>
    "tpu.trace_start"() <{level = 10 : i32, message = "bqk,bkd->bqd"}> : () -> ()
    %cst_210 = arith.constant dense<0.000000e+00> : vector<2x8x8xf32>
    %535 = tpu.matmul %534, %521, %cst_210 {dimension_numbers = #tpu.dot_dimension_numbers<[2], [1], [1], [2], [0, 0, 0, 1, 1, 2], [0], [0]>} : vector<2x8x8xbf16>, vector<2x8x8xbf16>, vector<2x8x8xf32> -> vector<2x8x8xf32>
    "tpu.trace_stop"() : () -> ()
    %536 = vector.extract_strided_slice %514 {offsets = [0, 0, 8], sizes = [2, 8, 8], strides = [1, 1, 1]} : vector<2x8x32xbf16> to vector<2x8x8xbf16>
    %537 = vector.extract_strided_slice %516 {offsets = [0, 0, 8], sizes = [2, 8, 8], strides = [1, 1, 1]} : vector<2x8x32xbf16> to vector<2x8x8xbf16>
    %538 = vector.extract_strided_slice %518 {offsets = [0, 0, 8], sizes = [2, 8, 8], strides = [1, 1, 1]} : vector<2x8x32xbf16> to vector<2x8x8xbf16>
    "tpu.trace_start"() <{level = 10 : i32, message = "bqd,bkd->bqk"}> : () -> ()
    %cst_211 = arith.constant dense<0.000000e+00> : vector<2x8x8xf32>
    %539 = tpu.matmul %536, %537, %cst_211 {dimension_numbers = #tpu.dot_dimension_numbers<[2], [2], [1], [1], [0, 0, 0, 1, 1, 1], [0], [0]>} : vector<2x8x8xbf16>, vector<2x8x8xbf16>, vector<2x8x8xf32> -> vector<2x8x8xf32>
    "tpu.trace_stop"() : () -> ()
    %cst_212 = arith.constant 0.353553385 : f32
    %540 = vector.broadcast %cst_212 : f32 to vector<2x8x8xf32>
    %541 = arith.mulf %539, %540 : vector<2x8x8xf32>
    %cst_213 = arith.constant dense<0xFF800000> : vector<2x8xf32>
    %542 = vector.multi_reduction <maximumf>, %541, %cst_213 [2] : vector<2x8x8xf32> to vector<2x8xf32>
    %543 = vector.shape_cast %542 : vector<2x8xf32> to vector<2x8x1xf32>
    %544 = vector.broadcast %543 : vector<2x8x1xf32> to vector<2x8x8xf32>
    %545 = arith.subf %541, %544 : vector<2x8x8xf32>
    %546 = math.exp %545 : vector<2x8x8xf32>
    %cst_214 = arith.constant dense<0.000000e+00> : vector<2x8xf32>
    %547 = vector.multi_reduction <add>, %546, %cst_214 [2] : vector<2x8x8xf32> to vector<2x8xf32>
    %548 = vector.shape_cast %547 : vector<2x8xf32> to vector<2x8x1xf32>
    %549 = vector.broadcast %548 : vector<2x8x1xf32> to vector<2x8x8xf32>
    %550 = arith.divf %546, %549 : vector<2x8x8xf32>
    %551 = arith.truncf %550 : vector<2x8x8xf32> to vector<2x8x8xbf16>
    "tpu.trace_start"() <{level = 10 : i32, message = "bqk,bkd->bqd"}> : () -> ()
    %cst_215 = arith.constant dense<0.000000e+00> : vector<2x8x8xf32>
    %552 = tpu.matmul %551, %538, %cst_215 {dimension_numbers = #tpu.dot_dimension_numbers<[2], [1], [1], [2], [0, 0, 0, 1, 1, 2], [0], [0]>} : vector<2x8x8xbf16>, vector<2x8x8xbf16>, vector<2x8x8xf32> -> vector<2x8x8xf32>
    "tpu.trace_stop"() : () -> ()
    %553 = vector.extract_strided_slice %514 {offsets = [0, 0, 16], sizes = [2, 8, 8], strides = [1, 1, 1]} : vector<2x8x32xbf16> to vector<2x8x8xbf16>
    %554 = vector.extract_strided_slice %516 {offsets = [0, 0, 16], sizes = [2, 8, 8], strides = [1, 1, 1]} : vector<2x8x32xbf16> to vector<2x8x8xbf16>
    %555 = vector.extract_strided_slice %518 {offsets = [0, 0, 16], sizes = [2, 8, 8], strides = [1, 1, 1]} : vector<2x8x32xbf16> to vector<2x8x8xbf16>
    "tpu.trace_start"() <{level = 10 : i32, message = "bqd,bkd->bqk"}> : () -> ()
    %cst_216 = arith.constant dense<0.000000e+00> : vector<2x8x8xf32>
    %556 = tpu.matmul %553, %554, %cst_216 {dimension_numbers = #tpu.dot_dimension_numbers<[2], [2], [1], [1], [0, 0, 0, 1, 1, 1], [0], [0]>} : vector<2x8x8xbf16>, vector<2x8x8xbf16>, vector<2x8x8xf32> -> vector<2x8x8xf32>
    "tpu.trace_stop"() : () -> ()
    %cst_217 = arith.constant 0.353553385 : f32
    %557 = vector.broadcast %cst_217 : f32 to vector<2x8x8xf32>
    %558 = arith.mulf %556, %557 : vector<2x8x8xf32>
    %cst_218 = arith.constant dense<0xFF800000> : vector<2x8xf32>
    %559 = vector.multi_reduction <maximumf>, %558, %cst_218 [2] : vector<2x8x8xf32> to vector<2x8xf32>
    %560 = vector.shape_cast %559 : vector<2x8xf32> to vector<2x8x1xf32>
    %561 = vector.broadcast %560 : vector<2x8x1xf32> to vector<2x8x8xf32>
    %562 = arith.subf %558, %561 : vector<2x8x8xf32>
    %563 = math.exp %562 : vector<2x8x8xf32>
    %cst_219 = arith.constant dense<0.000000e+00> : vector<2x8xf32>
    %564 = vector.multi_reduction <add>, %563, %cst_219 [2] : vector<2x8x8xf32> to vector<2x8xf32>
    %565 = vector.shape_cast %564 : vector<2x8xf32> to vector<2x8x1xf32>
    %566 = vector.broadcast %565 : vector<2x8x1xf32> to vector<2x8x8xf32>
    %567 = arith.divf %563, %566 : vector<2x8x8xf32>
    %568 = arith.truncf %567 : vector<2x8x8xf32> to vector<2x8x8xbf16>
    "tpu.trace_start"() <{level = 10 : i32, message = "bqk,bkd->bqd"}> : () -> ()
    %cst_220 = arith.constant dense<0.000000e+00> : vector<2x8x8xf32>
    %569 = tpu.matmul %568, %555, %cst_220 {dimension_numbers = #tpu.dot_dimension_numbers<[2], [1], [1], [2], [0, 0, 0, 1, 1, 2], [0], [0]>} : vector<2x8x8xbf16>, vector<2x8x8xbf16>, vector<2x8x8xf32> -> vector<2x8x8xf32>
    "tpu.trace_stop"() : () -> ()
    %570 = vector.extract_strided_slice %514 {offsets = [0, 0, 24], sizes = [2, 8, 8], strides = [1, 1, 1]} : vector<2x8x32xbf16> to vector<2x8x8xbf16>
    %571 = vector.extract_strided_slice %516 {offsets = [0, 0, 24], sizes = [2, 8, 8], strides = [1, 1, 1]} : vector<2x8x32xbf16> to vector<2x8x8xbf16>
    %572 = vector.extract_strided_slice %518 {offsets = [0, 0, 24], sizes = [2, 8, 8], strides = [1, 1, 1]} : vector<2x8x32xbf16> to vector<2x8x8xbf16>
    "tpu.trace_start"() <{level = 10 : i32, message = "bqd,bkd->bqk"}> : () -> ()
    %cst_221 = arith.constant dense<0.000000e+00> : vector<2x8x8xf32>
    %573 = tpu.matmul %570, %571, %cst_221 {dimension_numbers = #tpu.dot_dimension_numbers<[2], [2], [1], [1], [0, 0, 0, 1, 1, 1], [0], [0]>} : vector<2x8x8xbf16>, vector<2x8x8xbf16>, vector<2x8x8xf32> -> vector<2x8x8xf32>
    "tpu.trace_stop"() : () -> ()
    %cst_222 = arith.constant 0.353553385 : f32
    %574 = vector.broadcast %cst_222 : f32 to vector<2x8x8xf32>
    %575 = arith.mulf %573, %574 : vector<2x8x8xf32>
    %cst_223 = arith.constant dense<0xFF800000> : vector<2x8xf32>
    %576 = vector.multi_reduction <maximumf>, %575, %cst_223 [2] : vector<2x8x8xf32> to vector<2x8xf32>
    %577 = vector.shape_cast %576 : vector<2x8xf32> to vector<2x8x1xf32>
    %578 = vector.broadcast %577 : vector<2x8x1xf32> to vector<2x8x8xf32>
    %579 = arith.subf %575, %578 : vector<2x8x8xf32>
    %580 = math.exp %579 : vector<2x8x8xf32>
    %cst_224 = arith.constant dense<0.000000e+00> : vector<2x8xf32>
    %581 = vector.multi_reduction <add>, %580, %cst_224 [2] : vector<2x8x8xf32> to vector<2x8xf32>
    %582 = vector.shape_cast %581 : vector<2x8xf32> to vector<2x8x1xf32>
    %583 = vector.broadcast %582 : vector<2x8x1xf32> to vector<2x8x8xf32>
    %584 = arith.divf %580, %583 : vector<2x8x8xf32>
    %585 = arith.truncf %584 : vector<2x8x8xf32> to vector<2x8x8xbf16>
    "tpu.trace_start"() <{level = 10 : i32, message = "bqk,bkd->bqd"}> : () -> ()
    %cst_225 = arith.constant dense<0.000000e+00> : vector<2x8x8xf32>
    %586 = tpu.matmul %585, %572, %cst_225 {dimension_numbers = #tpu.dot_dimension_numbers<[2], [1], [1], [2], [0, 0, 0, 1, 1, 2], [0], [0]>} : vector<2x8x8xbf16>, vector<2x8x8xbf16>, vector<2x8x8xf32> -> vector<2x8x8xf32>
    "tpu.trace_stop"() : () -> ()
    %587 = tpu.concatenate %535, %552, %569, %586 in 2 : vector<2x8x8xf32>, vector<2x8x8xf32>, vector<2x8x8xf32>, vector<2x8x8xf32> -> vector<2x8x32xf32>
    %588 = vector.shape_cast %587 : vector<2x8x32xf32> to vector<16x32xf32>
    %589 = arith.truncf %588 : vector<16x32xf32> to vector<16x32xbf16>
    %cst_226 = arith.constant dense<0.000000e+00> : vector<16x32xf32>
    %590 = tpu.matmul %589, %496, %cst_226 {dimension_numbers = #tpu.dot_dimension_numbers<[1], [0], [0], [1], [0, 0, 1, 1], [], []>} : vector<16x32xbf16>, vector<32x32xbf16>, vector<16x32xf32> -> vector<16x32xf32>
    %591 = vector.broadcast %498 : vector<1x32xf32> to vector<16x32xf32>
    %592 = arith.addf %590, %591 : vector<16x32xf32>
    %593 = arith.addf %245, %592 : vector<16x32xf32>
    %cst_227 = arith.constant dense<0.000000e+00> : vector<16xf32>
    %594 = vector.multi_reduction <add>, %593, %cst_227 [1] : vector<16x32xf32> to vector<16xf32>
    %595 = vector.shape_cast %594 : vector<16xf32> to vector<16x1xf32>
    %cst_228 = arith.constant 3.200000e+01 : f32
    %596 = vector.broadcast %cst_228 : f32 to vector<16x1xf32>
    %597 = arith.divf %595, %596 : vector<16x1xf32>
    %598 = vector.broadcast %597 : vector<16x1xf32> to vector<16x32xf32>
    %599 = arith.subf %593, %598 : vector<16x32xf32>
    %600 = arith.mulf %599, %599 : vector<16x32xf32>
    %cst_229 = arith.constant dense<0.000000e+00> : vector<16xf32>
    %601 = vector.multi_reduction <add>, %600, %cst_229 [1] : vector<16x32xf32> to vector<16xf32>
    %602 = vector.shape_cast %601 : vector<16xf32> to vector<16x1xf32>
    %cst_230 = arith.constant 3.200000e+01 : f32
    %603 = vector.broadcast %cst_230 : f32 to vector<16x1xf32>
    %604 = arith.divf %602, %603 : vector<16x1xf32>
    %cst_231 = arith.constant 9.99999974E-6 : f32
    %605 = vector.broadcast %cst_231 : f32 to vector<16x1xf32>
    %606 = arith.addf %604, %605 : vector<16x1xf32>
    %607 = math.rsqrt %606 : vector<16x1xf32>
    %608 = vector.broadcast %607 : vector<16x1xf32> to vector<16x32xf32>
    %609 = arith.mulf %599, %608 : vector<16x32xf32>
    %610 = vector.broadcast %4 : vector<1x32xf32> to vector<16x32xf32>
    %611 = arith.mulf %609, %610 : vector<16x32xf32>
    %612 = vector.broadcast %6 : vector<1x32xf32> to vector<16x32xf32>
    %613 = arith.addf %611, %612 : vector<16x32xf32>
    %c0_232 = arith.constant 0 : index
    %c5 = arith.constant 5 : index
    %c0_233 = arith.constant 0 : index
    %c0_234 = arith.constant 0 : index
    %614 = vector.load %arg4[%c0_232, %c5, %c0_233, %c0_234] : memref<1x6x32x96xbf16, #tpu.memory_space<vmem>>, vector<1x1x32x96xbf16>
    %615 = vector.shape_cast %614 : vector<1x1x32x96xbf16> to vector<32x96xbf16>
    %c0_235 = arith.constant 0 : index
    %c5_236 = arith.constant 5 : index
    %c0_237 = arith.constant 0 : index
    %c0_238 = arith.constant 0 : index
    %616 = vector.load %arg5[%c0_235, %c5_236, %c0_237, %c0_238] : memref<1x6x1x96xf32, #tpu.memory_space<vmem>>, vector<1x1x1x96xf32>
    %617 = vector.shape_cast %616 : vector<1x1x1x96xf32> to vector<1x96xf32>
    %c0_239 = arith.constant 0 : index
    %c5_240 = arith.constant 5 : index
    %c0_241 = arith.constant 0 : index
    %c0_242 = arith.constant 0 : index
    %618 = vector.load %arg6[%c0_239, %c5_240, %c0_241, %c0_242] : memref<1x6x32x32xbf16, #tpu.memory_space<vmem>>, vector<1x1x32x32xbf16>
    %619 = vector.shape_cast %618 : vector<1x1x32x32xbf16> to vector<32x32xbf16>
    %c0_243 = arith.constant 0 : index
    %c5_244 = arith.constant 5 : index
    %c0_245 = arith.constant 0 : index
    %c0_246 = arith.constant 0 : index
    %620 = vector.load %arg7[%c0_243, %c5_244, %c0_245, %c0_246] : memref<1x6x1x32xf32, #tpu.memory_space<vmem>>, vector<1x1x1x32xf32>
    %621 = vector.shape_cast %620 : vector<1x1x1x32xf32> to vector<1x32xf32>
    %622 = vector.extract_strided_slice %615 {offsets = [0, 0], sizes = [32, 32], strides = [1, 1]} : vector<32x96xbf16> to vector<32x32xbf16>
    %623 = arith.truncf %361 : vector<16x32xf32> to vector<16x32xbf16>
    %cst_247 = arith.constant dense<0.000000e+00> : vector<16x32xf32>
    %624 = tpu.matmul %623, %622, %cst_247 {dimension_numbers = #tpu.dot_dimension_numbers<[1], [0], [0], [1], [0, 0, 1, 1], [], []>} : vector<16x32xbf16>, vector<32x32xbf16>, vector<16x32xf32> -> vector<16x32xf32>
    %625 = vector.extract_strided_slice %617 {offsets = [0, 0], sizes = [1, 32], strides = [1, 1]} : vector<1x96xf32> to vector<1x32xf32>
    %626 = vector.broadcast %625 : vector<1x32xf32> to vector<16x32xf32>
    %627 = arith.addf %624, %626 : vector<16x32xf32>
    %628 = vector.extract_strided_slice %615 {offsets = [0, 32], sizes = [32, 64], strides = [1, 1]} : vector<32x96xbf16> to vector<32x64xbf16>
    %629 = arith.truncf %490 : vector<16x32xf32> to vector<16x32xbf16>
    %cst_248 = arith.constant dense<0.000000e+00> : vector<16x64xf32>
    %630 = tpu.matmul %629, %628, %cst_248 {dimension_numbers = #tpu.dot_dimension_numbers<[1], [0], [0], [1], [0, 0, 1, 1], [], []>} : vector<16x32xbf16>, vector<32x64xbf16>, vector<16x64xf32> -> vector<16x64xf32>
    %631 = vector.extract_strided_slice %617 {offsets = [0, 32], sizes = [1, 64], strides = [1, 1]} : vector<1x96xf32> to vector<1x64xf32>
    %632 = vector.broadcast %631 : vector<1x64xf32> to vector<16x64xf32>
    %633 = arith.addf %630, %632 : vector<16x64xf32>
    %634 = vector.extract_strided_slice %633 {offsets = [0, 0], sizes = [16, 32], strides = [1, 1]} : vector<16x64xf32> to vector<16x32xf32>
    %635 = vector.extract_strided_slice %633 {offsets = [0, 32], sizes = [16, 32], strides = [1, 1]} : vector<16x64xf32> to vector<16x32xf32>
    %636 = vector.shape_cast %627 : vector<16x32xf32> to vector<2x8x32xf32>
    %637 = arith.truncf %636 : vector<2x8x32xf32> to vector<2x8x32xbf16>
    %638 = vector.shape_cast %634 : vector<16x32xf32> to vector<2x8x32xf32>
    %639 = arith.truncf %638 : vector<2x8x32xf32> to vector<2x8x32xbf16>
    %640 = vector.shape_cast %635 : vector<16x32xf32> to vector<2x8x32xf32>
    %641 = arith.truncf %640 : vector<2x8x32xf32> to vector<2x8x32xbf16>
    %642 = vector.extract_strided_slice %637 {offsets = [0, 0, 0], sizes = [2, 8, 8], strides = [1, 1, 1]} : vector<2x8x32xbf16> to vector<2x8x8xbf16>
    %643 = vector.extract_strided_slice %639 {offsets = [0, 0, 0], sizes = [2, 8, 8], strides = [1, 1, 1]} : vector<2x8x32xbf16> to vector<2x8x8xbf16>
    %644 = vector.extract_strided_slice %641 {offsets = [0, 0, 0], sizes = [2, 8, 8], strides = [1, 1, 1]} : vector<2x8x32xbf16> to vector<2x8x8xbf16>
    "tpu.trace_start"() <{level = 10 : i32, message = "bqd,bkd->bqk"}> : () -> ()
    %cst_249 = arith.constant dense<0.000000e+00> : vector<2x8x8xf32>
    %645 = tpu.matmul %642, %643, %cst_249 {dimension_numbers = #tpu.dot_dimension_numbers<[2], [2], [1], [1], [0, 0, 0, 1, 1, 1], [0], [0]>} : vector<2x8x8xbf16>, vector<2x8x8xbf16>, vector<2x8x8xf32> -> vector<2x8x8xf32>
    "tpu.trace_stop"() : () -> ()
    %cst_250 = arith.constant 0.353553385 : f32
    %646 = vector.broadcast %cst_250 : f32 to vector<2x8x8xf32>
    %647 = arith.mulf %645, %646 : vector<2x8x8xf32>
    %cst_251 = arith.constant dense<0xFF800000> : vector<2x8xf32>
    %648 = vector.multi_reduction <maximumf>, %647, %cst_251 [2] : vector<2x8x8xf32> to vector<2x8xf32>
    %649 = vector.shape_cast %648 : vector<2x8xf32> to vector<2x8x1xf32>
    %650 = vector.broadcast %649 : vector<2x8x1xf32> to vector<2x8x8xf32>
    %651 = arith.subf %647, %650 : vector<2x8x8xf32>
    %652 = math.exp %651 : vector<2x8x8xf32>
    %cst_252 = arith.constant dense<0.000000e+00> : vector<2x8xf32>
    %653 = vector.multi_reduction <add>, %652, %cst_252 [2] : vector<2x8x8xf32> to vector<2x8xf32>
    %654 = vector.shape_cast %653 : vector<2x8xf32> to vector<2x8x1xf32>
    %655 = vector.broadcast %654 : vector<2x8x1xf32> to vector<2x8x8xf32>
    %656 = arith.divf %652, %655 : vector<2x8x8xf32>
    %657 = arith.truncf %656 : vector<2x8x8xf32> to vector<2x8x8xbf16>
    "tpu.trace_start"() <{level = 10 : i32, message = "bqk,bkd->bqd"}> : () -> ()
    %cst_253 = arith.constant dense<0.000000e+00> : vector<2x8x8xf32>
    %658 = tpu.matmul %657, %644, %cst_253 {dimension_numbers = #tpu.dot_dimension_numbers<[2], [1], [1], [2], [0, 0, 0, 1, 1, 2], [0], [0]>} : vector<2x8x8xbf16>, vector<2x8x8xbf16>, vector<2x8x8xf32> -> vector<2x8x8xf32>
    "tpu.trace_stop"() : () -> ()
    %659 = vector.extract_strided_slice %637 {offsets = [0, 0, 8], sizes = [2, 8, 8], strides = [1, 1, 1]} : vector<2x8x32xbf16> to vector<2x8x8xbf16>
    %660 = vector.extract_strided_slice %639 {offsets = [0, 0, 8], sizes = [2, 8, 8], strides = [1, 1, 1]} : vector<2x8x32xbf16> to vector<2x8x8xbf16>
    %661 = vector.extract_strided_slice %641 {offsets = [0, 0, 8], sizes = [2, 8, 8], strides = [1, 1, 1]} : vector<2x8x32xbf16> to vector<2x8x8xbf16>
    "tpu.trace_start"() <{level = 10 : i32, message = "bqd,bkd->bqk"}> : () -> ()
    %cst_254 = arith.constant dense<0.000000e+00> : vector<2x8x8xf32>
    %662 = tpu.matmul %659, %660, %cst_254 {dimension_numbers = #tpu.dot_dimension_numbers<[2], [2], [1], [1], [0, 0, 0, 1, 1, 1], [0], [0]>} : vector<2x8x8xbf16>, vector<2x8x8xbf16>, vector<2x8x8xf32> -> vector<2x8x8xf32>
    "tpu.trace_stop"() : () -> ()
    %cst_255 = arith.constant 0.353553385 : f32
    %663 = vector.broadcast %cst_255 : f32 to vector<2x8x8xf32>
    %664 = arith.mulf %662, %663 : vector<2x8x8xf32>
    %cst_256 = arith.constant dense<0xFF800000> : vector<2x8xf32>
    %665 = vector.multi_reduction <maximumf>, %664, %cst_256 [2] : vector<2x8x8xf32> to vector<2x8xf32>
    %666 = vector.shape_cast %665 : vector<2x8xf32> to vector<2x8x1xf32>
    %667 = vector.broadcast %666 : vector<2x8x1xf32> to vector<2x8x8xf32>
    %668 = arith.subf %664, %667 : vector<2x8x8xf32>
    %669 = math.exp %668 : vector<2x8x8xf32>
    %cst_257 = arith.constant dense<0.000000e+00> : vector<2x8xf32>
    %670 = vector.multi_reduction <add>, %669, %cst_257 [2] : vector<2x8x8xf32> to vector<2x8xf32>
    %671 = vector.shape_cast %670 : vector<2x8xf32> to vector<2x8x1xf32>
    %672 = vector.broadcast %671 : vector<2x8x1xf32> to vector<2x8x8xf32>
    %673 = arith.divf %669, %672 : vector<2x8x8xf32>
    %674 = arith.truncf %673 : vector<2x8x8xf32> to vector<2x8x8xbf16>
    "tpu.trace_start"() <{level = 10 : i32, message = "bqk,bkd->bqd"}> : () -> ()
    %cst_258 = arith.constant dense<0.000000e+00> : vector<2x8x8xf32>
    %675 = tpu.matmul %674, %661, %cst_258 {dimension_numbers = #tpu.dot_dimension_numbers<[2], [1], [1], [2], [0, 0, 0, 1, 1, 2], [0], [0]>} : vector<2x8x8xbf16>, vector<2x8x8xbf16>, vector<2x8x8xf32> -> vector<2x8x8xf32>
    "tpu.trace_stop"() : () -> ()
    %676 = vector.extract_strided_slice %637 {offsets = [0, 0, 16], sizes = [2, 8, 8], strides = [1, 1, 1]} : vector<2x8x32xbf16> to vector<2x8x8xbf16>
    %677 = vector.extract_strided_slice %639 {offsets = [0, 0, 16], sizes = [2, 8, 8], strides = [1, 1, 1]} : vector<2x8x32xbf16> to vector<2x8x8xbf16>
    %678 = vector.extract_strided_slice %641 {offsets = [0, 0, 16], sizes = [2, 8, 8], strides = [1, 1, 1]} : vector<2x8x32xbf16> to vector<2x8x8xbf16>
    "tpu.trace_start"() <{level = 10 : i32, message = "bqd,bkd->bqk"}> : () -> ()
    %cst_259 = arith.constant dense<0.000000e+00> : vector<2x8x8xf32>
    %679 = tpu.matmul %676, %677, %cst_259 {dimension_numbers = #tpu.dot_dimension_numbers<[2], [2], [1], [1], [0, 0, 0, 1, 1, 1], [0], [0]>} : vector<2x8x8xbf16>, vector<2x8x8xbf16>, vector<2x8x8xf32> -> vector<2x8x8xf32>
    "tpu.trace_stop"() : () -> ()
    %cst_260 = arith.constant 0.353553385 : f32
    %680 = vector.broadcast %cst_260 : f32 to vector<2x8x8xf32>
    %681 = arith.mulf %679, %680 : vector<2x8x8xf32>
    %cst_261 = arith.constant dense<0xFF800000> : vector<2x8xf32>
    %682 = vector.multi_reduction <maximumf>, %681, %cst_261 [2] : vector<2x8x8xf32> to vector<2x8xf32>
    %683 = vector.shape_cast %682 : vector<2x8xf32> to vector<2x8x1xf32>
    %684 = vector.broadcast %683 : vector<2x8x1xf32> to vector<2x8x8xf32>
    %685 = arith.subf %681, %684 : vector<2x8x8xf32>
    %686 = math.exp %685 : vector<2x8x8xf32>
    %cst_262 = arith.constant dense<0.000000e+00> : vector<2x8xf32>
    %687 = vector.multi_reduction <add>, %686, %cst_262 [2] : vector<2x8x8xf32> to vector<2x8xf32>
    %688 = vector.shape_cast %687 : vector<2x8xf32> to vector<2x8x1xf32>
    %689 = vector.broadcast %688 : vector<2x8x1xf32> to vector<2x8x8xf32>
    %690 = arith.divf %686, %689 : vector<2x8x8xf32>
    %691 = arith.truncf %690 : vector<2x8x8xf32> to vector<2x8x8xbf16>
    "tpu.trace_start"() <{level = 10 : i32, message = "bqk,bkd->bqd"}> : () -> ()
    %cst_263 = arith.constant dense<0.000000e+00> : vector<2x8x8xf32>
    %692 = tpu.matmul %691, %678, %cst_263 {dimension_numbers = #tpu.dot_dimension_numbers<[2], [1], [1], [2], [0, 0, 0, 1, 1, 2], [0], [0]>} : vector<2x8x8xbf16>, vector<2x8x8xbf16>, vector<2x8x8xf32> -> vector<2x8x8xf32>
    "tpu.trace_stop"() : () -> ()
    %693 = vector.extract_strided_slice %637 {offsets = [0, 0, 24], sizes = [2, 8, 8], strides = [1, 1, 1]} : vector<2x8x32xbf16> to vector<2x8x8xbf16>
    %694 = vector.extract_strided_slice %639 {offsets = [0, 0, 24], sizes = [2, 8, 8], strides = [1, 1, 1]} : vector<2x8x32xbf16> to vector<2x8x8xbf16>
    %695 = vector.extract_strided_slice %641 {offsets = [0, 0, 24], sizes = [2, 8, 8], strides = [1, 1, 1]} : vector<2x8x32xbf16> to vector<2x8x8xbf16>
    "tpu.trace_start"() <{level = 10 : i32, message = "bqd,bkd->bqk"}> : () -> ()
    %cst_264 = arith.constant dense<0.000000e+00> : vector<2x8x8xf32>
    %696 = tpu.matmul %693, %694, %cst_264 {dimension_numbers = #tpu.dot_dimension_numbers<[2], [2], [1], [1], [0, 0, 0, 1, 1, 1], [0], [0]>} : vector<2x8x8xbf16>, vector<2x8x8xbf16>, vector<2x8x8xf32> -> vector<2x8x8xf32>
    "tpu.trace_stop"() : () -> ()
    %cst_265 = arith.constant 0.353553385 : f32
    %697 = vector.broadcast %cst_265 : f32 to vector<2x8x8xf32>
    %698 = arith.mulf %696, %697 : vector<2x8x8xf32>
    %cst_266 = arith.constant dense<0xFF800000> : vector<2x8xf32>
    %699 = vector.multi_reduction <maximumf>, %698, %cst_266 [2] : vector<2x8x8xf32> to vector<2x8xf32>
    %700 = vector.shape_cast %699 : vector<2x8xf32> to vector<2x8x1xf32>
    %701 = vector.broadcast %700 : vector<2x8x1xf32> to vector<2x8x8xf32>
    %702 = arith.subf %698, %701 : vector<2x8x8xf32>
    %703 = math.exp %702 : vector<2x8x8xf32>
    %cst_267 = arith.constant dense<0.000000e+00> : vector<2x8xf32>
    %704 = vector.multi_reduction <add>, %703, %cst_267 [2] : vector<2x8x8xf32> to vector<2x8xf32>
    %705 = vector.shape_cast %704 : vector<2x8xf32> to vector<2x8x1xf32>
    %706 = vector.broadcast %705 : vector<2x8x1xf32> to vector<2x8x8xf32>
    %707 = arith.divf %703, %706 : vector<2x8x8xf32>
    %708 = arith.truncf %707 : vector<2x8x8xf32> to vector<2x8x8xbf16>
    "tpu.trace_start"() <{level = 10 : i32, message = "bqk,bkd->bqd"}> : () -> ()
    %cst_268 = arith.constant dense<0.000000e+00> : vector<2x8x8xf32>
    %709 = tpu.matmul %708, %695, %cst_268 {dimension_numbers = #tpu.dot_dimension_numbers<[2], [1], [1], [2], [0, 0, 0, 1, 1, 2], [0], [0]>} : vector<2x8x8xbf16>, vector<2x8x8xbf16>, vector<2x8x8xf32> -> vector<2x8x8xf32>
    "tpu.trace_stop"() : () -> ()
    %710 = tpu.concatenate %658, %675, %692, %709 in 2 : vector<2x8x8xf32>, vector<2x8x8xf32>, vector<2x8x8xf32>, vector<2x8x8xf32> -> vector<2x8x32xf32>
    %711 = vector.shape_cast %710 : vector<2x8x32xf32> to vector<16x32xf32>
    %712 = arith.truncf %711 : vector<16x32xf32> to vector<16x32xbf16>
    %cst_269 = arith.constant dense<0.000000e+00> : vector<16x32xf32>
    %713 = tpu.matmul %712, %619, %cst_269 {dimension_numbers = #tpu.dot_dimension_numbers<[1], [0], [0], [1], [0, 0, 1, 1], [], []>} : vector<16x32xbf16>, vector<32x32xbf16>, vector<16x32xf32> -> vector<16x32xf32>
    %714 = vector.broadcast %621 : vector<1x32xf32> to vector<16x32xf32>
    %715 = arith.addf %713, %714 : vector<16x32xf32>
    %716 = arith.addf %361, %715 : vector<16x32xf32>
    %cst_270 = arith.constant dense<0.000000e+00> : vector<16xf32>
    %717 = vector.multi_reduction <add>, %716, %cst_270 [1] : vector<16x32xf32> to vector<16xf32>
    %718 = vector.shape_cast %717 : vector<16xf32> to vector<16x1xf32>
    %cst_271 = arith.constant 3.200000e+01 : f32
    %719 = vector.broadcast %cst_271 : f32 to vector<16x1xf32>
    %720 = arith.divf %718, %719 : vector<16x1xf32>
    %721 = vector.broadcast %720 : vector<16x1xf32> to vector<16x32xf32>
    %722 = arith.subf %716, %721 : vector<16x32xf32>
    %723 = arith.mulf %722, %722 : vector<16x32xf32>
    %cst_272 = arith.constant dense<0.000000e+00> : vector<16xf32>
    %724 = vector.multi_reduction <add>, %723, %cst_272 [1] : vector<16x32xf32> to vector<16xf32>
    %725 = vector.shape_cast %724 : vector<16xf32> to vector<16x1xf32>
    %cst_273 = arith.constant 3.200000e+01 : f32
    %726 = vector.broadcast %cst_273 : f32 to vector<16x1xf32>
    %727 = arith.divf %725, %726 : vector<16x1xf32>
    %cst_274 = arith.constant 9.99999974E-6 : f32
    %728 = vector.broadcast %cst_274 : f32 to vector<16x1xf32>
    %729 = arith.addf %727, %728 : vector<16x1xf32>
    %730 = math.rsqrt %729 : vector<16x1xf32>
    %731 = vector.broadcast %730 : vector<16x1xf32> to vector<16x32xf32>
    %732 = arith.mulf %722, %731 : vector<16x32xf32>
    %733 = vector.broadcast %4 : vector<1x32xf32> to vector<16x32xf32>
    %734 = arith.mulf %732, %733 : vector<16x32xf32>
    %735 = vector.broadcast %6 : vector<1x32xf32> to vector<16x32xf32>
    %736 = arith.addf %734, %735 : vector<16x32xf32>
    %c0_275 = arith.constant 0 : index
    %c0_276 = arith.constant 0 : index
    %c0_277 = arith.constant 0 : index
    %c0_278 = arith.constant 0 : index
    %737 = vector.load %arg8[%c0_275, %c0_276, %c0_277, %c0_278] : memref<1x3x32x64xbf16, #tpu.memory_space<vmem>>, vector<1x1x32x64xbf16>
    %738 = vector.shape_cast %737 : vector<1x1x32x64xbf16> to vector<32x64xbf16>
    %739 = arith.truncf %490 : vector<16x32xf32> to vector<16x32xbf16>
    %cst_279 = arith.constant dense<0.000000e+00> : vector<16x64xf32>
    %740 = tpu.matmul %739, %738, %cst_279 {dimension_numbers = #tpu.dot_dimension_numbers<[1], [0], [0], [1], [0, 0, 1, 1], [], []>} : vector<16x32xbf16>, vector<32x64xbf16>, vector<16x64xf32> -> vector<16x64xf32>
    %c0_280 = arith.constant 0 : index
    %c0_281 = arith.constant 0 : index
    %c0_282 = arith.constant 0 : index
    %c0_283 = arith.constant 0 : index
    %741 = vector.load %arg9[%c0_280, %c0_281, %c0_282, %c0_283] : memref<1x3x1x64xf32, #tpu.memory_space<vmem>>, vector<1x1x1x64xf32>
    %742 = vector.shape_cast %741 : vector<1x1x1x64xf32> to vector<1x64xf32>
    %743 = vector.broadcast %742 : vector<1x64xf32> to vector<16x64xf32>
    %744 = arith.addf %740, %743 : vector<16x64xf32>
    %cst_284 = arith.constant 0.000000e+00 : f32
    %745 = vector.broadcast %cst_284 : f32 to vector<16x64xf32>
    %746 = arith.maximumf %744, %745 : vector<16x64xf32>
    %c0_285 = arith.constant 0 : index
    %c0_286 = arith.constant 0 : index
    %c0_287 = arith.constant 0 : index
    %c0_288 = arith.constant 0 : index
    %747 = vector.load %arg10[%c0_285, %c0_286, %c0_287, %c0_288] : memref<1x3x64x32xbf16, #tpu.memory_space<vmem>>, vector<1x1x64x32xbf16>
    %748 = vector.shape_cast %747 : vector<1x1x64x32xbf16> to vector<64x32xbf16>
    %749 = arith.truncf %746 : vector<16x64xf32> to vector<16x64xbf16>
    %cst_289 = arith.constant dense<0.000000e+00> : vector<16x32xf32>
    %750 = tpu.matmul %749, %748, %cst_289 {dimension_numbers = #tpu.dot_dimension_numbers<[1], [0], [0], [1], [0, 0, 1, 1], [], []>} : vector<16x64xbf16>, vector<64x32xbf16>, vector<16x32xf32> -> vector<16x32xf32>
    %c0_290 = arith.constant 0 : index
    %c0_291 = arith.constant 0 : index
    %c0_292 = arith.constant 0 : index
    %c0_293 = arith.constant 0 : index
    %751 = vector.load %arg11[%c0_290, %c0_291, %c0_292, %c0_293] : memref<1x3x1x32xf32, #tpu.memory_space<vmem>>, vector<1x1x1x32xf32>
    %752 = vector.shape_cast %751 : vector<1x1x1x32xf32> to vector<1x32xf32>
    %753 = vector.broadcast %752 : vector<1x32xf32> to vector<16x32xf32>
    %754 = arith.addf %750, %753 : vector<16x32xf32>
    %755 = arith.addf %490, %754 : vector<16x32xf32>
    %cst_294 = arith.constant dense<0.000000e+00> : vector<16xf32>
    %756 = vector.multi_reduction <add>, %755, %cst_294 [1] : vector<16x32xf32> to vector<16xf32>
    %757 = vector.shape_cast %756 : vector<16xf32> to vector<16x1xf32>
    %cst_295 = arith.constant 3.200000e+01 : f32
    %758 = vector.broadcast %cst_295 : f32 to vector<16x1xf32>
    %759 = arith.divf %757, %758 : vector<16x1xf32>
    %760 = vector.broadcast %759 : vector<16x1xf32> to vector<16x32xf32>
    %761 = arith.subf %755, %760 : vector<16x32xf32>
    %762 = arith.mulf %761, %761 : vector<16x32xf32>
    %cst_296 = arith.constant dense<0.000000e+00> : vector<16xf32>
    %763 = vector.multi_reduction <add>, %762, %cst_296 [1] : vector<16x32xf32> to vector<16xf32>
    %764 = vector.shape_cast %763 : vector<16xf32> to vector<16x1xf32>
    %cst_297 = arith.constant 3.200000e+01 : f32
    %765 = vector.broadcast %cst_297 : f32 to vector<16x1xf32>
    %766 = arith.divf %764, %765 : vector<16x1xf32>
    %cst_298 = arith.constant 9.99999974E-6 : f32
    %767 = vector.broadcast %cst_298 : f32 to vector<16x1xf32>
    %768 = arith.addf %766, %767 : vector<16x1xf32>
    %769 = math.rsqrt %768 : vector<16x1xf32>
    %770 = vector.broadcast %769 : vector<16x1xf32> to vector<16x32xf32>
    %771 = arith.mulf %761, %770 : vector<16x32xf32>
    %772 = vector.broadcast %4 : vector<1x32xf32> to vector<16x32xf32>
    %773 = arith.mulf %771, %772 : vector<16x32xf32>
    %774 = vector.broadcast %6 : vector<1x32xf32> to vector<16x32xf32>
    %775 = arith.addf %773, %774 : vector<16x32xf32>
    %c0_299 = arith.constant 0 : index
    %c1_300 = arith.constant 1 : index
    %c0_301 = arith.constant 0 : index
    %c0_302 = arith.constant 0 : index
    %776 = vector.load %arg8[%c0_299, %c1_300, %c0_301, %c0_302] : memref<1x3x32x64xbf16, #tpu.memory_space<vmem>>, vector<1x1x32x64xbf16>
    %777 = vector.shape_cast %776 : vector<1x1x32x64xbf16> to vector<32x64xbf16>
    %778 = arith.truncf %613 : vector<16x32xf32> to vector<16x32xbf16>
    %cst_303 = arith.constant dense<0.000000e+00> : vector<16x64xf32>
    %779 = tpu.matmul %778, %777, %cst_303 {dimension_numbers = #tpu.dot_dimension_numbers<[1], [0], [0], [1], [0, 0, 1, 1], [], []>} : vector<16x32xbf16>, vector<32x64xbf16>, vector<16x64xf32> -> vector<16x64xf32>
    %c0_304 = arith.constant 0 : index
    %c1_305 = arith.constant 1 : index
    %c0_306 = arith.constant 0 : index
    %c0_307 = arith.constant 0 : index
    %780 = vector.load %arg9[%c0_304, %c1_305, %c0_306, %c0_307] : memref<1x3x1x64xf32, #tpu.memory_space<vmem>>, vector<1x1x1x64xf32>
    %781 = vector.shape_cast %780 : vector<1x1x1x64xf32> to vector<1x64xf32>
    %782 = vector.broadcast %781 : vector<1x64xf32> to vector<16x64xf32>
    %783 = arith.addf %779, %782 : vector<16x64xf32>
    %cst_308 = arith.constant 0.000000e+00 : f32
    %784 = vector.broadcast %cst_308 : f32 to vector<16x64xf32>
    %785 = arith.maximumf %783, %784 : vector<16x64xf32>
    %c0_309 = arith.constant 0 : index
    %c1_310 = arith.constant 1 : index
    %c0_311 = arith.constant 0 : index
    %c0_312 = arith.constant 0 : index
    %786 = vector.load %arg10[%c0_309, %c1_310, %c0_311, %c0_312] : memref<1x3x64x32xbf16, #tpu.memory_space<vmem>>, vector<1x1x64x32xbf16>
    %787 = vector.shape_cast %786 : vector<1x1x64x32xbf16> to vector<64x32xbf16>
    %788 = arith.truncf %785 : vector<16x64xf32> to vector<16x64xbf16>
    %cst_313 = arith.constant dense<0.000000e+00> : vector<16x32xf32>
    %789 = tpu.matmul %788, %787, %cst_313 {dimension_numbers = #tpu.dot_dimension_numbers<[1], [0], [0], [1], [0, 0, 1, 1], [], []>} : vector<16x64xbf16>, vector<64x32xbf16>, vector<16x32xf32> -> vector<16x32xf32>
    %c0_314 = arith.constant 0 : index
    %c1_315 = arith.constant 1 : index
    %c0_316 = arith.constant 0 : index
    %c0_317 = arith.constant 0 : index
    %790 = vector.load %arg11[%c0_314, %c1_315, %c0_316, %c0_317] : memref<1x3x1x32xf32, #tpu.memory_space<vmem>>, vector<1x1x1x32xf32>
    %791 = vector.shape_cast %790 : vector<1x1x1x32xf32> to vector<1x32xf32>
    %792 = vector.broadcast %791 : vector<1x32xf32> to vector<16x32xf32>
    %793 = arith.addf %789, %792 : vector<16x32xf32>
    %794 = arith.addf %613, %793 : vector<16x32xf32>
    %cst_318 = arith.constant dense<0.000000e+00> : vector<16xf32>
    %795 = vector.multi_reduction <add>, %794, %cst_318 [1] : vector<16x32xf32> to vector<16xf32>
    %796 = vector.shape_cast %795 : vector<16xf32> to vector<16x1xf32>
    %cst_319 = arith.constant 3.200000e+01 : f32
    %797 = vector.broadcast %cst_319 : f32 to vector<16x1xf32>
    %798 = arith.divf %796, %797 : vector<16x1xf32>
    %799 = vector.broadcast %798 : vector<16x1xf32> to vector<16x32xf32>
    %800 = arith.subf %794, %799 : vector<16x32xf32>
    %801 = arith.mulf %800, %800 : vector<16x32xf32>
    %cst_320 = arith.constant dense<0.000000e+00> : vector<16xf32>
    %802 = vector.multi_reduction <add>, %801, %cst_320 [1] : vector<16x32xf32> to vector<16xf32>
    %803 = vector.shape_cast %802 : vector<16xf32> to vector<16x1xf32>
    %cst_321 = arith.constant 3.200000e+01 : f32
    %804 = vector.broadcast %cst_321 : f32 to vector<16x1xf32>
    %805 = arith.divf %803, %804 : vector<16x1xf32>
    %cst_322 = arith.constant 9.99999974E-6 : f32
    %806 = vector.broadcast %cst_322 : f32 to vector<16x1xf32>
    %807 = arith.addf %805, %806 : vector<16x1xf32>
    %808 = math.rsqrt %807 : vector<16x1xf32>
    %809 = vector.broadcast %808 : vector<16x1xf32> to vector<16x32xf32>
    %810 = arith.mulf %800, %809 : vector<16x32xf32>
    %811 = vector.broadcast %4 : vector<1x32xf32> to vector<16x32xf32>
    %812 = arith.mulf %810, %811 : vector<16x32xf32>
    %813 = vector.broadcast %6 : vector<1x32xf32> to vector<16x32xf32>
    %814 = arith.addf %812, %813 : vector<16x32xf32>
    %c0_323 = arith.constant 0 : index
    %c2_324 = arith.constant 2 : index
    %c0_325 = arith.constant 0 : index
    %c0_326 = arith.constant 0 : index
    %815 = vector.load %arg8[%c0_323, %c2_324, %c0_325, %c0_326] : memref<1x3x32x64xbf16, #tpu.memory_space<vmem>>, vector<1x1x32x64xbf16>
    %816 = vector.shape_cast %815 : vector<1x1x32x64xbf16> to vector<32x64xbf16>
    %817 = arith.truncf %736 : vector<16x32xf32> to vector<16x32xbf16>
    %cst_327 = arith.constant dense<0.000000e+00> : vector<16x64xf32>
    %818 = tpu.matmul %817, %816, %cst_327 {dimension_numbers = #tpu.dot_dimension_numbers<[1], [0], [0], [1], [0, 0, 1, 1], [], []>} : vector<16x32xbf16>, vector<32x64xbf16>, vector<16x64xf32> -> vector<16x64xf32>
    %c0_328 = arith.constant 0 : index
    %c2_329 = arith.constant 2 : index
    %c0_330 = arith.constant 0 : index
    %c0_331 = arith.constant 0 : index
    %819 = vector.load %arg9[%c0_328, %c2_329, %c0_330, %c0_331] : memref<1x3x1x64xf32, #tpu.memory_space<vmem>>, vector<1x1x1x64xf32>
    %820 = vector.shape_cast %819 : vector<1x1x1x64xf32> to vector<1x64xf32>
    %821 = vector.broadcast %820 : vector<1x64xf32> to vector<16x64xf32>
    %822 = arith.addf %818, %821 : vector<16x64xf32>
    %cst_332 = arith.constant 0.000000e+00 : f32
    %823 = vector.broadcast %cst_332 : f32 to vector<16x64xf32>
    %824 = arith.maximumf %822, %823 : vector<16x64xf32>
    %c0_333 = arith.constant 0 : index
    %c2_334 = arith.constant 2 : index
    %c0_335 = arith.constant 0 : index
    %c0_336 = arith.constant 0 : index
    %825 = vector.load %arg10[%c0_333, %c2_334, %c0_335, %c0_336] : memref<1x3x64x32xbf16, #tpu.memory_space<vmem>>, vector<1x1x64x32xbf16>
    %826 = vector.shape_cast %825 : vector<1x1x64x32xbf16> to vector<64x32xbf16>
    %827 = arith.truncf %824 : vector<16x64xf32> to vector<16x64xbf16>
    %cst_337 = arith.constant dense<0.000000e+00> : vector<16x32xf32>
    %828 = tpu.matmul %827, %826, %cst_337 {dimension_numbers = #tpu.dot_dimension_numbers<[1], [0], [0], [1], [0, 0, 1, 1], [], []>} : vector<16x64xbf16>, vector<64x32xbf16>, vector<16x32xf32> -> vector<16x32xf32>
    %c0_338 = arith.constant 0 : index
    %c2_339 = arith.constant 2 : index
    %c0_340 = arith.constant 0 : index
    %c0_341 = arith.constant 0 : index
    %829 = vector.load %arg11[%c0_338, %c2_339, %c0_340, %c0_341] : memref<1x3x1x32xf32, #tpu.memory_space<vmem>>, vector<1x1x1x32xf32>
    %830 = vector.shape_cast %829 : vector<1x1x1x32xf32> to vector<1x32xf32>
    %831 = vector.broadcast %830 : vector<1x32xf32> to vector<16x32xf32>
    %832 = arith.addf %828, %831 : vector<16x32xf32>
    %833 = arith.addf %736, %832 : vector<16x32xf32>
    %cst_342 = arith.constant dense<0.000000e+00> : vector<16xf32>
    %834 = vector.multi_reduction <add>, %833, %cst_342 [1] : vector<16x32xf32> to vector<16xf32>
    %835 = vector.shape_cast %834 : vector<16xf32> to vector<16x1xf32>
    %cst_343 = arith.constant 3.200000e+01 : f32
    %836 = vector.broadcast %cst_343 : f32 to vector<16x1xf32>
    %837 = arith.divf %835, %836 : vector<16x1xf32>
    %838 = vector.broadcast %837 : vector<16x1xf32> to vector<16x32xf32>
    %839 = arith.subf %833, %838 : vector<16x32xf32>
    %840 = arith.mulf %839, %839 : vector<16x32xf32>
    %cst_344 = arith.constant dense<0.000000e+00> : vector<16xf32>
    %841 = vector.multi_reduction <add>, %840, %cst_344 [1] : vector<16x32xf32> to vector<16xf32>
    %842 = vector.shape_cast %841 : vector<16xf32> to vector<16x1xf32>
    %cst_345 = arith.constant 3.200000e+01 : f32
    %843 = vector.broadcast %cst_345 : f32 to vector<16x1xf32>
    %844 = arith.divf %842, %843 : vector<16x1xf32>
    %cst_346 = arith.constant 9.99999974E-6 : f32
    %845 = vector.broadcast %cst_346 : f32 to vector<16x1xf32>
    %846 = arith.addf %844, %845 : vector<16x1xf32>
    %847 = math.rsqrt %846 : vector<16x1xf32>
    %848 = vector.broadcast %847 : vector<16x1xf32> to vector<16x32xf32>
    %849 = arith.mulf %839, %848 : vector<16x32xf32>
    %850 = vector.broadcast %4 : vector<1x32xf32> to vector<16x32xf32>
    %851 = arith.mulf %849, %850 : vector<16x32xf32>
    %852 = vector.broadcast %6 : vector<1x32xf32> to vector<16x32xf32>
    %853 = arith.addf %851, %852 : vector<16x32xf32>
    %854 = vector.shape_cast %775 : vector<16x32xf32> to vector<2x8x32xf32>
    %c0_347 = arith.constant 0 : index
    %c0_348 = arith.constant 0 : index
    %c0_349 = arith.constant 0 : index
    %855 = vector.load %arg14[%c0_347, %c0_348, %c0_349] : memref<2x8x32xf32, #tpu.memory_space<vmem>>, vector<2x8x32xf32>
    tpu.vector_store %arg14[%c0_347, %c0_348, %c0_349], %854 {strides = array<i32>} : memref<2x8x32xf32, #tpu.memory_space<vmem>>, vector<2x8x32xf32>,
    %856 = vector.shape_cast %814 : vector<16x32xf32> to vector<2x8x32xf32>
    %c0_350 = arith.constant 0 : index
    %c0_351 = arith.constant 0 : index
    %c0_352 = arith.constant 0 : index
    %857 = vector.load %arg15[%c0_350, %c0_351, %c0_352] : memref<2x16x32xf32, #tpu.memory_space<vmem>>, vector<2x8x32xf32>
    tpu.vector_store %arg15[%c0_350, %c0_351, %c0_352], %856 {strides = array<i32>} : memref<2x16x32xf32, #tpu.memory_space<vmem>>, vector<2x8x32xf32>,
    %858 = vector.shape_cast %853 : vector<16x32xf32> to vector<2x8x32xf32>
    %c0_353 = arith.constant 0 : index
    %c8_354 = arith.constant 8 : index
    %c0_355 = arith.constant 0 : index
    %859 = vector.load %arg15[%c0_353, %c8_354, %c0_355] : memref<2x16x32xf32, #tpu.memory_space<vmem>>, vector<2x8x32xf32>
    tpu.vector_store %arg15[%c0_353, %c8_354, %c0_355], %858 {strides = array<i32>} : memref<2x16x32xf32, #tpu.memory_space<vmem>>, vector<2x8x32xf32>,
    %c1_i32 = arith.constant 1 : i32
    %860 = arith.cmpi eq, %arg1, %c1_i32 : i32
    %861 = arith.extui %860 : i1 to i32
    %c0_i32_356 = arith.constant 0 : i32
    %862 = arith.cmpi ne, %861, %c0_i32_356 : i32
    scf.if %862 {
      %863 = tpu.concatenate %410, %427, %444, %461 in 2 : vector<2x8x16xf32>, vector<2x8x16xf32>, vector<2x8x16xf32>, vector<2x8x16xf32> -> vector<2x8x64xf32>
      %c0_357 = arith.constant 0 : index
      %c0_358 = arith.constant 0 : index
      %c0_359 = arith.constant 0 : index
      %864 = vector.load %arg16[%c0_357, %c0_358, %c0_359] : memref<2x8x64xf32, #tpu.memory_space<vmem>>, vector<2x8x64xf32>
      tpu.vector_store %arg16[%c0_357, %c0_358, %c0_359], %863 {strides = array<i32>} : memref<2x8x64xf32, #tpu.memory_space<vmem>>, vector<2x8x64xf32>,
      %865 = tpu.concatenate %533, %550, %567, %584 in 2 : vector<2x8x8xf32>, vector<2x8x8xf32>, vector<2x8x8xf32>, vector<2x8x8xf32> -> vector<2x8x32xf32>
      %c0_360 = arith.constant 0 : index
      %c0_361 = arith.constant 0 : index
      %c0_362 = arith.constant 0 : index
      %866 = vector.load %arg17[%c0_360, %c0_361, %c0_362] : memref<2x8x32xf32, #tpu.memory_space<vmem>>, vector<2x8x32xf32>
      tpu.vector_store %arg17[%c0_360, %c0_361, %c0_362], %865 {strides = array<i32>} : memref<2x8x32xf32, #tpu.memory_space<vmem>>, vector<2x8x32xf32>,
      %867 = tpu.concatenate %656, %673, %690, %707 in 2 : vector<2x8x8xf32>, vector<2x8x8xf32>, vector<2x8x8xf32>, vector<2x8x8xf32> -> vector<2x8x32xf32>
      %c0_363 = arith.constant 0 : index
      %c0_364 = arith.constant 0 : index
      %c0_365 = arith.constant 0 : index
      %868 = vector.load %arg18[%c0_363, %c0_364, %c0_365] : memref<2x8x32xf32, #tpu.memory_space<vmem>>, vector<2x8x32xf32>
      tpu.vector_store %arg18[%c0_363, %c0_364, %c0_365], %867 {strides = array<i32>} : memref<2x8x32xf32, #tpu.memory_space<vmem>>, vector<2x8x32xf32>,
    } else {
    }
    return
  }
  func.func @transform_0(%arg0: i32, %arg1: i32) -> (i32, i32, i32) {
    %c0_i32 = arith.constant 0 : i32
    %c0_i32_0 = arith.constant 0 : i32
    %c0_i32_1 = arith.constant 0 : i32
    return %arg0, %c0_i32, %c0_i32_0 : i32, i32, i32
  }
  func.func @transform_1(%arg0: i32, %arg1: i32) -> (i32, i32, i32) {
    %c0_i32 = arith.constant 0 : i32
    %c0_i32_0 = arith.constant 0 : i32
    %c0_i32_1 = arith.constant 0 : i32
    return %arg0, %c0_i32, %c0_i32_0 : i32, i32, i32
  }
  func.func @transform_2(%arg0: i32, %arg1: i32) -> (i32, i32, i32, i32) {
    %c0_i32 = arith.constant 0 : i32
    %c0_i32_0 = arith.constant 0 : i32
    %c0_i32_1 = arith.constant 0 : i32
    %c0_i32_2 = arith.constant 0 : i32
    return %arg1, %c0_i32, %c0_i32_0, %c0_i32_1 : i32, i32, i32, i32
  }
  func.func @transform_3(%arg0: i32, %arg1: i32) -> (i32, i32, i32, i32) {
    %c0_i32 = arith.constant 0 : i32
    %c0_i32_0 = arith.constant 0 : i32
    %c0_i32_1 = arith.constant 0 : i32
    %c0_i32_2 = arith.constant 0 : i32
    return %arg1, %c0_i32, %c0_i32_0, %c0_i32_1 : i32, i32, i32, i32
  }
  func.func @transform_4(%arg0: i32, %arg1: i32) -> (i32, i32, i32, i32) {
    %c0_i32 = arith.constant 0 : i32
    %c0_i32_0 = arith.constant 0 : i32
    %c0_i32_1 = arith.constant 0 : i32
    %c0_i32_2 = arith.constant 0 : i32
    return %arg1, %c0_i32, %c0_i32_0, %c0_i32_1 : i32, i32, i32, i32
  }
  func.func @transform_5(%arg0: i32, %arg1: i32) -> (i32, i32, i32, i32) {
    %c0_i32 = arith.constant 0 : i32
    %c0_i32_0 = arith.constant 0 : i32
    %c0_i32_1 = arith.constant 0 : i32
    %c0_i32_2 = arith.constant 0 : i32
    return %arg1, %c0_i32, %c0_i32_0, %c0_i32_1 : i32, i32, i32, i32
  }
  func.func @transform_6(%arg0: i32, %arg1: i32) -> (i32, i32, i32, i32) {
    %c0_i32 = arith.constant 0 : i32
    %c0_i32_0 = arith.constant 0 : i32
    %c0_i32_1 = arith.constant 0 : i32
    %c0_i32_2 = arith.constant 0 : i32
    return %arg1, %c0_i32, %c0_i32_0, %c0_i32_1 : i32, i32, i32, i32
  }
  func.func @transform_7(%arg0: i32, %arg1: i32) -> (i32, i32, i32, i32) {
    %c0_i32 = arith.constant 0 : i32
    %c0_i32_0 = arith.constant 0 : i32
    %c0_i32_1 = arith.constant 0 : i32
    %c0_i32_2 = arith.constant 0 : i32
    return %arg1, %c0_i32, %c0_i32_0, %c0_i32_1 : i32, i32, i32, i32
  }
  func.func @transform_8(%arg0: i32, %arg1: i32) -> (i32, i32, i32, i32) {
    %c0_i32 = arith.constant 0 : i32
    %c0_i32_0 = arith.constant 0 : i32
    %c0_i32_1 = arith.constant 0 : i32
    %c0_i32_2 = arith.constant 0 : i32
    return %arg1, %c0_i32, %c0_i32_0, %c0_i32_1 : i32, i32, i32, i32
  }
  func.func @transform_9(%arg0: i32, %arg1: i32) -> (i32, i32, i32, i32) {
    %c0_i32 = arith.constant 0 : i32
    %c0_i32_0 = arith.constant 0 : i32
    %c0_i32_1 = arith.constant 0 : i32
    %c0_i32_2 = arith.constant 0 : i32
    return %arg1, %c0_i32, %c0_i32_0, %c0_i32_1 : i32, i32, i32, i32
  }
  func.func @transform_10(%arg0: i32, %arg1: i32) -> (i32, i32, i32) {
    %c0_i32 = arith.constant 0 : i32
    %c0_i32_0 = arith.constant 0 : i32
    %c0_i32_1 = arith.constant 0 : i32
    return %arg1, %c0_i32, %c0_i32_0 : i32, i32, i32
  }
  func.func @transform_11(%arg0: i32, %arg1: i32) -> (i32, i32, i32) {
    %c0_i32 = arith.constant 0 : i32
    %c0_i32_0 = arith.constant 0 : i32
    %c0_i32_1 = arith.constant 0 : i32
    return %arg1, %c0_i32, %c0_i32_0 : i32, i32, i32
  }
  func.func @transform_12(%arg0: i32, %arg1: i32) -> (i32, i32, i32) {
    %c0_i32 = arith.constant 0 : i32
    %c0_i32_0 = arith.constant 0 : i32
    %c0_i32_1 = arith.constant 0 : i32
    return %arg0, %c0_i32, %c0_i32_0 : i32, i32, i32
  }
  func.func @transform_13(%arg0: i32, %arg1: i32) -> (i32, i32, i32) {
    %c0_i32 = arith.constant 0 : i32
    %c0_i32_0 = arith.constant 0 : i32
    %c0_i32_1 = arith.constant 0 : i32
    return %arg0, %c0_i32, %c0_i32_0 : i32, i32, i32
  }
  func.func @transform_14(%arg0: i32, %arg1: i32) -> (i32, i32, i32) {
    %c0_i32 = arith.constant 0 : i32
    %c0_i32_0 = arith.constant 0 : i32
    %c0_i32_1 = arith.constant 0 : i32
    return %arg0, %c0_i32, %c0_i32_0 : i32, i32, i32
  }
  func.func @transform_15(%arg0: i32, %arg1: i32) -> (i32, i32, i32) {
    %c0_i32 = arith.constant 0 : i32
    %c0_i32_0 = arith.constant 0 : i32
    %c0_i32_1 = arith.constant 0 : i32
    return %arg0, %c0_i32, %c0_i32_0 : i32, i32, i32
  }
  func.func @transform_16(%arg0: i32, %arg1: i32) -> (i32, i32, i32) {
    %c0_i32 = arith.constant 0 : i32
    %c0_i32_0 = arith.constant 0 : i32
    %c0_i32_1 = arith.constant 0 : i32
    return %arg0, %c0_i32, %c0_i32_0 : i32, i32, i32
  }
}

</mosaic_0001>

<bundles_post_ra>
// kernel: transformer_encoder_fwd.1
= control target key start
LH: loop header
LB: loop body
LE: loop exit
PB: predicated region body
PF: predicated region fallthrough
CT: control target
= control target key end

     0   :  { %s9059_s0 = inlined_call_operand.vmem [shape: f32[2,8,32], index: 0, kind: input, shape index: {}]   ;;  %s9060_s1 = inlined_call_operand.vmem [shape: f32[2,16,32], index: 1, kind: input, shape index: {}]   ;;  %s9061_s2 = inlined_call_operand.vmem [shape: bf16[2,6,32,96], index: 2, kind: input, shape index: {}]   ;;  %s9062_s3 = inlined_call_operand.vmem [shape: f32[2,6,1,96], index: 3, kind: input, shape index: {}]   ;;  %s9063_s4 = inlined_call_operand.hbm [shape: bf16[2,6,32,32], index: 4, kind: input, shape index: {}]   ;;  %s9064_s5 = inlined_call_operand.vmem [shape: f32[2,6,1,32], index: 5, kind: input, shape index: {}]   ;;  %s9065_s6 = inlined_call_operand.vmem [shape: bf16[2,3,32,64], index: 6, kind: input, shape index: {}]   ;;  %s9066_s7 = inlined_call_operand.vmem [shape: f32[2,3,1,64], index: 7, kind: input, shape index: {}]   ;;  %s9067_s8 = inlined_call_operand.vmem [shape: bf16[2,3,64,32], index: 8, kind: input, shape index: {}]   ;;  %s9068_s9 = inlined_call_operand.vmem [shape: f32[2,3,1,32], index: 9, kind: input, shape index: {}]   ;;  %s9069_s10 = inlined_call_operand.vmem [shape: f32[2,1,32], index: 10, kind: input, shape index: {}]   ;;  %s9070_s11 = inlined_call_operand.vmem [shape: f32[2,1,32], index: 11, kind: input, shape index: {}]   ;;  %s9071_s12 = inlined_call_operand.hbm [shape: f32[2,8,32], index: 12, kind: output, shape index: {0}]   ;;  %s9072_s13 = inlined_call_operand.vmem [shape: f32[2,16,32], index: 13, kind: output, shape index: {1}]   ;;  %s9073_s14 = inlined_call_operand.vmem [shape: f32[2,8,64], index: 14, kind: output, shape index: {2}]   ;;  %s9074_s15 = inlined_call_operand.vmem [shape: f32[2,8,32], index: 15, kind: output, shape index: {3}]   ;;  %s9075_s16 = inlined_call_operand.vmem [shape: f32[2,8,32], index: 16, kind: output, shape index: {4}]  }
   0x1   :  { %9107 = sst [smem:[#allocation13_spill]] %s9059_s0 }
   0x2   :  { %9108 = sst [smem:[#allocation14_spill]] %s9060_s1 }
   0x3   :  { %9109 = sst [smem:[#allocation15_spill]] %s9061_s2 }
   0x4   :  { %9110 = sst [smem:[#allocation16_spill]] %s9062_s3 }
   0x5   :  { %9111 = sst [smem:[#allocation17_spill]] %s9063_s4 }
   0x6   :  { %9112 = sst [smem:[#allocation18_spill]] %s9064_s5 }
   0x7   :  { %9113 = sst [smem:[#allocation19_spill]] %s9065_s6 }
   0x8   :  { %9114 = sst [smem:[#allocation20_spill]] %s9066_s7 }
   0x9   :  { %9115 = sst [smem:[#allocation21_spill]] %s9069_s10 }
   0xa   :  { %9116 = sst [smem:[#allocation22_spill]] %s9070_s11 }
   0xb   :  { %9117 = sst [smem:[#allocation23_spill]] %s9071_s12 }
   0xc   :  { %9118 = sst [smem:[#allocation24_spill]] %s9072_s13 }
   0xd   :  { %9119 = sst [smem:[#allocation25_spill]] %s9073_s14 }
   0xe   :  { %9120 = sst [smem:[#allocation26_spill]] %s9074_s15 }
   0xf   :  { %9121 = sst [smem:[#allocation27_spill]] %s9075_s16 }
  0x10   :  { %22 = vsyncpa [#allocation3], 0 }
  0x11   :  { %24 = vsyncpa [#allocation3 + $0x1], 0 }
  0x12   :  { %25 = vsyncpa [#allocation4], 0  ;;  %s7258_s21 = smov 0   ;;  %s7260_s22 = smov 0  }
  0x13   :  { %s7262_s23 = smov 0   ;;  %s7264_s24 = smov 0  }
  0x14   :  { %s7266_s25 = smov 0   ;;  %s7268_s26 = smov 0  }
  0x15 LB: > { %9122 = sst [smem:[#allocation8_spill]] %s7131_s22  ;;  %s9079_s27 = sadd.s32 4294967295, %s7147_s26   ;;  %s7147_s26 = sphi %s7268_s26, %s31_s26   ;;  %s7143_s25 = sphi %s7266_s25, %s9164_s25   ;;  %s7139_s24 = sphi %s7264_s24, %s9163_s24   ;;  %s7135_s23 = sphi %s7262_s23, %s9162_s23   ;;  %s7131_s22 = sphi %s7260_s22, %s9161_s22   ;;  %s7127_s21 = sphi %s7258_s21, %s9160_s21  }
  0x16   : > { %9123 = sst [smem:[#allocation9_spill]] %s7135_s23  ;;  %s40_s28 = sadd.s32 1, %s7143_s25 }
  0x17   : > { %9124 = sst [smem:[#allocation10_spill]] %s7143_s25  ;;  %p41_p0 = scmp.ge.s32.totalorder %s40_s28, 2 }
  0x18   : > { %s154_s29 = sadd.s32 1, %s7135_s23  ;;  %p161_p1 = scmp.ne.s32.totalorder %s7135_s23, %s7131_s22 }
  0x19   : > { %p162_p2 = scmp.eq.s32.totalorder %s7147_s26, 0  ;;  %s9166_s28 = smov (%p41_p0, %s40_s28), 0 }
  0x1a   : > { %9125 = sst [smem:[#allocation11_spill]] %s9166_s28  ;;  %p167_p4 = scmp.ne.s32.totalorder %s7131_s22, %s7127_s21 }
  0x1b   : > { %p163_p3 = por %p162_p2, %p161_p1  ;;  %s151_s30 = ssub.s32 %s7143_s25, %s9166_s28 }
  0x1c   : > { %p168_p5 = scmp.eq.s32.totalorder %s9079_s27, 0  ;;  %p152_p6 = scmp.eq.s32.totalorder %s151_s30, 0 }
  0x1d   : > { %p6610_p8 = scmp.lt.s32.totalorder %s7147_s26, 2  ;;  %s537_s18 = sand.u32 1, %s7135_s23  }
  0x1e   : > { %p7299_p7 = por %p168_p5, %p167_p4  ;;  %s6594_s19 = smul.u32 96, %s7143_s25 }
  0x1f   : > { %s7305_s17 = scalar_select %p152_p6, %s7135_s23, %s154_s29  }
  0x20   : > { %s6593_s20 = smul.u32 96, %s537_s18  ;;  %s9128_s4 = sld [smem:[#allocation17_spill]] }
  0x21   : > { %9127 = sst [smem:[#allocation12_spill]] %s7305_s17  ;;  %p6607_p9 = pnand %p6610_p8, %p163_p3 }
  0x22   : > { %s541_s30 = scalar_lea.vmem [#allocation2], %s6593_s20  ;;  %s538_s16 = scalar_lea.sflag [#allocation3], %s537_s18 }
  0x23   : > { %s549_s27 = sshll.u32 %s541_s30, 4  ;;  %s7149_s15 = smov 64   ;;  %s550_s27 = int_to_ptr.vmem [resolvable:$true] %s549_s27 }
  0x24   : > { %s7150_s13 = smov 4   ;;  %p6169_p10 = scmp.ge.s32.totalorder %s7147_s26, 1 }
  0x25   : > { %p606_p11 = scmp.lt.s32.totalorder %s7147_s26, 3 }
  0x26   : > { %s546_s21 = scalar_lea.hbm %s9128_s4, %s6594_s19 }
  0x27   : > { %s547_s28 = sshll.u32 %s546_s21, 4  ;;  %p607_p12 = pnand %p6169_p10, %p606_p11  ;;  %s548_s28 = int_to_ptr.hbm [resolvable:$true] %s547_s28 }
  0x28   : > { %6609 = dma.hbm_to_vmem [thread:$0]  (!%p6607_p9), %s548_s28, 1536, %s550_s27, %s538_s16, %s7149_s15, %s7149_s15, %s7150_s13  }
  0x29   : > { %610 = sbr.rel (%p607_p12) target bundleno = 7106 (0x1bc2), region = 68  ;;  %s612_s29 = sand.u32 (!%p607_p12), 1, %s7131_s22  }
  0x2a   : > { %s6595_s25 = smul.u32 (!%p607_p12), 96, %s612_s29  ;;  %s613_s12 = scalar_lea.sflag (!%p607_p12), [#allocation3], %s612_s29 }
  0x2c   : > { %s7315_s14 = scalar_lea.vmem (!%p607_p12), [#allocation2], %s6595_s25 }
  0x2e   : > { %7118 = dma.done.wait (%p7299_p7), %s613_s12, 1536  }
  0x2f   : > { %7120 = vsyncadd (%p7299_p7), %s613_s12, 4294965760  ;;  %p743_p13 = scmp.lt.s32.totalorder %s7139_s24, 1  ;;  %s9129_s10 = sld [smem:[#allocation21_spill]] }
  0x30   : > { %s9130_s11 = sld [smem:[#allocation22_spill]]  ;;  %p6173_p0 = scmp.ne.s32.totalorder %s7139_s24, 0 }
  0x31   : > { %s744_s13 = scalar_select %p743_p13, %s7139_s24, 1 }
  0x32   : > { %s9131_s2 = sld [smem:[#allocation15_spill]] }
  0x33   : > { %s6596_s15 = smul.u32 96, %s744_s13  ;;  %s9132_s3 = sld [smem:[#allocation16_spill]] }
  0x34   : > { %s6597_s18 = smul.u32 6, %s744_s13  ;;  %s9133_s5 = sld [smem:[#allocation18_spill]] }
  0x35   : > { %s7326_s28 = scalar_lea.vmem %s9129_s10, %s744_s13  ;;  %s6598_s29 = smul.u32 48, %s744_s13 }
  0x36   : > { %s7331_s25 = scalar_lea.vmem %s9130_s11, %s744_s13  ;;  %s9134_s6 = sld [smem:[#allocation19_spill]] }
  0x37   : > { %s6599_s11 = smul.u32 3, %s744_s13  ;;  %s9135_s7 = sld [smem:[#allocation20_spill]] }
  0x38   : > { %s7336_s0 = scalar_lea.vmem %s9131_s2, %s6596_s15  ;;  %s7356_s2 = scalar_lea.vmem %s9067_s8, %s6596_s15 }
  0x39   : > { %s7341_s17 = scalar_lea.vmem %s9132_s3, %s6597_s18  ;;  %810 = sbr.rel (%p6173_p0) target bundleno = 73 (0x49), region = 76 }
  0x3a   : > { %s7346_s10 = scalar_lea.vmem %s9133_s5, %s6597_s18  ;;  %s7366_s18 = scalar_lea.vmem %s9068_s9, %s6599_s11 }
  0x3b   : > { %s9137_s1 = sld [smem:[#allocation14_spill]] (!%p6173_p0) }
  0x3c   : > { %s7351_s20 = scalar_lea.vmem %s9134_s6, %s6598_s29  ;;  %s9136_s29 = sld [smem:[#allocation13_spill]] (!%p6173_p0) }
  0x3d   : > { %s7361_s12 = scalar_lea.vmem %s9135_s7, %s6599_s11  ;;  %s9138_s23 = sld [smem:[#allocation24_spill]] (!%p6173_p0) }
  0x3e   : > { %vm813_vm0 = vcmask 261120  }
  0x41   : > { %v816_v2 = vld [vmem:[%s9137_s1] sm:$0xff]  ;;  %v817_v3 = vld [vmem:[%s9137_s1 + $0x8] sm:$0xff]  ;;  %v818_v4 = vld [vmem:[%s9137_s1 + $0x10] sm:$0xff] }
  0x42   : > { %v811_v0 = vld [vmem:[%s9136_s29] sm:$0xff]  ;;  %v812_v1 = vld [vmem:[%s9136_s29 + $0x8] sm:$0xff]  ;;  %v819_v5 = vld [vmem:[%s9137_s1 + $0x18] sm:$0xff] }
  0x43   : > { %814 = vst.msk [vmem:[#allocation5] sm:$0xff] %vm813_vm0, %v811_v0 }
  0x44   : > { %815 = vst.msk [vmem:[#allocation5 + $0x8] sm:$0xff] %vm813_vm0, %v812_v1 }
  0x45   : > { %820 = vst.msk [vmem:[%s9138_s23] sm:$0xff] %vm813_vm0, %v816_v2 }
  0x46   : > { %821 = vst.msk [vmem:[%s9138_s23 + $0x8] sm:$0xff] %vm813_vm0, %v817_v3 }
  0x47   : > { %822 = vst.msk [vmem:[%s9138_s23 + $0x10] sm:$0xff] %vm813_vm0, %v818_v4 }
  0x48   : > { %823 = vst.msk [vmem:[%s9138_s23 + $0x18] sm:$0xff] %vm813_vm0, %v819_v5 }
  0x49 PF: > { %v6552_v6 = vld [vmem:[%s7336_s0 + $0x8] sm:$0xff]  ;;  %v6551_v7 = vld [vmem:[%s7336_s0] sm:$0xff]  ;;  %vm858_vm1 = vcmask 261120   ;;  %s9103_s5 = smov 120   ;;  %s9089_s21 = smov 88   ;;  %vm883_vm2 = vcmask 64512  }
  0x4a   : > { %v826_v8 = vld [vmem:[#allocation5] sm:$0xff]  ;;  %868 = vmatpush.bf16.msra.mxu0 %v6552_v6  ;;  %s9105_s30 = smov 96   ;;  %s9091_s4 = smov 112   ;;  %v6556_v5 = vld [vmem:[%s7336_s0 + $0x18] sm:$0xff]  ;;  %vm984_vm3 = vcmask 1043456  }
  0x4b   : > { %v827_v9 = vld [vmem:[#allocation5 + $0x8] sm:$0xff]  ;;  %v6775_v11 = vld [vmem:[%s7341_s17] ss:$0 sm:$0xff]  ;;  %s9101_s16 = smov 80   ;;  %s9099_s23 = smov 72  }
  0x4c   : > { %v842_v10 = vpack.c.bf16 %v827_v9, %v826_v8  ;;  %s9087_s13 = smov 104   ;;  %s7158_s15 = smov 64  }
  0x4d   : > { %s7159_s27 = smov 56   ;;  %s7160_s22 = smov 48  }
  0x4e   : > { %869 = vmatpush.bf16.msra.mxu0 %v6551_v7  ;;  %s9139_s11 = sld [smem:[#allocation24_spill]]  ;;  %s9141_s19 = smov 104  }
  0x4f   : > { %s9097_s3 = smov 8   ;;  %p6538_p1 = scmp.ne.s32.totalorder %s7139_s24, 1 }
  0x50   : > { %s7169_s24 = smov (!%p6538_p1), 48  }
  0x51   : > { %6182 = vmatmul.msk.bf16.vlgmr.msra.gmra.mxu0 %vm858_vm1, %v842_v10 }
  0xce   : > { %v871_v12 = vpop.f32.mrf.mxu0 }
  0xcf   : > { %v872_v13 = vadd.f32 %v6775_v11, %v871_v12  ;;  %v828_v12 = vld [vmem:[%s9139_s11] sm:$0xff] }
  0xd1   : > { %v876_v14 = vpack.c.bf16 %v872_v13, %v872_v13  ;;  %v830_v13 = vld [vmem:[%s9139_s11 + $0x10] sm:$0xff] }
  0xd3   : > { %v879_v15 = vunpack.c.l.b16 %v876_v14 }
  0xd5   : > { %v7403_v16 = vpack.c.b16 %v879_v15, %v879_v15 }
  0xd6   : > { %v873_v17 = vpop.f32.mrf.mxu0 }
  0xd7   : > { %v874_v18 = vadd.f32 %v6775_v11, %v873_v17  ;;  %1022 = vrot.lane.b32.xlu2 %v7403_v16, %s9103_s5  ;;  %1024 = vrot.lane.b32.xlu1 %v7403_v16, %s9089_s21  ;;  %v6555_v11 = vld [vmem:[%s7336_s0 + $0x10] sm:$0xff] }
  0xd8   : > { %881 = vrot.lane.b32.xlu0 %v7403_v16, %s9105_s30 }
  0xd9   : > { %v877_v19 = vpack.c.bf16 %v874_v18, %v874_v18 }
  0xdb   : > { %v904_v20 = vunpack.c.l.b16 %v877_v19 }
  0xdd   : > { %v7411_v21 = vpack.c.b16 %v904_v20, %v904_v20 }
  0xdf   : > { %1045 = vrot.lane.b32.xlu2 %v7411_v21, %s9103_s5  ;;  %1047 = vrot.lane.b32.xlu1 %v7411_v21, %s9089_s21  ;;  %s7161_s21 = smov 40  }
  0xe0   : > { %906 = vrot.lane.b32.xlu0 %v7411_v21, %s9105_s30 }
  0xe7   : > { %1162 = vrot.lane.b32.xlu2 %v7403_v16, %s9091_s4  ;;  %1187 = vrot.lane.b32.xlu1 %v7411_v21, %s9101_s16 }
  0xe8   : > { %1164 = vrot.lane.b32.xlu0 %v7403_v16, %s9101_s16 }
  0xef   : > { %1327 = vrot.lane.b32.xlu2 %v7411_v21, %s9099_s23  ;;  %1304 = vrot.lane.b32.xlu1 %v7403_v16, %s9099_s23 }
  0xf0   : > { %1185 = vrot.lane.b32.xlu0 %v7411_v21, %s9091_s4 }
  0xf7   : > { %1325 = vrot.lane.b32.xlu1 %v7411_v21, %s9087_s13 }
  0xf8   : > { %1302 = vrot.lane.b32.xlu0 %v7403_v16, %s9087_s13  ;;  %s9140_s13 = smov 88  }
 0x131   : > { %v1023_v22 = vpop.permute.xlu2 %1022 }
 0x139   : > { %v1046_v27 = vpop.permute.xlu2 %1045 }
 0x141   : > { %v1163_v32 = vpop.permute.xlu2 %1162 }
 0x149   : > { %v1025_v23 = vpop.permute.xlu1 %1024  ;;  %v1328_v37 = vpop.permute.xlu2 %1327 }
 0x14a   : > { %v882_v24 = vpop.permute.xlu0 %881  ;;  %v1030_v25 = vsel %vm883_vm2, %v1025_v23, 0  ;;  %v1333_v40 = vsel %vm883_vm2, %v1328_v37, 0 }
 0x14b   : > { %v888_v26 = vsel %vm883_vm2, %v882_v24, 0  ;;  %1039 = vmatpush.bf16.xpose.msrb.mxu0 %v1030_v25 }
 0x14c   : > { %897 = vmatpush.bf16.xpose.msra.mxu1 %v888_v26 }
 0x151   : > { %v1048_v28 = vpop.permute.xlu1 %1047 }
 0x152   : > { %v907_v29 = vpop.permute.xlu0 %906  ;;  %6187 = vmatmul.msk.bf16.vlgmr.msrb.gmra.mxu0 %vm883_vm2, %v1023_v22  ;;  %v1053_v30 = vsel %vm883_vm2, %v1048_v28, 0 }
 0x153   : > { %6183 = vmatmul.msk.bf16.vlgmr.msra.gmra.mxu1 %vm883_vm2, %v876_v14  ;;  %v912_v31 = vsel %vm883_vm2, %v907_v29, 0  ;;  %v1584_v14 = vpack.c.bf16 %v830_v13, %v828_v12 }
 0x154   : > { %921 = vmatpush.bf16.xpose.msra.mxu2 %v912_v31  ;;  %1062 = vmatpush.bf16.xpose.msrb.mxu1 %v1053_v30 }
 0x159   : > { %v1188_v33 = vpop.permute.xlu1 %1187 }
 0x15a   : > { %v1193_v34 = vsel %vm883_vm2, %v1188_v33, 0  ;;  %v1165_v35 = vpop.permute.xlu0 %1164 }
 0x15b   : > { %v1170_v36 = vsel %vm883_vm2, %v1165_v35, 0  ;;  %6184 = vmatmul.msk.bf16.vlgmr.msra.gmra.mxu2 %vm883_vm2, %v877_v19 }
 0x15c   : > { %1202 = vmatpush.bf16.xpose.msra.mxu1 %v1193_v34  ;;  %1179 = vmatpush.bf16.xpose.msra.mxu0 %v1170_v36 }
 0x161   : > { %v1305_v38 = vpop.permute.xlu1 %1304 }
 0x162   : > { %v1310_v39 = vsel %vm883_vm2, %v1305_v38, 0  ;;  %v1186_v41 = vpop.permute.xlu0 %1185 }
 0x163   : > { %6188 = vmatmul.msk.bf16.vlgmr.msrb.gmra.mxu1 %vm883_vm2, %v1046_v27  ;;  %6191 = vmatmul.msk.bf16.vlgmr.msra.gmra.mxu0 %vm883_vm2, %v1163_v32 }
 0x164   : > { %1342 = vmatpush.bf16.xpose.msrb.mxu1 %v1333_v40  ;;  %1319 = vmatpush.bf16.xpose.msrb.mxu0 %v1310_v39 }
 0x169   : > { %v1326_v43 = vpop.permute.xlu1 %1325 }
 0x16a   : > { %v1303_v42 = vpop.permute.xlu0 %1302 }
 0x173   : > { %6192 = vmatmul.msk.bf16.vlgmr.msra.gmra.mxu1 %vm883_vm2, %v1186_v41  ;;  %6195 = vmatmul.msk.bf16.vlgmr.msrb.gmra.mxu0 %vm883_vm2, %v1303_v42 }
 0x174   : > { %1609 = vmatpush.bf16.msra.mxu1 %v6556_v5 }
 0x178   : > { %1610 = vmatpush.bf16.msra.mxu1 %v6555_v11 }
 0x183   : > { %6196 = vmatmul.msk.bf16.vlgmr.msrb.gmra.mxu1 %vm883_vm2, %v1326_v43 }
 0x193   : > { %6226 = vmatmul.msk.bf16.vlgmr.msra.gmra.mxu1 %vm858_vm1, %v1584_v14 }
 0x1cf   : > { %v1041_v44 = vpop.f32.mrf.mxu0 }
 0x1d0   : > { %v899_v45 = vpop.f32.mrf.mxu1  ;;  %v1068_v46 = vmul.f32 0.35355338, %v1041_v44 }
 0x1d1   : > { %v927_v47 = vmul.f32 0.35355338, %v899_v45 }
 0x1d2   : > { %v1070_v48 = vsel %vm883_vm2, %v1068_v46, -inf }
 0x1d3   : > { %1071 = vmax.xlane.f32.xlu1 %v1070_v48  ;;  %v929_v49 = vsel %vm883_vm2, %v927_v47, -inf }
 0x1d4   : > { %930 = vmax.xlane.f32.xlu2 %v929_v49 }
 0x1d7   : > { %v1043_v50 = vpop.f32.mrf.mxu0 }
 0x1d8   : > { %v901_v51 = vpop.f32.mrf.mxu1 }
 0x1de   : > { %v923_v52 = vpop.f32.mrf.mxu2 }
 0x1df   : > { %v7453_v53 = vmul.f32 0.35355338, %v923_v52 }
 0x1e0   : > { %v1064_v54 = vpop.f32.mrf.mxu1  ;;  %v1181_v55 = vpop.f32.mrf.mxu0 }
 0x1e1   : > { %v932_v56 = vsel %vm883_vm2, %v7453_v53, -inf  ;;  %v1069_v7 = vmul.f32 0.35355338, %v1064_v54  ;;  %v1208_v9 = vmul.f32 0.35355338, %v1181_v55 }
 0x1e2   : > { %933 = vmax.xlane.f32.xlu0 %v932_v56  ;;  %v6776_v55 = vld [vmem:[%s7341_s17 + $0x1] ss:$0 sm:$0xff] }
 0x1e3   : > { %v1073_v8 = vsel %vm883_vm2, %v1069_v7, -inf  ;;  %v1210_v10 = vsel %vm883_vm2, %v1208_v9, -inf }
 0x1e6   : > { %v925_v57 = vpop.f32.mrf.mxu2 }
 0x1e8   : > { %v1066_v58 = vpop.f32.mrf.mxu1  ;;  %v1183_v59 = vpop.f32.mrf.mxu0 }
 0x1ec   : > { %979 = vrot.lane.b32.xlu2 %v7403_v16, %s7158_s15  ;;  %1141 = vrot.lane.b32.xlu1 %v7411_v21, %s7159_s27 }
 0x1f0   : > { %v1204_v60 = vpop.f32.mrf.mxu1  ;;  %v1321_v61 = vpop.f32.mrf.mxu0 }
 0x1f1   : > { %v7461_v62 = vmul.f32 0.35355338, %v1204_v60  ;;  %v1348_v15 = vmul.f32 0.35355338, %v1321_v61 }
 0x1f3   : > { %v1213_v63 = vsel %vm883_vm2, %v7461_v62, -inf  ;;  %v1350_v17 = vsel %vm883_vm2, %v1348_v15, -inf }
 0x1f4   : > { %1214 = vmax.xlane.f32.xlu0 %v1213_v63  ;;  %1260 = vrot.lane.b32.xlu1 %v7403_v16, %s7160_s22 }
 0x1f8   : > { %v1206_v0 = vpop.f32.mrf.mxu1  ;;  %v1323_v1 = vpop.f32.mrf.mxu0 }
 0x200   : > { %v1344_v2 = vpop.f32.mrf.mxu1 }
 0x201   : > { %v1349_v3 = vmul.f32 0.35355338, %v1344_v2 }
 0x203   : > { %v1353_v4 = vsel %vm883_vm2, %v1349_v3, -inf }
 0x204   : > { %1354 = vmax.xlane.f32.xlu0 %v1353_v4 }
 0x208   : > { %v1346_v6 = vpop.f32.mrf.mxu1 }
 0x210   : > { %v1612_v59 = vpop.f32.mrf.mxu1 }
 0x211   : > { %v1613_v61 = vadd.f32 %v6776_v55, %v1612_v59 }
 0x215   : > { %1074 = vmax.xlane.f32.xlu2 %v1073_v8 }
 0x218   : > { %1001 = vrot.lane.b32.xlu0 %v7411_v21, %s7158_s15  ;;  %v1614_v8 = vpop.f32.mrf.mxu1 }
 0x21d   : > { %1211 = vmax.xlane.f32.xlu2 %v1210_v10 }
 0x225   : > { %1351 = vmax.xlane.f32.xlu2 %v1350_v17 }
 0x23d   : > { %1120 = vrot.lane.b32.xlu2 %v7403_v16, %s7159_s27 }
 0x246   : > { %v1072_v18 = vpop.xlane.xlu1 %1071 }
 0x247   : > { %v1076_v19 = vsub.f32 %v1068_v46, %v1072_v18  ;;  %v931_v20 = vpop.xlane.xlu2 %930 }
 0x248   : > { %v935_v22 = vsub.f32 %v927_v47, %v931_v20 }
 0x249   : > { %v1078_v23 = vmul.f32 1.442695, %v1076_v19 }
 0x24a   : > { %v937_v24 = vmul.f32 1.442695, %v935_v22 }
 0x24b   : > { %6795 = vpow2.f32 %v1078_v23 }
 0x24c   : > { %6797 = vpow2.f32 %v937_v24 }
 0x24f   : > { %v980_v25 = vpop.permute.xlu2 %979 }
 0x250   : > { %v986_v26 = vsel %vm984_vm3, %v980_v25, 0 }
 0x251   : > { %v7485_v27 = vpop.eup %6795  ;;  %995 = vmatpush.bf16.msra.mxu3 %v986_v26 }
 0x252   : > { %v7487_v28 = vpop.eup %6797  ;;  %v1082_v29 = vsel %vm883_vm2, %v7485_v27, 0.0 }
 0x253   : > { %v941_v30 = vsel %vm883_vm2, %v7487_v28, 0.0  ;;  %1083 = vadd.xlane.f32.xlu0 %v1082_v29 }
 0x254   : > { %942 = vadd.xlane.f32.xlu1 %v941_v30 }
 0x255   : > { %v934_v31 = vpop.xlane.xlu0 %933 }
 0x256   : > { %v936_v38 = vsub.f32 %v7453_v53, %v934_v31 }
 0x258   : > { %v939_v40 = vmul.f32 1.442695, %v936_v38 }
 0x25e   : > { %v7503_v48 = vpop.permute.xlu1 %1141 }
 0x266   : > { %v1261_v58 = vpop.permute.xlu1 %1260 }
 0x267   : > { %v1215_v32 = vpop.xlane.xlu0 %1214  ;;  %v1266_v2 = vsel %vm984_vm3, %v1261_v58, 0 }
 0x268   : > { %v1217_v56 = vsub.f32 %v7461_v62, %v1215_v32 }
 0x26a   : > { %v1220_v63 = vmul.f32 1.442695, %v1217_v56 }
 0x26d   : > { %1281 = vrot.lane.b32.xlu1 %v7411_v21, %s7160_s22 }
 0x277   : > { %v1355_v33 = vpop.xlane.xlu0 %1354 }
 0x278   : > { %v1357_v34 = vsub.f32 %v1349_v3, %v1355_v33  ;;  %v7517_v3 = vpack.c.bf16 %v1613_v61, %v1613_v61 }
 0x27a   : > { %v1360_v35 = vmul.f32 1.442695, %v1357_v34  ;;  %v1620_v5 = vunpack.c.l.b16 %v7517_v3 }
 0x27c   : > { %6799 = vpow2.f32 %v1360_v35 }
 0x27d   : > { %6801 = vpow2.f32 %v939_v40 }
 0x282   : > { %v7495_v36 = vpop.eup %6799 }
 0x283   : > { %v1365_v37 = vsel %vm883_vm2, %v7495_v36, 0.0  ;;  %v7501_v46 = vpop.eup %6801 }
 0x284   : > { %1366 = vadd.xlane.f32.xlu2 %v1365_v37  ;;  %v944_v49 = vsel %vm883_vm2, %v7501_v46, 0.0 }
 0x288   : > { %v1075_v39 = vpop.xlane.xlu2 %1074 }
 0x289   : > { %v1077_v43 = vsub.f32 %v1069_v7, %v1075_v39  ;;  %v7526_v7 = vpack.c.b16 %v1620_v5, %v1620_v5 }
 0x28a   : > { %v1002_v41 = vpop.permute.xlu0 %1001 }
 0x28b   : > { %v1007_v42 = vsel %vm984_vm3, %v1002_v41, 0  ;;  %v1080_v45 = vmul.f32 1.442695, %v1077_v43 }
 0x28c   : > { %1016 = vmatpush.bf16.msrb.mxu3 %v1007_v42 }
 0x28d   : > { %6803 = vpow2.f32 %v1080_v45 }
 0x290   : > { %v1212_v44 = vpop.xlane.xlu2 %1211 }
 0x291   : > { %v1216_v47 = vsub.f32 %v1208_v9, %v1212_v44  ;;  %v1615_v9 = vadd.f32 %v6776_v55, %v1614_v8  ;;  %v1147_v44 = vsel %vm984_vm3, %v7503_v48, 0 }
 0x293   : > { %v1218_v50 = vmul.f32 1.442695, %v1216_v47  ;;  %v7507_v53 = vpop.eup %6803  ;;  %v7532_v11 = vpack.c.bf16 %v1615_v9, %v1615_v9 }
 0x294   : > { %v1085_v57 = vsel %vm883_vm2, %v7507_v53, 0.0 }
 0x295   : > { %6805 = vpow2.f32 %v1218_v50  ;;  %v1644_v12 = vunpack.c.l.b16 %v7532_v11 }
 0x297   : > { %945 = vadd.xlane.f32.xlu1 %v944_v49  ;;  %v7537_v14 = vpack.c.b16 %v1644_v12, %v1644_v12 }
 0x298   : > { %v1352_v51 = vpop.xlane.xlu2 %1351 }
 0x299   : > { %v1356_v52 = vsub.f32 %v1348_v15, %v1352_v51 }
 0x29b   : > { %v1358_v54 = vmul.f32 1.442695, %v1356_v52  ;;  %v7514_v1 = vpop.eup %6805 }
 0x29c   : > { %v1222_v6 = vsel %vm883_vm2, %v7514_v1, 0.0  ;;  %1622 = vrot.lane.b32.xlu2 %v7526_v7, %s9105_s30 }
 0x29d   : > { %6807 = vpow2.f32 %v1358_v54 }
 0x29e   : > { %6809 = vpow2.f32 %v1220_v63 }
 0x29f   : > { %1086 = vadd.xlane.f32.xlu1 %v1085_v57 }
 0x2a0   : > { %v1121_v60 = vpop.permute.xlu2 %1120 }
 0x2a1   : > { %v1126_v0 = vsel %vm984_vm3, %v1121_v60, 0 }
 0x2a2   : > { %1135 = vmatpush.bf16.msrb.mxu2 %v1126_v0 }
 0x2a3   : > { %v7519_v62 = vpop.eup %6807 }
 0x2a4   : > { %v1362_v4 = vsel %vm883_vm2, %v7519_v62, 0.0  ;;  %v7530_v10 = vpop.eup %6809  ;;  %1784 = vrot.lane.b32.xlu2 %v7537_v14, %s9103_s5 }
 0x2a5   : > { %1363 = vadd.xlane.f32.xlu0 %v1362_v4  ;;  %v1225_v13 = vsel %vm883_vm2, %v7530_v10, 0.0 }
 0x2a6   : > { %1275 = vmatpush.bf16.msra.mxu2 %v1266_v2 }
 0x2a7   : > { %1223 = vadd.xlane.f32.xlu1 %v1222_v6 }
 0x2ac   : > { %1901 = vrot.lane.b32.xlu2 %v7526_v7, %s9091_s4 }
 0x2af   : > { %1226 = vadd.xlane.f32.xlu1 %v1225_v13 }
 0x2b4   : > { %2066 = vrot.lane.b32.xlu2 %v7537_v14, %s9099_s23 }
 0x2b9   : > { %1421 = vrot.lane.b32.xlu0 %v7411_v21, %s7161_s21 }
 0x2bc   : > { %1719 = vrot.lane.b32.xlu2 %v7526_v7, %s7158_s15 }
 0x2c1   : > { %1761 = vrot.lane.b32.xlu0 %v7526_v7, %s9103_s5 }
 0x2c6   : > { %v1084_v15 = vpop.xlane.xlu0 %1083 }
 0x2c7   : > { %v943_v17 = vpop.xlane.xlu1 %942  ;;  %6811 = vrcp.f32 %v1084_v15  ;;  %v1099_v24 = vand.u32 2147483648, %v1084_v15  ;;  %v1097_v26 = vand.u32 2147483647, %v1084_v15  ;;  %vm1093_vm6 = vweird.f32 %v1084_v15 }
 0x2c8   : > { %6813 = vrcp.f32 %v943_v17  ;;  %1400 = vrot.lane.b32.xlu1 %v7403_v16, %s7161_s21  ;;  %v958_v25 = vand.u32 2147483648, %v943_v17  ;;  %v956_v30 = vand.u32 2147483647, %v943_v17  ;;  %vm952_vm8 = vweird.f32 %v943_v17 }
 0x2c9   : > { %1926 = vrot.lane.b32.xlu0 %v7537_v14, %s9101_s16  ;;  %v1100_v32 = vor.u32 1.1754944e-38, %v1099_v24  ;;  %vm1098_vm10 = vcmp.eq.f32.partialorder %v1097_v26, 8.507059e+37 }
 0x2ca   : > { %v959_v34 = vor.u32 1.1754944e-38, %v958_v25  ;;  %vm957_vm11 = vcmp.eq.f32.partialorder %v956_v30, 8.507059e+37 }
 0x2cd   : > { %v6812_v21 = vpop.eup %6811 }
 0x2ce   : > { %v6814_v18 = vpop.eup %6813  ;;  %v1089_v19 = vmul.f32 %v6812_v21, %v1084_v15  ;;  %vm1094_vm4 = vweird.f32 %v6812_v21 }
 0x2cf   : > { %v948_v20 = vmul.f32 %v6814_v18, %v943_v17  ;;  %vm953_vm5 = vweird.f32 %v6814_v18  ;;  %vm1095_vm7 = vmor %vm1093_vm6, %vm1094_vm4 }
 0x2d0   : > { %v1090_v22 = vsub.f32 1.0, %v1089_v19  ;;  %1646 = vrot.lane.b32.xlu1 %v7537_v14, %s9105_s30  ;;  %vm954_vm9 = vmor %vm952_vm8, %vm953_vm5 }
 0x2d1   : > { %v949_v23 = vsub.f32 1.0, %v948_v20  ;;  %2043 = vrot.lane.b32.xlu0 %v7526_v7, %s9099_s23  ;;  %s9144_s23 = smov 112  }
 0x2d2   : > { %v1091_v16 = vmul.f32 %v6812_v21, %v1090_v22  ;;  %v6554_v22 = vld [vmem:[%s7315_s14 + $0x8] sm:$0xff] }
 0x2d3   : > { %v950_v29 = vmul.f32 %v6814_v18, %v949_v23  ;;  %1499 = vmatpush.bf16.msra.mxu0 %v6554_v22 }
 0x2d4   : > { %v1092_v31 = vadd.f32 %v6812_v21, %v1091_v16 }
 0x2d5   : > { %v951_v33 = vadd.f32 %v6814_v18, %v950_v29 }
 0x2d6   : > { %v1096_v35 = vsel %vm1095_vm7, %v6812_v21, %v1092_v31 }
 0x2d7   : > { %v955_v37 = vsel %vm954_vm9, %v6814_v18, %v951_v33  ;;  %v1101_v38 = vsel %vm1098_vm10, %v1100_v32, %v1096_v35 }
 0x2d8   : > { %1763 = vrot.lane.b32.xlu1 %v7526_v7, %s9140_s13  ;;  %v960_v39 = vsel %vm957_vm11, %v959_v34, %v955_v37  ;;  %v1102_v40 = vmul.f32 %v7485_v27, %v1101_v38  ;;  %v6553_v34 = vld [vmem:[%s7315_s14] sm:$0xff] }
 0x2d9   : > { %v961_v41 = vmul.f32 %v7487_v28, %v960_v39  ;;  %2064 = vrot.lane.b32.xlu0 %v7537_v14, %s9141_s19  ;;  %1500 = vmatpush.bf16.msra.mxu0 %v6553_v34 }
 0x2da   : > { %v1118_v42 = vpack.c.bf16 %v1102_v40, %v1102_v40 }
 0x2db   : > { %v977_v43 = vpack.c.bf16 %v961_v41, %v961_v41 }
 0x2dc   : > { %6189 = vmatmul.msk.bf16.vlgmr.msrb.gmra.mxu2 %vm883_vm2, %v1118_v42 }
 0x2dd   : > { %6185 = vmatmul.msk.bf16.vlgmr.msra.gmra.mxu3 %vm883_vm2, %v977_v43 }
 0x2de   : > { %1156 = vmatpush.bf16.msra.mxu3 %v1147_v44 }
 0x2df   : > { %v1282_v28 = vpop.permute.xlu1 %1281 }
 0x2e0   : > { %1786 = vrot.lane.b32.xlu1 %v7537_v14, %s9140_s13  ;;  %v1287_v15 = vsel %vm984_vm3, %v1282_v28, 0 }
 0x2e8   : > { %1903 = vrot.lane.b32.xlu1 %v7526_v7, %s9101_s16  ;;  %s9143_s16 = smov 72  }
 0x2f0   : > { %1924 = vrot.lane.b32.xlu1 %v7537_v14, %s9091_s4  ;;  %s9093_s4 = smov 16  }
 0x2f7   : > { %v7577_v27 = vpop.xlane.xlu2 %1366 }
 0x2f8   : > { %2041 = vrot.lane.b32.xlu1 %v7526_v7, %s9141_s19 }
 0x2ff   : > { %v7579_v45 = vpop.permute.xlu2 %1622 }
 0x307   : > { %v7581_v49 = vpop.permute.xlu2 %1784 }
 0x30a   : > { %v946_v47 = vpop.xlane.xlu1 %945 }
 0x30b   : > { %6815 = vrcp.f32 %v946_v47  ;;  %v973_v55 = vand.u32 2147483648, %v946_v47  ;;  %v971_v56 = vand.u32 2147483647, %v946_v47  ;;  %vm967_vm13 = vweird.f32 %v946_v47 }
 0x30d   : > { %v974_v61 = vor.u32 1.1754944e-38, %v973_v55  ;;  %vm972_vm15 = vcmp.eq.f32.partialorder %v971_v56, 8.507059e+37 }
 0x30f   : > { %v7585_v60 = vpop.permute.xlu2 %1901 }
 0x311   : > { %v6816_v48 = vpop.eup %6815 }
 0x312   : > { %v963_v50 = vmul.f32 %v6816_v48, %v946_v47  ;;  %v1087_v51 = vpop.xlane.xlu1 %1086  ;;  %vm968_vm12 = vweird.f32 %v6816_v48 }
 0x313   : > { %6817 = vrcp.f32 %v1087_v51  ;;  %vm969_vm14 = vmor %vm967_vm13, %vm968_vm12  ;;  %v1114_v18 = vand.u32 2147483648, %v1087_v51  ;;  %vm1108_vm4 = vweird.f32 %v1087_v51 }
 0x314   : > { %v964_v52 = vsub.f32 1.0, %v963_v50 }
 0x315   : > { %v1115_v26 = vor.u32 1.1754944e-38, %v1114_v18 }
 0x316   : > { %v965_v54 = vmul.f32 %v6816_v48, %v964_v52 }
 0x317   : > { %v7593_v21 = vpop.permute.xlu2 %2066 }
 0x318   : > { %v7583_v57 = vpop.xlane.xlu0 %1363  ;;  %v966_v58 = vadd.f32 %v6816_v48, %v965_v54 }
 0x319   : > { %v6818_v59 = vpop.eup %6817  ;;  %6819 = vrcp.f32 %v7583_v57  ;;  %vm1373_vm13 = vweird.f32 %v7583_v57 }
 0x31a   : > { %v1104_v63 = vmul.f32 %v6818_v59, %v1087_v51  ;;  %v1224_v0 = vpop.xlane.xlu1 %1223  ;;  %v970_v2 = vsel %vm969_vm14, %v6816_v48, %v966_v58  ;;  %vm1109_vm0 = vweird.f32 %v6818_v59  ;;  %v1377_v58 = vand.u32 2147483647, %v7583_v57 }
 0x31b   : > { %6821 = vrcp.f32 %v1224_v0  ;;  %v975_v5 = vsel %vm972_vm15, %v974_v61, %v970_v2  ;;  %vm1110_vm5 = vmor %vm1108_vm4, %vm1109_vm0  ;;  %v1239_v25 = vand.u32 2147483648, %v1224_v0  ;;  %v1237_v30 = vand.u32 2147483647, %v1224_v0 }
 0x31c   : > { %v1105_v4 = vsub.f32 1.0, %v1104_v63  ;;  %v976_v6 = vmul.f32 %v7501_v46, %v975_v5  ;;  %v1112_v46 = vand.u32 2147483647, %v1087_v51  ;;  %vm1233_vm8 = vweird.f32 %v1224_v0 }
 0x31d   : > { %v1240_v37 = vor.u32 1.1754944e-38, %v1239_v25  ;;  %vm1238_vm10 = vcmp.eq.f32.partialorder %v1237_v30, 8.507059e+37  ;;  %vm1378_vm4 = vcmp.eq.f32.partialorder %v1377_v58, 8.507059e+37 }
 0x31e   : > { %v1106_v8 = vmul.f32 %v6818_v59, %v1105_v4  ;;  %v978_v9 = vpack.c.bf16 %v976_v6, %v976_v6  ;;  %vm1113_vm7 = vcmp.eq.f32.partialorder %v1112_v46, 8.507059e+37 }
 0x31f   : > { %v7589_v12 = vpop.eup %6819  ;;  %v1720_v38 = vpop.permute.xlu2 %1719 }
 0x320   : > { %v1107_v17 = vadd.f32 %v6818_v59, %v1106_v8  ;;  %6186 = vmatmul.msk.bf16.vlgmr.msrb.gmra.mxu3 %vm883_vm2, %v978_v9  ;;  %v1369_v23 = vmul.f32 %v7589_v12, %v7583_v57  ;;  %v1725_v43 = vsel %vm984_vm3, %v1720_v38, 0  ;;  %vm1374_vm11 = vweird.f32 %v7589_v12 }
 0x321   : > { %v6822_v13 = vpop.eup %6821  ;;  %1296 = vmatpush.bf16.msrb.mxu3 %v1287_v15  ;;  %1734 = vmatpush.bf16.msrb.mxu0 %v1725_v43  ;;  %vm1375_vm14 = vmor %vm1373_vm13, %vm1374_vm11  ;;  %v1628_v9 = vsel %vm883_vm2, %v7579_v45, 0  ;;  %v1394_v45 = vand.u32 2147483648, %v7577_v27  ;;  %vm1471_vm11 = vcmask 195584  }
 0x322   : > { %v1229_v19 = vmul.f32 %v6822_v13, %v1224_v0  ;;  %v7595_v20 = vpop.xlane.xlu1 %1226  ;;  %v1111_v16 = vsel %vm1110_vm5, %v6818_v59, %v1107_v17  ;;  %vm1234_vm6 = vweird.f32 %v6822_v13  ;;  %v1370_v31 = vsub.f32 1.0, %v1369_v23 }
 0x323   : > { %6823 = vrcp.f32 %v7595_v20  ;;  %v1116_v33 = vsel %vm1113_vm7, %v1115_v26, %v1111_v16  ;;  %vm1235_vm9 = vmor %vm1233_vm8, %vm1234_vm6  ;;  %v1254_v59 = vand.u32 2147483648, %v7595_v20  ;;  %vm1248_vm15 = vweird.f32 %v7595_v20 }
 0x324   : > { %v1230_v24 = vsub.f32 1.0, %v1229_v19  ;;  %v1117_v41 = vmul.f32 %v7507_v53, %v1116_v33  ;;  %6825 = vrcp.f32 %v7577_v27  ;;  %v1371_v44 = vmul.f32 %v7589_v12, %v1370_v31 }
 0x325   : > { %v1379_v53 = vand.u32 2147483648, %v7583_v57  ;;  %v1252_v61 = vand.u32 2147483647, %v7595_v20  ;;  %v1255_v5 = vor.u32 1.1754944e-38, %v1254_v59  ;;  %vm1388_vm7 = vweird.f32 %v7577_v27 }
 0x326   : > { %v1231_v29 = vmul.f32 %v6822_v13, %v1230_v24  ;;  %v1119_v52 = vpack.c.bf16 %v1117_v41, %v1117_v41  ;;  %v1372_v54 = vadd.f32 %v7589_v12, %v1371_v44  ;;  %v1395_v24 = vor.u32 1.1754944e-38, %v1394_v45 }
 0x327   : > { %v1380_v2 = vor.u32 1.1754944e-38, %v1379_v53  ;;  %vm1253_vm5 = vcmp.eq.f32.partialorder %v1252_v61, 8.507059e+37 }
 0x328   : > { %v1232_v32 = vadd.f32 %v6822_v13, %v1231_v29  ;;  %v1376_v63 = vsel %vm1375_vm14, %v7589_v12, %v1372_v54 }
 0x329   : > { %v6824_v35 = vpop.eup %6823  ;;  %v1381_v6 = vsel %vm1378_vm4, %v1380_v2, %v1376_v63 }
 0x32a   : > { %v1236_v39 = vsel %vm1235_vm9, %v6822_v13, %v1232_v32  ;;  %v1244_v40 = vmul.f32 %v6824_v35, %v7595_v20  ;;  %vm1249_vm12 = vweird.f32 %v6824_v35  ;;  %v1382_v15 = vmul.f32 %v7519_v62, %v1381_v6 }
 0x32b   : > { %v1241_v42 = vsel %vm1238_vm10, %v1240_v37, %v1236_v39  ;;  %v1422_v50 = vpop.permute.xlu0 %1421  ;;  %vm1250_vm0 = vmor %vm1248_vm15, %vm1249_vm12  ;;  %v1392_v62 = vand.u32 2147483647, %v7577_v27  ;;  %vm1468_vm10 = vcmask 130048  }
 0x32c   : > { %v1245_v28 = vsub.f32 1.0, %v1244_v40  ;;  %v1242_v47 = vmul.f32 %v7514_v1, %v1241_v42  ;;  %v1427_v56 = vsel %vm984_vm3, %v1422_v50, 0  ;;  %v6826_v1 = vpop.eup %6825  ;;  %v1398_v19 = vpack.c.bf16 %v1382_v15, %v1382_v15 }
 0x32d   : > { %v1384_v0 = vmul.f32 %v6826_v1, %v7577_v27  ;;  %vm1389_vm6 = vweird.f32 %v6826_v1  ;;  %vm1393_vm9 = vcmp.eq.f32.partialorder %v1392_v62, 8.507059e+37  ;;  %v2072_v42 = vsel %vm883_vm2, %v7593_v21, 0 }
 0x32e   : > { %v1246_v48 = vmul.f32 %v6824_v35, %v1245_v28  ;;  %v1258_v51 = vpack.c.bf16 %v1242_v47, %v1242_v47  ;;  %vm1390_vm8 = vmor %vm1388_vm7, %vm1389_vm6 }
 0x32f   : > { %v1385_v8 = vsub.f32 1.0, %v1384_v0 }
 0x330   : > { %6193 = vmatmul.msk.bf16.vlgmr.msra.gmra.mxu2 %vm883_vm2, %v1258_v51  ;;  %v1247_v55 = vadd.f32 %v6824_v35, %v1246_v48  ;;  %6190 = vmatmul.msk.bf16.vlgmr.msra.gmra.mxu3 %vm883_vm2, %v1119_v52 }
 0x331   : > { %1436 = vmatpush.bf16.msra.mxu3 %v1427_v56  ;;  %v1386_v18 = vmul.f32 %v6826_v1, %v1385_v8 }
 0x332   : > { %v1251_v4 = vsel %vm1250_vm0, %v6824_v35, %v1247_v55 }
 0x333   : > { %v1256_v57 = vsel %vm1253_vm5, %v1255_v5, %v1251_v4  ;;  %v1387_v46 = vadd.f32 %v6826_v1, %v1386_v18  ;;  %v1762_v25 = vpop.permute.xlu0 %1761 }
 0x334   : > { %v1257_v12 = vmul.f32 %v7530_v10, %v1256_v57 }
 0x335   : > { %v1391_v23 = vsel %vm1390_vm8, %v6826_v1, %v1387_v46 }
 0x336   : > { %v1259_v20 = vpack.c.bf16 %v1257_v12, %v1257_v12  ;;  %v1396_v16 = vsel %vm1393_vm9, %v1395_v24, %v1391_v23 }
 0x337   : > { %v1397_v30 = vmul.f32 %v7495_v36, %v1396_v16 }
 0x339   : > { %v1399_v31 = vpack.c.bf16 %v1397_v30, %v1397_v30 }
 0x33a   : > { %v1401_v13 = vpop.permute.xlu1 %1400 }
 0x33b   : > { %v1406_v17 = vsel %vm984_vm3, %v1401_v13, 0  ;;  %v1927_v33 = vpop.permute.xlu0 %1926 }
 0x33c   : > { %1415 = vmatpush.bf16.msrb.mxu2 %v1406_v17  ;;  %v1932_v36 = vsel %vm883_vm2, %v1927_v33, 0  ;;  %v831_v33 = vld [vmem:[%s9139_s11 + $0x18] sm:$0xff] }
 0x340   : > { %1637 = vmatpush.bf16.xpose.msra.mxu2 %v1628_v9  ;;  %6194 = vmatmul.msk.bf16.vlgmr.msrb.gmra.mxu3 %vm883_vm2, %v1259_v20 }
 0x341   : > { %6197 = vmatmul.msk.bf16.vlgmr.msrb.gmra.mxu2 %vm883_vm2, %v1398_v19 }
 0x342   : > { %v1647_v22 = vpop.permute.xlu1 %1646 }
 0x343   : > { %v1652_v10 = vsel %vm883_vm2, %v1647_v22, 0  ;;  %v2044_v37 = vpop.permute.xlu0 %2043 }
 0x344   : > { %1661 = vmatpush.bf16.xpose.msrb.mxu3 %v1652_v10  ;;  %v2049_v38 = vsel %vm883_vm2, %v2044_v37, 0 }
 0x34a   : > { %v1764_v26 = vpop.permute.xlu1 %1763 }
 0x34b   : > { %v1769_v29 = vsel %vm883_vm2, %v1764_v26, 0 }
 0x34c   : > { %1778 = vmatpush.bf16.xpose.msrb.mxu2 %v1769_v29 }
 0x350   : > { %6198 = vmatmul.msk.bf16.vlgmr.msra.gmra.mxu3 %vm883_vm2, %v1399_v31  ;;  %v6560_v31 = vld [vmem:[%s7336_s0 + $0x28] sm:$0xff] }
 0x351   : > { %6227 = vmatmul.msk.bf16.vlgmr.msra.gmra.mxu2 %vm883_vm2, %v7517_v3 }
 0x352   : > { %v1787_v27 = vpop.permute.xlu1 %1786 }
 0x353   : > { %v1792_v32 = vsel %vm883_vm2, %v1787_v27, 0  ;;  %v6559_v27 = vld [vmem:[%s7336_s0 + $0x20] sm:$0xff] }
 0x354   : > { %1801 = vmatpush.bf16.xpose.msra.mxu3 %v1792_v32  ;;  %v829_v32 = vld [vmem:[%s9139_s11 + $0x8] sm:$0xff] }
 0x35a   : > { %v1904_v34 = vpop.permute.xlu1 %1903 }
 0x35b   : > { %v1909_v35 = vsel %vm883_vm2, %v1904_v34, 0  ;;  %v2308_v34 = vpack.c.bf16 %v831_v33, %v829_v32 }
 0x35c   : > { %1918 = vmatpush.bf16.xpose.msra.mxu2 %v1909_v35 }
 0x35f   : > { %v1137_v39 = vpop.f32.mrf.mxu2 }
 0x360   : > { %v7641_v40 = vpop.f32.mrf.mxu3  ;;  %6228 = vmatmul.msk.bf16.vlgmr.msrb.gmra.mxu3 %vm883_vm2, %v7532_v11  ;;  %v2065_v11 = vpop.permute.xlu0 %2064 }
 0x361   : > { %6231 = vmatmul.msk.bf16.vlgmr.msrb.gmra.mxu2 %vm883_vm2, %v1762_v25  ;;  %1941 = vmatpush.bf16.xpose.msrb.mxu3 %v1932_v36 }
 0x362   : > { %v1925_v43 = vpop.permute.xlu1 %1924 }
 0x364   : > { %2058 = vmatpush.bf16.xpose.msrb.mxu2 %v2049_v38 }
 0x367   : > { %v1139_v3 = vpop.f32.mrf.mxu2 }
 0x368   : > { %v999_v41 = vpop.f32.mrf.mxu3 }
 0x36a   : > { %v2042_v44 = vpop.permute.xlu1 %2041 }
 0x370   : > { %6232 = vmatmul.msk.bf16.vlgmr.msra.gmra.mxu3 %vm883_vm2, %v7581_v49 }
 0x371   : > { %6235 = vmatmul.msk.bf16.vlgmr.msra.gmra.mxu2 %vm883_vm2, %v7585_v60  ;;  %2081 = vmatpush.bf16.xpose.msra.mxu3 %v2072_v42 }
 0x380   : > { %6236 = vmatmul.msk.bf16.vlgmr.msrb.gmra.mxu3 %vm883_vm2, %v1925_v43 }
 0x381   : > { %6239 = vmatmul.msk.bf16.vlgmr.msrb.gmra.mxu2 %vm883_vm2, %v2042_v44  ;;  %2333 = vmatpush.bf16.msrb.mxu3 %v6560_v31 }
 0x385   : > { %2334 = vmatpush.bf16.msrb.mxu3 %v6559_v27 }
 0x390   : > { %6240 = vmatmul.msk.bf16.vlgmr.msra.gmra.mxu3 %vm883_vm2, %v2065_v11 }
 0x3a0   : > { %6270 = vmatmul.msk.bf16.vlgmr.msrb.gmra.mxu3 %vm858_vm1, %v2308_v34 }
 0x3a3   : > { %v7655_v28 = vpop.f32.mrf.mxu3 }
 0x3ab   : > { %v1020_v47 = vpop.f32.mrf.mxu3 }
 0x3b3   : > { %v1277_v60 = vpop.f32.mrf.mxu2  ;;  %v1158_v48 = vpop.f32.mrf.mxu3 }
 0x3b4   : > { %v6685_v50 = vpack.i.bf16 %v1158_v48, %v1137_v39 }
 0x3b6   : > { %6686 = vrot.lane.b32.xlu1 %v6685_v50, %s9097_s3  ;;  %s9147_s3 = smov 8  }
 0x3bb   : > { %v1279_v49 = vpop.f32.mrf.mxu2  ;;  %v1160_v21 = vpop.f32.mrf.mxu3 }
 0x3c3   : > { %v1298_v52 = vpop.f32.mrf.mxu3 }
 0x3c4   : > { %v1417_v51 = vpop.f32.mrf.mxu2  ;;  %v6690_v54 = vpack.i.bf16 %v1298_v52, %v1277_v60 }
 0x3c6   : > { %6691 = vrot.lane.b32.xlu0 %v6690_v54, %s9093_s4  ;;  %s9095_s4 = smov 24  }
 0x3cb   : > { %v1300_v55 = vpop.f32.mrf.mxu3 }
 0x3cc   : > { %v1419_v53 = vpop.f32.mrf.mxu2 }
 0x3d3   : > { %v1438_v1 = vpop.f32.mrf.mxu3 }
 0x3d4   : > { %v1639_v56 = vpop.f32.mrf.mxu2  ;;  %v6695_v9 = vpack.i.bf16 %v1438_v1, %v1417_v51 }
 0x3d5   : > { %v1667_v58 = vmul.f32 0.35355338, %v1639_v56 }
 0x3d7   : > { %v1669_v59 = vsel %vm883_vm2, %v1667_v58, -inf }
 0x3d8   : > { %1670 = vmax.xlane.f32.xlu2 %v1669_v59 }
 0x3db   : > { %v1440_v63 = vpop.f32.mrf.mxu3 }
 0x3dc   : > { %v1641_v61 = vpop.f32.mrf.mxu2 }
 0x3e3   : > { %v1663_v2 = vpop.f32.mrf.mxu3 }
 0x3e4   : > { %v1780_v0 = vpop.f32.mrf.mxu2  ;;  %v7660_v4 = vmul.f32 0.35355338, %v1663_v2 }
 0x3e5   : > { %v7664_v57 = vmul.f32 0.35355338, %v1780_v0 }
 0x3e6   : > { %v1672_v5 = vsel %vm883_vm2, %v7660_v4, -inf }
 0x3e7   : > { %1673 = vmax.xlane.f32.xlu1 %v1672_v5  ;;  %v1809_v13 = vsel %vm883_vm2, %v7664_v57, -inf }
 0x3eb   : > { %v1665_v8 = vpop.f32.mrf.mxu3 }
 0x3ec   : > { %v1782_v6 = vpop.f32.mrf.mxu2 }
 0x3f0   : > { %6696 = vrot.lane.b32.xlu2 %v6695_v9, %s9095_s4  ;;  %1810 = vmax.xlane.f32.xlu0 %v1809_v13  ;;  %s9142_s4 = smov 80  }
 0x3f3   : > { %v1803_v17 = vpop.f32.mrf.mxu3 }
 0x3f4   : > { %v1920_v15 = vpop.f32.mrf.mxu2  ;;  %v7677_v24 = vmul.f32 0.35355338, %v1803_v17 }
 0x3f5   : > { %v7669_v12 = vmul.f32 0.35355338, %v1920_v15 }
 0x3f6   : > { %v1812_v29 = vsel %vm883_vm2, %v7677_v24, -inf }
 0x3f7   : > { %v1949_v18 = vsel %vm883_vm2, %v7669_v12, -inf }
 0x3f8   : > { %1950 = vmax.xlane.f32.xlu1 %v1949_v18 }
 0x3fb   : > { %v1805_v20 = vpop.f32.mrf.mxu3 }
 0x3fc   : > { %v1922_v19 = vpop.f32.mrf.mxu2 }
 0x403   : > { %v1943_v45 = vpop.f32.mrf.mxu3 }
 0x404   : > { %v2060_v46 = vpop.f32.mrf.mxu2  ;;  %v7673_v22 = vmul.f32 0.35355338, %v1943_v45 }
 0x405   : > { %v7702_v50 = vmul.f32 0.35355338, %v2060_v46 }
 0x406   : > { %v1952_v62 = vsel %vm883_vm2, %v7673_v22, -inf }
 0x407   : > { %1953 = vmax.xlane.f32.xlu0 %v1952_v62 }
 0x40b   : > { %v1945_v23 = vpop.f32.mrf.mxu3 }
 0x40c   : > { %v2062_v10 = vpop.f32.mrf.mxu2 }
 0x413   : > { %v2083_v16 = vpop.f32.mrf.mxu3 }
 0x414   : > { %v7679_v25 = vmul.f32 0.35355338, %v2083_v16 }
 0x416   : > { %v2092_v26 = vsel %vm883_vm2, %v7679_v25, -inf }
 0x417   : > { %2093 = vmax.xlane.f32.xlu1 %v2092_v26 }
 0x419   : > { %1813 = vmax.xlane.f32.xlu2 %v1812_v29  ;;  %v6777_v29 = vld [vmem:[%s7341_s17 + $0x2] ss:$0 sm:$0xff] }
 0x41b   : > { %v2085_v30 = vpop.f32.mrf.mxu3 }
 0x423   : > { %v2336_v30 = vpop.f32.mrf.mxu3 }
 0x424   : > { %v2337_v27 = vadd.f32 %v6777_v29, %v2336_v30 }
 0x426   : > { %v7750_v32 = vpack.c.bf16 %v2337_v27, %v2337_v27 }
 0x428   : > { %v6687_v38 = vpop.permute.xlu1 %6686  ;;  %v2344_v34 = vunpack.c.l.b16 %v7750_v32 }
 0x429   : > { %v6689_v3 = vunpack.i.h.bf16 %v6687_v38  ;;  %v6688_v41 = vunpack.i.l.bf16 %v6687_v38 }
 0x42b   : > { %v1467_v11 = vsel %vm883_vm2, %v7655_v28, %v6689_v3  ;;  %v1466_v47 = vsel %vm883_vm2, %v7641_v40, %v6688_v41  ;;  %v2089_v40 = vsel %vm883_vm2, %v7702_v50, -inf }
 0x430   : > { %1859 = vrot.lane.b32.xlu1 %v7526_v7, %s7159_s27 }
 0x431   : > { %1740 = vrot.lane.b32.xlu2 %v7537_v14, %s7158_s15 }
 0x438   : > { %v6692_v36 = vpop.permute.xlu0 %6691 }
 0x439   : > { %v6694_v42 = vunpack.i.h.bf16 %v6692_v36  ;;  %v6693_v43 = vunpack.i.l.bf16 %v6692_v36 }
 0x43b   : > { %v1470_v49 = vsel %vm1468_vm10, %v1467_v11, %v6694_v42  ;;  %v1469_v21 = vsel %vm1468_vm10, %v1466_v47, %v6693_v43 }
 0x44b   : > { %v1671_v35 = vpop.xlane.xlu2 %1670 }
 0x44c   : > { %v1675_v37 = vsub.f32 %v1667_v58, %v1671_v35  ;;  %v7759_v35 = vpack.c.b16 %v2344_v34, %v2344_v34 }
 0x44e   : > { %v1677_v39 = vmul.f32 1.442695, %v1675_v37  ;;  %v2338_v37 = vpop.f32.mrf.mxu3 }
 0x44f   : > { %v2339_v36 = vadd.f32 %v6777_v29, %v2338_v37 }
 0x450   : > { %6827 = vpow2.f32 %v1677_v39 }
 0x451   : > { %v7764_v41 = vpack.c.bf16 %v2339_v36, %v2339_v36 }
 0x453   : > { %v6697_v44 = vpop.permute.xlu2 %6696  ;;  %v2368_v11 = vunpack.c.l.b16 %v7764_v41 }
 0x454   : > { %v6699_v60 = vunpack.i.h.bf16 %v6697_v44  ;;  %v6698_v48 = vunpack.i.l.bf16 %v6697_v44 }
 0x456   : > { %v7706_v51 = vpop.eup %6827  ;;  %v1472_v52 = vsel %vm1471_vm11, %v1469_v21, %v6698_v48  ;;  %v1473_v54 = vsel %vm1471_vm11, %v1470_v49, %v6699_v60 }
 0x457   : > { %v1474_v53 = vpack.c.bf16 %v1473_v54, %v1472_v52  ;;  %v1681_v28 = vsel %vm883_vm2, %v7706_v51, 0.0  ;;  %v7773_v52 = vpack.c.b16 %v2368_v11, %v2368_v11 }
 0x458   : > { %1682 = vadd.xlane.f32.xlu0 %v1681_v28 }
 0x459   : > { %6207 = vmatmul.msk.bf16.vlgmr.msra.gmra.mxu0 %vm858_vm1, %v1474_v53 }
 0x45a   : > { %2090 = vmax.xlane.f32.xlu2 %v2089_v40  ;;  %v1674_v55 = vpop.xlane.xlu1 %1673 }
 0x45b   : > { %v1676_v56 = vsub.f32 %v7660_v4, %v1674_v55 }
 0x45d   : > { %v1679_v1 = vmul.f32 1.442695, %v1676_v56 }
 0x45f   : > { %6829 = vpow2.f32 %v1679_v1 }
 0x463   : > { %v1811_v58 = vpop.xlane.xlu0 %1810 }
 0x464   : > { %v1815_v59 = vsub.f32 %v7664_v57, %v1811_v58 }
 0x465   : > { %v7717_v61 = vpop.eup %6829 }
 0x466   : > { %v1817_v63 = vmul.f32 1.442695, %v1815_v59  ;;  %v1684_v0 = vsel %vm883_vm2, %v7717_v61, 0.0 }
 0x467   : > { %1685 = vadd.xlane.f32.xlu2 %v1684_v0 }
 0x468   : > { %6831 = vpow2.f32 %v1817_v63 }
 0x46b   : > { %v1951_v2 = vpop.xlane.xlu1 %1950 }
 0x46c   : > { %v1955_v5 = vsub.f32 %v7669_v12, %v1951_v2 }
 0x46e   : > { %v1957_v6 = vmul.f32 1.442695, %v1955_v5  ;;  %v7722_v8 = vpop.eup %6831 }
 0x46f   : > { %v1821_v4 = vsel %vm883_vm2, %v7722_v8, 0.0 }
 0x470   : > { %6833 = vpow2.f32 %v1957_v6  ;;  %1822 = vadd.xlane.f32.xlu0 %v1821_v4 }
 0x476   : > { %v7726_v57 = vpop.eup %6833 }
 0x477   : > { %v1961_v9 = vsel %vm883_vm2, %v7726_v57, 0.0 }
 0x478   : > { %1962 = vadd.xlane.f32.xlu2 %v1961_v9 }
 0x47a   : > { %v1954_v13 = vpop.xlane.xlu0 %1953 }
 0x47b   : > { %v1956_v15 = vsub.f32 %v7673_v22, %v1954_v13 }
 0x47d   : > { %v1959_v17 = vmul.f32 1.442695, %v1956_v15 }
 0x47f   : > { %6835 = vpow2.f32 %v1959_v17 }
 0x485   : > { %v7731_v12 = vpop.eup %6835 }
 0x486   : > { %v1964_v18 = vsel %vm883_vm2, %v7731_v12, 0.0 }
 0x487   : > { %1965 = vadd.xlane.f32.xlu0 %v1964_v18 }
 0x48a   : > { %v2094_v23 = vpop.xlane.xlu1 %2093 }
 0x48b   : > { %v2096_v26 = vsub.f32 %v7679_v25, %v2094_v23 }
 0x48c   : > { %v1814_v19 = vpop.xlane.xlu2 %1813 }
 0x48d   : > { %v1816_v20 = vsub.f32 %v7677_v24, %v1814_v19  ;;  %v2099_v31 = vmul.f32 1.442695, %v2096_v26 }
 0x48f   : > { %v1819_v46 = vmul.f32 1.442695, %v1816_v20 }
 0x491   : > { %6837 = vpow2.f32 %v1819_v46 }
 0x492   : > { %6839 = vpow2.f32 %v2099_v31 }
 0x494   : > { %v1741_v45 = vpop.permute.xlu2 %1740 }
 0x495   : > { %v1746_v62 = vsel %vm984_vm3, %v1741_v45, 0 }
 0x496   : > { %1755 = vmatpush.bf16.msrb.mxu1 %v1746_v62 }
 0x497   : > { %v7737_v10 = vpop.eup %6837 }
 0x498   : > { %v1824_v22 = vsel %vm883_vm2, %v7737_v10, 0.0  ;;  %v7752_v33 = vpop.eup %6839 }
 0x499   : > { %1825 = vadd.xlane.f32.xlu1 %v1824_v22  ;;  %v2104_v25 = vsel %vm883_vm2, %v7752_v33, 0.0 }
 0x49b   : > { %1880 = vrot.lane.b32.xlu0 %v7537_v14, %s7159_s27 }
 0x4a2   : > { %v1860_v16 = vpop.permute.xlu1 %1859 }
 0x4a3   : > { %v1865_v24 = vsel %vm984_vm3, %v1860_v16, 0 }
 0x4a4   : > { %1874 = vmatpush.bf16.msra.mxu0 %v1865_v24 }
 0x4b2   : > { %1999 = vrot.lane.b32.xlu1 %v7526_v7, %s7160_s22 }
 0x4ba   : > { %2139 = vrot.lane.b32.xlu1 %v7526_v7, %s7161_s21 }
 0x4c2   : > { %2160 = vrot.lane.b32.xlu1 %v7537_v14, %s7161_s21 }
 0x4c5   : > { %2105 = vadd.xlane.f32.xlu0 %v2104_v25 }
 0x4ca   : > { %2346 = vrot.lane.b32.xlu1 %v7759_v35, %s9105_s30 }
 0x4cb   : > { %v1683_v38 = vpop.xlane.xlu0 %1682 }
 0x4cc   : > { %6841 = vrcp.f32 %v1683_v38  ;;  %v1698_v47 = vand.u32 2147483648, %v1683_v38  ;;  %v1696_v48 = vand.u32 2147483647, %v1683_v38  ;;  %vm1692_vm13 = vweird.f32 %v1683_v38 }
 0x4cd   : > { %v2091_v7 = vpop.xlane.xlu2 %2090 }
 0x4ce   : > { %v2095_v39 = vsub.f32 %v7702_v50, %v2091_v7  ;;  %v1699_v54 = vor.u32 1.1754944e-38, %v1698_v47  ;;  %vm1697_vm15 = vcmp.eq.f32.partialorder %v1696_v48, 8.507059e+37 }
 0x4d0   : > { %v2097_v3 = vmul.f32 1.442695, %v2095_v39 }
 0x4d2   : > { %v6842_v42 = vpop.eup %6841  ;;  %6843 = vpow2.f32 %v2097_v3  ;;  %2487 = vrot.lane.b32.xlu1 %v7759_v35, %s9140_s13 }
 0x4d3   : > { %v1688_v43 = vmul.f32 %v6842_v42, %v1683_v38  ;;  %vm1693_vm12 = vweird.f32 %v6842_v42 }
 0x4d4   : > { %vm1694_vm14 = vmor %vm1692_vm13, %vm1693_vm12 }
 0x4d5   : > { %v1689_v44 = vsub.f32 1.0, %v1688_v43 }
 0x4d7   : > { %v1690_v60 = vmul.f32 %v6842_v42, %v1689_v44 }
 0x4d8   : > { %v7769_v49 = vpop.eup %6843 }
 0x4d9   : > { %v1691_v21 = vadd.f32 %v6842_v42, %v1690_v60  ;;  %v2101_v50 = vsel %vm883_vm2, %v7769_v49, 0.0  ;;  %2508 = vrot.lane.b32.xlu0 %v7773_v52, %s9103_s5 }
 0x4da   : > { %2102 = vadd.xlane.f32.xlu2 %v2101_v50  ;;  %2485 = vrot.lane.b32.xlu1 %v7759_v35, %s9103_s5  ;;  %v1686_v28 = vpop.xlane.xlu2 %1685  ;;  %s9148_s5 = smov 16  }
 0x4db   : > { %v1695_v53 = vsel %vm1694_vm14, %v6842_v42, %v1691_v21  ;;  %6845 = vrcp.f32 %v1686_v28  ;;  %v1713_v0 = vand.u32 2147483648, %v1686_v28  ;;  %v1711_v5 = vand.u32 2147483647, %v1686_v28 }
 0x4dc   : > { %v1700_v40 = vsel %vm1697_vm15, %v1699_v54, %v1695_v53  ;;  %vm1707_vm4 = vweird.f32 %v1686_v28 }
 0x4dd   : > { %v1701_v55 = vmul.f32 %v7706_v51, %v1700_v40  ;;  %v1714_v51 = vor.u32 1.1754944e-38, %v1713_v0  ;;  %vm1712_vm6 = vcmp.eq.f32.partialorder %v1711_v5, 8.507059e+37 }
 0x4df   : > { %v1717_v56 = vpack.c.bf16 %v1701_v55, %v1701_v55 }
 0x4e1   : > { %6229 = vmatmul.msk.bf16.vlgmr.msrb.gmra.mxu0 %vm883_vm2, %v1717_v56  ;;  %v6846_v1 = vpop.eup %6845  ;;  %2790 = vrot.lane.b32.xlu0 %v7773_v52, %s9143_s16 }
 0x4e2   : > { %2650 = vrot.lane.b32.xlu1 %v7773_v52, %s9142_s4  ;;  %v1703_v58 = vmul.f32 %v6846_v1, %v1686_v28  ;;  %vm1708_vm0 = vweird.f32 %v6846_v1 }
 0x4e3   : > { %v1823_v59 = vpop.xlane.xlu0 %1822  ;;  %vm1709_vm5 = vmor %vm1707_vm4, %vm1708_vm0 }
 0x4e4   : > { %v1704_v63 = vsub.f32 1.0, %v1703_v58  ;;  %6847 = vrcp.f32 %v1823_v59  ;;  %v1838_v19 = vand.u32 2147483648, %v1823_v59  ;;  %v1836_v45 = vand.u32 2147483647, %v1823_v59 }
 0x4e5   : > { %vm1832_vm8 = vweird.f32 %v1823_v59 }
 0x4e6   : > { %v1705_v2 = vmul.f32 %v6846_v1, %v1704_v63  ;;  %v1839_v22 = vor.u32 1.1754944e-38, %v1838_v19  ;;  %vm1837_vm12 = vcmp.eq.f32.partialorder %v1836_v45, 8.507059e+37 }
 0x4e8   : > { %v1706_v6 = vadd.f32 %v6846_v1, %v1705_v2 }
 0x4ea   : > { %2648 = vrot.lane.b32.xlu1 %v7773_v52, %s9144_s23  ;;  %v6848_v4 = vpop.eup %6847  ;;  %v1710_v9 = vsel %vm1709_vm5, %v6846_v1, %v1706_v6 }
 0x4eb   : > { %v1828_v13 = vmul.f32 %v6848_v4, %v1823_v59  ;;  %v1715_v15 = vsel %vm1712_vm6, %v1714_v51, %v1710_v9  ;;  %vm1833_vm7 = vweird.f32 %v6848_v4  ;;  %v1963_v26 = vpop.xlane.xlu2 %1962 }
 0x4ec   : > { %v1716_v17 = vmul.f32 %v7717_v61, %v1715_v15  ;;  %vm1834_vm9 = vmor %vm1832_vm8, %vm1833_vm7  ;;  %6849 = vrcp.f32 %v1963_v26  ;;  %v1978_v43 = vand.u32 2147483648, %v1963_v26  ;;  %vm1972_vm0 = vweird.f32 %v1963_v26 }
 0x4ed   : > { %v1829_v18 = vsub.f32 1.0, %v1828_v13  ;;  %v1976_v11 = vand.u32 2147483647, %v1963_v26 }
 0x4ee   : > { %v1718_v20 = vpack.c.bf16 %v1716_v17, %v1716_v17  ;;  %v1979_v50 = vor.u32 1.1754944e-38, %v1978_v43  ;;  %v7824_v17 = vpop.f32.mrf.mxu0 }
 0x4ef   : > { %v1830_v46 = vmul.f32 %v6848_v4, %v1829_v18  ;;  %vm1977_vm7 = vcmp.eq.f32.partialorder %v1976_v11, 8.507059e+37 }
 0x4f0   : > { %6230 = vmatmul.msk.bf16.vlgmr.msrb.gmra.mxu1 %vm883_vm2, %v1718_v20 }
 0x4f1   : > { %v1831_v62 = vadd.f32 %v6848_v4, %v1830_v46 }
 0x4f2   : > { %2020 = vrot.lane.b32.xlu2 %v7537_v14, %s7160_s22  ;;  %2765 = vrot.lane.b32.xlu1 %v7759_v35, %s9141_s19  ;;  %v6850_v29 = vpop.eup %6849 }
 0x4f3   : > { %v1835_v23 = vsel %vm1834_vm9, %v6848_v4, %v1831_v62  ;;  %v1968_v31 = vmul.f32 %v6850_v29, %v1963_v26  ;;  %vm1973_vm14 = vweird.f32 %v6850_v29 }
 0x4f4   : > { %v1840_v61 = vsel %vm1837_vm12, %v1839_v22, %v1835_v23  ;;  %vm1974_vm5 = vmor %vm1972_vm0, %vm1973_vm14 }
 0x4f5   : > { %v1841_v16 = vmul.f32 %v7722_v8, %v1840_v61  ;;  %v1969_v34 = vsub.f32 1.0, %v1968_v31 }
 0x4f7   : > { %v1857_v24 = vpack.c.bf16 %v1841_v16, %v1841_v16  ;;  %v1970_v38 = vmul.f32 %v6850_v29, %v1969_v34 }
 0x4f9   : > { %6233 = vmatmul.msk.bf16.vlgmr.msra.gmra.mxu0 %vm883_vm2, %v1857_v24  ;;  %v1971_v42 = vadd.f32 %v6850_v29, %v1970_v38 }
 0x4fa   : > { %2370 = vrot.lane.b32.xlu2 %v7773_v52, %s9105_s30  ;;  %v7799_v14 = vpop.xlane.xlu0 %1965  ;;  %s9149_s30 = smov 24  }
 0x4fb   : > { %v1975_v48 = vsel %vm1974_vm5, %v6850_v29, %v1971_v42  ;;  %v1993_v13 = vand.u32 2147483648, %v7799_v14  ;;  %vm1987_vm9 = vweird.f32 %v7799_v14  ;;  %v1991_v15 = vand.u32 2147483647, %v7799_v14 }
 0x4fc   : > { %v1980_v28 = vsel %vm1977_vm7, %v1979_v50, %v1975_v48 }
 0x4fd   : > { %v1981_v40 = vmul.f32 %v7726_v57, %v1980_v28  ;;  %v1994_v46 = vor.u32 1.1754944e-38, %v1993_v13 }
 0x4ff   : > { %v1997_v1 = vpack.c.bf16 %v1981_v40, %v1981_v40  ;;  %v6558_v40 = vld [vmem:[%s7315_s14 + $0x18] sm:$0xff] }
 0x500   : > { %2236 = vmatpush.bf16.msra.mxu2 %v6558_v40 }
 0x502   : > { %2510 = vrot.lane.b32.xlu2 %v7773_v52, %s9140_s13 }
 0x50a   : > { %2627 = vrot.lane.b32.xlu2 %v7759_v35, %s9142_s4 }
 0x50c   : > { %v1826_v30 = vpop.xlane.xlu1 %1825 }
 0x50d   : > { %6851 = vrcp.f32 %v1826_v30  ;;  %v1881_v8 = vpop.permute.xlu0 %1880  ;;  %v1853_v36 = vand.u32 2147483648, %v1826_v30  ;;  %v1851_v3 = vand.u32 2147483647, %v1826_v30  ;;  %vm1847_vm15 = vweird.f32 %v1826_v30 }
 0x50e   : > { %v1886_v27 = vsel %vm984_vm3, %v1881_v8, 0  ;;  %6853 = vrcp.f32 %v7799_v14 }
 0x50f   : > { %1895 = vmatpush.bf16.msra.mxu1 %v1886_v27  ;;  %v1854_v47 = vor.u32 1.1754944e-38, %v1853_v36  ;;  %vm1852_vm6 = vcmp.eq.f32.partialorder %v1851_v3, 8.507059e+37 }
 0x512   : > { %2625 = vrot.lane.b32.xlu2 %v7759_v35, %s9144_s23 }
 0x513   : > { %v6852_v25 = vpop.eup %6851 }
 0x514   : > { %v1843_v37 = vmul.f32 %v6852_v25, %v1826_v30  ;;  %vm1848_vm13 = vweird.f32 %v6852_v25  ;;  %v6854_v63 = vpop.eup %6853 }
 0x515   : > { %vm1849_vm4 = vmor %vm1847_vm15, %vm1848_vm13  ;;  %v1983_v57 = vmul.f32 %v6854_v63, %v7799_v14  ;;  %vm1988_vm8 = vweird.f32 %v6854_v63  ;;  %vm1992_vm13 = vcmp.eq.f32.partialorder %v1991_v15, 8.507059e+37  ;;  %v7828_v14 = vpop.f32.mrf.mxu0 }
 0x516   : > { %v1844_v7 = vsub.f32 1.0, %v1843_v37  ;;  %vm1989_vm12 = vmor %vm1987_vm9, %vm1988_vm8 }
 0x517   : > { %v1984_v5 = vsub.f32 1.0, %v1983_v57 }
 0x518   : > { %v1845_v39 = vmul.f32 %v6852_v25, %v1844_v7 }
 0x519   : > { %v1985_v51 = vmul.f32 %v6854_v63, %v1984_v5 }
 0x51a   : > { %2767 = vrot.lane.b32.xlu2 %v7759_v35, %s9143_s16  ;;  %v1846_v44 = vadd.f32 %v6852_v25, %v1845_v39 }
 0x51b   : > { %v1986_v4 = vadd.f32 %v6854_v63, %v1985_v51 }
 0x51c   : > { %v1850_v60 = vsel %vm1849_vm4, %v6852_v25, %v1846_v44 }
 0x51d   : > { %v1855_v21 = vsel %vm1852_vm6, %v1854_v47, %v1850_v60  ;;  %v1990_v19 = vsel %vm1989_vm12, %v6854_v63, %v1986_v4 }
 0x51e   : > { %v1856_v54 = vmul.f32 %v7737_v10, %v1855_v21  ;;  %v1995_v45 = vsel %vm1992_vm13, %v1994_v46, %v1990_v19 }
 0x51f   : > { %v1996_v23 = vmul.f32 %v7731_v12, %v1995_v45 }
 0x520   : > { %v1858_v53 = vpack.c.bf16 %v1856_v54, %v1856_v54 }
 0x521   : > { %v1998_v8 = vpack.c.bf16 %v1996_v23, %v1996_v23 }
 0x522   : > { %2788 = vrot.lane.b32.xlu2 %v7773_v52, %s9141_s19  ;;  %6234 = vmatmul.msk.bf16.vlgmr.msra.gmra.mxu1 %vm883_vm2, %v1858_v53 }
 0x524   : > { %v2000_v55 = vpop.permute.xlu1 %1999 }
 0x525   : > { %v2005_v56 = vsel %vm984_vm3, %v2000_v55, 0 }
 0x526   : > { %2014 = vmatpush.bf16.msrb.mxu0 %v2005_v56 }
 0x529   : > { %6237 = vmatmul.msk.bf16.vlgmr.msrb.gmra.mxu0 %vm883_vm2, %v1997_v1 }
 0x52a   : > { %2443 = vrot.lane.b32.xlu2 %v7759_v35, %s7158_s15 }
 0x52c   : > { %v2140_v10 = vpop.permute.xlu1 %2139 }
 0x52d   : > { %v2145_v58 = vsel %vm984_vm3, %v2140_v10, 0  ;;  %v6557_v10 = vld [vmem:[%s7315_s14 + $0x10] sm:$0xff] }
 0x52e   : > { %2154 = vmatpush.bf16.msra.mxu0 %v2145_v58  ;;  %2237 = vmatpush.bf16.msra.mxu2 %v6557_v10 }
 0x534   : > { %v2161_v59 = vpop.permute.xlu1 %2160 }
 0x535   : > { %v2166_v29 = vsel %vm984_vm3, %v2161_v59, 0 }
 0x538   : > { %v2106_v6 = vpop.xlane.xlu0 %2105 }
 0x539   : > { %6855 = vrcp.f32 %v2106_v6  ;;  %v2133_v12 = vand.u32 2147483648, %v2106_v6  ;;  %vm2127_vm4 = vweird.f32 %v2106_v6  ;;  %v2131_v38 = vand.u32 2147483647, %v2106_v6 }
 0x53b   : > { %v2134_v11 = vor.u32 1.1754944e-38, %v2133_v12  ;;  %vm2132_vm8 = vcmp.eq.f32.partialorder %v2131_v38, 8.507059e+37 }
 0x53c   : > { %v2347_v0 = vpop.permute.xlu1 %2346 }
 0x53d   : > { %v2352_v2 = vsel %vm883_vm2, %v2347_v0, 0 }
 0x53e   : > { %2361 = vmatpush.bf16.xpose.msrb.mxu0 %v2352_v2 }
 0x53f   : > { %v6856_v9 = vpop.eup %6855 }
 0x540   : > { %v2123_v20 = vmul.f32 %v6856_v9, %v2106_v6  ;;  %vm2128_vm15 = vweird.f32 %v6856_v9 }
 0x541   : > { %vm7832_vm6 = vmor %vm2127_vm4, %vm2128_vm15 }
 0x542   : > { %v2124_v62 = vsub.f32 1.0, %v2123_v20 }
 0x544   : > { %v2125_v24 = vmul.f32 %v6856_v9, %v2124_v62  ;;  %v2488_v48 = vpop.permute.xlu1 %2487 }
 0x545   : > { %v2493_v21 = vsel %vm883_vm2, %v2488_v48, 0 }
 0x546   : > { %v2126_v25 = vadd.f32 %v6856_v9, %v2125_v24 }
 0x548   : > { %v2130_v42 = vsel %vm7832_vm6, %v6856_v9, %v2126_v25 }
 0x549   : > { %v2135_v54 = vsel %vm2132_vm8, %v2134_v11, %v2130_v42 }
 0x54a   : > { %v2136_v53 = vmul.f32 %v7752_v33, %v2135_v54 }
 0x54b   : > { %v2509_v6 = vpop.permute.xlu0 %2508 }
 0x54c   : > { %v2138_v56 = vpack.c.bf16 %v2136_v53, %v2136_v53  ;;  %v2486_v58 = vpop.permute.xlu1 %2485 }
 0x54d   : > { %v2103_v18 = vpop.xlane.xlu2 %2102 }
 0x54e   : > { %6857 = vrcp.f32 %v2103_v18  ;;  %v2118_v31 = vand.u32 2147483648, %v2103_v18  ;;  %v2116_v34 = vand.u32 2147483647, %v2103_v18  ;;  %vm2112_vm0 = vweird.f32 %v2103_v18 }
 0x550   : > { %v2119_v7 = vor.u32 1.1754944e-38, %v2118_v31  ;;  %vm2117_vm7 = vcmp.eq.f32.partialorder %v2116_v34, 8.507059e+37 }
 0x553   : > { %v2791_v13 = vpop.permute.xlu0 %2790 }
 0x554   : > { %v6858_v22 = vpop.eup %6857  ;;  %v2651_v2 = vpop.permute.xlu1 %2650  ;;  %v2796_v15 = vsel %vm883_vm2, %v2791_v13, 0 }
 0x555   : > { %v2108_v61 = vmul.f32 %v6858_v22, %v2103_v18  ;;  %v2021_v16 = vpop.permute.xlu2 %2020  ;;  %vm2113_vm14 = vweird.f32 %v6858_v22  ;;  %v2656_v5 = vsel %vm883_vm2, %v2651_v2, 0 }
 0x556   : > { %v2026_v26 = vsel %vm984_vm3, %v2021_v16, 0  ;;  %vm2114_vm5 = vmor %vm2112_vm0, %vm2113_vm14 }
 0x557   : > { %v2109_v30 = vsub.f32 1.0, %v2108_v61  ;;  %2035 = vmatpush.bf16.msrb.mxu1 %v2026_v26 }
 0x559   : > { %v2110_v27 = vmul.f32 %v6858_v22, %v2109_v30 }
 0x55a   : > { %6238 = vmatmul.msk.bf16.vlgmr.msrb.gmra.mxu1 %vm883_vm2, %v1998_v8 }
 0x55b   : > { %2175 = vmatpush.bf16.msra.mxu1 %v2166_v29  ;;  %v2111_v37 = vadd.f32 %v6858_v22, %v2110_v27 }
 0x55d   : > { %v2115_v39 = vsel %vm2114_vm5, %v6858_v22, %v2111_v37  ;;  %v2371_v3 = vpop.permute.xlu2 %2370 }
 0x55e   : > { %v2376_v43 = vsel %vm883_vm2, %v2371_v3, 0  ;;  %v2120_v44 = vsel %vm2117_vm7, %v2119_v7, %v2115_v39  ;;  %v7839_v47 = vpop.f32.mrf.mxu0 }
 0x55f   : > { %2385 = vmatpush.bf16.xpose.msrb.mxu1 %v2376_v43  ;;  %v2121_v60 = vmul.f32 %v7769_v49, %v2120_v44 }
 0x561   : > { %v2137_v50 = vpack.c.bf16 %v2121_v60, %v2121_v60 }
 0x563   : > { %6241 = vmatmul.msk.bf16.vlgmr.msra.gmra.mxu0 %vm883_vm2, %v2137_v50 }
 0x564   : > { %2502 = vmatpush.bf16.xpose.msra.mxu0 %v2493_v21 }
 0x565   : > { %v2511_v28 = vpop.permute.xlu2 %2510 }
 0x566   : > { %v1738_v55 = vpop.f32.mrf.mxu0  ;;  %v2516_v1 = vsel %vm883_vm2, %v2511_v28, 0 }
 0x56a   : > { %6242 = vmatmul.msk.bf16.vlgmr.msra.gmra.mxu1 %vm883_vm2, %v2138_v56 }
 0x56b   : > { %2525 = vmatpush.bf16.xpose.msra.mxu1 %v2516_v1 }
 0x56d   : > { %v2628_v49 = vpop.permute.xlu2 %2627  ;;  %v7849_v59 = vpop.f32.mrf.mxu1 }
 0x56e   : > { %v2633_v63 = vsel %vm883_vm2, %v2628_v49, 0 }
 0x573   : > { %6271 = vmatmul.msk.bf16.vlgmr.msrb.gmra.mxu0 %vm883_vm2, %v7750_v32 }
 0x574   : > { %2642 = vmatpush.bf16.xpose.msrb.mxu0 %v2633_v63 }
 0x575   : > { %v2626_v33 = vpop.permute.xlu2 %2625  ;;  %v1759_v0 = vpop.f32.mrf.mxu1 }
 0x576   : > { %v1876_v57 = vpop.f32.mrf.mxu0 }
 0x57a   : > { %6272 = vmatmul.msk.bf16.vlgmr.msrb.gmra.mxu1 %vm883_vm2, %v7764_v41  ;;  %v2649_v41 = vpop.permute.xlu1 %2648 }
 0x57b   : > { %2665 = vmatpush.bf16.xpose.msrb.mxu1 %v2656_v5 }
 0x57d   : > { %v2768_v51 = vpop.permute.xlu2 %2767 }
 0x57e   : > { %v1878_v4 = vpop.f32.mrf.mxu0  ;;  %v2773_v9 = vsel %vm883_vm2, %v2768_v51, 0 }
 0x582   : > { %v2766_v45 = vpop.permute.xlu1 %2765 }
 0x583   : > { %6275 = vmatmul.msk.bf16.vlgmr.msra.gmra.mxu0 %vm883_vm2, %v2486_v58 }
 0x584   : > { %2782 = vmatpush.bf16.xpose.msra.mxu0 %v2773_v9 }
 0x585   : > { %v2789_v32 = vpop.permute.xlu2 %2788 }
 0x58a   : > { %6276 = vmatmul.msk.bf16.vlgmr.msra.gmra.mxu1 %vm883_vm2, %v2509_v6 }
 0x58b   : > { %2805 = vmatpush.bf16.xpose.msra.mxu1 %v2796_v15 }
 0x58d   : > { %v2444_v18 = vpop.permute.xlu2 %2443 }
 0x58e   : > { %v2449_v19 = vsel %vm984_vm3, %v2444_v18, 0 }
 0x58f   : > { %2458 = vmatpush.bf16.msrb.mxu2 %v2449_v19 }
 0x593   : > { %6279 = vmatmul.msk.bf16.vlgmr.msrb.gmra.mxu0 %vm883_vm2, %v2626_v33 }
 0x59a   : > { %6280 = vmatmul.msk.bf16.vlgmr.msrb.gmra.mxu1 %vm883_vm2, %v2649_v41 }
 0x59f   : > { %v1897_v20 = vpop.f32.mrf.mxu1 }
 0x5a0   : > { %v6700_v46 = vpack.i.bf16 %v1897_v20, %v1876_v57 }
 0x5a2   : > { %6701 = vrot.lane.b32.xlu1 %v6700_v46, %s9147_s3 }
 0x5a3   : > { %6283 = vmatmul.msk.bf16.vlgmr.msra.gmra.mxu0 %vm883_vm2, %v2766_v45 }
 0x5a6   : > { %v2016_v62 = vpop.f32.mrf.mxu0 }
 0x5a7   : > { %v1899_v22 = vpop.f32.mrf.mxu1 }
 0x5aa   : > { %6284 = vmatmul.msk.bf16.vlgmr.msra.gmra.mxu1 %vm883_vm2, %v2789_v32 }
 0x5ae   : > { %v2018_v23 = vpop.f32.mrf.mxu0 }
 0x5d7   : > { %v2037_v61 = vpop.f32.mrf.mxu1 }
 0x5d8   : > { %v6705_v16 = vpack.i.bf16 %v2037_v61, %v2016_v62 }
 0x5da   : > { %6706 = vrot.lane.b32.xlu2 %v6705_v16, %s9148_s5 }
 0x5df   : > { %v2039_v24 = vpop.f32.mrf.mxu1 }
 0x5e0   : > { %v2156_v26 = vpop.f32.mrf.mxu0 }
 0x5e7   : > { %v2177_v29 = vpop.f32.mrf.mxu1 }
 0x5e8   : > { %v2158_v30 = vpop.f32.mrf.mxu0  ;;  %v6710_v42 = vpack.i.bf16 %v2177_v29, %v2156_v26 }
 0x5ef   : > { %v2179_v31 = vpop.f32.mrf.mxu1 }
 0x5f0   : > { %v2363_v8 = vpop.f32.mrf.mxu0 }
 0x5f1   : > { %v2391_v27 = vmul.f32 0.35355338, %v2363_v8 }
 0x5f3   : > { %v2393_v34 = vsel %vm883_vm2, %v2391_v27, -inf }
 0x5f4   : > { %2394 = vmax.xlane.f32.xlu0 %v2393_v34 }
 0x5f7   : > { %v2387_v25 = vpop.f32.mrf.mxu1 }
 0x5f8   : > { %v7869_v12 = vmul.f32 0.35355338, %v2387_v25  ;;  %v2365_v37 = vpop.f32.mrf.mxu0 }
 0x5fa   : > { %v2396_v38 = vsel %vm883_vm2, %v7869_v12, -inf }
 0x5fb   : > { %2397 = vmax.xlane.f32.xlu1 %v2396_v38 }
 0x5ff   : > { %v2389_v7 = vpop.f32.mrf.mxu1 }
 0x600   : > { %v2504_v36 = vpop.f32.mrf.mxu0 }
 0x601   : > { %v2531_v39 = vmul.f32 0.35355338, %v2504_v36 }
 0x603   : > { %v2533_v3 = vsel %vm883_vm2, %v2531_v39, -inf }
 0x604   : > { %2534 = vmax.xlane.f32.xlu2 %v2533_v3 }
 0x607   : > { %v2527_v43 = vpop.f32.mrf.mxu1 }
 0x608   : > { %6711 = vrot.lane.b32.xlu0 %v6710_v42, %s9149_s30  ;;  %v2506_v44 = vpop.f32.mrf.mxu0  ;;  %v2532_v58 = vmul.f32 0.35355338, %v2527_v43 }
 0x60a   : > { %v2536_v33 = vsel %vm883_vm2, %v2532_v58, -inf }
 0x60f   : > { %v2529_v11 = vpop.f32.mrf.mxu1 }
 0x610   : > { %v2644_v60 = vpop.f32.mrf.mxu0 }
 0x611   : > { %v7875_v48 = vmul.f32 0.35355338, %v2644_v60 }
 0x613   : > { %v2673_v21 = vsel %vm883_vm2, %v7875_v48, -inf }
 0x614   : > { %2674 = vmax.xlane.f32.xlu1 %v2673_v21  ;;  %v6702_v51 = vpop.permute.xlu1 %6701 }
 0x615   : > { %v6704_v13 = vunpack.i.h.bf16 %v6702_v51  ;;  %v6703_v15 = vunpack.i.l.bf16 %v6702_v51 }
 0x617   : > { %v2667_v50 = vpop.f32.mrf.mxu1  ;;  %v2206_v23 = vsel %vm883_vm2, %v7849_v59, %v6704_v13  ;;  %v2205_v61 = vsel %vm883_vm2, %v7839_v47, %v6703_v15 }
 0x618   : > { %v2672_v54 = vmul.f32 0.35355338, %v2667_v50  ;;  %v2646_v53 = vpop.f32.mrf.mxu0 }
 0x61a   : > { %v2676_v28 = vsel %vm883_vm2, %v2672_v54, -inf }
 0x61b   : > { %2677 = vmax.xlane.f32.xlu2 %v2676_v28 }
 0x61f   : > { %v2669_v40 = vpop.f32.mrf.mxu1 }
 0x620   : > { %v2784_v55 = vpop.f32.mrf.mxu0 }
 0x621   : > { %v7885_v0 = vmul.f32 0.35355338, %v2784_v55 }
 0x623   : > { %v2813_v57 = vsel %vm883_vm2, %v7885_v0, -inf }
 0x627   : > { %v2807_v56 = vpop.f32.mrf.mxu1 }
 0x628   : > { %v7880_v1 = vmul.f32 0.35355338, %v2807_v56  ;;  %v2786_v49 = vpop.f32.mrf.mxu0 }
 0x62a   : > { %v2816_v10 = vsel %vm883_vm2, %v7880_v1, -inf }
 0x62b   : > { %2817 = vmax.xlane.f32.xlu1 %v2816_v10 }
 0x62f   : > { %v2809_v63 = vpop.f32.mrf.mxu1 }
 0x632   : > { %2537 = vmax.xlane.f32.xlu0 %v2536_v33 }
 0x634   : > { %v6707_v4 = vpop.permute.xlu2 %6706 }
 0x635   : > { %v6709_v41 = vunpack.i.h.bf16 %v6707_v4  ;;  %v6708_v20 = vunpack.i.l.bf16 %v6707_v4 }
 0x637   : > { %v2208_v26 = vsel %vm1468_vm10, %v2206_v23, %v6709_v41  ;;  %v2207_v29 = vsel %vm1468_vm10, %v2205_v61, %v6708_v20  ;;  %v7952_v20 = vld [vmem:[%s7346_s10] ss:$0 sm:$0xff] }
 0x63a   : > { %2814 = vmax.xlane.f32.xlu0 %v2813_v57 }
 0x644   : > { %2583 = vrot.lane.b32.xlu1 %v7759_v35, %s7159_s27 }
 0x64e   : > { %2604 = vrot.lane.b32.xlu0 %v7773_v52, %s7159_s27 }
 0x667   : > { %v2395_v2 = vpop.xlane.xlu0 %2394 }
 0x668   : > { %v2399_v5 = vsub.f32 %v2391_v27, %v2395_v2 }
 0x66a   : > { %v2401_v6 = vmul.f32 1.442695, %v2399_v5 }
 0x66c   : > { %6859 = vpow2.f32 %v2401_v6 }
 0x66e   : > { %v2398_v18 = vpop.xlane.xlu1 %2397 }
 0x66f   : > { %v2400_v45 = vsub.f32 %v7869_v12, %v2398_v18 }
 0x671   : > { %v2403_v8 = vmul.f32 1.442695, %v2400_v45 }
 0x672   : > { %v7893_v9 = vpop.eup %6859 }
 0x673   : > { %v2405_v32 = vsel %vm883_vm2, %v7893_v9, 0.0 }
 0x674   : > { %2406 = vadd.xlane.f32.xlu2 %v2405_v32 }
 0x677   : > { %v2535_v19 = vpop.xlane.xlu2 %2534 }
 0x678   : > { %v2539_v46 = vsub.f32 %v2531_v39, %v2535_v19 }
 0x67a   : > { %v2541_v62 = vmul.f32 1.442695, %v2539_v46  ;;  %v6712_v22 = vpop.permute.xlu0 %6711 }
 0x67b   : > { %v6714_v16 = vunpack.i.h.bf16 %v6712_v22  ;;  %v6713_v24 = vunpack.i.l.bf16 %v6712_v22  ;;  %v1503_v22 = vadd.f32 %v7952_v20, %v7824_v17 }
 0x67c   : > { %6861 = vpow2.f32 %v2541_v62 }
 0x67d   : > { %v2210_v30 = vsel %vm1471_vm11, %v2208_v26, %v6714_v16  ;;  %v2209_v31 = vsel %vm1471_vm11, %v2207_v29, %v6713_v24  ;;  %6863 = vpow2.f32 %v2403_v8  ;;  %v7025_v26 = vld [vmem:[#allocation5] sm:$0xff] }
 0x67e   : > { %v2211_v27 = vpack.c.bf16 %v2210_v30, %v2209_v31  ;;  %v7958_v29 = vadd.f32 %v7025_v26, %v1503_v22 }
 0x680   : > { %6251 = vmatmul.msk.bf16.vlgmr.msra.gmra.mxu2 %vm858_vm1, %v2211_v27 }
 0x682   : > { %v7907_v34 = vpop.eup %6861 }
 0x683   : > { %v2545_v47 = vsel %vm883_vm2, %v7907_v34, 0.0  ;;  %v7911_v59 = vpop.eup %6863 }
 0x684   : > { %2546 = vadd.xlane.f32.xlu0 %v2545_v47  ;;  %v2408_v25 = vsel %vm883_vm2, %v7911_v59, 0.0 }
 0x687   : > { %v2675_v39 = vpop.xlane.xlu1 %2674 }
 0x688   : > { %v2679_v3 = vsub.f32 %v7875_v48, %v2675_v39 }
 0x68a   : > { %v2681_v44 = vmul.f32 1.442695, %v2679_v3 }
 0x68c   : > { %2464 = vrot.lane.b32.xlu2 %v7773_v52, %s7158_s15  ;;  %2409 = vadd.xlane.f32.xlu0 %v2408_v25  ;;  %s9150_s15 = smov 96  }
 0x68e   : > { %v2678_v12 = vpop.xlane.xlu2 %2677 }
 0x68f   : > { %v2680_v37 = vsub.f32 %v2672_v54, %v2678_v12 }
 0x691   : > { %v2683_v38 = vmul.f32 1.442695, %v2680_v37 }
 0x693   : > { %6865 = vpow2.f32 %v2683_v38 }
 0x699   : > { %v7917_v7 = vpop.eup %6865 }
 0x69a   : > { %v2688_v36 = vsel %vm883_vm2, %v7917_v7, 0.0 }
 0x69b   : > { %2689 = vadd.xlane.f32.xlu0 %v2688_v36 }
 0x69e   : > { %v2818_v21 = vpop.xlane.xlu1 %2817 }
 0x69f   : > { %v2820_v40 = vsub.f32 %v7880_v1, %v2818_v21 }
 0x6a1   : > { %v2823_v49 = vmul.f32 1.442695, %v2820_v40 }
 0x6a5   : > { %v2538_v42 = vpop.xlane.xlu0 %2537 }
 0x6a6   : > { %v2540_v43 = vsub.f32 %v2532_v58, %v2538_v42 }
 0x6a8   : > { %v2543_v11 = vmul.f32 1.442695, %v2540_v43 }
 0x6aa   : > { %6867 = vpow2.f32 %v2543_v11 }
 0x6ab   : > { %6869 = vpow2.f32 %v2681_v44 }
 0x6ad   : > { %v2815_v60 = vpop.xlane.xlu0 %2814 }
 0x6ae   : > { %v2819_v50 = vsub.f32 %v7885_v0, %v2815_v60 }
 0x6af   : > { %2744 = vrot.lane.b32.xlu0 %v7773_v52, %s7160_s22 }
 0x6b0   : > { %v7925_v54 = vpop.eup %6867  ;;  %v2821_v53 = vmul.f32 1.442695, %v2819_v50 }
 0x6b1   : > { %v7927_v28 = vpop.eup %6869  ;;  %v2548_v48 = vsel %vm883_vm2, %v7925_v54, 0.0 }
 0x6b2   : > { %2549 = vadd.xlane.f32.xlu1 %v2548_v48  ;;  %6871 = vpow2.f32 %v2821_v53  ;;  %v2685_v55 = vsel %vm883_vm2, %v7927_v28, 0.0 }
 0x6b3   : > { %6873 = vpow2.f32 %v2823_v49 }
 0x6b5   : > { %2686 = vadd.xlane.f32.xlu2 %v2685_v55 }
 0x6b6   : > { %v2584_v56 = vpop.permute.xlu1 %2583 }
 0x6b7   : > { %v2589_v10 = vsel %vm984_vm3, %v2584_v56, 0 }
 0x6b8   : > { %2598 = vmatpush.bf16.msra.mxu2 %v2589_v10  ;;  %v7935_v58 = vpop.eup %6871 }
 0x6b9   : > { %v2825_v63 = vsel %vm883_vm2, %v7935_v58, 0.0  ;;  %v7939_v33 = vpop.eup %6873 }
 0x6ba   : > { %v2828_v1 = vsel %vm883_vm2, %v7939_v33, 0.0 }
 0x6bd   : > { %2826 = vadd.xlane.f32.xlu2 %v2825_v63 }
 0x6c0   : > { %v2605_v2 = vpop.permute.xlu0 %2604 }
 0x6c1   : > { %v2610_v4 = vsel %vm984_vm3, %v2605_v2, 0 }
 0x6c5   : > { %2829 = vadd.xlane.f32.xlu2 %v2828_v1 }
 0x6cb   : > { %2723 = vrot.lane.b32.xlu1 %v7759_v35, %s7160_s22  ;;  %s9151_s22 = smov 120  }
 0x6d3   : > { %2884 = vrot.lane.b32.xlu1 %v7773_v52, %s7161_s21 }
 0x6dd   : > { %2863 = vrot.lane.b32.xlu2 %v7759_v35, %s7161_s21 }
 0x6e7   : > { %v2407_v0 = vpop.xlane.xlu2 %2406 }
 0x6e8   : > { %6875 = vrcp.f32 %v2407_v0  ;;  %v2422_v52 = vand.u32 2147483648, %v2407_v0  ;;  %v2420_v15 = vand.u32 2147483647, %v2407_v0  ;;  %vm2416_vm12 = vweird.f32 %v2407_v0 }
 0x6ea   : > { %v2423_v19 = vor.u32 1.1754944e-38, %v2422_v52  ;;  %vm2421_vm14 = vcmp.eq.f32.partialorder %v2420_v15, 8.507059e+37 }
 0x6ee   : > { %v6876_v57 = vpop.eup %6875 }
 0x6ef   : > { %v2412_v5 = vmul.f32 %v6876_v57, %v2407_v0  ;;  %v2465_v6 = vpop.permute.xlu2 %2464  ;;  %vm2417_vm9 = vweird.f32 %v6876_v57 }
 0x6f0   : > { %v2470_v51 = vsel %vm984_vm3, %v2465_v6, 0  ;;  %vm2418_vm13 = vmor %vm2416_vm12, %vm2417_vm9 }
 0x6f1   : > { %v2413_v32 = vsub.f32 1.0, %v2412_v5  ;;  %2479 = vmatpush.bf16.msra.mxu3 %v2470_v51 }
 0x6f3   : > { %v2414_v13 = vmul.f32 %v6876_v57, %v2413_v32 }
 0x6f5   : > { %2619 = vmatpush.bf16.msrb.mxu3 %v2610_v4  ;;  %v2415_v18 = vadd.f32 %v6876_v57, %v2414_v13 }
 0x6f7   : > { %v2419_v35 = vsel %vm2418_vm13, %v6876_v57, %v2415_v18  ;;  %v2547_v41 = vpop.xlane.xlu0 %2546 }
 0x6f8   : > { %6877 = vrcp.f32 %v2547_v41  ;;  %v2424_v46 = vsel %vm2421_vm14, %v2423_v19, %v2419_v35  ;;  %v2562_v30 = vand.u32 2147483648, %v2547_v41  ;;  %v2560_v8 = vand.u32 2147483647, %v2547_v41 }
 0x6f9   : > { %v2425_v45 = vmul.f32 %v7893_v9, %v2424_v46  ;;  %vm2556_vm0 = vweird.f32 %v2547_v41  ;;  %v1509_v9 = vsel %vm858_vm1, %v7958_v29, 0.0 }
 0x6fa   : > { %v2563_v47 = vor.u32 1.1754944e-38, %v2562_v30  ;;  %vm2561_vm5 = vcmp.eq.f32.partialorder %v2560_v8, 8.507059e+37 }
 0x6fb   : > { %v2441_v62 = vpack.c.bf16 %v2425_v45, %v2425_v45 }
 0x6fd   : > { %6273 = vmatmul.msk.bf16.vlgmr.msrb.gmra.mxu2 %vm883_vm2, %v2441_v62 }
 0x6fe   : > { %v6878_v23 = vpop.eup %6877 }
 0x6ff   : > { %v2552_v61 = vmul.f32 %v6878_v23, %v2547_v41  ;;  %v2410_v16 = vpop.xlane.xlu0 %2409  ;;  %vm2557_vm15 = vweird.f32 %v6878_v23 }
 0x700   : > { %6879 = vrcp.f32 %v2410_v16  ;;  %vm2558_vm4 = vmor %vm2556_vm0, %vm2557_vm15  ;;  %v2437_v39 = vand.u32 2147483648, %v2410_v16  ;;  %v2435_v42 = vand.u32 2147483647, %v2410_v16  ;;  %vm2431_vm7 = vweird.f32 %v2410_v16 }
 0x701   : > { %v2553_v24 = vsub.f32 1.0, %v2552_v61 }
 0x702   : > { %v2438_v11 = vor.u32 1.1754944e-38, %v2437_v39  ;;  %vm2436_vm9 = vcmp.eq.f32.partialorder %v2435_v42, 8.507059e+37 }
 0x703   : > { %v2554_v31 = vmul.f32 %v6878_v23, %v2553_v24 }
 0x705   : > { %v2555_v27 = vadd.f32 %v6878_v23, %v2554_v31 }
 0x706   : > { %v6880_v17 = vpop.eup %6879  ;;  %1510 = vadd.xlane.f32.xlu2 %v1509_v9 }
 0x707   : > { %v2559_v25 = vsel %vm2558_vm4, %v6878_v23, %v2555_v27  ;;  %v2427_v12 = vmul.f32 %v6880_v17, %v2410_v16  ;;  %vm2432_vm6 = vweird.f32 %v6880_v17 }
 0x708   : > { %v2564_v37 = vsel %vm2561_vm5, %v2563_v47, %v2559_v25  ;;  %vm2433_vm8 = vmor %vm2431_vm7, %vm2432_vm6 }
 0x709   : > { %v2428_v38 = vsub.f32 1.0, %v2427_v12  ;;  %v2565_v36 = vmul.f32 %v7907_v34, %v2564_v37 }
 0x70b   : > { %v2429_v3 = vmul.f32 %v6880_v17, %v2428_v38  ;;  %v2581_v43 = vpack.c.bf16 %v2565_v36, %v2565_v36 }
 0x70d   : > { %v2430_v44 = vadd.f32 %v6880_v17, %v2429_v3  ;;  %6277 = vmatmul.msk.bf16.vlgmr.msra.gmra.mxu2 %vm883_vm2, %v2581_v43 }
 0x70e   : > { %v7966_v34 = vpop.xlane.xlu0 %2689 }
 0x70f   : > { %v2434_v60 = vsel %vm2433_vm8, %v6880_v17, %v2430_v44  ;;  %6881 = vrcp.f32 %v7966_v34  ;;  %v2717_v27 = vand.u32 2147483648, %v7966_v34  ;;  %vm2711_vm8 = vweird.f32 %v7966_v34 }
 0x710   : > { %v2439_v21 = vsel %vm2436_vm9, %v2438_v11, %v2434_v60  ;;  %v2715_v17 = vand.u32 2147483647, %v7966_v34 }
 0x711   : > { %v2440_v50 = vmul.f32 %v7911_v59, %v2439_v21  ;;  %v2718_v3 = vor.u32 1.1754944e-38, %v2717_v27 }
 0x713   : > { %v2442_v53 = vpack.c.bf16 %v2440_v50, %v2440_v50 }
 0x715   : > { %6274 = vmatmul.msk.bf16.vlgmr.msra.gmra.mxu3 %vm883_vm2, %v2442_v53  ;;  %v7970_v49 = vpop.eup %6881 }
 0x716   : > { %v2707_v1 = vmul.f32 %v7970_v49, %v7966_v34  ;;  %vm2712_vm7 = vweird.f32 %v7970_v49 }
 0x717   : > { %vm2713_vm9 = vmor %vm2711_vm8, %vm2712_vm7 }
 0x718   : > { %v2708_v32 = vsub.f32 1.0, %v2707_v1 }
 0x71a   : > { %v2709_v22 = vmul.f32 %v7970_v49, %v2708_v32 }
 0x71c   : > { %v2710_v8 = vadd.f32 %v7970_v49, %v2709_v22 }
 0x71e   : > { %v2714_v37 = vsel %vm2713_vm9, %v7970_v49, %v2710_v8 }
 0x721   : > { %v2745_v48 = vpop.permute.xlu0 %2744 }
 0x722   : > { %v2750_v40 = vsel %vm984_vm3, %v2745_v48, 0 }
 0x723   : > { %2759 = vmatpush.bf16.msra.mxu3 %v2750_v40 }
 0x725   : > { %v2550_v55 = vpop.xlane.xlu1 %2549 }
 0x726   : > { %6883 = vrcp.f32 %v2550_v55  ;;  %v2577_v57 = vand.u32 2147483648, %v2550_v55  ;;  %v2575_v51 = vand.u32 2147483647, %v2550_v55  ;;  %vm2571_vm13 = vweird.f32 %v2550_v55 }
 0x728   : > { %v2687_v56 = vpop.xlane.xlu2 %2686  ;;  %v2578_v52 = vor.u32 1.1754944e-38, %v2577_v57  ;;  %vm2576_vm0 = vcmp.eq.f32.partialorder %v2575_v51, 8.507059e+37 }
 0x729   : > { %6885 = vrcp.f32 %v2687_v56  ;;  %v2702_v18 = vand.u32 2147483648, %v2687_v56  ;;  %v2700_v19 = vand.u32 2147483647, %v2687_v56  ;;  %vm2696_vm4 = vweird.f32 %v2687_v56 }
 0x72b   : > { %v2703_v61 = vor.u32 1.1754944e-38, %v2702_v18  ;;  %vm2701_vm6 = vcmp.eq.f32.partialorder %v2700_v19, 8.507059e+37 }
 0x72c   : > { %v6884_v10 = vpop.eup %6883 }
 0x72d   : > { %v2567_v63 = vmul.f32 %v6884_v10, %v2550_v55  ;;  %vm2572_vm12 = vweird.f32 %v6884_v10 }
 0x72e   : > { %vm2573_vm14 = vmor %vm2571_vm13, %vm2572_vm12  ;;  %vm2716_vm12 = vcmp.eq.f32.partialorder %v2715_v17, 8.507059e+37 }
 0x72f   : > { %v6886_v59 = vpop.eup %6885  ;;  %v2568_v0 = vsub.f32 1.0, %v2567_v63  ;;  %v2719_v43 = vsel %vm2716_vm12, %v2718_v3, %v2714_v37 }
 0x730   : > { %v2692_v2 = vmul.f32 %v6886_v59, %v2687_v56  ;;  %v7974_v5 = vpop.xlane.xlu2 %2826  ;;  %vm2697_vm15 = vweird.f32 %v6886_v59  ;;  %v2720_v50 = vmul.f32 %v7917_v7, %v2719_v43 }
 0x731   : > { %v2569_v6 = vmul.f32 %v6884_v10, %v2568_v0  ;;  %6887 = vrcp.f32 %v7974_v5  ;;  %vm2698_vm5 = vmor %vm2696_vm4, %vm2697_vm15  ;;  %v2842_v44 = vand.u32 2147483648, %v7974_v5  ;;  %v2840_v11 = vand.u32 2147483647, %v7974_v5 }
 0x732   : > { %v2693_v4 = vsub.f32 1.0, %v2692_v2  ;;  %v2722_v56 = vpack.c.bf16 %v2720_v50, %v2720_v50 }
 0x733   : > { %v2570_v13 = vadd.f32 %v6884_v10, %v2569_v6  ;;  %v2843_v48 = vor.u32 1.1754944e-38, %v2842_v44 }
 0x734   : > { %v2694_v15 = vmul.f32 %v6886_v59, %v2693_v4 }
 0x735   : > { %v2574_v35 = vsel %vm2573_vm14, %v6884_v10, %v2570_v13  ;;  %vm2836_vm14 = vweird.f32 %v7974_v5 }
 0x736   : > { %v2579_v41 = vsel %vm2576_vm0, %v2578_v52, %v2574_v35  ;;  %v2695_v46 = vadd.f32 %v6886_v59, %v2694_v15  ;;  %vm2841_vm0 = vcmp.eq.f32.partialorder %v2840_v11, 8.507059e+37 }
 0x737   : > { %v6888_v45 = vpop.eup %6887  ;;  %v2580_v62 = vmul.f32 %v7925_v54, %v2579_v41 }
 0x738   : > { %v2699_v23 = vsel %vm2698_vm5, %v6886_v59, %v2695_v46  ;;  %v2832_v16 = vmul.f32 %v6888_v45, %v7974_v5  ;;  %v2830_v24 = vpop.xlane.xlu2 %2829  ;;  %vm2837_vm13 = vweird.f32 %v6888_v45 }
 0x739   : > { %6889 = vrcp.f32 %v2830_v24  ;;  %v2582_v30 = vpack.c.bf16 %v2580_v62, %v2580_v62  ;;  %v2704_v31 = vsel %vm2701_vm6, %v2703_v61, %v2699_v23  ;;  %vm2838_vm15 = vmor %vm2836_vm14, %vm2837_vm13  ;;  %v2857_v63 = vand.u32 2147483648, %v2830_v24 }
 0x73a   : > { %v2833_v26 = vsub.f32 1.0, %v2832_v16  ;;  %v2705_v54 = vmul.f32 %v7927_v28, %v2704_v31  ;;  %vm2851_vm5 = vweird.f32 %v2830_v24  ;;  %v2855_v59 = vand.u32 2147483647, %v2830_v24  ;;  %v7026_v31 = vld [vmem:[%s9139_s11] sm:$0xff] }
 0x73b   : > { %6278 = vmatmul.msk.bf16.vlgmr.msrb.gmra.mxu3 %vm883_vm2, %v2582_v30  ;;  %v2858_v0 = vor.u32 1.1754944e-38, %v2857_v63 }
 0x73c   : > { %v2834_v47 = vmul.f32 %v6888_v45, %v2833_v26  ;;  %v2721_v39 = vpack.c.bf16 %v2705_v54, %v2705_v54  ;;  %vm2856_vm7 = vcmp.eq.f32.partialorder %v2855_v59, 8.507059e+37  ;;  %v8007_v26 = vld [vmem:[%s7346_s10 + $0x1] ss:$0 sm:$0xff]  ;;  %v1505_v54 = vadd.f32 %v7952_v20, %v7828_v14 }
 0x73d   : > { %v2724_v9 = vpop.permute.xlu1 %2723 }
 0x73e   : > { %v2729_v25 = vsel %vm984_vm3, %v2724_v9, 0  ;;  %v2835_v42 = vadd.f32 %v6888_v45, %v2834_v47  ;;  %v7027_v9 = vld [vmem:[#allocation5 + $0x8] sm:$0xff] }
 0x73f   : > { %v6890_v12 = vpop.eup %6889  ;;  %2738 = vmatpush.bf16.msrb.mxu2 %v2729_v25  ;;  %v1508_v17 = vadd.f32 %v7027_v9, %v1505_v54  ;;  %v6562_v25 = vld [vmem:[%s7315_s14 + $0x28] sm:$0xff] }
 0x740   : > { %v2847_v38 = vmul.f32 %v6890_v12, %v2830_v24  ;;  %v2864_v36 = vpop.permute.xlu2 %2863  ;;  %v2839_v53 = vsel %vm2838_vm15, %v6888_v45, %v2835_v42  ;;  %vm2852_vm4 = vweird.f32 %v6890_v12  ;;  %2960 = vmatpush.bf16.msrb.mxu0 %v6562_v25 }
 0x741   : > { %v2869_v28 = vsel %vm984_vm3, %v2864_v36, 0  ;;  %v2844_v55 = vsel %vm2841_vm0, %v2843_v48, %v2839_v53  ;;  %vm2853_vm6 = vmor %vm2851_vm5, %vm2852_vm4  ;;  %v1512_v47 = vsel %vm858_vm1, %v1508_v17, 0.0 }
 0x742   : > { %6281 = vmatmul.msk.bf16.vlgmr.msrb.gmra.mxu2 %vm883_vm2, %v2721_v39  ;;  %v2848_v60 = vsub.f32 1.0, %v2847_v38  ;;  %v2845_v49 = vmul.f32 %v7935_v58, %v2844_v55  ;;  %v2239_v58 = vpop.f32.mrf.mxu2 }
 0x743   : > { %2878 = vmatpush.bf16.msra.mxu2 %v2869_v28  ;;  %v2240_v30 = vadd.f32 %v8007_v26, %v2239_v58 }
 0x744   : > { %v2849_v40 = vmul.f32 %v6890_v12, %v2848_v60  ;;  %v2861_v7 = vpack.c.bf16 %v2845_v49, %v2845_v49 }
 0x745   : > { %v2885_v21 = vpop.permute.xlu1 %2884  ;;  %v2244_v8 = vadd.f32 %v7026_v31, %v2240_v30  ;;  %v6563_v30 = vld [vmem:[%s7336_s0 + $0x30] sm:$0xff] }
 0x746   : > { %v2890_v34 = vsel %vm984_vm3, %v2885_v21, 0  ;;  %v2850_v10 = vadd.f32 %v6890_v12, %v2849_v40 }
 0x747   : > { %2899 = vmatpush.bf16.msrb.mxu3 %v2890_v34  ;;  %v2246_v27 = vsel %vm858_vm1, %v2244_v8, 0.0  ;;  %v7165_v34 = vmov 32.0  }
 0x748   : > { %v2854_v1 = vsel %vm2853_vm6, %v6890_v12, %v2850_v10  ;;  %v6561_v12 = vld [vmem:[%s7315_s14 + $0x20] sm:$0xff]  ;;  %6891 = vrcp.f32 %v7165_v34 }
 0x749   : > { %v2859_v57 = vsel %vm2856_vm7, %v2858_v0, %v2854_v1  ;;  %2961 = vmatpush.bf16.msrb.mxu0 %v6561_v12  ;;  %v6780_v10 = vld [vmem:[%s7346_s10 + $0x2] ss:$0 sm:$0xff] }
 0x74a   : > { %v2860_v2 = vmul.f32 %v7939_v33, %v2859_v57  ;;  %v8001_v6 = vpop.f32.mrf.mxu2  ;;  %v7028_v57 = vld [vmem:[%s9139_s11 + $0x8] sm:$0xff] }
 0x74b   : > { %6282 = vmatmul.msk.bf16.vlgmr.msra.gmra.mxu3 %vm883_vm2, %v2722_v56  ;;  %v2242_v31 = vadd.f32 %v8007_v26, %v8001_v6  ;;  %v7030_v26 = vld [vmem:[%s9139_s11 + $0x18] sm:$0xff] }
 0x74c   : > { %v2862_v5 = vpack.c.bf16 %v2860_v2, %v2860_v2 }
 0x74e   : > { %v6892_v48 = vpop.eup %6891 }
 0x74f   : > { %v1516_v40 = vmul.f32 32.0, %v6892_v48  ;;  %vm1520_vm8 = vweird.f32 %v6892_v48 }
 0x751   : > { %v1517_v55 = vsub.f32 1.0, %v1516_v40 }
 0x752   : > { %6285 = vmatmul.msk.bf16.vlgmr.msra.gmra.mxu2 %vm883_vm2, %v2861_v7 }
 0x753   : > { %v1518_v56 = vmul.f32 %v6892_v48, %v1517_v55 }
 0x755   : > { %v1519_v49 = vadd.f32 %v6892_v48, %v1518_v56 }
 0x757   : > { %v8027_v59 = vsel %vm1520_vm8, %v6892_v48, %v1519_v49  ;;  %v8090_v49 = vld [vmem:[%s7341_s17 + $0x3] ss:$0 sm:$0xff] }
 0x75b   : > { %6286 = vmatmul.msk.bf16.vlgmr.msrb.gmra.mxu3 %vm883_vm2, %v2862_v5 }
 0x780   : > { %v2460_v51 = vpop.f32.mrf.mxu2 }
 0x788   : > { %v2462_v4 = vpop.f32.mrf.mxu2 }
 0x790   : > { %v2600_v32 = vpop.f32.mrf.mxu2 }
 0x798   : > { %v2481_v13 = vpop.f32.mrf.mxu3  ;;  %v2602_v52 = vpop.f32.mrf.mxu2 }
 0x7a0   : > { %v2483_v15 = vpop.f32.mrf.mxu3 }
 0x7be   : > { %v2621_v18 = vpop.f32.mrf.mxu3 }
 0x7bf   : > { %v6715_v35 = vpack.i.bf16 %v2621_v18, %v2600_v32 }
 0x7c1   : > { %6716 = vrot.lane.b32.xlu0 %v6715_v35, %s9147_s3 }
 0x7c5   : > { %v2740_v19 = vpop.f32.mrf.mxu2 }
 0x7c6   : > { %v2623_v41 = vpop.f32.mrf.mxu3 }
 0x7cd   : > { %v2742_v33 = vpop.f32.mrf.mxu2 }
 0x7ce   : > { %v2761_v46 = vpop.f32.mrf.mxu3 }
 0x7cf   : > { %v6720_v45 = vpack.i.bf16 %v2761_v46, %v2740_v19 }
 0x7d1   : > { %6721 = vrot.lane.b32.xlu1 %v6720_v45, %s9148_s5 }
 0x7d5   : > { %v2880_v62 = vpop.f32.mrf.mxu2 }
 0x7d6   : > { %v2763_v22 = vpop.f32.mrf.mxu3 }
 0x7d7   : > { %v6564_v22 = vld [vmem:[%s7336_s0 + $0x38] sm:$0xff] }
 0x7d8   : > { %3065 = vmatpush.bf16.msrb.mxu1 %v6564_v22 }
 0x7dc   : > { %3066 = vmatpush.bf16.msrb.mxu1 %v6563_v30 }
 0x7dd   : > { %v2882_v23 = vpop.f32.mrf.mxu2 }
 0x7de   : > { %v2901_v61 = vpop.f32.mrf.mxu3 }
 0x7df   : > { %v6725_v16 = vpack.i.bf16 %v2901_v61, %v2880_v62 }
 0x7e1   : > { %6726 = vrot.lane.b32.xlu0 %v6725_v16, %s9149_s30 }
 0x7e6   : > { %v2903_v24 = vpop.f32.mrf.mxu3 }
 0x7fb   : > { %2247 = vadd.xlane.f32.xlu1 %v2246_v27  ;;  %v7029_v27 = vld [vmem:[%s9139_s11 + $0x10] sm:$0xff] }
 0x7fc   : > { %v2245_v9 = vadd.f32 %v7029_v27, %v2242_v31 }
 0x803   : > { %1513 = vadd.xlane.f32.xlu1 %v1512_v47 }
 0x81c   : > { %3077 = vrot.lane.b32.xlu1 %v6564_v22, %s9150_s15 }
 0x824   : > { %3081 = vrot.lane.b32.xlu1 %v8090_v49, %s9150_s15 }
 0x833   : > { %v6717_v37 = vpop.permute.xlu0 %6716 }
 0x834   : > { %v6719_v36 = vunpack.i.h.bf16 %v6717_v37  ;;  %v6718_v39 = vunpack.i.l.bf16 %v6717_v37  ;;  %v2249_v37 = vsel %vm858_vm1, %v2245_v9, 0.0 }
 0x836   : > { %v2930_v14 = vsel %vm883_vm2, %v2481_v13, %v6719_v36  ;;  %v2929_v20 = vsel %vm883_vm2, %v2460_v51, %v6718_v39  ;;  %v1511_v51 = vpop.xlane.xlu2 %1510 }
 0x837   : > { %v1522_v4 = vmul.f32 %v8027_v59, %v1511_v51 }
 0x839   : > { %v8036_v13 = vsub.f32 %v7958_v29, %v1522_v4 }
 0x83b   : > { %v1526_v15 = vmul.f32 %v8036_v13, %v8036_v13 }
 0x83d   : > { %v1528_v18 = vsel %vm858_vm1, %v1526_v15, 0.0 }
 0x843   : > { %v6722_v38 = vpop.permute.xlu1 %6721 }
 0x844   : > { %v6724_v3 = vunpack.i.h.bf16 %v6722_v38  ;;  %v6723_v28 = vunpack.i.l.bf16 %v6722_v38 }
 0x846   : > { %v2931_v11 = vsel %vm1468_vm10, %v2929_v20, %v6723_v28  ;;  %v2932_v60 = vsel %vm1468_vm10, %v2930_v14, %v6724_v3  ;;  %v8071_v3 = vld [vmem:[%s7326_s28] ss:$0 sm:$0xff] }
 0x853   : > { %v6727_v42 = vpop.permute.xlu0 %6726 }
 0x854   : > { %v6729_v43 = vunpack.i.h.bf16 %v6727_v42  ;;  %v6728_v44 = vunpack.i.l.bf16 %v6727_v42  ;;  %v8074_v42 = vld [vmem:[%s7331_s25] ss:$0 sm:$0xff] }
 0x856   : > { %v2933_v21 = vsel %vm1471_vm11, %v2931_v11, %v6728_v44  ;;  %v2934_v50 = vsel %vm1471_vm11, %v2932_v60, %v6729_v43 }
 0x857   : > { %v2935_v53 = vpack.c.bf16 %v2934_v50, %v2933_v21 }
 0x859   : > { %6295 = vmatmul.msk.bf16.vlgmr.msrb.gmra.mxu0 %vm858_vm1, %v2935_v53 }
 0x86e   : > { %v2248_v63 = vpop.xlane.xlu1 %2247 }
 0x86f   : > { %v2252_v1 = vmul.f32 %v2248_v63, %v8027_v59 }
 0x871   : > { %v2254_v5 = vsub.f32 %v2244_v8, %v2252_v1 }
 0x873   : > { %v2256_v32 = vmul.f32 %v2254_v5, %v2254_v5 }
 0x875   : > { %v2258_v52 = vsel %vm858_vm1, %v2256_v32, 0.0 }
 0x876   : > { %v1514_v35 = vpop.xlane.xlu1 %1513 }
 0x877   : > { %v1523_v33 = vmul.f32 %v8027_v59, %v1514_v35 }
 0x879   : > { %v8048_v45 = vsub.f32 %v1508_v17, %v1523_v33 }
 0x87b   : > { %v1527_v24 = vmul.f32 %v8048_v45, %v8048_v45 }
 0x87d   : > { %v1531_v8 = vsel %vm858_vm1, %v1527_v24, 0.0 }
 0x88e   : > { %v3078_v53 = vpop.permute.xlu1 %3077 }
 0x88f   : > { %3096 = vmatpush.bf16.msrb.mxu2 %v3078_v53 }
 0x8d6   : > { %v2963_v7 = vpop.f32.mrf.mxu0 }
 0x8d7   : > { %v2964_v0 = vadd.f32 %v6780_v10, %v2963_v7 }
 0x8d9   : > { %v2968_v2 = vadd.f32 %v7028_v57, %v2964_v0 }
 0x8db   : > { %v2970_v58 = vsel %vm858_vm1, %v2968_v2, 0.0 }
 0x8dc   : > { %2971 = vadd.xlane.f32.xlu0 %v2970_v58 }
 0x8de   : > { %v2965_v17 = vpop.f32.mrf.mxu0 }
 0x8df   : > { %v2966_v12 = vadd.f32 %v6780_v10, %v2965_v17 }
 0x8e1   : > { %v8068_v36 = vadd.f32 %v7030_v26, %v2966_v12 }
 0x8e3   : > { %v2973_v20 = vsel %vm858_vm1, %v8068_v36, 0.0 }
 0x8e4   : > { %2259 = vadd.xlane.f32.xlu0 %v2258_v52 }
 0x8ec   : > { %1529 = vadd.xlane.f32.xlu0 %v1528_v18 }
 0x900   : > { %3075 = vrot.lane.b32.xlu0 %v6563_v30, %s9150_s15 }
 0x94f   : > { %v2972_v19 = vpop.xlane.xlu0 %2971 }
 0x950   : > { %v2976_v41 = vmul.f32 %v2972_v19, %v8027_v59 }
 0x952   : > { %v8044_v46 = vsub.f32 %v2968_v2, %v2976_v41 }
 0x954   : > { %v2980_v29 = vmul.f32 %v8044_v46, %v8044_v46 }
 0x956   : > { %v2982_v62 = vsel %vm858_vm1, %v2980_v29, 0.0 }
 0x957   : > { %v2260_v23 = vpop.xlane.xlu0 %2259  ;;  %2983 = vadd.xlane.f32.xlu2 %v2982_v62 }
 0x958   : > { %v2264_v61 = vmul.f32 %v2260_v23, %v8027_v59 }
 0x95a   : > { %v2266_v16 = vadd.f32 1e-05, %v2264_v61 }
 0x95c   : > { %6893 = vrsqrt.f32 %v2266_v16  ;;  %vm2274_vm12 = vweird.f32 %v2266_v16 }
 0x95f   : > { %1532 = vadd.xlane.f32.xlu2 %v1531_v8  ;;  %v1530_v11 = vpop.xlane.xlu0 %1529 }
 0x960   : > { %v1534_v60 = vmul.f32 %v1530_v11, %v8027_v59 }
 0x962   : > { %v6894_v54 = vpop.eup %6893  ;;  %v1536_v21 = vadd.f32 1e-05, %v1534_v60 }
 0x963   : > { %v2269_v47 = vmul.f32 %v6894_v54, %v2266_v16  ;;  %vm2275_vm9 = vweird.f32 %v6894_v54 }
 0x964   : > { %vm2276_vm13 = vmor %vm2274_vm12, %vm2275_vm9  ;;  %6895 = vrsqrt.f32 %v1536_v21  ;;  %vm1544_vm5 = vweird.f32 %v1536_v21 }
 0x965   : > { %v2270_v25 = vmul.f32 %v6894_v54, %v2269_v47 }
 0x967   : > { %v2271_v38 = vmul.f32 0.5, %v2270_v25  ;;  %2250 = vadd.xlane.f32.xlu2 %v2249_v37 }
 0x969   : > { %v2272_v6 = vsub.f32 1.5, %v2271_v38 }
 0x96a   : > { %v6896_v34 = vpop.eup %6895 }
 0x96b   : > { %v2273_v39 = vmul.f32 %v6894_v54, %v2272_v6  ;;  %v1539_v55 = vmul.f32 %v6896_v34, %v1536_v21  ;;  %vm1545_vm15 = vweird.f32 %v6896_v34 }
 0x96c   : > { %vm1546_vm6 = vmor %vm1544_vm5, %vm1545_vm15 }
 0x96d   : > { %v2277_v28 = vsel %vm2276_vm13, %v6894_v54, %v2273_v39  ;;  %v1540_v10 = vmul.f32 %v6896_v34, %v1539_v55 }
 0x96e   : > { %v2288_v14 = vmul.f32 %v2277_v28, %v2254_v5 }
 0x96f   : > { %2974 = vadd.xlane.f32.xlu2 %v2973_v20  ;;  %v1541_v57 = vmul.f32 0.5, %v1540_v10 }
 0x970   : > { %v2290_v43 = vmul.f32 %v8071_v3, %v2288_v14 }
 0x971   : > { %v1542_v58 = vsub.f32 1.5, %v1541_v57 }
 0x972   : > { %v8080_v44 = vadd.f32 %v8074_v42, %v2290_v43  ;;  %v3076_v56 = vpop.permute.xlu0 %3075 }
 0x973   : > { %3097 = vmatpush.bf16.msrb.mxu2 %v3076_v56  ;;  %v1543_v35 = vmul.f32 %v6896_v34, %v1542_v58 }
 0x974   : > { %3018 = vst.msk [vmem:[%s9139_s11] sm:$0xff] %vm858_vm1, %v8080_v44 }
 0x975   : > { %v1547_v61 = vsel %vm1546_vm6, %v6896_v34, %v1543_v35 }
 0x976   : > { %v1558_v54 = vmul.f32 %v1547_v61, %v8036_v13 }
 0x978   : > { %v1563_v25 = vmul.f32 %v8071_v3, %v1558_v54 }
 0x97a   : > { %v8119_v38 = vadd.f32 %v8074_v42, %v1563_v25 }
 0x97b   : > { %v3022_v26 = vld [vmem:[%s9139_s11] sm:$0xff] }
 0x9ca   : > { %v2984_v50 = vpop.xlane.xlu2 %2983 }
 0x9cb   : > { %v2988_v48 = vmul.f32 %v2984_v50, %v8027_v59 }
 0x9cd   : > { %v2990_v40 = vadd.f32 1e-05, %v2988_v48 }
 0x9cf   : > { %6897 = vrsqrt.f32 %v2990_v40  ;;  %vm2998_vm0 = vweird.f32 %v2990_v40 }
 0x9d2   : > { %v1533_v63 = vpop.xlane.xlu2 %1532 }
 0x9d3   : > { %v1535_v7 = vmul.f32 %v1533_v63, %v8027_v59 }
 0x9d5   : > { %v6898_v1 = vpop.eup %6897  ;;  %v1537_v0 = vadd.f32 1e-05, %v1535_v7 }
 0x9d6   : > { %v2993_v2 = vmul.f32 %v6898_v1, %v2990_v40  ;;  %vm2999_vm14 = vweird.f32 %v6898_v1 }
 0x9d7   : > { %6899 = vrsqrt.f32 %v1537_v0  ;;  %vm3000_vm4 = vmor %vm2998_vm0, %vm2999_vm14  ;;  %vm1554_vm8 = vweird.f32 %v1537_v0 }
 0x9d8   : > { %v2994_v5 = vmul.f32 %v6898_v1, %v2993_v2 }
 0x9da   : > { %v2995_v51 = vmul.f32 0.5, %v2994_v5  ;;  %v2251_v4 = vpop.xlane.xlu2 %2250 }
 0x9db   : > { %v2253_v32 = vmul.f32 %v2251_v4, %v8027_v59 }
 0x9dc   : > { %v2996_v52 = vsub.f32 1.5, %v2995_v51 }
 0x9dd   : > { %v6900_v15 = vpop.eup %6899  ;;  %v8096_v18 = vsub.f32 %v2245_v9, %v2253_v32 }
 0x9de   : > { %v2997_v19 = vmul.f32 %v6898_v1, %v2996_v52  ;;  %v1549_v41 = vmul.f32 %v6900_v15, %v1537_v0  ;;  %vm1555_vm7 = vweird.f32 %v6900_v15  ;;  %v3082_v52 = vpop.permute.xlu1 %3081 }
 0x9df   : > { %v2257_v33 = vmul.f32 %v8096_v18, %v8096_v18  ;;  %vm1556_vm9 = vmor %vm1554_vm8, %vm1555_vm7 }
 0x9e0   : > { %v3001_v29 = vsel %vm3000_vm4, %v6898_v1, %v2997_v19  ;;  %v1550_v62 = vmul.f32 %v6900_v15, %v1549_v41 }
 0x9e1   : > { %v3012_v22 = vmul.f32 %v3001_v29, %v8044_v46  ;;  %v2261_v23 = vsel %vm858_vm1, %v2257_v33, 0.0 }
 0x9e2   : > { %v1551_v16 = vmul.f32 0.5, %v1550_v62  ;;  %2262 = vadd.xlane.f32.xlu2 %v2261_v23  ;;  %v2975_v24 = vpop.xlane.xlu2 %2974 }
 0x9e3   : > { %v3014_v30 = vmul.f32 %v8071_v3, %v3012_v22  ;;  %v2977_v31 = vmul.f32 %v2975_v24, %v8027_v59 }
 0x9e4   : > { %v1552_v8 = vsub.f32 1.5, %v1551_v16 }
 0x9e5   : > { %v8106_v27 = vadd.f32 %v8074_v42, %v3014_v30  ;;  %v2979_v9 = vsub.f32 %v8068_v36, %v2977_v31 }
 0x9e6   : > { %v1553_v46 = vmul.f32 %v6900_v15, %v1552_v8 }
 0x9e7   : > { %3020 = vst.msk [vmem:[%s9139_s11 + $0x8] sm:$0xff] %vm858_vm1, %v8106_v27  ;;  %v2981_v17 = vmul.f32 %v2979_v9, %v2979_v9 }
 0x9e8   : > { %v1557_v47 = vsel %vm1556_vm9, %v6900_v15, %v1553_v46 }
 0x9e9   : > { %v1559_v13 = vmul.f32 %v1557_v47, %v8048_v45  ;;  %v2985_v12 = vsel %vm858_vm1, %v2981_v17, 0.0 }
 0x9ea   : > { %2986 = vadd.xlane.f32.xlu0 %v2985_v12 }
 0x9eb   : > { %v1564_v37 = vmul.f32 %v8071_v3, %v1559_v13 }
 0x9ed   : > { %v8122_v6 = vadd.f32 %v8074_v42, %v1564_v37 }
 0x9ee   : > { %v3023_v36 = vld [vmem:[%s9139_s11 + $0x8] sm:$0xff] }
 0x9ef   : > { %v3040_v45 = vpack.c.bf16 %v8122_v6, %v8119_v38  ;;  %v3073_v39 = vpack.c.bf16 %v3023_v36, %v3022_v26 }
 0x9f1   : > { %6314 = vmatmul.msk.bf16.vlgmr.msrb.gmra.mxu1 %vm858_vm1, %v3040_v45  ;;  %6315 = vmatmul.msk.bf16.vlgmr.msrb.gmra.mxu2 %vm858_vm1, %v3073_v39 }
 0xa55   : > { %v2263_v28 = vpop.xlane.xlu2 %2262 }
 0xa56   : > { %v2265_v14 = vmul.f32 %v2263_v28, %v8027_v59 }
 0xa58   : > { %v2267_v20 = vadd.f32 1e-05, %v2265_v14 }
 0xa5a   : > { %6901 = vrsqrt.f32 %v2267_v20  ;;  %vm2284_vm13 = vweird.f32 %v2267_v20 }
 0xa5d   : > { %v2987_v43 = vpop.xlane.xlu0 %2986 }
 0xa5e   : > { %v2989_v11 = vmul.f32 %v2987_v43, %v8027_v59 }
 0xa60   : > { %v6902_v60 = vpop.eup %6901  ;;  %v2991_v21 = vadd.f32 1e-05, %v2989_v11 }
 0xa61   : > { %v2279_v50 = vmul.f32 %v6902_v60, %v2267_v20  ;;  %vm2285_vm12 = vweird.f32 %v6902_v60 }
 0xa62   : > { %6903 = vrsqrt.f32 %v2991_v21  ;;  %vm2286_vm14 = vmor %vm2284_vm13, %vm2285_vm12  ;;  %vm3008_vm0 = vweird.f32 %v2991_v21 }
 0xa63   : > { %v2280_v53 = vmul.f32 %v6902_v60, %v2279_v50 }
 0xa65   : > { %v2281_v34 = vmul.f32 0.5, %v2280_v53 }
 0xa67   : > { %v2282_v48 = vsub.f32 1.5, %v2281_v34 }
 0xa68   : > { %v6904_v40 = vpop.eup %6903 }
 0xa69   : > { %v2283_v55 = vmul.f32 %v6902_v60, %v2282_v48  ;;  %v3003_v56 = vmul.f32 %v6904_v40, %v2991_v21  ;;  %vm3009_vm15 = vweird.f32 %v6904_v40 }
 0xa6a   : > { %vm3010_vm4 = vmor %vm3008_vm0, %vm3009_vm15 }
 0xa6b   : > { %v2287_v10 = vsel %vm2286_vm14, %v6902_v60, %v2283_v55  ;;  %v3004_v63 = vmul.f32 %v6904_v40, %v3003_v56 }
 0xa6c   : > { %v2289_v7 = vmul.f32 %v2287_v10, %v8096_v18 }
 0xa6d   : > { %v3005_v1 = vmul.f32 0.5, %v3004_v63 }
 0xa6e   : > { %v2291_v0 = vmul.f32 %v8071_v3, %v2289_v7  ;;  %v3068_v61 = vpop.f32.mrf.mxu1 }
 0xa6f   : > { %v3006_v57 = vsub.f32 1.5, %v3005_v1  ;;  %v3069_v24 = vadd.f32 %v8090_v49, %v3068_v61 }
 0xa70   : > { %v8139_v2 = vadd.f32 %v8074_v42, %v2291_v0 }
 0xa71   : > { %v3007_v5 = vmul.f32 %v6904_v40, %v3006_v57  ;;  %v3109_v30 = vpack.c.bf16 %v3069_v24, %v3069_v24 }
 0xa72   : > { %3019 = vst.msk [vmem:[%s9139_s11 + $0x10] sm:$0xff] %vm858_vm1, %v8139_v2 }
 0xa73   : > { %v3011_v58 = vsel %vm3010_vm4, %v6904_v40, %v3007_v5  ;;  %v3254_v60 = vunpack.c.l.b16 %v3109_v30 }
 0xa74   : > { %v3013_v51 = vmul.f32 %v3011_v58, %v2979_v9  ;;  %v3099_v4 = vpop.f32.mrf.mxu2 }
 0xa75   : > { %v3100_v18 = vadd.f32 %v3099_v4, %v3082_v52  ;;  %v3255_v50 = vpack.c.b16 %v3254_v60, %v3254_v60 }
 0xa76   : > { %v3015_v32 = vmul.f32 %v8071_v3, %v3013_v51  ;;  %v3070_v39 = vpop.f32.mrf.mxu1 }
 0xa77   : > { %v3111_v19 = vpack.c.bf16 %v3100_v18, %v3100_v18  ;;  %v3071_v43 = vadd.f32 %v8090_v49, %v3070_v39 }
 0xa78   : > { %v8148_v15 = vadd.f32 %v8074_v42, %v3015_v32 }
 0xa79   : > { %v3117_v29 = vunpack.c.l.b16 %v3111_v19  ;;  %v3024_v3 = vld [vmem:[%s9139_s11 + $0x10] sm:$0xff]  ;;  %v3110_v11 = vpack.c.bf16 %v3071_v43, %v3071_v43 }
 0xa7a   : > { %3021 = vst.msk [vmem:[%s9139_s11 + $0x18] sm:$0xff] %vm858_vm1, %v8148_v15 }
 0xa7b   : > { %v3280_v21 = vunpack.c.l.b16 %v3110_v11 }
 0xa7c   : > { %v3101_v35 = vpop.f32.mrf.mxu2 }
 0xa7d   : > { %v3102_v41 = vadd.f32 %v3101_v35, %v3082_v52  ;;  %v3281_v53 = vpack.c.b16 %v3280_v21, %v3280_v21 }
 0xa7f   : > { %v3112_v33 = vpack.c.bf16 %v3102_v41, %v3102_v41 }
 0xa81   : > { %v3118_v62 = vunpack.c.l.b16 %v3112_v33  ;;  %v3025_v42 = vld [vmem:[%s9139_s11 + $0x18] sm:$0xff] }
 0xa82   : > { %v3074_v22 = vpack.c.bf16 %v3025_v42, %v3024_v3 }
 0xa83   : > { %v8161_v23 = vpack.c.b16 %v3118_v62, %v3117_v29 }
 0xa84   : > { %6316 = vmatmul.msk.bf16.gmra.mxu2 %vm858_vm1, %v3074_v22 }
 0xa85   : > { %3215 = vrot.lane.b32.xlu2 %v8161_v23, %s9150_s15  ;;  %v3124_v16 = vsel %vm883_vm2, %v8161_v23, 0 }
 0xa86   : > { %3133 = vmatpush.bf16.xpose.msra.mxu3 %v3124_v16 }
 0xa8d   : > { %3258 = vrot.lane.b32.xlu2 %v8161_v23, %s9151_s22  ;;  %6317 = vmatmul.msk.bf16.vlgmr.msra.gmra.mxu3 %vm883_vm2, %v3109_v30 }
 0xadf   : > { %v3216_v31 = vpop.permute.xlu2 %3215 }
 0xae0   : > { %3228 = vmatpush.bf16.msra.mxu1 %v3216_v31 }
 0xae7   : > { %v3259_v36 = vpop.permute.xlu2 %3258 }
 0xae8   : > { %v3264_v20 = vsel %vm883_vm2, %v3259_v36, 0  ;;  %v3794_v36 = vpack.c.bf16 %v8139_v2, %v8080_v44 }
 0xb07   : > { %v3104_v8 = vpop.f32.mrf.mxu2 }
 0xb08   : > { %v3105_v54 = vadd.f32 %v3104_v8, %v3082_v52 }
 0xb0a   : > { %v3113_v46 = vpack.c.bf16 %v3105_v54, %v3105_v54 }
 0xb0c   : > { %v3141_v37 = vunpack.c.l.b16 %v3113_v46 }
 0xb0f   : > { %v3106_v9 = vpop.f32.mrf.mxu2 }
 0xb10   : > { %v3107_v17 = vadd.f32 %v3106_v9, %v3082_v52  ;;  %v3135_v47 = vpop.f32.mrf.mxu3 }
 0xb11   : > { %v3163_v25 = vmul.f32 0.35355338, %v3135_v47 }
 0xb12   : > { %v3114_v13 = vpack.c.bf16 %v3107_v17, %v3107_v17 }
 0xb13   : > { %v3165_v12 = vsel %vm1468_vm10, %v3163_v25, -inf }
 0xb14   : > { %v3142_v26 = vunpack.c.l.b16 %v3114_v13  ;;  %3166 = vmax.xlane.f32.xlu1 %v3165_v12  ;;  %v8214_v12 = vld [vmem:[%s7336_s0 + $0x48] sm:$0xff] }
 0xb16   : > { %v8173_v45 = vpack.c.b16 %v3142_v26, %v3141_v37  ;;  %v8219_v37 = vld [vmem:[%s7336_s0 + $0x40] sm:$0xff] }
 0xb18   : > { %3284 = vrot.lane.b32.xlu0 %v8173_v45, %s9151_s22  ;;  %v3137_v28 = vpop.f32.mrf.mxu3  ;;  %v3148_v14 = vsel %vm883_vm2, %v8173_v45, 0 }
 0xb19   : > { %3157 = vmatpush.bf16.xpose.msra.mxu0 %v3148_v14 }
 0xb20   : > { %3420 = vrot.lane.b32.xlu0 %v8173_v45, %s9144_s23  ;;  %6318 = vmatmul.msk.bf16.vlgmr.msra.gmra.mxu0 %vm883_vm2, %v3110_v11 }
 0xb21   : > { %3273 = vmatpush.bf16.xpose.msrb.mxu0 %v3264_v20 }
 0xb28   : > { %3533 = vrot.lane.b32.xlu0 %v8161_v23, %s9141_s19 }
 0xb2d   : > { %3256 = vrot.lane.b32.xlu1 %v3255_v50, %s9151_s22 }
 0xb30   : > { %3554 = vrot.lane.b32.xlu0 %v3281_v53, %s9141_s19 }
 0xb35   : > { %3418 = vrot.lane.b32.xlu1 %v3281_v53, %s9144_s23 }
 0xb3d   : > { %3531 = vrot.lane.b32.xlu1 %v3255_v50, %s9141_s19 }
 0xb87   : > { %v3167_v49 = vpop.xlane.xlu1 %3166 }
 0xb88   : > { %v3171_v34 = vsub.f32 %v3163_v25, %v3167_v49 }
 0xb8a   : > { %v3173_v48 = vmul.f32 1.442695, %v3171_v34  ;;  %v3285_v40 = vpop.permute.xlu0 %3284 }
 0xb8b   : > { %v3290_v55 = vsel %vm883_vm2, %v3285_v40, 0 }
 0xb8c   : > { %6905 = vpow2.f32 %v3173_v48  ;;  %3299 = vmatpush.bf16.xpose.msrb.mxu1 %v3290_v55 }
 0xb92   : > { %v6906_v56 = vpop.eup %6905  ;;  %v3421_v58 = vpop.permute.xlu0 %3420 }
 0xb93   : > { %v3177_v10 = vsel %vm1468_vm10, %v6906_v56, 0.0  ;;  %v3426_v30 = vsel %vm883_vm2, %v3421_v58, 0 }
 0xb94   : > { %3178 = vadd.xlane.f32.xlu2 %v3177_v10 }
 0xb9a   : > { %v3534_v33 = vpop.permute.xlu0 %3533 }
 0xb9b   : > { %v3539_v61 = vsel %vm883_vm2, %v3534_v33, 0 }
 0xb9d   : > { %v3159_v63 = vpop.f32.mrf.mxu0 }
 0xb9e   : > { %v3164_v0 = vmul.f32 0.35355338, %v3159_v63 }
 0xb9f   : > { %v3257_v7 = vpop.permute.xlu1 %3256 }
 0xba0   : > { %6321 = vmatmul.msk.bf16.vlgmr.msrb.gmra.mxu0 %vm883_vm2, %v3257_v7  ;;  %v3168_v57 = vsel %vm1468_vm10, %v3164_v0, -inf }
 0xba2   : > { %v3555_v26 = vpop.permute.xlu0 %3554 }
 0xba5   : > { %v3161_v1 = vpop.f32.mrf.mxu0 }
 0xba7   : > { %v3419_v46 = vpop.permute.xlu1 %3418 }
 0xbac   : > { %3282 = vrot.lane.b32.xlu2 %v3281_v53, %s9151_s22 }
 0xbaf   : > { %v3532_v13 = vpop.permute.xlu1 %3531 }
 0xbb4   : > { %3397 = vrot.lane.b32.xlu2 %v8161_v23, %s9144_s23 }
 0xbbc   : > { %3395 = vrot.lane.b32.xlu2 %v3255_v50, %s9144_s23 }
 0xbc4   : > { %3556 = vrot.lane.b32.xlu2 %v8173_v45, %s9141_s19 }
 0xbed   : > { %3169 = vmax.xlane.f32.xlu2 %v3168_v57 }
 0xc07   : > { %v3179_v5 = vpop.xlane.xlu2 %3178 }
 0xc08   : > { %6907 = vrcp.f32 %v3179_v5  ;;  %v3194_v18 = vand.u32 2147483648, %v3179_v5  ;;  %v3192_v19 = vand.u32 2147483647, %v3179_v5  ;;  %vm3188_vm6 = vweird.f32 %v3179_v5 }
 0xc0a   : > { %v3195_v29 = vor.u32 1.1754944e-38, %v3194_v18  ;;  %vm3193_vm8 = vcmp.eq.f32.partialorder %v3192_v19, 8.507059e+37 }
 0xc0e   : > { %v6908_v51 = vpop.eup %6907 }
 0xc0f   : > { %v3184_v4 = vmul.f32 %v6908_v51, %v3179_v5  ;;  %v3283_v32 = vpop.permute.xlu2 %3282  ;;  %vm3189_vm5 = vweird.f32 %v6908_v51 }
 0xc10   : > { %vm3190_vm7 = vmor %vm3188_vm6, %vm3189_vm5 }
 0xc11   : > { %v3185_v52 = vsub.f32 1.0, %v3184_v4 }
 0xc13   : > { %v3186_v35 = vmul.f32 %v6908_v51, %v3185_v52 }
 0xc15   : > { %v3187_v41 = vadd.f32 %v6908_v51, %v3186_v35 }
 0xc17   : > { %v3191_v62 = vsel %vm3190_vm7, %v6908_v51, %v3187_v41  ;;  %v3398_v3 = vpop.permute.xlu2 %3397 }
 0xc18   : > { %v3196_v42 = vsel %vm3193_vm8, %v3195_v29, %v3191_v62  ;;  %v3403_v22 = vsel %vm883_vm2, %v3398_v3, 0 }
 0xc19   : > { %v8202_v16 = vmul.f32 %v6906_v56, %v3196_v42  ;;  %3412 = vmatpush.bf16.xpose.msra.mxu0 %v3403_v22 }
 0xc1b   : > { %v3213_v24 = vpack.c.bf16 %v8202_v16, %v8202_v16 }
 0xc1d   : > { %6319 = vmatmul.msk.bf16.vlgmr.msra.gmra.mxu1 %vm1468_vm10, %v3213_v24  ;;  %v3275_v31 = vpop.f32.mrf.mxu0 }
 0xc1e   : > { %v3305_v8 = vmul.f32 0.35355338, %v3275_v31  ;;  %3435 = vmatpush.bf16.xpose.msra.mxu1 %v3426_v30 }
 0xc1f   : > { %v3396_v54 = vpop.permute.xlu2 %3395 }
 0xc20   : > { %6325 = vmatmul.msk.bf16.vlgmr.msra.gmra.mxu0 %vm883_vm2, %v3396_v54  ;;  %v3307_v9 = vsel %vm1468_vm10, %v3305_v8, -inf }
 0xc21   : > { %3548 = vmatpush.bf16.xpose.msrb.mxu0 %v3539_v61  ;;  %3308 = vmax.xlane.f32.xlu1 %v3307_v9 }
 0xc25   : > { %v3277_v17 = vpop.f32.mrf.mxu0 }
 0xc27   : > { %v3557_v47 = vpop.permute.xlu2 %3556 }
 0xc28   : > { %v3562_v25 = vsel %vm883_vm2, %v3557_v47, 0 }
 0xc2d   : > { %6322 = vmatmul.msk.bf16.vlgmr.msrb.gmra.mxu1 %vm883_vm2, %v3283_v32 }
 0xc2e   : > { %3571 = vmatpush.bf16.xpose.msrb.mxu1 %v3562_v25 }
 0xc30   : > { %6329 = vmatmul.msk.bf16.vlgmr.msrb.gmra.mxu0 %vm883_vm2, %v3532_v13 }
 0xc3d   : > { %6326 = vmatmul.msk.bf16.vlgmr.msra.gmra.mxu1 %vm883_vm2, %v3419_v46 }
 0xc3e   : > { %3819 = vmatpush.bf16.msra.mxu1 %v8214_v12 }
 0xc42   : > { %3820 = vmatpush.bf16.msra.mxu1 %v8219_v37 }
 0xc4d   : > { %6330 = vmatmul.msk.bf16.vlgmr.msrb.gmra.mxu1 %vm883_vm2, %v3555_v26 }
 0xc5d   : > { %6360 = vmatmul.msk.bf16.vlgmr.msra.gmra.mxu1 %vm858_vm1, %v3794_v36 }
 0xc60   : > { %v3170_v39 = vpop.xlane.xlu2 %3169 }
 0xc61   : > { %v3172_v28 = vsub.f32 %v3164_v0, %v3170_v39 }
 0xc63   : > { %v3175_v14 = vmul.f32 1.442695, %v3172_v28 }
 0xc65   : > { %6909 = vpow2.f32 %v3175_v14 }
 0xc6b   : > { %v8226_v20 = vpop.eup %6909 }
 0xc6c   : > { %v3180_v43 = vsel %vm1468_vm10, %v8226_v20, 0.0 }
 0xc6d   : > { %3181 = vadd.xlane.f32.xlu1 %v3180_v43 }
 0xc94   : > { %v3309_v34 = vpop.xlane.xlu1 %3308 }
 0xc95   : > { %v3313_v55 = vsub.f32 %v3305_v8, %v3309_v34 }
 0xc97   : > { %v3315_v63 = vmul.f32 1.442695, %v3313_v55 }
 0xc99   : > { %6911 = vpow2.f32 %v3315_v63 }
 0xc9a   : > { %v8230_v11 = vpop.f32.mrf.mxu1 }
 0xc9d   : > { %v3414_v60 = vpop.f32.mrf.mxu0 }
 0xc9e   : > { %v3441_v21 = vmul.f32 0.35355338, %v3414_v60 }
 0xc9f   : > { %v8237_v5 = vpop.eup %6911 }
 0xca0   : > { %v3443_v50 = vsel %vm1468_vm10, %v3441_v21, -inf  ;;  %v3319_v32 = vsel %vm1468_vm10, %v8237_v5, 0.0 }
 0xca1   : > { %3444 = vmax.xlane.f32.xlu2 %v3443_v50 }
 0xca2   : > { %v3232_v53 = vpop.f32.mrf.mxu1 }
 0xca5   : > { %v3416_v49 = vpop.f32.mrf.mxu0 }
 0xcaa   : > { %v3301_v48 = vpop.f32.mrf.mxu1 }
 0xcab   : > { %v3306_v40 = vmul.f32 0.35355338, %v3301_v48 }
 0xcad   : > { %v3550_v56 = vpop.f32.mrf.mxu0  ;;  %v3310_v10 = vsel %vm1468_vm10, %v3306_v40, -inf }
 0xcae   : > { %3311 = vmax.xlane.f32.xlu0 %v3310_v10  ;;  %v3577_v7 = vmul.f32 0.35355338, %v3550_v56 }
 0xcb0   : > { %v3579_v57 = vsel %vm1468_vm10, %v3577_v7, -inf }
 0xcb2   : > { %v3303_v1 = vpop.f32.mrf.mxu1 }
 0xcb5   : > { %v3552_v0 = vpop.f32.mrf.mxu0 }
 0xcb6   : > { %3580 = vmax.xlane.f32.xlu0 %v3579_v57 }
 0xcb9   : > { %3376 = vrot.lane.b32.xlu2 %v8173_v45, %s9140_s13 }
 0xcba   : > { %v3437_v58 = vpop.f32.mrf.mxu1 }
 0xcbb   : > { %v3442_v51 = vmul.f32 0.35355338, %v3437_v58 }
 0xcbd   : > { %v3446_v4 = vsel %vm1468_vm10, %v3442_v51, -inf }
 0xcbe   : > { %3447 = vmax.xlane.f32.xlu1 %v3446_v4  ;;  %3320 = vadd.xlane.f32.xlu0 %v3319_v32 }
 0xcc2   : > { %v3439_v52 = vpop.f32.mrf.mxu1 }
 0xcca   : > { %v3573_v18 = vpop.f32.mrf.mxu1 }
 0xccb   : > { %v3578_v19 = vmul.f32 0.35355338, %v3573_v18 }
 0xccd   : > { %v3582_v41 = vsel %vm1468_vm10, %v3578_v19, -inf }
 0xcd2   : > { %v3575_v35 = vpop.f32.mrf.mxu1 }
 0xcd7   : > { %3234 = vrot.lane.b32.xlu1 %v8173_v45, %s9150_s15 }
 0xce0   : > { %v3182_v30 = vpop.xlane.xlu1 %3181 }
 0xce1   : > { %vm3203_vm12 = vweird.f32 %v3182_v30  ;;  %v3207_v53 = vand.u32 2147483647, %v3182_v30 }
 0xce2   : > { %3583 = vmax.xlane.f32.xlu2 %v3582_v41 }
 0xce3   : > { %vm3208_vm14 = vcmp.eq.f32.partialorder %v3207_v53, 8.507059e+37 }
 0xd14   : > { %v3445_v33 = vpop.xlane.xlu2 %3444 }
 0xd15   : > { %v3449_v29 = vsub.f32 %v3441_v21, %v3445_v33  ;;  %v3209_v21 = vand.u32 2147483648, %v3182_v30 }
 0xd17   : > { %v3451_v62 = vmul.f32 1.442695, %v3449_v29  ;;  %v3210_v34 = vor.u32 1.1754944e-38, %v3209_v21 }
 0xd19   : > { %6913 = vpow2.f32 %v3451_v62 }
 0xd1c   : > { %v3377_v56 = vpop.permute.xlu2 %3376 }
 0xd1f   : > { %v8245_v3 = vpop.eup %6913 }
 0xd20   : > { %v3455_v42 = vsel %vm1468_vm10, %v8245_v3, 0.0 }
 0xd21   : > { %v3312_v22 = vpop.xlane.xlu0 %3311  ;;  %3456 = vadd.xlane.f32.xlu0 %v3455_v42 }
 0xd22   : > { %v3314_v61 = vsub.f32 %v3306_v40, %v3312_v22 }
 0xd24   : > { %v3317_v24 = vmul.f32 1.442695, %v3314_v61 }
 0xd26   : > { %6915 = vpow2.f32 %v3317_v24 }
 0xd27   : > { %6917 = vrcp.f32 %v3182_v30 }
 0xd29   : > { %v3581_v31 = vpop.xlane.xlu0 %3580 }
 0xd2a   : > { %v3585_v8 = vsub.f32 %v3577_v7, %v3581_v31 }
 0xd2c   : > { %v8249_v54 = vpop.eup %6915  ;;  %v3587_v9 = vmul.f32 1.442695, %v3585_v8 }
 0xd2d   : > { %v3322_v46 = vsel %vm1468_vm10, %v8249_v54, 0.0  ;;  %v6918_v17 = vpop.eup %6917 }
 0xd2e   : > { %6919 = vpow2.f32 %v3587_v9  ;;  %3323 = vadd.xlane.f32.xlu2 %v3322_v46  ;;  %v3199_v47 = vmul.f32 %v6918_v17, %v3182_v30  ;;  %vm3204_vm9 = vweird.f32 %v6918_v17 }
 0xd2f   : > { %vm3205_vm13 = vmor %vm3203_vm12, %vm3204_vm9 }
 0xd30   : > { %v3200_v36 = vsub.f32 1.0, %v3199_v47 }
 0xd31   : > { %v3448_v25 = vpop.xlane.xlu1 %3447  ;;  %v3321_v57 = vpop.xlane.xlu0 %3320 }
 0xd32   : > { %v3450_v13 = vsub.f32 %v3442_v51, %v3448_v25  ;;  %v3201_v14 = vmul.f32 %v6918_v17, %v3200_v36  ;;  %v3336_v35 = vand.u32 2147483648, %v3321_v57  ;;  %vm3330_vm0 = vweird.f32 %v3321_v57 }
 0xd34   : > { %v8253_v26 = vpop.eup %6919  ;;  %v3453_v39 = vmul.f32 1.442695, %v3450_v13  ;;  %v3202_v60 = vadd.f32 %v6918_v17, %v3201_v14 }
 0xd35   : > { %3357 = vrot.lane.b32.xlu0 %v8161_v23, %s9140_s13  ;;  %v3591_v28 = vsel %vm1468_vm10, %v8253_v26, 0.0 }
 0xd36   : > { %3592 = vadd.xlane.f32.xlu1 %v3591_v28  ;;  %6921 = vpow2.f32 %v3453_v39  ;;  %v3206_v49 = vsel %vm3205_vm13, %v6918_v17, %v3202_v60 }
 0xd37   : > { %v3211_v48 = vsel %vm3208_vm14, %v3210_v34, %v3206_v49 }
 0xd38   : > { %v8264_v40 = vmul.f32 %v8226_v20, %v3211_v48 }
 0xd3a   : > { %v3214_v10 = vpack.c.bf16 %v8264_v40, %v8264_v40 }
 0xd3c   : > { %v8259_v43 = vpop.eup %6921 }
 0xd3d   : > { %v3458_v50 = vsel %vm1468_vm10, %v8259_v43, 0.0 }
 0xd3e   : > { %3459 = vadd.xlane.f32.xlu2 %v3458_v50 }
 0xd49   : > { %v3235_v55 = vpop.permute.xlu1 %3234 }
 0xd4a   : > { %3247 = vmatpush.bf16.msrb.mxu3 %v3235_v55 }
 0xd4d   : > { %6320 = vmatmul.msk.bf16.vlgmr.msrb.gmra.mxu3 %vm1468_vm10, %v3214_v10 }
 0xd4e   : > { %3389 = vmatpush.bf16.msra.mxu3 %v3377_v56 }
 0xd55   : > { %v3584_v63 = vpop.xlane.xlu2 %3583 }
 0xd56   : > { %v3586_v7 = vsub.f32 %v3578_v19, %v3584_v63  ;;  %3493 = vrot.lane.b32.xlu2 %v8161_v23, %s9142_s4  ;;  %v3334_v19 = vand.u32 2147483647, %v3321_v57 }
 0xd58   : > { %v3589_v1 = vmul.f32 1.442695, %v3586_v7  ;;  %vm3335_vm5 = vcmp.eq.f32.partialorder %v3334_v19, 8.507059e+37 }
 0xd5a   : > { %6923 = vpow2.f32 %v3589_v1 }
 0xd5b   : > { %6925 = vrcp.f32 %v3321_v57 }
 0xd5e   : > { %3512 = vrot.lane.b32.xlu2 %v8173_v45, %s9142_s4 }
 0xd60   : > { %v8273_v20 = vpop.eup %6923 }
 0xd61   : > { %v3594_v0 = vsel %vm1468_vm10, %v8273_v20, 0.0  ;;  %v6926_v58 = vpop.eup %6925 }
 0xd62   : > { %3595 = vadd.xlane.f32.xlu0 %v3594_v0  ;;  %v3326_v51 = vmul.f32 %v6926_v58, %v3321_v57  ;;  %vm3331_vm15 = vweird.f32 %v6926_v58 }
 0xd63   : > { %vm3332_vm4 = vmor %vm3330_vm0, %vm3331_vm15 }
 0xd64   : > { %v3327_v4 = vsub.f32 1.0, %v3326_v51 }
 0xd66   : > { %3629 = vrot.lane.b32.xlu2 %v8161_v23, %s9143_s16  ;;  %v3328_v52 = vmul.f32 %v6926_v58, %v3327_v4  ;;  %v3337_v23 = vor.u32 1.1754944e-38, %v3336_v35 }
 0xd68   : > { %v3329_v18 = vadd.f32 %v6926_v58, %v3328_v52 }
 0xd6a   : > { %v3333_v33 = vsel %vm3332_vm4, %v6926_v58, %v3329_v18 }
 0xd6e   : > { %3648 = vrot.lane.b32.xlu2 %v8173_v45, %s9143_s16  ;;  %v3338_v45 = vsel %vm3335_vm5, %v3337_v23, %v3333_v33 }
 0xd6f   : > { %v8282_v42 = vmul.f32 %v8237_v5, %v3338_v45 }
 0xd71   : > { %v3355_v30 = vpack.c.bf16 %v8282_v42, %v8282_v42 }
 0xd94   : > { %v3457_v32 = vpop.xlane.xlu0 %3456 }
 0xd95   : > { %6927 = vrcp.f32 %v3457_v32  ;;  %v3472_v13 = vand.u32 2147483648, %v3457_v32  ;;  %vm3466_vm9 = vweird.f32 %v3457_v32  ;;  %v3470_v28 = vand.u32 2147483647, %v3457_v32 }
 0xd97   : > { %v3473_v34 = vor.u32 1.1754944e-38, %v3472_v13  ;;  %vm3471_vm15 = vcmp.eq.f32.partialorder %v3470_v28, 8.507059e+37 }
 0xd9b   : > { %v6928_v41 = vpop.eup %6927 }
 0xd9c   : > { %v3462_v62 = vmul.f32 %v6928_v41, %v3457_v32  ;;  %vm3467_vm7 = vweird.f32 %v6928_v41 }
 0xd9d   : > { %vm3468_vm13 = vmor %vm3466_vm9, %vm3467_vm7 }
 0xd9e   : > { %v3463_v22 = vsub.f32 1.0, %v3462_v62 }
 0xda0   : > { %v3464_v9 = vmul.f32 %v6928_v41, %v3463_v22 }
 0xda1   : > { %v3324_v29 = vpop.xlane.xlu2 %3323 }
 0xda2   : > { %6929 = vrcp.f32 %v3324_v29  ;;  %v3351_v17 = vand.u32 2147483648, %v3324_v29  ;;  %v3349_v5 = vand.u32 2147483647, %v3324_v29  ;;  %v3465_v25 = vadd.f32 %v6928_v41, %v3464_v9 }
 0xda3   : > { %vm3345_vm8 = vweird.f32 %v3324_v29 }
 0xda4   : > { %v3352_v14 = vor.u32 1.1754944e-38, %v3351_v17  ;;  %vm3350_vm14 = vcmp.eq.f32.partialorder %v3349_v5, 8.507059e+37  ;;  %v3469_v21 = vsel %vm3468_vm13, %v6928_v41, %v3465_v25 }
 0xda5   : > { %v3474_v55 = vsel %vm3471_vm15, %v3473_v34, %v3469_v21 }
 0xda6   : > { %v8298_v63 = vmul.f32 %v8245_v3, %v3474_v55 }
 0xda7   : > { %v3358_v61 = vpop.permute.xlu0 %3357 }
 0xda8   : > { %v6930_v24 = vpop.eup %6929  ;;  %3370 = vmatpush.bf16.msra.mxu2 %v3358_v61 }
 0xda9   : > { %v3341_v31 = vmul.f32 %v6930_v24, %v3324_v29  ;;  %v8286_v8 = vpop.xlane.xlu1 %3592  ;;  %vm3346_vm6 = vweird.f32 %v6930_v24 }
 0xdaa   : > { %6931 = vrcp.f32 %v8286_v8  ;;  %vm3347_vm12 = vmor %vm3345_vm8, %vm3346_vm6  ;;  %vm3602_vm5 = vweird.f32 %v8286_v8  ;;  %v3608_v3 = vand.u32 2147483648, %v8286_v8  ;;  %v3606_v35 = vand.u32 2147483647, %v8286_v8 }
 0xdab   : > { %v3342_v46 = vsub.f32 1.0, %v3341_v31  ;;  %6323 = vmatmul.msk.bf16.vlgmr.msra.gmra.mxu2 %vm1468_vm10, %v3355_v30 }
 0xdac   : > { %v3609_v45 = vor.u32 1.1754944e-38, %v3608_v3 }
 0xdad   : > { %v3343_v47 = vmul.f32 %v6930_v24, %v3342_v46 }
 0xdaf   : > { %v3344_v36 = vadd.f32 %v6930_v24, %v3343_v47 }
 0xdb0   : > { %v6932_v39 = vpop.eup %6931 }
 0xdb1   : > { %v3348_v60 = vsel %vm3347_vm12, %v6930_v24, %v3344_v36  ;;  %v3598_v53 = vmul.f32 %v6932_v39, %v8286_v8  ;;  %v3460_v49 = vpop.xlane.xlu2 %3459  ;;  %vm3603_vm0 = vweird.f32 %v6932_v39  ;;  %vm3607_vm12 = vcmp.eq.f32.partialorder %v3606_v35, 8.507059e+37 }
 0xdb2   : > { %v3353_v50 = vsel %vm3350_vm14, %v3352_v14, %v3348_v60  ;;  %6933 = vrcp.f32 %v3460_v49  ;;  %v3487_v51 = vand.u32 2147483648, %v3460_v49  ;;  %v3485_v52 = vand.u32 2147483647, %v3460_v49  ;;  %vm8305_vm6 = vmor %vm3602_vm5, %vm3603_vm0 }
 0xdb3   : > { %v8292_v48 = vmul.f32 %v8249_v54, %v3353_v50  ;;  %v3599_v10 = vsub.f32 1.0, %v3598_v53  ;;  %v3491_v54 = vpack.c.bf16 %v8298_v63, %v8298_v63  ;;  %vm3481_vm7 = vweird.f32 %v3460_v49 }
 0xdb4   : > { %v3488_v41 = vor.u32 1.1754944e-38, %v3487_v51  ;;  %vm3486_vm9 = vcmp.eq.f32.partialorder %v3485_v52, 8.507059e+37  ;;  %v6565_v52 = vld [vmem:[%s7315_s14 + $0x30] sm:$0xff] }
 0xdb5   : > { %v3356_v56 = vpack.c.bf16 %v8292_v48, %v8292_v48  ;;  %v3600_v1 = vmul.f32 %v6932_v39, %v3599_v10 }
 0xdb7   : > { %6324 = vmatmul.msk.bf16.vlgmr.msra.gmra.mxu3 %vm1468_vm10, %v3356_v56  ;;  %v3601_v4 = vadd.f32 %v6932_v39, %v3600_v1 }
 0xdb8   : > { %v6934_v7 = vpop.eup %6933 }
 0xdb9   : > { %v3477_v0 = vmul.f32 %v6934_v7, %v3460_v49  ;;  %v3494_v57 = vpop.permute.xlu2 %3493  ;;  %vm3482_vm4 = vweird.f32 %v6934_v7  ;;  %v3605_v33 = vsel %vm8305_vm6, %v6932_v39, %v3601_v4 }
 0xdba   : > { %3506 = vmatpush.bf16.msrb.mxu2 %v3494_v57  ;;  %vm3483_vm8 = vmor %vm3481_vm7, %vm3482_vm4  ;;  %v3610_v61 = vsel %vm3607_vm12, %v3609_v45, %v3605_v33 }
 0xdbb   : > { %v3478_v58 = vsub.f32 1.0, %v3477_v0  ;;  %v8318_v30 = vmul.f32 %v8253_v26, %v3610_v61 }
 0xdbd   : > { %v3479_v32 = vmul.f32 %v6934_v7, %v3478_v58  ;;  %6327 = vmatmul.msk.bf16.vlgmr.msrb.gmra.mxu2 %vm1468_vm10, %v3491_v54  ;;  %v3627_v8 = vpack.c.bf16 %v8318_v30, %v8318_v30 }
 0xdbf   : > { %v3480_v19 = vadd.f32 %v6934_v7, %v3479_v32  ;;  %v6566_v32 = vld [vmem:[%s7315_s14 + $0x38] sm:$0xff] }
 0xdc0   : > { %3722 = vmatpush.bf16.msra.mxu0 %v6566_v32 }
 0xdc1   : > { %v3484_v23 = vsel %vm3483_vm8, %v6934_v7, %v3480_v19  ;;  %v3513_v29 = vpop.permute.xlu2 %3512 }
 0xdc2   : > { %v3489_v62 = vsel %vm3486_vm9, %v3488_v41, %v3484_v23  ;;  %3525 = vmatpush.bf16.msrb.mxu3 %v3513_v29 }
 0xdc3   : > { %v8313_v22 = vmul.f32 %v8259_v43, %v3489_v62 }
 0xdc4   : > { %3723 = vmatpush.bf16.msra.mxu0 %v6565_v52 }
 0xdc5   : > { %v3492_v24 = vpack.c.bf16 %v8313_v22, %v8313_v22 }
 0xdc7   : > { %6328 = vmatmul.msk.bf16.vlgmr.msrb.gmra.mxu3 %vm1468_vm10, %v3492_v24 }
 0xdc9   : > { %v3630_v31 = vpop.permute.xlu2 %3629 }
 0xdca   : > { %3642 = vmatpush.bf16.msra.mxu2 %v3630_v31 }
 0xdcd   : > { %6331 = vmatmul.msk.bf16.vlgmr.msra.gmra.mxu2 %vm1468_vm10, %v3627_v8 }
 0xdd0   : > { %v3249_v9 = vpop.f32.mrf.mxu3 }
 0xdd1   : > { %v3649_v46 = vpop.permute.xlu2 %3648 }
 0xdd2   : > { %3661 = vmatpush.bf16.msra.mxu3 %v3649_v46 }
 0xdd5   : > { %v3596_v43 = vpop.xlane.xlu0 %3595 }
 0xdd6   : > { %6935 = vrcp.f32 %v3596_v43  ;;  %v3623_v26 = vand.u32 2147483648, %v3596_v43  ;;  %v3621_v36 = vand.u32 2147483647, %v3596_v43  ;;  %vm3617_vm14 = vweird.f32 %v3596_v43 }
 0xdd8   : > { %v3251_v17 = vpop.f32.mrf.mxu3  ;;  %v3624_v28 = vor.u32 1.1754944e-38, %v3623_v26  ;;  %vm3622_vm0 = vcmp.eq.f32.partialorder %v3621_v36, 8.507059e+37 }
 0xdd9   : > { %v6785_v17 = vld [vmem:[%s7346_s10 + $0x3] ss:$0 sm:$0xff] }
 0xddc   : > { %v6936_v47 = vpop.eup %6935 }
 0xddd   : > { %v3613_v5 = vmul.f32 %v6936_v47, %v3596_v43  ;;  %vm3618_vm13 = vweird.f32 %v6936_v47 }
 0xdde   : > { %vm3619_vm15 = vmor %vm3617_vm14, %vm3618_vm13 }
 0xddf   : > { %v3614_v25 = vsub.f32 1.0, %v3613_v5 }
 0xde1   : > { %v3615_v13 = vmul.f32 %v6936_v47, %v3614_v25 }
 0xde3   : > { %v3616_v39 = vadd.f32 %v6936_v47, %v3615_v13 }
 0xde5   : > { %v3620_v14 = vsel %vm3619_vm15, %v6936_v47, %v3616_v39 }
 0xde6   : > { %v3625_v60 = vsel %vm3622_vm0, %v3624_v28, %v3620_v14 }
 0xde7   : > { %v8325_v21 = vmul.f32 %v8273_v20, %v3625_v60 }
 0xde9   : > { %v3628_v50 = vpack.c.bf16 %v8325_v21, %v8325_v21 }
 0xdeb   : > { %6332 = vmatmul.msk.bf16.vlgmr.msra.gmra.mxu3 %vm1468_vm10, %v3628_v50 }
 0xe2e   : > { %v3372_v53 = vpop.f32.mrf.mxu2 }
 0xe36   : > { %v3374_v49 = vpop.f32.mrf.mxu2 }
 0xe3a   : > { %v3391_v34 = vpop.f32.mrf.mxu3 }
 0xe3b   : > { %v6730_v55 = vpack.i.bf16 %v3391_v34, %v3372_v53  ;;  %v3822_v34 = vpop.f32.mrf.mxu1 }
 0xe3d   : > { %6731 = vrot.lane.b32.xlu2 %v6730_v55, %s9147_s3 }
 0xe40   : > { %v3508_v56 = vpop.f32.mrf.mxu2 }
 0xe42   : > { %v3393_v10 = vpop.f32.mrf.mxu3 }
 0xe43   : > { %v6784_v10 = vld [vmem:[%s7341_s17 + $0x4] ss:$0 sm:$0xff] }
 0xe48   : > { %v3510_v7 = vpop.f32.mrf.mxu2 }
 0xe4a   : > { %v3527_v1 = vpop.f32.mrf.mxu3 }
 0xe4b   : > { %v6735_v0 = vpack.i.bf16 %v3527_v1, %v3508_v56  ;;  %v3824_v56 = vpop.f32.mrf.mxu1  ;;  %v3823_v1 = vadd.f32 %v6784_v10, %v3822_v34 }
 0xe4d   : > { %6736 = vrot.lane.b32.xlu1 %v6735_v0, %s9148_s5 }
 0xe50   : > { %v3644_v20 = vpop.f32.mrf.mxu2 }
 0xe52   : > { %v3529_v57 = vpop.f32.mrf.mxu3 }
 0xe58   : > { %v3646_v54 = vpop.f32.mrf.mxu2 }
 0xe6e   : > { %v3663_v58 = vpop.f32.mrf.mxu3 }
 0xe6f   : > { %v6740_v51 = vpack.i.bf16 %v3663_v58, %v3644_v20  ;;  %v8359_v20 = vpack.c.bf16 %v3823_v1, %v3823_v1 }
 0xe71   : > { %6741 = vrot.lane.b32.xlu0 %v6740_v51, %s9149_s30  ;;  %v3997_v54 = vunpack.c.l.b16 %v8359_v20 }
 0xe73   : > { %v8368_v58 = vpack.c.b16 %v3997_v54, %v3997_v54 }
 0xe76   : > { %v3665_v4 = vpop.f32.mrf.mxu3 }
 0xe97   : > { %v6732_v3 = vpop.permute.xlu2 %6731 }
 0xe98   : > { %v6734_v35 = vunpack.i.h.bf16 %v6732_v3  ;;  %v6733_v19 = vunpack.i.l.bf16 %v6732_v3 }
 0xe9a   : > { %v3692_v29 = vsel %vm883_vm2, %v3249_v9, %v6734_v35  ;;  %v3691_v45 = vsel %vm883_vm2, %v8230_v11, %v6733_v19 }
 0xebf   : > { %v6737_v18 = vpop.permute.xlu1 %6736 }
 0xec0   : > { %v6739_v41 = vunpack.i.h.bf16 %v6737_v18  ;;  %v6738_v33 = vunpack.i.l.bf16 %v6737_v18 }
 0xec2   : > { %v3694_v24 = vsel %vm1468_vm10, %v3692_v29, %v6739_v41  ;;  %v3693_v31 = vsel %vm1468_vm10, %v3691_v45, %v6738_v33 }
 0xee3   : > { %v6742_v23 = vpop.permute.xlu0 %6741 }
 0xee4   : > { %v6744_v62 = vunpack.i.h.bf16 %v6742_v23  ;;  %v6743_v61 = vunpack.i.l.bf16 %v6742_v23 }
 0xee6   : > { %v3696_v8 = vsel %vm1471_vm11, %v3694_v24, %v6744_v62  ;;  %v3695_v46 = vsel %vm1471_vm11, %v3693_v31, %v6743_v61 }
 0xee7   : > { %v3697_v43 = vpack.c.bf16 %v3696_v8, %v3695_v46 }
 0xee9   : > { %6341 = vmatmul.msk.bf16.vlgmr.msra.gmra.mxu0 %vm858_vm1, %v3697_v43 }
 0xf66   : > { %v3725_v47 = vpop.f32.mrf.mxu0 }
 0xf67   : > { %v3726_v5 = vadd.f32 %v6785_v17, %v3725_v47 }
 0xf69   : > { %v3730_v9 = vadd.f32 %v3726_v5, %v8119_v38  ;;  %v7031_v5 = vld [vmem:[%s7326_s28] ss:$0 sm:$0xff] }
 0xf6b   : > { %v3732_v11 = vsel %vm858_vm1, %v3730_v9, 0.0 }
 0xf6c   : > { %3733 = vadd.xlane.f32.xlu2 %v3732_v11 }
 0xf6e   : > { %v3727_v25 = vpop.f32.mrf.mxu0 }
 0xf6f   : > { %v3728_v26 = vadd.f32 %v6785_v17, %v3727_v25 }
 0xf71   : > { %v3731_v13 = vadd.f32 %v3728_v26, %v8122_v6  ;;  %v7032_v26 = vld [vmem:[%s7331_s25] ss:$0 sm:$0xff] }
 0xf73   : > { %v3735_v36 = vsel %vm858_vm1, %v3731_v13, 0.0 }
 0xf74   : > { %3736 = vadd.xlane.f32.xlu0 %v3735_v36 }
 0xf88   : > { %3828 = vrot.lane.b32.xlu0 %v8219_v37, %s9150_s15  ;;  %v3825_v37 = vadd.f32 %v6784_v10, %v3824_v56 }
 0xf8a   : > { %v8355_v7 = vpack.c.bf16 %v3825_v37, %v3825_v37 }
 0xf8c   : > { %v4023_v0 = vunpack.c.l.b16 %v8355_v7 }
 0xf8e   : > { %v8361_v57 = vpack.c.b16 %v4023_v0, %v4023_v0 }
 0xfdf   : > { %v3734_v39 = vpop.xlane.xlu2 %3733 }
 0xfe0   : > { %v3738_v28 = vmul.f32 %v3734_v39, %v8027_v59 }
 0xfe2   : > { %v3740_v14 = vsub.f32 %v3730_v9, %v3738_v28 }
 0xfe4   : > { %v3742_v60 = vmul.f32 %v3740_v14, %v3740_v14 }
 0xfe6   : > { %v3744_v38 = vsel %vm858_vm1, %v3742_v60, 0.0 }
 0xfe7   : > { %v3737_v50 = vpop.xlane.xlu0 %3736  ;;  %3745 = vadd.xlane.f32.xlu1 %v3744_v38 }
 0xfe8   : > { %v3739_v53 = vmul.f32 %v3737_v50, %v8027_v59 }
 0xfea   : > { %v3741_v49 = vsub.f32 %v3731_v13, %v3739_v53 }
 0xfec   : > { %v3743_v6 = vmul.f32 %v3741_v49, %v3741_v49 }
 0xfee   : > { %v3747_v55 = vsel %vm858_vm1, %v3743_v6, 0.0 }
 0xfef   : > { %3748 = vadd.xlane.f32.xlu2 %v3747_v55 }
 0xffa   : > { %v3829_v29 = vpop.permute.xlu0 %3828 }
0x1000   : > { %3834 = vrot.lane.b32.xlu1 %v6784_v10, %s9150_s15 }
0x1007   : > { %3830 = vrot.lane.b32.xlu2 %v8214_v12, %s9150_s15 }
0x1008   : > { %4025 = vrot.lane.b32.xlu1 %v8361_v57, %s9151_s22 }
0x1010   : > { %4142 = vrot.lane.b32.xlu1 %v8368_v58, %s9144_s23 }
0x105a   : > { %v3746_v51 = vpop.xlane.xlu1 %3745 }
0x105b   : > { %v3750_v4 = vmul.f32 %v3746_v51, %v8027_v59 }
0x105d   : > { %v3752_v32 = vadd.f32 1e-05, %v3750_v4 }
0x105f   : > { %6937 = vrsqrt.f32 %v3752_v32  ;;  %vm3760_vm5 = vweird.f32 %v3752_v32 }
0x1062   : > { %v3749_v52 = vpop.xlane.xlu2 %3748 }
0x1063   : > { %v3751_v3 = vmul.f32 %v3749_v52, %v8027_v59 }
0x1065   : > { %v6938_v18 = vpop.eup %6937  ;;  %v3753_v12 = vadd.f32 1e-05, %v3751_v3 }
0x1066   : > { %v3755_v35 = vmul.f32 %v6938_v18, %v3752_v32  ;;  %vm3761_vm4 = vweird.f32 %v6938_v18 }
0x1067   : > { %6939 = vrsqrt.f32 %v3753_v12  ;;  %vm3762_vm6 = vmor %vm3760_vm5, %vm3761_vm4  ;;  %vm3770_vm8 = vweird.f32 %v3753_v12 }
0x1068   : > { %v3756_v19 = vmul.f32 %v6938_v18, %v3755_v35 }
0x106a   : > { %v3757_v41 = vmul.f32 0.5, %v3756_v19  ;;  %v3831_v33 = vpop.permute.xlu2 %3830 }
0x106b   : > { %3846 = vmatpush.bf16.msrb.mxu2 %v3831_v33 }
0x106c   : > { %v3758_v23 = vsub.f32 1.5, %v3757_v41 }
0x106d   : > { %v6940_v45 = vpop.eup %6939 }
0x106e   : > { %v3759_v62 = vmul.f32 %v6938_v18, %v3758_v23  ;;  %v3765_v61 = vmul.f32 %v6940_v45, %v3753_v12  ;;  %vm3771_vm7 = vweird.f32 %v6940_v45 }
0x106f   : > { %3847 = vmatpush.bf16.msrb.mxu2 %v3829_v29  ;;  %vm3772_vm9 = vmor %vm3770_vm8, %vm3771_vm7 }
0x1070   : > { %v3766_v24 = vmul.f32 %v6940_v45, %v3765_v61  ;;  %v3763_v31 = vsel %vm3762_vm6, %v6938_v18, %v3759_v62 }
0x1071   : > { %v3774_v43 = vmul.f32 %v3763_v31, %v3740_v14 }
0x1072   : > { %v3767_v8 = vmul.f32 0.5, %v3766_v24  ;;  %v3835_v28 = vpop.permute.xlu1 %3834  ;;  %v8428_v24 = vld [vmem:[%s7336_s0 + $0x58] sm:$0xff] }
0x1073   : > { %v3776_v9 = vmul.f32 %v7031_v5, %v3774_v43 }
0x1074   : > { %v3768_v46 = vsub.f32 1.5, %v3767_v8  ;;  %v8433_v8 = vld [vmem:[%s7336_s0 + $0x50] sm:$0xff]  ;;  %s7166_s0 = smov (!%p6538_p1), 8  }
0x1075   : > { %v8376_v13 = vadd.f32 %v7032_v26, %v3776_v9 }
0x1076   : > { %v3769_v17 = vmul.f32 %v6940_v45, %v3768_v46 }
0x1078   : > { %v3773_v47 = vsel %vm3772_vm9, %v6940_v45, %v3769_v17  ;;  %v4549_v17 = vpack.c.bf16 %v8148_v15, %v8106_v27 }
0x1079   : > { %v3775_v11 = vmul.f32 %v3773_v47, %v3741_v49 }
0x107b   : > { %v3777_v25 = vmul.f32 %v7031_v5, %v3775_v11 }
0x107d   : > { %v8378_v36 = vadd.f32 %v7032_v26, %v3777_v25 }
0x107f   : > { %v8382_v39 = vpack.c.bf16 %v8378_v36, %v8376_v13 }
0x1081   : > { %6361 = vmatmul.msk.bf16.vlgmr.msrb.gmra.mxu2 %vm858_vm1, %v8382_v39 }
0x1104   : > { %v3849_v14 = vpop.f32.mrf.mxu2 }
0x1105   : > { %v3850_v60 = vadd.f32 %v3849_v14, %v3835_v28 }
0x1107   : > { %v3856_v38 = vpack.c.bf16 %v3850_v60, %v3850_v60 }
0x1109   : > { %v3862_v50 = vsel %vm883_vm2, %v3856_v38, 0  ;;  %v3949_v53 = vunpack.c.l.b16 %v3856_v38 }
0x110a   : > { %3871 = vmatpush.bf16.xpose.msrb.mxu3 %v3862_v50 }
0x110b   : > { %v8387_v49 = vpack.c.b16 %v3949_v53, %v3949_v53 }
0x110c   : > { %v3851_v6 = vpop.f32.mrf.mxu2 }
0x110d   : > { %v3852_v34 = vadd.f32 %v3851_v6, %v3835_v28  ;;  %4001 = vrot.lane.b32.xlu2 %v8387_v49, %s9151_s22 }
0x110f   : > { %v3857_v55 = vpack.c.bf16 %v3852_v34, %v3852_v34 }
0x1111   : > { %v3881_v56 = vsel %vm883_vm2, %v3857_v55, 0  ;;  %v3973_v10 = vunpack.c.l.b16 %v3857_v55  ;;  %6362 = vmatmul.msk.bf16.vlgmr.msrb.gmra.mxu3 %vm883_vm2, %v8359_v20  ;;  %v4026_v20 = vpop.permute.xlu1 %4025 }
0x1112   : > { %3890 = vmatpush.bf16.xpose.msrb.mxu0 %v3881_v56 }
0x1113   : > { %v8394_v37 = vpack.c.b16 %v3973_v10, %v3973_v10 }
0x1115   : > { %4307 = vrot.lane.b32.xlu1 %v8394_v37, %s9141_s19  ;;  %4027 = vrot.lane.b32.xlu0 %v8394_v37, %s9151_s22 }
0x1116   : > { %3999 = vrot.lane.b32.xlu2 %v8368_v58, %s9151_s22 }
0x1119   : > { %6363 = vmatmul.msk.bf16.vlgmr.msrb.gmra.mxu0 %vm883_vm2, %v8355_v7  ;;  %v4143_v51 = vpop.permute.xlu1 %4142 }
0x111d   : > { %4144 = vrot.lane.b32.xlu0 %v8387_v49, %s9144_s23 }
0x111e   : > { %4167 = vrot.lane.b32.xlu2 %v8394_v37, %s9144_s23 }
0x1125   : > { %4165 = vrot.lane.b32.xlu0 %v8361_v57, %s9144_s23 }
0x1126   : > { %4284 = vrot.lane.b32.xlu2 %v8387_v49, %s9141_s19 }
0x112d   : > { %4282 = vrot.lane.b32.xlu0 %v8368_v58, %s9141_s19 }
0x112e   : > { %4305 = vrot.lane.b32.xlu2 %v8361_v57, %s9141_s19 }
0x1167   : > { %v4002_v1 = vpop.permute.xlu2 %4001 }
0x1168   : > { %v4007_v7 = vsel %vm883_vm2, %v4002_v1, 0 }
0x1169   : > { %4016 = vmatpush.bf16.xpose.msra.mxu3 %v4007_v7 }
0x1170   : > { %v4000_v0 = vpop.permute.xlu2 %3999 }
0x1171   : > { %6366 = vmatmul.msk.bf16.vlgmr.msra.gmra.mxu3 %vm883_vm2, %v4000_v0 }
0x1178   : > { %v4168_v54 = vpop.permute.xlu2 %4167 }
0x1179   : > { %v4173_v52 = vsel %vm883_vm2, %v4168_v54, 0 }
0x1180   : > { %v4285_v3 = vpop.permute.xlu2 %4284 }
0x1181   : > { %v4290_v35 = vsel %vm883_vm2, %v4285_v3, 0 }
0x1187   : > { %v4028_v4 = vpop.permute.xlu0 %4027  ;;  %v4308_v58 = vpop.permute.xlu1 %4307 }
0x1188   : > { %v4033_v32 = vsel %vm883_vm2, %v4028_v4, 0  ;;  %v4313_v18 = vsel %vm883_vm2, %v4308_v58, 0  ;;  %v4306_v43 = vpop.permute.xlu2 %4305 }
0x1189   : > { %4042 = vmatpush.bf16.xpose.msra.mxu0 %v4033_v32 }
0x118f   : > { %v4145_v57 = vpop.permute.xlu0 %4144 }
0x1190   : > { %v4150_v12 = vsel %vm883_vm2, %v4145_v57, 0  ;;  %6367 = vmatmul.msk.bf16.vlgmr.msra.gmra.mxu0 %vm883_vm2, %v4026_v20 }
0x1191   : > { %4182 = vmatpush.bf16.xpose.msrb.mxu0 %v4173_v52  ;;  %4159 = vmatpush.bf16.xpose.msrb.mxu3 %v4150_v12 }
0x1194   : > { %v3873_v19 = vpop.f32.mrf.mxu3 }
0x1195   : > { %v3896_v41 = vmul.f32 0.35355338, %v3873_v19 }
0x1196   : > { %v3892_v33 = vpop.f32.mrf.mxu0 }
0x1197   : > { %v3897_v23 = vmul.f32 0.35355338, %v3892_v33  ;;  %v3898_v29 = vsel %vm883_vm2, %v3896_v41, -inf  ;;  %v4166_v61 = vpop.permute.xlu0 %4165 }
0x1198   : > { %6370 = vmatmul.msk.bf16.vlgmr.msrb.gmra.mxu3 %vm883_vm2, %v4143_v51  ;;  %3899 = vmax.xlane.f32.xlu0 %v3898_v29 }
0x1199   : > { %4322 = vmatpush.bf16.xpose.msra.mxu0 %v4313_v18  ;;  %4299 = vmatpush.bf16.xpose.msra.mxu3 %v4290_v35  ;;  %v3901_v45 = vsel %vm883_vm2, %v3897_v23, -inf }
0x119a   : > { %3902 = vmax.xlane.f32.xlu1 %v3901_v45 }
0x119c   : > { %v3875_v62 = vpop.f32.mrf.mxu3 }
0x119e   : > { %v3894_v31 = vpop.f32.mrf.mxu0 }
0x119f   : > { %v4283_v46 = vpop.permute.xlu0 %4282 }
0x11a0   : > { %6371 = vmatmul.msk.bf16.vlgmr.msrb.gmra.mxu0 %vm883_vm2, %v4166_v61 }
0x11a1   : > { %4574 = vmatpush.bf16.msrb.mxu0 %v8428_v24 }
0x11a5   : > { %4575 = vmatpush.bf16.msrb.mxu0 %v8433_v8 }
0x11a8   : > { %6374 = vmatmul.msk.bf16.vlgmr.msra.gmra.mxu3 %vm883_vm2, %v4283_v46 }
0x11b0   : > { %6375 = vmatmul.msk.bf16.vlgmr.msra.gmra.mxu0 %vm883_vm2, %v4306_v43 }
0x11c0   : > { %6405 = vmatmul.msk.bf16.vlgmr.msrb.gmra.mxu0 %vm858_vm1, %v4549_v17 }
0x11f4   : > { %v4018_v47 = vpop.f32.mrf.mxu3 }
0x11f5   : > { %v4048_v5 = vmul.f32 0.35355338, %v4018_v47 }
0x11f7   : > { %v4050_v9 = vsel %vm883_vm2, %v4048_v5, -inf }
0x11f8   : > { %4051 = vmax.xlane.f32.xlu1 %v4050_v9 }
0x11fc   : > { %v4020_v11 = vpop.f32.mrf.mxu3 }
0x120b   : > { %v3900_v25 = vpop.xlane.xlu0 %3899 }
0x120c   : > { %v3904_v26 = vsub.f32 %v3896_v41, %v3900_v25 }
0x120d   : > { %v3903_v28 = vpop.xlane.xlu1 %3902  ;;  %v4044_v14 = vpop.f32.mrf.mxu0 }
0x120e   : > { %v3906_v60 = vmul.f32 1.442695, %v3904_v26  ;;  %v3905_v38 = vsub.f32 %v3897_v23, %v3903_v28  ;;  %v4049_v50 = vmul.f32 0.35355338, %v4044_v14 }
0x1210   : > { %6941 = vpow2.f32 %v3906_v60  ;;  %v3908_v53 = vmul.f32 1.442695, %v3905_v38  ;;  %v4053_v6 = vsel %vm883_vm2, %v4049_v50, -inf }
0x1211   : > { %4054 = vmax.xlane.f32.xlu2 %v4053_v6 }
0x1212   : > { %6943 = vpow2.f32 %v3908_v53 }
0x1215   : > { %v4046_v34 = vpop.f32.mrf.mxu0 }
0x1216   : > { %v8443_v55 = vpop.eup %6941 }
0x1217   : > { %v3910_v56 = vsel %vm883_vm2, %v8443_v55, 0.0 }
0x1218   : > { %v8447_v10 = vpop.eup %6943  ;;  %3911 = vadd.xlane.f32.xlu1 %v3910_v56 }
0x1219   : > { %v3913_v1 = vsel %vm883_vm2, %v8447_v10, 0.0 }
0x121a   : > { %3914 = vadd.xlane.f32.xlu2 %v3913_v1 }
0x121b   : > { %v4161_v7 = vpop.f32.mrf.mxu3 }
0x121c   : > { %v8451_v0 = vmul.f32 0.35355338, %v4161_v7 }
0x121d   : > { %v4184_v20 = vpop.f32.mrf.mxu0 }
0x121e   : > { %v8453_v54 = vmul.f32 0.35355338, %v4184_v20  ;;  %v4190_v4 = vsel %vm883_vm2, %v8451_v0, -inf }
0x1220   : > { %v4193_v51 = vsel %vm883_vm2, %v8453_v54, -inf }
0x1221   : > { %4194 = vmax.xlane.f32.xlu0 %v4193_v51 }
0x1222   : > { %4191 = vmax.xlane.f32.xlu2 %v4190_v4 }
0x1223   : > { %v4163_v32 = vpop.f32.mrf.mxu3 }
0x1225   : > { %v4186_v52 = vpop.f32.mrf.mxu0 }
0x122b   : > { %v4301_v58 = vpop.f32.mrf.mxu3 }
0x122c   : > { %v8459_v3 = vmul.f32 0.35355338, %v4301_v58 }
0x122d   : > { %v4324_v57 = vpop.f32.mrf.mxu0 }
0x122e   : > { %v4329_v18 = vmul.f32 0.35355338, %v4324_v57  ;;  %v4330_v12 = vsel %vm883_vm2, %v8459_v3, -inf }
0x122f   : > { %4331 = vmax.xlane.f32.xlu0 %v4330_v12 }
0x1230   : > { %v4333_v35 = vsel %vm883_vm2, %v4329_v18, -inf }
0x1231   : > { %4334 = vmax.xlane.f32.xlu1 %v4333_v35 }
0x1233   : > { %v4303_v19 = vpop.f32.mrf.mxu3 }
0x1235   : > { %v4326_v41 = vpop.f32.mrf.mxu0 }
0x123a   : > { %4121 = vrot.lane.b32.xlu2 %v8394_v37, %s9140_s13 }
0x1243   : > { %3951 = vrot.lane.b32.xlu0 %v8387_v49, %s9150_s15 }
0x124a   : > { %3975 = vrot.lane.b32.xlu1 %v8394_v37, %s9150_s15 }
0x126b   : > { %v4052_v33 = vpop.xlane.xlu1 %4051 }
0x126c   : > { %v4056_v23 = vsub.f32 %v4048_v5, %v4052_v33 }
0x126e   : > { %v4058_v29 = vmul.f32 1.442695, %v4056_v23 }
0x1270   : > { %6945 = vpow2.f32 %v4058_v29 }
0x1276   : > { %v8470_v45 = vpop.eup %6945 }
0x1277   : > { %v4062_v62 = vsel %vm883_vm2, %v8470_v45, 0.0 }
0x1278   : > { %4063 = vadd.xlane.f32.xlu2 %v4062_v62 }
0x1284   : > { %v4055_v61 = vpop.xlane.xlu2 %4054 }
0x1285   : > { %v4057_v31 = vsub.f32 %v4049_v50, %v4055_v61 }
0x1287   : > { %v4060_v46 = vmul.f32 1.442695, %v4057_v31 }
0x1289   : > { %6947 = vpow2.f32 %v4060_v46 }
0x128b   : > { %v3912_v47 = vpop.xlane.xlu1 %3911 }
0x128c   : > { %6949 = vrcp.f32 %v3912_v47  ;;  %v3927_v56 = vand.u32 2147483648, %v3912_v47  ;;  %vm3921_vm13 = vweird.f32 %v3912_v47  ;;  %v3925_v1 = vand.u32 2147483647, %v3912_v47 }
0x128d   : > { %v3915_v5 = vpop.xlane.xlu2 %3914 }
0x128e   : > { %6951 = vrcp.f32 %v3915_v5  ;;  %v3928_v4 = vor.u32 1.1754944e-38, %v3927_v56  ;;  %vm3926_vm15 = vcmp.eq.f32.partialorder %v3925_v1, 8.507059e+37  ;;  %vm3936_vm4 = vweird.f32 %v3915_v5 }
0x128f   : > { %v8474_v43 = vpop.eup %6947  ;;  %v3940_v12 = vand.u32 2147483647, %v3915_v5 }
0x1290   : > { %4261 = vrot.lane.b32.xlu2 %v8394_v37, %s9142_s4  ;;  %v4065_v17 = vsel %vm883_vm2, %v8474_v43, 0.0 }
0x1291   : > { %4066 = vadd.xlane.f32.xlu0 %v4065_v17  ;;  %vm3941_vm6 = vcmp.eq.f32.partialorder %v3940_v12, 8.507059e+37 }
0x1292   : > { %v6950_v9 = vpop.eup %6949 }
0x1293   : > { %v3917_v11 = vmul.f32 %v6950_v9, %v3912_v47  ;;  %vm3922_vm12 = vweird.f32 %v6950_v9 }
0x1294   : > { %v6952_v25 = vpop.eup %6951  ;;  %v4195_v60 = vpop.xlane.xlu0 %4194  ;;  %vm3923_vm14 = vmor %vm3921_vm13, %vm3922_vm12 }
0x1295   : > { %v3918_v26 = vsub.f32 1.0, %v3917_v11  ;;  %v3932_v14 = vmul.f32 %v6952_v25, %v3915_v5  ;;  %vm3937_vm0 = vweird.f32 %v6952_v25  ;;  %v4192_v57 = vpop.xlane.xlu2 %4191  ;;  %v4197_v11 = vsub.f32 %v8453_v54, %v4195_v60 }
0x1296   : > { %vm3938_vm5 = vmor %vm3936_vm4, %vm3937_vm0  ;;  %v4196_v29 = vsub.f32 %v8451_v0, %v4192_v57 }
0x1297   : > { %v3919_v50 = vmul.f32 %v6950_v9, %v3918_v26  ;;  %v3933_v6 = vsub.f32 1.0, %v3932_v14 }
0x1298   : > { %4240 = vrot.lane.b32.xlu2 %v8387_v49, %s9142_s4 }
0x1299   : > { %v3920_v34 = vadd.f32 %v6950_v9, %v3919_v50 }
0x129b   : > { %v3924_v20 = vsel %vm3923_vm14, %v6950_v9, %v3920_v34 }
0x129c   : > { %v3929_v52 = vsel %vm3926_vm15, %v3928_v4, %v3924_v20 }
0x129d   : > { %v8491_v35 = vmul.f32 %v8443_v55, %v3929_v52  ;;  %v4198_v55 = vmul.f32 1.442695, %v4196_v29  ;;  %v4122_v46 = vpop.permute.xlu2 %4121 }
0x129e   : > { %v4127_v9 = vsel %vm984_vm3, %v4122_v46, 0 }
0x129f   : > { %v3946_v62 = vpack.c.bf16 %v8491_v35, %v8491_v35 }
0x12a0   : > { %4401 = vrot.lane.b32.xlu2 %v8394_v37, %s9143_s16  ;;  %v3934_v37 = vmul.f32 %v6952_v25, %v3933_v6 }
0x12a2   : > { %v4332_v7 = vpop.xlane.xlu0 %4331  ;;  %v3935_v58 = vadd.f32 %v6952_v25, %v3934_v37 }
0x12a3   : > { %v4336_v47 = vsub.f32 %v8459_v3, %v4332_v7 }
0x12a4   : > { %v4335_v28 = vpop.xlane.xlu1 %4334  ;;  %v3939_v19 = vsel %vm3938_vm5, %v6952_v25, %v3935_v58 }
0x12a5   : > { %v4337_v38 = vsub.f32 %v4329_v18, %v4335_v28  ;;  %4100 = vrot.lane.b32.xlu0 %v8387_v49, %s9140_s13  ;;  %v3942_v18 = vand.u32 2147483648, %v3915_v5  ;;  %v4338_v25 = vmul.f32 1.442695, %v4336_v47 }
0x12a7   : > { %v4340_v53 = vmul.f32 1.442695, %v4337_v38  ;;  %v3943_v33 = vor.u32 1.1754944e-38, %v3942_v18 }
0x12a9   : > { %6953 = vpow2.f32 %v4340_v53  ;;  %v3944_v61 = vsel %vm3941_vm6, %v3943_v33, %v3939_v19 }
0x12aa   : > { %v8499_v31 = vmul.f32 %v8447_v10, %v3944_v61  ;;  %6955 = vpow2.f32 %v4198_v55  ;;  %v4200_v10 = vmul.f32 1.442695, %v4197_v11 }
0x12ab   : > { %6957 = vpow2.f32 %v4338_v25 }
0x12ac   : > { %v3947_v0 = vpack.c.bf16 %v8499_v31, %v8499_v31  ;;  %6959 = vpow2.f32 %v4200_v10 }
0x12af   : > { %v8486_v51 = vpop.eup %6953 }
0x12b0   : > { %v4345_v32 = vsel %vm883_vm2, %v8486_v51, 0.0  ;;  %v8508_v26 = vpop.eup %6955 }
0x12b1   : > { %4346 = vadd.xlane.f32.xlu1 %v4345_v32  ;;  %v4202_v3 = vsel %vm883_vm2, %v8508_v26, 0.0  ;;  %v8514_v28 = vpop.eup %6957 }
0x12b2   : > { %v8516_v54 = vpop.eup %6959  ;;  %v4342_v14 = vsel %vm883_vm2, %v8514_v28, 0.0 }
0x12b3   : > { %v4205_v60 = vsel %vm883_vm2, %v8516_v54, 0.0 }
0x12b5   : > { %v3952_v41 = vpop.permute.xlu0 %3951 }
0x12b6   : > { %v3957_v23 = vsel %vm984_vm3, %v3952_v41, 0 }
0x12b7   : > { %3966 = vmatpush.bf16.msrb.mxu1 %v3957_v23 }
0x12ba   : > { %6364 = vmatmul.msk.bf16.vlgmr.msrb.gmra.mxu1 %vm883_vm2, %v3946_v62 }
0x12bc   : > { %v3976_v17 = vpop.permute.xlu1 %3975 }
0x12bd   : > { %v3981_v5 = vsel %vm984_vm3, %v3976_v17, 0 }
0x12be   : > { %3990 = vmatpush.bf16.msra.mxu2 %v3981_v5 }
0x12c1   : > { %6365 = vmatmul.msk.bf16.vlgmr.msra.gmra.mxu2 %vm883_vm2, %v3947_v0 }
0x12c2   : > { %4136 = vmatpush.bf16.msrb.mxu2 %v4127_v9 }
0x12c9   : > { %4203 = vadd.xlane.f32.xlu2 %v4202_v3 }
0x12ca   : > { %4584 = vrot.lane.b32.xlu1 %v8428_v24, %s9150_s15  ;;  %v8527_v24 = vld [vmem:[%s7341_s17 + $0x5] ss:$0 sm:$0xff] }
0x12cf   : > { %4343 = vadd.xlane.f32.xlu0 %v4342_v14 }
0x12d1   : > { %4206 = vadd.xlane.f32.xlu2 %v4205_v60 }
0x12e3   : > { %4582 = vrot.lane.b32.xlu0 %v8433_v8, %s9150_s15 }
0x12e9   : > { %4380 = vrot.lane.b32.xlu2 %v8387_v49, %s9143_s16 }
0x12eb   : > { %v4064_v38 = vpop.xlane.xlu2 %4063 }
0x12ec   : > { %6961 = vrcp.f32 %v4064_v38  ;;  %v4079_v20 = vand.u32 2147483648, %v4064_v38  ;;  %vm4073_vm8 = vweird.f32 %v4064_v38  ;;  %v4077_v32 = vand.u32 2147483647, %v4064_v38 }
0x12ee   : > { %v4080_v19 = vor.u32 1.1754944e-38, %v4079_v20  ;;  %vm4078_vm13 = vcmp.eq.f32.partialorder %v4077_v32, 8.507059e+37 }
0x12f1   : > { %4588 = vrot.lane.b32.xlu2 %v8527_v24, %s9150_s15 }
0x12f2   : > { %v6962_v6 = vpop.eup %6961 }
0x12f3   : > { %v4262_v50 = vpop.permute.xlu2 %4261  ;;  %v4069_v34 = vmul.f32 %v6962_v6, %v4064_v38  ;;  %vm4074_vm7 = vweird.f32 %v6962_v6 }
0x12f4   : > { %v4267_v53 = vsel %vm984_vm3, %v4262_v50, 0  ;;  %vm4075_vm9 = vmor %vm4073_vm8, %vm4074_vm7 }
0x12f5   : > { %4276 = vmatpush.bf16.msra.mxu2 %v4267_v53  ;;  %v4070_v56 = vsub.f32 1.0, %v4069_v34 }
0x12f7   : > { %v4071_v8 = vmul.f32 %v6962_v6, %v4070_v56 }
0x12f9   : > { %v4072_v7 = vadd.f32 %v6962_v6, %v4071_v8 }
0x12fb   : > { %v4241_v4 = vpop.permute.xlu2 %4240  ;;  %v4076_v57 = vsel %vm4075_vm9, %v6962_v6, %v4072_v7 }
0x12fc   : > { %v4081_v33 = vsel %vm4078_vm13, %v4080_v19, %v4076_v57  ;;  %v4246_v9 = vsel %vm984_vm3, %v4241_v4, 0 }
0x12fd   : > { %v8533_v61 = vmul.f32 %v8470_v45, %v4081_v33 }
0x12ff   : > { %v4098_v0 = vpack.c.bf16 %v8533_v61, %v8533_v61 }
0x1303   : > { %v4402_v46 = vpop.permute.xlu2 %4401 }
0x1304   : > { %v4067_v1 = vpop.xlane.xlu0 %4066  ;;  %v4407_v11 = vsel %vm984_vm3, %v4402_v46, 0 }
0x1305   : > { %6963 = vrcp.f32 %v4067_v1  ;;  %v4094_v58 = vand.u32 2147483648, %v4067_v1  ;;  %v4092_v12 = vand.u32 2147483647, %v4067_v1  ;;  %vm4088_vm14 = vweird.f32 %v4067_v1 }
0x1307   : > { %v4095_v23 = vor.u32 1.1754944e-38, %v4094_v58  ;;  %vm4093_vm0 = vcmp.eq.f32.partialorder %v4092_v12, 8.507059e+37 }
0x130b   : > { %v6964_v37 = vpop.eup %6963 }
0x130c   : > { %v4084_v49 = vmul.f32 %v6964_v37, %v4067_v1  ;;  %vm4089_vm12 = vweird.f32 %v6964_v37 }
0x130d   : > { %vm4090_vm15 = vmor %vm4088_vm14, %vm4089_vm12 }
0x130e   : > { %v4085_v52 = vsub.f32 1.0, %v4084_v49 }
0x1310   : > { %v4086_v18 = vmul.f32 %v6964_v37, %v4085_v52 }
0x1312   : > { %v4087_v41 = vadd.f32 %v6964_v37, %v4086_v18 }
0x1314   : > { %v4091_v29 = vsel %vm4090_vm15, %v6964_v37, %v4087_v41 }
0x1315   : > { %v4096_v62 = vsel %vm4093_vm0, %v4095_v23, %v4091_v29 }
0x1316   : > { %v8536_v55 = vmul.f32 %v8474_v43, %v4096_v62 }
0x1317   : > { %v4101_v17 = vpop.permute.xlu0 %4100 }
0x1318   : > { %v4099_v47 = vpack.c.bf16 %v8536_v55, %v8536_v55  ;;  %v4106_v5 = vsel %vm984_vm3, %v4101_v17, 0 }
0x1319   : > { %4115 = vmatpush.bf16.msra.mxu1 %v4106_v5 }
0x131a   : > { %6369 = vmatmul.msk.bf16.vlgmr.msrb.gmra.mxu2 %vm883_vm2, %v4099_v47 }
0x131b   : > { %4416 = vmatpush.bf16.msrb.mxu2 %v4407_v11 }
0x131c   : > { %6368 = vmatmul.msk.bf16.vlgmr.msra.gmra.mxu1 %vm883_vm2, %v4098_v0 }
0x131d   : > { %4255 = vmatpush.bf16.msrb.mxu1 %v4246_v9 }
0x1324   : > { %v8549_v10 = vpop.xlane.xlu1 %4346 }
0x1337   : > { %v8547_v45 = vpop.f32.mrf.mxu1 }
0x133c   : > { %v4204_v43 = vpop.xlane.xlu2 %4203  ;;  %v4585_v47 = vpop.permute.xlu1 %4584 }
0x133d   : > { %6965 = vrcp.f32 %v4204_v43  ;;  %v4219_v6 = vand.u32 2147483648, %v4204_v43  ;;  %v4217_v56 = vand.u32 2147483647, %v4204_v43  ;;  %vm4213_vm5 = vweird.f32 %v4204_v43 }
0x133f   : > { %v3970_v25 = vpop.f32.mrf.mxu1  ;;  %v4220_v20 = vor.u32 1.1754944e-38, %v4219_v6  ;;  %vm4218_vm7 = vcmp.eq.f32.partialorder %v4217_v56, 8.507059e+37 }
0x1342   : > { %v4344_v3 = vpop.xlane.xlu0 %4343 }
0x1343   : > { %v6966_v14 = vpop.eup %6965  ;;  %6967 = vrcp.f32 %v4344_v3  ;;  %vm4353_vm14 = vweird.f32 %v4344_v3 }
0x1344   : > { %6969 = vrcp.f32 %v8549_v10  ;;  %v4209_v60 = vmul.f32 %v6966_v14, %v4204_v43  ;;  %v4207_v38 = vpop.xlane.xlu2 %4206  ;;  %v8552_v50 = vpop.f32.mrf.mxu2  ;;  %vm4214_vm4 = vweird.f32 %v6966_v14  ;;  %v4357_v43 = vand.u32 2147483647, %v4344_v3 }
0x1345   : > { %6971 = vrcp.f32 %v4207_v38  ;;  %vm4215_vm6 = vmor %vm4213_vm5, %vm4214_vm4  ;;  %v4234_v29 = vand.u32 2147483648, %v4207_v38  ;;  %v4232_v17 = vand.u32 2147483647, %v4207_v38  ;;  %vm4228_vm12 = vweird.f32 %v4207_v38 }
0x1346   : > { %v4210_v53 = vsub.f32 1.0, %v4209_v60  ;;  %vm4358_vm4 = vcmp.eq.f32.partialorder %v4357_v43, 8.507059e+37 }
0x1347   : > { %v4235_v11 = vor.u32 1.1754944e-38, %v4234_v29  ;;  %vm4233_vm15 = vcmp.eq.f32.partialorder %v4232_v17, 8.507059e+37  ;;  %v4577_v17 = vpop.f32.mrf.mxu0 }
0x1348   : > { %v4211_v34 = vmul.f32 %v6966_v14, %v4210_v53 }
0x1349   : > { %v6968_v1 = vpop.eup %6967 }
0x134a   : > { %v8554_v8 = vpop.eup %6969  ;;  %v4212_v37 = vadd.f32 %v6966_v14, %v4211_v34  ;;  %v4349_v7 = vmul.f32 %v6968_v1, %v4344_v3  ;;  %vm4354_vm9 = vweird.f32 %v6968_v1 }
0x134b   : > { %v6972_v49 = vpop.eup %6971  ;;  %v4364_v18 = vmul.f32 %v8554_v8, %v8549_v10  ;;  %vm4355_vm0 = vmor %vm4353_vm14, %vm4354_vm9  ;;  %vm4369_vm5 = vweird.f32 %v8554_v8 }
0x134c   : > { %v4216_v4 = vsel %vm4215_vm6, %v6966_v14, %v4212_v37  ;;  %v4350_v32 = vsub.f32 1.0, %v4349_v7  ;;  %v4224_v52 = vmul.f32 %v6972_v49, %v4207_v38  ;;  %v4381_v58 = vpop.permute.xlu2 %4380  ;;  %v3994_v57 = vpop.f32.mrf.mxu2  ;;  %vm4229_vm8 = vweird.f32 %v6972_v49 }
0x134d   : > { %v4221_v12 = vsel %vm4218_vm7, %v4220_v20, %v4216_v4  ;;  %v4386_v19 = vsel %vm984_vm3, %v4381_v58, 0  ;;  %v4365_v5 = vsub.f32 1.0, %v4364_v18  ;;  %vm4230_vm13 = vmor %vm4228_vm12, %vm4229_vm8  ;;  %v4374_v7 = vand.u32 2147483648, %v8549_v10 }
0x134e   : > { %v8560_v41 = vmul.f32 %v8508_v26, %v4221_v12  ;;  %v4351_v33 = vmul.f32 %v6968_v1, %v4350_v32  ;;  %v4225_v23 = vsub.f32 1.0, %v4224_v52  ;;  %4395 = vmatpush.bf16.msra.mxu1 %v4386_v19  ;;  %v4359_v26 = vand.u32 2147483648, %v4344_v3 }
0x134f   : > { %v4366_v53 = vmul.f32 %v8554_v8, %v4365_v5  ;;  %vm4368_vm6 = vweird.f32 %v8549_v10  ;;  %v4375_v20 = vor.u32 1.1754944e-38, %v4374_v7  ;;  %v4578_v5 = vadd.f32 %v8527_v24, %v4577_v17 }
0x1350   : > { %v4238_v62 = vpack.c.bf16 %v8560_v41, %v8560_v41  ;;  %v4226_v46 = vmul.f32 %v6972_v49, %v4225_v23  ;;  %v4352_v9 = vadd.f32 %v6968_v1, %v4351_v33  ;;  %v4360_v38 = vor.u32 1.1754944e-38, %v4359_v26  ;;  %vm4370_vm7 = vmor %vm4368_vm6, %vm4369_vm5  ;;  %v6570_v33 = vld [vmem:[%s7315_s14 + $0x48] sm:$0xff] }
0x1351   : > { %v4367_v3 = vadd.f32 %v8554_v8, %v4366_v53  ;;  %4477 = vmatpush.bf16.msrb.mxu3 %v6570_v33  ;;  %v4605_v26 = vpack.c.bf16 %v4578_v5, %v4578_v5 }
0x1352   : > { %v4227_v0 = vadd.f32 %v6972_v49, %v4226_v46  ;;  %6372 = vmatmul.msk.bf16.vlgmr.msrb.gmra.mxu1 %vm883_vm2, %v4238_v62  ;;  %v4356_v6 = vsel %vm4355_vm0, %v6968_v1, %v4352_v9 }
0x1353   : > { %4597 = vmatpush.bf16.msrb.mxu1 %v4585_v47  ;;  %v4361_v37 = vsel %vm4358_vm4, %v4360_v38, %v4356_v6 }
0x1354   : > { %v4231_v25 = vsel %vm4230_vm13, %v6972_v49, %v4227_v0  ;;  %v8578_v1 = vmul.f32 %v8514_v28, %v4361_v37  ;;  %v4371_v49 = vsel %vm4370_vm7, %v8554_v8, %v4367_v3  ;;  %v4589_v0 = vpop.permute.xlu2 %4588 }
0x1355   : > { %v4236_v14 = vsel %vm4233_vm15, %v4235_v11, %v4231_v25  ;;  %v4583_v60 = vpop.permute.xlu0 %4582  ;;  %v4579_v25 = vpop.f32.mrf.mxu0 }
0x1356   : > { %v8567_v34 = vmul.f32 %v8516_v54, %v4236_v14  ;;  %v4372_v54 = vand.u32 2147483647, %v8549_v10  ;;  %v4378_v4 = vpack.c.bf16 %v8578_v1, %v8578_v1  ;;  %v4580_v6 = vadd.f32 %v8527_v24, %v4579_v25 }
0x1357   : > { %4598 = vmatpush.bf16.msrb.mxu1 %v4583_v60  ;;  %v4748_v60 = vunpack.c.l.b16 %v4605_v26 }
0x1358   : > { %v4239_v56 = vpack.c.bf16 %v8567_v34, %v8567_v34  ;;  %vm4373_vm8 = vcmp.eq.f32.partialorder %v4372_v54, 8.507059e+37  ;;  %v4606_v54 = vpack.c.bf16 %v4580_v6, %v4580_v6 }
0x1359   : > { %v4376_v32 = vsel %vm4373_vm8, %v4375_v20, %v4371_v49  ;;  %v4749_v3 = vpack.c.b16 %v4748_v60, %v4748_v60 }
0x135a   : > { %6373 = vmatmul.msk.bf16.vlgmr.msra.gmra.mxu2 %vm883_vm2, %v4239_v56  ;;  %v8585_v52 = vmul.f32 %v8486_v51, %v4376_v32  ;;  %v6569_v51 = vld [vmem:[%s7315_s14 + $0x40] sm:$0xff]  ;;  %v4774_v32 = vunpack.c.l.b16 %v4606_v54 }
0x135b   : > { %4478 = vmatpush.bf16.msrb.mxu3 %v6569_v51 }
0x135c   : > { %v4379_v28 = vpack.c.bf16 %v8585_v52, %v8585_v52 }
0x1362   : > { %6376 = vmatmul.msk.bf16.vlgmr.msra.gmra.mxu1 %vm883_vm2, %v4378_v4 }
0x136a   : > { %6377 = vmatmul.msk.bf16.vlgmr.msrb.gmra.mxu2 %vm883_vm2, %v4379_v28 }
0x1372   : > { %6406 = vmatmul.msk.bf16.vlgmr.msrb.gmra.mxu1 %vm858_vm1, %v8382_v39 }
0x1399   : > { %v4117_v10 = vpop.f32.mrf.mxu1 }
0x139d   : > { %v4138_v8 = vpop.f32.mrf.mxu2 }
0x139e   : > { %v6745_v58 = vpack.i.bf16 %v4138_v8, %v4117_v10  ;;  %v4775_v8 = vpack.c.b16 %v4774_v32, %v4774_v32 }
0x13a0   : > { %6746 = vrot.lane.b32.xlu2 %v6745_v58, %s9147_s3 }
0x13a1   : > { %v4119_v57 = vpop.f32.mrf.mxu1 }
0x13a5   : > { %v4140_v18 = vpop.f32.mrf.mxu2 }
0x13cf   : > { %v4257_v12 = vpop.f32.mrf.mxu1 }
0x13d7   : > { %v4259_v19 = vpop.f32.mrf.mxu1 }
0x13dd   : > { %v4278_v23 = vpop.f32.mrf.mxu2 }
0x13de   : > { %v6750_v29 = vpack.i.bf16 %v4278_v23, %v4257_v12 }
0x13df   : > { %v4397_v62 = vpop.f32.mrf.mxu1 }
0x13e0   : > { %6751 = vrot.lane.b32.xlu2 %v6750_v29, %s9148_s5 }
0x13e5   : > { %v4280_v46 = vpop.f32.mrf.mxu2 }
0x13e7   : > { %v4399_v47 = vpop.f32.mrf.mxu1 }
0x13ed   : > { %v4418_v9 = vpop.f32.mrf.mxu2 }
0x13ee   : > { %v6755_v11 = vpack.i.bf16 %v4418_v9, %v4397_v62 }
0x13ef   : > { %v4600_v43 = vpop.f32.mrf.mxu1 }
0x13f0   : > { %v4601_v14 = vadd.f32 %v4600_v43, %v4589_v0  ;;  %6756 = vrot.lane.b32.xlu0 %v6755_v11, %s9149_s30 }
0x13f2   : > { %v4607_v53 = vpack.c.bf16 %v4601_v14, %v4601_v14 }
0x13f4   : > { %v4613_v38 = vsel %vm883_vm2, %v4607_v53, 0  ;;  %v4700_v56 = vunpack.c.l.b16 %v4607_v53 }
0x13f5   : > { %v4420_v37 = vpop.f32.mrf.mxu2  ;;  %4622 = vmatpush.bf16.xpose.msra.mxu2 %v4613_v38 }
0x13f6   : > { %v8600_v7 = vpack.c.b16 %v4700_v56, %v4700_v56 }
0x13f7   : > { %v4602_v49 = vpop.f32.mrf.mxu1 }
0x13f8   : > { %v4603_v20 = vadd.f32 %v4602_v49, %v4589_v0  ;;  %4750 = vrot.lane.b32.xlu0 %v4749_v3, %s9151_s22  ;;  %4752 = vrot.lane.b32.xlu1 %v8600_v7, %s9151_s22 }
0x13fa   : > { %v4608_v4 = vpack.c.bf16 %v4603_v20, %v4603_v20  ;;  %v6747_v58 = vpop.permute.xlu2 %6746 }
0x13fb   : > { %v6749_v18 = vunpack.i.h.bf16 %v6747_v58  ;;  %v6748_v12 = vunpack.i.l.bf16 %v6747_v58  ;;  %v6575_v58 = vld [vmem:[%s7351_s20] sm:$0xff] }
0x13fc   : > { %v4632_v24 = vsel %vm883_vm2, %v4608_v4, 0  ;;  %v4724_v28 = vunpack.c.l.b16 %v4608_v4  ;;  %6407 = vmatmul.msk.bf16.vlgmr.msra.gmra.mxu2 %vm883_vm2, %v4605_v26 }
0x13fd   : > { %4641 = vmatpush.bf16.xpose.msra.mxu3 %v4632_v24  ;;  %v4447_v29 = vsel %vm883_vm2, %v8552_v50, %v6749_v18  ;;  %v4446_v62 = vsel %vm883_vm2, %v8547_v45, %v6748_v12  ;;  %v8652_v18 = vld [vmem:[%s7346_s10 + $0x4] ss:$0 sm:$0xff] }
0x13fe   : > { %v8607_v10 = vpack.c.b16 %v4724_v28, %v4724_v28 }
0x1400   : > { %4918 = vrot.lane.b32.xlu0 %v8607_v10, %s9144_s23  ;;  %4778 = vrot.lane.b32.xlu2 %v8607_v10, %s9151_s22 }
0x1401   : > { %4776 = vrot.lane.b32.xlu1 %v4775_v8, %s9151_s22 }
0x1408   : > { %5035 = vrot.lane.b32.xlu0 %v8600_v7, %s9141_s19  ;;  %4895 = vrot.lane.b32.xlu2 %v8600_v7, %s9144_s23 }
0x1409   : > { %4893 = vrot.lane.b32.xlu1 %v4749_v3, %s9144_s23 }
0x1410   : > { %5056 = vrot.lane.b32.xlu0 %v4775_v8, %s9141_s19  ;;  %4916 = vrot.lane.b32.xlu2 %v4775_v8, %s9144_s23  ;;  %v6576_v8 = vld [vmem:[%s7351_s20 + $0x8] sm:$0xff] }
0x1411   : > { %5058 = vrot.lane.b32.xlu1 %v8607_v10, %s9141_s19 }
0x1418   : > { %5033 = vrot.lane.b32.xlu2 %v4749_v3, %s9141_s19 }
0x143a   : > { %v6752_v57 = vpop.permute.xlu2 %6751 }
0x143b   : > { %v6754_v33 = vunpack.i.h.bf16 %v6752_v57  ;;  %v6753_v51 = vunpack.i.l.bf16 %v6752_v57 }
0x143d   : > { %v4449_v47 = vsel %vm1468_vm10, %v4447_v29, %v6754_v33  ;;  %v4448_v5 = vsel %vm1468_vm10, %v4446_v62, %v6753_v51 }
0x145a   : > { %v4779_v19 = vpop.permute.xlu2 %4778 }
0x145b   : > { %v4784_v11 = vsel %vm883_vm2, %v4779_v19, 0 }
0x1462   : > { %v6757_v23 = vpop.permute.xlu0 %6756  ;;  %v4896_v43 = vpop.permute.xlu2 %4895 }
0x1463   : > { %v6759_v46 = vunpack.i.h.bf16 %v6757_v23  ;;  %v6758_v17 = vunpack.i.l.bf16 %v6757_v23  ;;  %v4901_v14 = vsel %vm883_vm2, %v4896_v43, 0 }
0x1465   : > { %v4451_v9 = vsel %vm1471_vm11, %v4449_v47, %v6759_v46  ;;  %v4450_v0 = vsel %vm1471_vm11, %v4448_v5, %v6758_v17 }
0x1466   : > { %v4452_v26 = vpack.c.bf16 %v4451_v9, %v4450_v0 }
0x1468   : > { %6386 = vmatmul.msk.bf16.vlgmr.msrb.gmra.mxu3 %vm858_vm1, %v4452_v26 }
0x1469   : > { %4793 = vmatpush.bf16.xpose.msrb.mxu3 %v4784_v11 }
0x146a   : > { %v4753_v50 = vpop.permute.xlu1 %4752  ;;  %v4751_v25 = vpop.permute.xlu0 %4750 }
0x146b   : > { %v4758_v45 = vsel %vm883_vm2, %v4753_v50, 0  ;;  %v4917_v24 = vpop.permute.xlu2 %4916 }
0x146c   : > { %4767 = vmatpush.bf16.xpose.msrb.mxu2 %v4758_v45 }
0x1472   : > { %v4919_v53 = vpop.permute.xlu0 %4918 }
0x1473   : > { %v4777_v60 = vpop.permute.xlu1 %4776  ;;  %6411 = vmatmul.msk.bf16.vlgmr.msrb.gmra.mxu2 %vm883_vm2, %v4751_v25  ;;  %v4924_v6 = vsel %vm883_vm2, %v4919_v53, 0  ;;  %v5034_v28 = vpop.permute.xlu2 %5033 }
0x1474   : > { %4910 = vmatpush.bf16.xpose.msra.mxu2 %v4901_v14 }
0x1478   : > { %6408 = vmatmul.msk.bf16.vlgmr.msra.gmra.mxu3 %vm883_vm2, %v4606_v54 }
0x1479   : > { %4933 = vmatpush.bf16.xpose.msra.mxu3 %v4924_v6 }
0x147a   : > { %v5036_v56 = vpop.permute.xlu0 %5035 }
0x147b   : > { %v4894_v38 = vpop.permute.xlu1 %4893  ;;  %v5041_v37 = vsel %vm883_vm2, %v5036_v56, 0 }
0x147c   : > { %5050 = vmatpush.bf16.xpose.msrb.mxu2 %v5041_v37 }
0x147f   : > { %v4624_v3 = vpop.f32.mrf.mxu2 }
0x1480   : > { %v4647_v49 = vmul.f32 0.35355338, %v4624_v3 }
0x1482   : > { %v4649_v20 = vsel %vm883_vm2, %v4647_v49, -inf  ;;  %v5057_v57 = vpop.permute.xlu0 %5056 }
0x1483   : > { %4650 = vmax.xlane.f32.xlu1 %v4649_v20  ;;  %6415 = vmatmul.msk.bf16.vlgmr.msra.gmra.mxu2 %vm883_vm2, %v4894_v38  ;;  %v5059_v4 = vpop.permute.xlu1 %5058 }
0x1484   : > { %v5064_v54 = vsel %vm883_vm2, %v5059_v4, 0 }
0x1487   : > { %v4626_v32 = vpop.f32.mrf.mxu2 }
0x1488   : > { %6412 = vmatmul.msk.bf16.vlgmr.msrb.gmra.mxu3 %vm883_vm2, %v4777_v60 }
0x1489   : > { %5073 = vmatpush.bf16.xpose.msrb.mxu3 %v5064_v54 }
0x1493   : > { %6419 = vmatmul.msk.bf16.vlgmr.msrb.gmra.mxu2 %vm883_vm2, %v5034_v28 }
0x1498   : > { %6416 = vmatmul.msk.bf16.vlgmr.msra.gmra.mxu3 %vm883_vm2, %v4917_v24 }
0x1499   : > { %5312 = vmatpush.bf16.msra.mxu3 %v6576_v8 }
0x149d   : > { %5313 = vmatpush.bf16.msra.mxu3 %v6575_v58 }
0x14a8   : > { %6420 = vmatmul.msk.bf16.vlgmr.msrb.gmra.mxu3 %vm883_vm2, %v5057_v57 }
0x14b8   : > { %6440 = vmatmul.msk.bf16.vlgmr.msra.gmra.mxu3 %vm858_vm1, %v8382_v39 }
0x14eb   : > { %v4480_v12 = vpop.f32.mrf.mxu3 }
0x14ec   : > { %v8655_v19 = vadd.f32 %v8652_v18, %v4480_v12 }
0x14f3   : > { %v8657_v33 = vpop.f32.mrf.mxu3 }
0x14f6   : > { %v4651_v51 = vpop.xlane.xlu1 %4650  ;;  %v4769_v23 = vpop.f32.mrf.mxu2 }
0x14f7   : > { %v4655_v29 = vsub.f32 %v4647_v49, %v4651_v51  ;;  %v4799_v62 = vmul.f32 0.35355338, %v4769_v23 }
0x14f9   : > { %v4657_v46 = vmul.f32 1.442695, %v4655_v29  ;;  %v4801_v17 = vsel %vm883_vm2, %v4799_v62, -inf }
0x14fa   : > { %4802 = vmax.xlane.f32.xlu0 %v4801_v17 }
0x14fb   : > { %6973 = vpow2.f32 %v4657_v46  ;;  %v4643_v47 = vpop.f32.mrf.mxu3 }
0x14fc   : > { %v4648_v5 = vmul.f32 0.35355338, %v4643_v47 }
0x14fe   : > { %v4771_v39 = vpop.f32.mrf.mxu2  ;;  %v4652_v9 = vsel %vm883_vm2, %v4648_v5, -inf }
0x14ff   : > { %4653 = vmax.xlane.f32.xlu2 %v4652_v9 }
0x1501   : > { %v8661_v0 = vpop.eup %6973 }
0x1502   : > { %v4661_v26 = vsel %vm883_vm2, %v8661_v0, 0.0 }
0x1503   : > { %4662 = vadd.xlane.f32.xlu0 %v4661_v26  ;;  %v4645_v11 = vpop.f32.mrf.mxu3 }
0x1506   : > { %v4912_v43 = vpop.f32.mrf.mxu2 }
0x1507   : > { %v4939_v50 = vmul.f32 0.35355338, %v4912_v43 }
0x1509   : > { %v4941_v45 = vsel %vm883_vm2, %v4939_v50, -inf }
0x150a   : > { %4942 = vmax.xlane.f32.xlu2 %v4941_v45 }
0x150b   : > { %v4795_v25 = vpop.f32.mrf.mxu3 }
0x150c   : > { %v4800_v14 = vmul.f32 0.35355338, %v4795_v25 }
0x150e   : > { %v4914_v60 = vpop.f32.mrf.mxu2  ;;  %v4804_v53 = vsel %vm883_vm2, %v4800_v14, -inf }
0x150f   : > { %4805 = vmax.xlane.f32.xlu1 %v4804_v53 }
0x1513   : > { %v4797_v6 = vpop.f32.mrf.mxu3 }
0x1516   : > { %v5052_v38 = vpop.f32.mrf.mxu2 }
0x1517   : > { %v8676_v28 = vmul.f32 0.35355338, %v5052_v38 }
0x1519   : > { %v5081_v8 = vsel %vm883_vm2, %v8676_v28, -inf }
0x151b   : > { %v4935_v56 = vpop.f32.mrf.mxu3 }
0x151c   : > { %v4940_v37 = vmul.f32 0.35355338, %v4935_v56 }
0x151e   : > { %v5054_v3 = vpop.f32.mrf.mxu2  ;;  %v4944_v49 = vsel %vm883_vm2, %v4940_v37, -inf }
0x151f   : > { %4945 = vmax.xlane.f32.xlu0 %v4944_v49 }
0x1523   : > { %v4937_v20 = vpop.f32.mrf.mxu3 }
0x1528   : > { %4702 = vrot.lane.b32.xlu1 %v8600_v7, %s9150_s15 }
0x152b   : > { %v5075_v4 = vpop.f32.mrf.mxu3 }
0x152c   : > { %v8670_v32 = vmul.f32 0.35355338, %v5075_v4 }
0x152e   : > { %v5084_v24 = vsel %vm883_vm2, %v8670_v32, -inf }
0x152f   : > { %5085 = vmax.xlane.f32.xlu2 %v5084_v24 }
0x1533   : > { %4851 = vrot.lane.b32.xlu0 %v8600_v7, %s9140_s13  ;;  %v5077_v54 = vpop.f32.mrf.mxu3 }
0x1552   : > { %5082 = vmax.xlane.f32.xlu1 %v5081_v8 }
0x156d   : > { %v4803_v58 = vpop.xlane.xlu0 %4802 }
0x156e   : > { %v4807_v57 = vsub.f32 %v4799_v62, %v4803_v58 }
0x1570   : > { %v4809_v12 = vmul.f32 1.442695, %v4807_v57 }
0x1572   : > { %6975 = vpow2.f32 %v4809_v12  ;;  %v4654_v51 = vpop.xlane.xlu2 %4653 }
0x1573   : > { %v4656_v23 = vsub.f32 %v4648_v5, %v4654_v51 }
0x1575   : > { %v4659_v29 = vmul.f32 1.442695, %v4656_v23 }
0x1576   : > { %v4663_v46 = vpop.xlane.xlu0 %4662 }
0x1577   : > { %6977 = vpow2.f32 %v4659_v29  ;;  %v4678_v49 = vand.u32 2147483648, %v4663_v46  ;;  %vm4672_vm12 = vweird.f32 %v4663_v46  ;;  %v4676_v20 = vand.u32 2147483647, %v4663_v46 }
0x1578   : > { %v8680_v17 = vpop.eup %6975  ;;  %6979 = vrcp.f32 %v4663_v46 }
0x1579   : > { %v4813_v47 = vsel %vm883_vm2, %v8680_v17, 0.0  ;;  %v4679_v54 = vor.u32 1.1754944e-38, %v4678_v49  ;;  %vm4677_vm14 = vcmp.eq.f32.partialorder %v4676_v20, 8.507059e+37 }
0x157a   : > { %4814 = vadd.xlane.f32.xlu2 %v4813_v47 }
0x157d   : > { %v8684_v39 = vpop.eup %6977  ;;  %v4943_v26 = vpop.xlane.xlu2 %4942 }
0x157e   : > { %v4664_v9 = vsel %vm883_vm2, %v8684_v39, 0.0  ;;  %v6980_v62 = vpop.eup %6979  ;;  %v4947_v45 = vsub.f32 %v4939_v50, %v4943_v26 }
0x157f   : > { %4665 = vadd.xlane.f32.xlu1 %v4664_v9  ;;  %v4668_v5 = vmul.f32 %v6980_v62, %v4663_v46  ;;  %vm4673_vm9 = vweird.f32 %v6980_v62 }
0x1580   : > { %v4949_v53 = vmul.f32 1.442695, %v4947_v45  ;;  %vm4674_vm13 = vmor %vm4672_vm12, %vm4673_vm9 }
0x1581   : > { %v4669_v60 = vsub.f32 1.0, %v4668_v5 }
0x1582   : > { %v4806_v11 = vpop.xlane.xlu1 %4805 }
0x1583   : > { %v4808_v43 = vsub.f32 %v4800_v14, %v4806_v11  ;;  %v4670_v6 = vmul.f32 %v6980_v62, %v4669_v60 }
0x1585   : > { %v4811_v25 = vmul.f32 1.442695, %v4808_v43  ;;  %v4671_v3 = vadd.f32 %v6980_v62, %v4670_v6 }
0x1587   : > { %6981 = vpow2.f32 %v4811_v25  ;;  %v4675_v4 = vsel %vm4674_vm13, %v6980_v62, %v4671_v3 }
0x1588   : > { %6983 = vpow2.f32 %v4949_v53  ;;  %v4680_v58 = vsel %vm4677_vm14, %v4679_v54, %v4675_v4 }
0x1589   : > { %v8701_v12 = vmul.f32 %v8661_v0, %v4680_v58 }
0x158b   : > { %v4697_v29 = vpack.c.bf16 %v8701_v12, %v8701_v12 }
0x158d   : > { %v8688_v38 = vpop.eup %6981 }
0x158e   : > { %v4816_v56 = vsel %vm883_vm2, %v8688_v38, 0.0  ;;  %v8694_v50 = vpop.eup %6983 }
0x158f   : > { %4817 = vadd.xlane.f32.xlu0 %v4816_v56  ;;  %v4953_v57 = vsel %vm883_vm2, %v8694_v50, 0.0 }
0x1592   : > { %v4946_v14 = vpop.xlane.xlu0 %4945  ;;  %4726 = vrot.lane.b32.xlu2 %v8607_v10, %s9150_s15 }
0x1593   : > { %v4948_v24 = vsub.f32 %v4940_v37, %v4946_v14 }
0x1595   : > { %v4951_v8 = vmul.f32 1.442695, %v4948_v24 }
0x1597   : > { %6985 = vpow2.f32 %v4951_v8  ;;  %4954 = vadd.xlane.f32.xlu0 %v4953_v57 }
0x1598   : > { %4872 = vrot.lane.b32.xlu1 %v8607_v10, %s9140_s13 }
0x159a   : > { %v4703_v51 = vpop.permute.xlu1 %4702 }
0x159b   : > { %v4708_v23 = vsel %vm984_vm3, %v4703_v51, 0 }
0x159c   : > { %4717 = vmatpush.bf16.msra.mxu0 %v4708_v23 }
0x159d   : > { %v8704_v37 = vpop.eup %6985 }
0x159e   : > { %v4956_v46 = vsel %vm883_vm2, %v8704_v37, 0.0 }
0x159f   : > { %6409 = vmatmul.msk.bf16.vlgmr.msra.gmra.mxu0 %vm883_vm2, %v4697_v29  ;;  %4957 = vadd.xlane.f32.xlu0 %v4956_v46 }
0x15a2   : > { %v5086_v0 = vpop.xlane.xlu2 %5085 }
0x15a3   : > { %v5088_v62 = vsub.f32 %v8670_v32, %v5086_v0 }
0x15a5   : > { %v4852_v47 = vpop.permute.xlu0 %4851  ;;  %v5091_v26 = vmul.f32 1.442695, %v5088_v62 }
0x15a6   : > { %v4857_v9 = vsel %vm984_vm3, %v4852_v47, 0 }
0x15a7   : > { %4866 = vmatpush.bf16.msrb.mxu0 %v4857_v9  ;;  %6987 = vpow2.f32 %v5091_v26 }
0x15ad   : > { %v8717_v11 = vpop.eup %6987 }
0x15ae   : > { %v5096_v5 = vsel %vm883_vm2, %v8717_v11, 0.0 }
0x15b3   : > { %4991 = vrot.lane.b32.xlu0 %v8600_v7, %s9142_s4 }
0x15bb   : > { %5012 = vrot.lane.b32.xlu0 %v8607_v10, %s9142_s4  ;;  %s9155_s4 = sld [smem:[#allocation27_spill]] (!%p6538_p1) }
0x15c2   : > { %5097 = vadd.xlane.f32.xlu1 %v5096_v5 }
0x15c3   : > { %5131 = vrot.lane.b32.xlu0 %v8600_v7, %s9143_s16 }
0x15c5   : > { %v5083_v43 = vpop.xlane.xlu1 %5082 }
0x15c6   : > { %v5087_v32 = vsub.f32 %v8676_v28, %v5083_v43 }
0x15c8   : > { %v5089_v45 = vmul.f32 1.442695, %v5087_v32 }
0x15ca   : > { %6989 = vpow2.f32 %v5089_v45 }
0x15cb   : > { %5152 = vrot.lane.b32.xlu0 %v8607_v10, %s9143_s16 }
0x15d0   : > { %v8726_v25 = vpop.eup %6989 }
0x15d1   : > { %v5093_v60 = vsel %vm883_vm2, %v8726_v25, 0.0 }
0x15d2   : > { %5094 = vadd.xlane.f32.xlu2 %v5093_v60 }
0x15ed   : > { %v4815_v53 = vpop.xlane.xlu2 %4814 }
0x15ee   : > { %6991 = vrcp.f32 %v4815_v53  ;;  %v4830_v20 = vand.u32 2147483648, %v4815_v53  ;;  %v4828_v4 = vand.u32 2147483647, %v4815_v53  ;;  %vm4824_vm0 = vweird.f32 %v4815_v53 }
0x15f0   : > { %v4831_v8 = vor.u32 1.1754944e-38, %v4830_v20  ;;  %vm4829_vm5 = vcmp.eq.f32.partialorder %v4828_v4, 8.507059e+37 }
0x15f2   : > { %v4666_v6 = vpop.xlane.xlu1 %4665 }
0x15f3   : > { %6993 = vrcp.f32 %v4666_v6  ;;  %v4693_v51 = vand.u32 2147483648, %v4666_v6  ;;  %v4691_v46 = vand.u32 2147483647, %v4666_v6  ;;  %vm4687_vm7 = vweird.f32 %v4666_v6 }
0x15f4   : > { %v6992_v56 = vpop.eup %6991 }
0x15f5   : > { %v4820_v7 = vmul.f32 %v6992_v56, %v4815_v53  ;;  %v4727_v3 = vpop.permute.xlu2 %4726  ;;  %vm4825_vm15 = vweird.f32 %v6992_v56  ;;  %v4694_v62 = vor.u32 1.1754944e-38, %v4693_v51  ;;  %vm4692_vm9 = vcmp.eq.f32.partialorder %v4691_v46, 8.507059e+37 }
0x15f6   : > { %v4732_v28 = vsel %vm984_vm3, %v4727_v3, 0  ;;  %vm4826_vm4 = vmor %vm4824_vm0, %vm4825_vm15 }
0x15f7   : > { %v4821_v49 = vsub.f32 1.0, %v4820_v7  ;;  %4741 = vmatpush.bf16.msra.mxu1 %v4732_v28 }
0x15f9   : > { %v6994_v14 = vpop.eup %6993  ;;  %v4822_v10 = vmul.f32 %v6992_v56, %v4821_v49 }
0x15fa   : > { %v4683_v24 = vmul.f32 %v6994_v14, %v4666_v6  ;;  %vm4688_vm6 = vweird.f32 %v6994_v14 }
0x15fb   : > { %v4823_v54 = vadd.f32 %v6992_v56, %v4822_v10  ;;  %vm4689_vm8 = vmor %vm4687_vm7, %vm4688_vm6 }
0x15fc   : > { %v4684_v58 = vsub.f32 1.0, %v4683_v24 }
0x15fd   : > { %v4827_v57 = vsel %vm4826_vm4, %v6992_v56, %v4823_v54 }
0x15fe   : > { %v4832_v23 = vsel %vm4829_vm5, %v4831_v8, %v4827_v57  ;;  %v4685_v29 = vmul.f32 %v6994_v14, %v4684_v58 }
0x15ff   : > { %v8732_v47 = vmul.f32 %v8680_v17, %v4832_v23 }
0x1600   : > { %v4686_v9 = vadd.f32 %v6994_v14, %v4685_v29 }
0x1601   : > { %v4849_v0 = vpack.c.bf16 %v8732_v47, %v8732_v47 }
0x1602   : > { %v4690_v26 = vsel %vm4689_vm8, %v6994_v14, %v4686_v9  ;;  %v4818_v5 = vpop.xlane.xlu0 %4817 }
0x1603   : > { %v4695_v43 = vsel %vm4692_vm9, %v4694_v62, %v4690_v26  ;;  %6995 = vrcp.f32 %v4818_v5  ;;  %6413 = vmatmul.msk.bf16.vlgmr.msrb.gmra.mxu0 %vm883_vm2, %v4849_v0  ;;  %v4845_v3 = vand.u32 2147483648, %v4818_v5  ;;  %v4843_v49 = vand.u32 2147483647, %v4818_v5 }
0x1604   : > { %v8738_v32 = vmul.f32 %v8684_v39, %v4695_v43  ;;  %vm4839_vm13 = vweird.f32 %v4818_v5 }
0x1605   : > { %v4846_v14 = vor.u32 1.1754944e-38, %v4845_v3  ;;  %vm4844_vm15 = vcmp.eq.f32.partialorder %v4843_v49, 8.507059e+37 }
0x1606   : > { %v4698_v17 = vpack.c.bf16 %v8738_v32, %v8738_v32 }
0x1608   : > { %6410 = vmatmul.msk.bf16.vlgmr.msra.gmra.mxu1 %vm883_vm2, %v4698_v17 }
0x1609   : > { %v6996_v45 = vpop.eup %6995 }
0x160a   : > { %v4835_v60 = vmul.f32 %v6996_v45, %v4818_v5  ;;  %v4873_v53 = vpop.permute.xlu1 %4872  ;;  %v4955_v6 = vpop.xlane.xlu0 %4954  ;;  %vm4840_vm12 = vweird.f32 %v6996_v45 }
0x160b   : > { %v4878_v56 = vsel %vm984_vm3, %v4873_v53, 0  ;;  %6997 = vrcp.f32 %v4955_v6  ;;  %vm4841_vm14 = vmor %vm4839_vm13, %vm4840_vm12  ;;  %v4970_v9 = vand.u32 2147483648, %v4955_v6  ;;  %vm4964_vm4 = vweird.f32 %v4955_v6 }
0x160c   : > { %v4836_v7 = vsub.f32 1.0, %v4835_v60  ;;  %4887 = vmatpush.bf16.msrb.mxu1 %v4878_v56  ;;  %v4968_v0 = vand.u32 2147483647, %v4955_v6 }
0x160d   : > { %v4971_v43 = vor.u32 1.1754944e-38, %v4970_v9 }
0x160e   : > { %v4837_v28 = vmul.f32 %v6996_v45, %v4836_v7  ;;  %vm4969_vm6 = vcmp.eq.f32.partialorder %v4968_v0, 8.507059e+37 }
0x1610   : > { %v4838_v39 = vadd.f32 %v6996_v45, %v4837_v28 }
0x1611   : > { %v6998_v20 = vpop.eup %6997 }
0x1612   : > { %v4842_v10 = vsel %vm4841_vm14, %v6996_v45, %v4838_v39  ;;  %v4960_v4 = vmul.f32 %v6998_v20, %v4955_v6  ;;  %v4958_v24 = vpop.xlane.xlu0 %4957  ;;  %vm4965_vm0 = vweird.f32 %v6998_v20 }
0x1613   : > { %v4847_v54 = vsel %vm4844_vm15, %v4846_v14, %v4842_v10  ;;  %6999 = vrcp.f32 %v4958_v24  ;;  %vm4966_vm5 = vmor %vm4964_vm4, %vm4965_vm0  ;;  %v4985_v60 = vand.u32 2147483648, %v4958_v24  ;;  %vm4979_vm8 = vweird.f32 %v4958_v24 }
0x1614   : > { %v8745_v8 = vmul.f32 %v8688_v38, %v4847_v54  ;;  %v4961_v58 = vsub.f32 1.0, %v4960_v4  ;;  %v4983_v56 = vand.u32 2147483647, %v4958_v24 }
0x1615   : > { %v4986_v49 = vor.u32 1.1754944e-38, %v4985_v60 }
0x1616   : > { %v4850_v57 = vpack.c.bf16 %v8745_v8, %v8745_v8  ;;  %v4962_v51 = vmul.f32 %v6998_v20, %v4961_v58  ;;  %vm4984_vm12 = vcmp.eq.f32.partialorder %v4983_v56, 8.507059e+37  ;;  %v6577_v56 = vld [vmem:[%s7356_s2] sm:$0xff] }
0x1618   : > { %6414 = vmatmul.msk.bf16.vlgmr.msrb.gmra.mxu1 %vm883_vm2, %v4850_v57  ;;  %v4963_v29 = vadd.f32 %v6998_v20, %v4962_v51  ;;  %v6580_v57 = vld [vmem:[%s7356_s2 + $0x18] sm:$0xff] }
0x1619   : > { %v7000_v23 = vpop.eup %6999 }
0x161a   : > { %v4975_v46 = vmul.f32 %v7000_v23, %v4958_v24  ;;  %v4967_v38 = vsel %vm4966_vm5, %v6998_v20, %v4963_v29  ;;  %vm4980_vm7 = vweird.f32 %v7000_v23  ;;  %v6579_v29 = vld [vmem:[%s7356_s2 + $0x10] sm:$0xff] }
0x161b   : > { %v4972_v17 = vsel %vm4969_vm6, %v4971_v43, %v4967_v38  ;;  %vm4981_vm9 = vmor %vm4979_vm8, %vm4980_vm7  ;;  %vm5359_vm7 = vcmask 523264  }
0x161c   : > { %v4976_v62 = vsub.f32 1.0, %v4975_v46  ;;  %v8750_v26 = vpop.f32.mrf.mxu0  ;;  %v8753_v53 = vmul.f32 %v8694_v50, %v4972_v17 }
0x161e   : > { %v4977_v5 = vmul.f32 %v7000_v23, %v4976_v62  ;;  %v4989_v39 = vpack.c.bf16 %v8753_v53, %v8753_v53 }
0x1620   : > { %v4978_v45 = vadd.f32 %v7000_v23, %v4977_v5  ;;  %v6578_v5 = vld [vmem:[%s7356_s2 + $0x8] sm:$0xff] }
0x1622   : > { %v4982_v3 = vsel %vm4981_vm9, %v7000_v23, %v4978_v45 }
0x1623   : > { %v4987_v20 = vsel %vm4984_vm12, %v4986_v49, %v4982_v3 }
0x1624   : > { %v4721_v7 = vpop.f32.mrf.mxu0  ;;  %v8760_v50 = vmul.f32 %v8704_v37, %v4987_v20 }
0x1625   : > { %v4992_v6 = vpop.permute.xlu0 %4991 }
0x1626   : > { %v4997_v28 = vsel %vm984_vm3, %v4992_v6, 0  ;;  %v4990_v4 = vpack.c.bf16 %v8760_v50, %v8760_v50 }
0x1627   : > { %5006 = vmatpush.bf16.msra.mxu0 %v4997_v28 }
0x162a   : > { %6417 = vmatmul.msk.bf16.vlgmr.msra.gmra.mxu0 %vm883_vm2, %v4989_v39 }
0x162d   : > { %v5013_v14 = vpop.permute.xlu0 %5012 }
0x162e   : > { %v5018_v10 = vsel %vm984_vm3, %v5013_v14, 0 }
0x162f   : > { %5027 = vmatpush.bf16.msra.mxu1 %v5018_v10 }
0x1632   : > { %6418 = vmatmul.msk.bf16.vlgmr.msra.gmra.mxu1 %vm883_vm2, %v4990_v4 }
0x1635   : > { %v5132_v24 = vpop.permute.xlu0 %5131  ;;  %v5098_v54 = vpop.xlane.xlu1 %5097 }
0x1636   : > { %v5137_v58 = vsel %vm984_vm3, %v5132_v24, 0  ;;  %7001 = vrcp.f32 %v5098_v54  ;;  %v5125_v0 = vand.u32 2147483648, %v5098_v54  ;;  %v5123_v38 = vand.u32 2147483647, %v5098_v54  ;;  %v5315_v24 = vpop.f32.mrf.mxu3 }
0x1637   : > { %5146 = vmatpush.bf16.msrb.mxu0 %v5137_v58  ;;  %vm5119_vm14 = vweird.f32 %v5098_v54 }
0x1638   : > { %v5126_v17 = vor.u32 1.1754944e-38, %v5125_v0  ;;  %vm5124_vm0 = vcmp.eq.f32.partialorder %v5123_v38, 8.507059e+37 }
0x163b   : > { %5367 = vmatpush.bf16.msra.mxu0 %v6580_v57 }
0x163c   : > { %v7002_v37 = vpop.eup %7001 }
0x163d   : > { %v5115_v51 = vmul.f32 %v7002_v37, %v5098_v54  ;;  %v5153_v23 = vpop.permute.xlu0 %5152  ;;  %vm5120_vm13 = vweird.f32 %v7002_v37 }
0x163e   : > { %v5158_v46 = vsel %vm984_vm3, %v5153_v23, 0  ;;  %vm5121_vm15 = vmor %vm5119_vm14, %vm5120_vm13  ;;  %v6788_v23 = vld [vmem:[%s7361_s12] ss:$0 sm:$0xff] }
0x163f   : > { %v5116_v9 = vsub.f32 1.0, %v5115_v51  ;;  %5167 = vmatpush.bf16.msrb.mxu1 %v5158_v46  ;;  %5368 = vmatpush.bf16.msra.mxu0 %v6579_v29  ;;  %v5317_v51 = vpop.f32.mrf.mxu3  ;;  %v5316_v46 = vadd.f32 %v6788_v23, %v5315_v24 }
0x1640   : > { %v5318_v29 = vadd.f32 %v6788_v23, %v5317_v51 }
0x1641   : > { %v5117_v62 = vmul.f32 %v7002_v37, %v5116_v9  ;;  %v5320_v0 = vmax.f32 %v5316_v46, 0.0 }
0x1642   : > { %v5321_v9 = vmax.f32 %v5318_v29, 0.0  ;;  %v6789_v29 = vld [vmem:[%s7366_s18] ss:$0 sm:$0xff] }
0x1643   : > { %v5118_v43 = vadd.f32 %v7002_v37, %v5117_v62  ;;  %5369 = vmatpush.bf16.msra.mxu0 %v6578_v5 }
0x1644   : > { %v5330_v62 = vpack.c.bf16 %v5321_v9, %v5320_v0 }
0x1645   : > { %v5122_v45 = vsel %vm5121_vm15, %v7002_v37, %v5118_v43  ;;  %v5095_v60 = vpop.xlane.xlu2 %5094 }
0x1646   : > { %v5127_v7 = vsel %vm5124_vm0, %v5126_v17, %v5122_v45  ;;  %7003 = vrcp.f32 %v5095_v60  ;;  %v5110_v20 = vand.u32 2147483648, %v5095_v60  ;;  %v5108_v10 = vand.u32 2147483647, %v5095_v60 }
0x1647   : > { %v8773_v6 = vmul.f32 %v8717_v11, %v5127_v7  ;;  %5370 = vmatpush.bf16.msra.mxu0 %v6577_v56  ;;  %vm5104_vm4 = vweird.f32 %v5095_v60 }
0x1648   : > { %v5111_v11 = vor.u32 1.1754944e-38, %v5110_v20  ;;  %vm5109_vm6 = vcmp.eq.f32.partialorder %v5108_v10, 8.507059e+37 }
0x1649   : > { %v5130_v3 = vpack.c.bf16 %v8773_v6, %v8773_v6 }
0x164b   : > { %6422 = vmatmul.msk.bf16.vlgmr.msrb.gmra.mxu1 %vm883_vm2, %v5130_v3 }
0x164c   : > { %v7004_v28 = vpop.eup %7003 }
0x164d   : > { %v5100_v49 = vmul.f32 %v7004_v28, %v5095_v60  ;;  %vm5105_vm3 = vweird.f32 %v7004_v28 }
0x164e   : > { %vm5106_vm5 = vmor %vm5104_vm4, %vm5105_vm3 }
0x164f   : > { %v5101_v39 = vsub.f32 1.0, %v5100_v49 }
0x1651   : > { %v5102_v14 = vmul.f32 %v7004_v28, %v5101_v39  ;;  %v4483_v39 = vadd.f32 %v8652_v18, %v8657_v33  ;;  %v6574_v18 = vld [vmem:[%s7315_s14 + $0x58] sm:$0xff]  ;;  %v6573_v33 = vld [vmem:[%s7315_s14 + $0x50] sm:$0xff] }
0x1652   : > { %5228 = vmatpush.bf16.msra.mxu2 %v6574_v18 }
0x1653   : > { %v5103_v4 = vadd.f32 %v7004_v28, %v5102_v14  ;;  %v4486_v20 = vadd.f32 %v4483_v39, %v8139_v2 }
0x1655   : > { %v5107_v54 = vsel %vm5106_vm5, %v7004_v28, %v5103_v4  ;;  %v4490_v14 = vsel %vm858_vm1, %v4486_v20, 0.0 }
0x1656   : > { %v5112_v58 = vsel %vm5109_vm6, %v5111_v11, %v5107_v54  ;;  %5229 = vmatpush.bf16.msra.mxu2 %v6573_v33 }
0x1657   : > { %v8779_v57 = vmul.f32 %v8726_v25, %v5112_v58  ;;  %v4485_v58 = vadd.f32 %v8655_v19, %v8080_v44 }
0x1659   : > { %v5129_v37 = vpack.c.bf16 %v8779_v57, %v8779_v57 }
0x165b   : > { %6421 = vmatmul.msk.bf16.vlgmr.msrb.gmra.mxu0 %vm883_vm2, %v5129_v37  ;;  %v4487_v37 = vsel %vm858_vm1, %v4485_v58, 0.0 }
0x166b   : > { %6457 = vmatmul.msk.bf16.vlgmr.msra.gmra.mxu0 %vm5359_vm7, %v5330_v62 }
0x1680   : > { %v4868_v38 = vpop.f32.mrf.mxu0 }
0x1685   : > { %v4743_v5 = vpop.f32.mrf.mxu1 }
0x1688   : > { %v4870_v43 = vpop.f32.mrf.mxu0 }
0x168d   : > { %v4745_v25 = vpop.f32.mrf.mxu1 }
0x1695   : > { %v4889_v17 = vpop.f32.mrf.mxu1 }
0x1696   : > { %v6760_v45 = vpack.i.bf16 %v4889_v17, %v4868_v38 }
0x1698   : > { %6761 = vrot.lane.b32.xlu2 %v6760_v45, %s9147_s3  ;;  %s9156_s3 = sld [smem:[#allocation25_spill]] (!%p6538_p1) }
0x169d   : > { %v4891_v60 = vpop.f32.mrf.mxu1 }
0x16a7   : > { %v5008_v56 = vpop.f32.mrf.mxu0 }
0x16af   : > { %v5010_v7 = vpop.f32.mrf.mxu0  ;;  %v5029_v3 = vpop.f32.mrf.mxu1 }
0x16b0   : > { %v6765_v28 = vpack.i.bf16 %v5029_v3, %v5008_v56 }
0x16b2   : > { %6766 = vrot.lane.b32.xlu1 %v6765_v28, %s9148_s5 }
0x16b7   : > { %v5031_v49 = vpop.f32.mrf.mxu1 }
0x16c1   : > { %4491 = vadd.xlane.f32.xlu2 %v4490_v14 }
0x16c8   : > { %v5169_v10 = vpop.f32.mrf.mxu1 }
0x16d0   : > { %v5171_v4 = vpop.f32.mrf.mxu1 }
0x16d1   : > { %v6790_v4 = vld [vmem:[%s7346_s10 + $0x5] ss:$0 sm:$0xff] }
0x16d8   : > { %v5148_v24 = vpop.f32.mrf.mxu0 }
0x16d9   : > { %v6770_v11 = vpack.i.bf16 %v5169_v10, %v5148_v24 }
0x16db   : > { %6771 = vrot.lane.b32.xlu0 %v6770_v11, %s9149_s30 }
0x16e0   : > { %v5150_v54 = vpop.f32.mrf.mxu0 }
0x16e8   : > { %v5372_v9 = vpop.f32.mrf.mxu0 }
0x16e9   : > { %v5373_v62 = vadd.f32 %v6789_v29, %v5372_v9 }
0x16eb   : > { %v8806_v19 = vadd.f32 %v5373_v62, %v8376_v13 }
0x16ed   : > { %v5379_v38 = vsel %vm858_vm1, %v8806_v19, 0.0 }
0x16f2   : > { %v6762_v2 = vpop.permute.xlu2 %6761 }
0x16f3   : > { %v6764_v25 = vunpack.i.h.bf16 %v6762_v2  ;;  %v6763_v17 = vunpack.i.l.bf16 %v6762_v2 }
0x16f5   : > { %v5198_v7 = vsel %vm883_vm2, %v4743_v5, %v6764_v25  ;;  %v5197_v3 = vsel %vm883_vm2, %v8750_v26, %v6763_v17 }
0x1705   : > { %4488 = vadd.xlane.f32.xlu0 %v4487_v37 }
0x1724   : > { %v6767_v43 = vpop.permute.xlu1 %6766 }
0x1725   : > { %v6769_v45 = vunpack.i.h.bf16 %v6767_v43  ;;  %v6768_v60 = vunpack.i.l.bf16 %v6767_v43 }
0x1727   : > { %v5199_v13 = vsel %vm1468_vm10, %v5197_v3, %v6768_v60  ;;  %v5200_v39 = vsel %vm1468_vm10, %v5198_v7, %v6769_v45  ;;  %v6582_v60 = vld [vmem:[%s7351_s20 + $0x18] sm:$0xff] }
0x1728   : > { %5459 = vmatpush.bf16.msra.mxu1 %v6582_v60 }
0x1734   : > { %v4492_v51 = vpop.xlane.xlu2 %4491 }
0x1735   : > { %v4494_v23 = vmul.f32 %v4492_v51, %v8027_v59 }
0x1737   : > { %v8800_v46 = vsub.f32 %v4486_v20, %v4494_v23 }
0x1739   : > { %v4498_v0 = vmul.f32 %v8800_v46, %v8800_v46 }
0x173b   : > { %v4502_v44 = vsel %vm858_vm1, %v4498_v0, 0.0 }
0x173c   : > { %4503 = vadd.xlane.f32.xlu2 %v4502_v44 }
0x1744   : > { %5380 = vadd.xlane.f32.xlu2 %v5379_v38 }
0x174d   : > { %v6772_v56 = vpop.permute.xlu0 %6771 }
0x174e   : > { %v6774_v28 = vunpack.i.h.bf16 %v6772_v56  ;;  %v6773_v49 = vunpack.i.l.bf16 %v6772_v56 }
0x1750   : > { %v5201_v20 = vsel %vm1471_vm11, %v5199_v13, %v6773_v49  ;;  %v5202_v14 = vsel %vm1471_vm11, %v5200_v39, %v6774_v28  ;;  %v6581_v13 = vld [vmem:[%s7351_s20 + $0x10] sm:$0xff] }
0x1751   : > { %v5203_v10 = vpack.c.bf16 %v5202_v14, %v5201_v20  ;;  %5460 = vmatpush.bf16.msra.mxu1 %v6581_v13 }
0x1753   : > { %6431 = vmatmul.msk.bf16.vlgmr.msra.gmra.mxu2 %vm858_vm1, %v5203_v10 }
0x1778   : > { %v4489_v54 = vpop.xlane.xlu0 %4488 }
0x1779   : > { %v4493_v18 = vmul.f32 %v4489_v54, %v8027_v59 }
0x177b   : > { %v4495_v51 = vsub.f32 %v4485_v58, %v4493_v18 }
0x177d   : > { %v4497_v9 = vmul.f32 %v4495_v51, %v4495_v51 }
0x177f   : > { %v4499_v0 = vsel %vm858_vm1, %v4497_v9, 0.0 }
0x17d6   : > { %v5231_v24 = vpop.f32.mrf.mxu2 }
0x17d7   : > { %v5232_v11 = vadd.f32 %v6790_v4, %v5231_v24 }
0x17d9   : > { %v5236_v5 = vadd.f32 %v5232_v11, %v8106_v27  ;;  %v4504_v27 = vpop.xlane.xlu2 %4503 }
0x17da   : > { %v4506_v62 = vmul.f32 %v4504_v27, %v8027_v59 }
0x17db   : > { %v5238_v26 = vsel %vm858_vm1, %v5236_v5, 0.0 }
0x17dc   : > { %5239 = vadd.xlane.f32.xlu1 %v5238_v26  ;;  %v4508_v44 = vadd.f32 1e-05, %v4506_v62  ;;  %v8848_v62 = vld [vmem:[%s7326_s28] ss:$0 sm:$0xff] }
0x17de   : > { %v5233_v37 = vpop.f32.mrf.mxu2  ;;  %7005 = vrsqrt.f32 %v4508_v44  ;;  %vm4525_vm9 = vweird.f32 %v4508_v44 }
0x17df   : > { %v5234_v2 = vadd.f32 %v6790_v4, %v5233_v37 }
0x17e1   : > { %v5237_v33 = vadd.f32 %v5234_v2, %v8148_v15  ;;  %v5374_v15 = vpop.f32.mrf.mxu0 }
0x17e2   : > { %v5375_v17 = vadd.f32 %v6789_v29, %v5374_v15  ;;  %v8853_v15 = vld [vmem:[%s7331_s25] ss:$0 sm:$0xff] }
0x17e3   : > { %v5241_v23 = vsel %vm858_vm1, %v5237_v33, 0.0 }
0x17e4   : > { %5242 = vadd.xlane.f32.xlu0 %v5241_v23  ;;  %v7006_v7 = vpop.eup %7005  ;;  %v8835_v28 = vadd.f32 %v5375_v17, %v8378_v36 }
0x17e5   : > { %v4520_v39 = vmul.f32 %v7006_v7, %v4508_v44  ;;  %vm4526_vm8 = vweird.f32 %v7006_v7 }
0x17e6   : > { %v5382_v29 = vsel %vm858_vm1, %v8835_v28, 0.0  ;;  %vm4527_vm12 = vmor %vm4525_vm9, %vm4526_vm8 }
0x17e7   : > { %v4521_v10 = vmul.f32 %v7006_v7, %v4520_v39 }
0x17e9   : > { %v4522_v11 = vmul.f32 0.5, %v4521_v10 }
0x17ec   : > { %4500 = vadd.xlane.f32.xlu0 %v4499_v0 }
0x184f   : > { %v5240_v38 = vpop.xlane.xlu1 %5239 }
0x1850   : > { %v5244_v43 = vmul.f32 %v5240_v38, %v8027_v59 }
0x1852   : > { %v8827_v25 = vsub.f32 %v5236_v5, %v5244_v43  ;;  %v4523_v5 = vsub.f32 1.5, %v4522_v11 }
0x1854   : > { %v5248_v58 = vmul.f32 %v8827_v25, %v8827_v25  ;;  %v4524_v54 = vmul.f32 %v7006_v7, %v4523_v5 }
0x1856   : > { %v5250_v45 = vsel %vm858_vm1, %v5248_v58, 0.0  ;;  %v4528_v2 = vsel %vm4527_vm12, %v7006_v7, %v4524_v54  ;;  %v6587_v7 = vld [vmem:[%s7351_s20 + $0x20] sm:$0xff] }
0x1857   : > { %5251 = vadd.xlane.f32.xlu0 %v5250_v45  ;;  %v5243_v56 = vpop.xlane.xlu0 %5242  ;;  %v4530_v9 = vmul.f32 %v4528_v2, %v8800_v46  ;;  %v6588_v45 = vld [vmem:[%s7351_s20 + $0x28] sm:$0xff]  ;;  %s7167_s20 = smov (!%p6538_p1), 32  }
0x1858   : > { %v5245_v3 = vmul.f32 %v5243_v56, %v8027_v59  ;;  %5607 = vmatpush.bf16.msrb.mxu3 %v6588_v45  ;;  %v6584_v2 = vld [vmem:[%s7356_s2 + $0x28] sm:$0xff] }
0x1859   : > { %v4532_v38 = vmul.f32 %v8848_v62, %v4530_v9 }
0x185a   : > { %v8837_v49 = vsub.f32 %v5237_v33, %v5245_v3 }
0x185b   : > { %v8856_v58 = vadd.f32 %v8853_v15, %v4532_v38 }
0x185c   : > { %v5249_v20 = vmul.f32 %v8837_v49, %v8837_v49  ;;  %5608 = vmatpush.bf16.msrb.mxu3 %v6587_v7 }
0x185e   : > { %v5253_v14 = vsel %vm858_vm1, %v5249_v20, 0.0 }
0x185f   : > { %5383 = vadd.xlane.f32.xlu0 %v5382_v29  ;;  %5254 = vadd.xlane.f32.xlu1 %v5253_v14  ;;  %v4501_v4 = vpop.xlane.xlu0 %4500 }
0x1860   : > { %v4505_v36 = vmul.f32 %v4501_v4, %v8027_v59  ;;  %v6586_v4 = vld [vmem:[%s7356_s2 + $0x38] sm:$0xff] }
0x1861   : > { %5515 = vmatpush.bf16.msrb.mxu2 %v6586_v4 }
0x1862   : > { %v4507_v24 = vadd.f32 1e-05, %v4505_v36 }
0x1864   : > { %7007 = vrsqrt.f32 %v4507_v24  ;;  %vm4515_vm14 = vweird.f32 %v4507_v24 }
0x186a   : > { %v7008_v26 = vpop.eup %7007 }
0x186b   : > { %v4510_v37 = vmul.f32 %v7008_v26, %v4507_v24  ;;  %vm4516_vm13 = vweird.f32 %v7008_v26 }
0x186c   : > { %vm4517_vm15 = vmor %vm4515_vm14, %vm4516_vm13 }
0x186d   : > { %v4511_v18 = vmul.f32 %v7008_v26, %v4510_v37 }
0x186f   : > { %v4512_v33 = vmul.f32 0.5, %v4511_v18 }
0x1871   : > { %v4513_v23 = vsub.f32 1.5, %v4512_v33 }
0x1873   : > { %v4514_v0 = vmul.f32 %v7008_v26, %v4513_v23 }
0x1875   : > { %v4518_v27 = vsel %vm4517_vm15, %v7008_v26, %v4514_v0  ;;  %v6585_v26 = vld [vmem:[%s7356_s2 + $0x30] sm:$0xff]  ;;  %v6583_v0 = vld [vmem:[%s7356_s2 + $0x20] sm:$0xff] }
0x1876   : > { %v4529_v44 = vmul.f32 %v4518_v27, %v4495_v51  ;;  %5516 = vmatpush.bf16.msrb.mxu2 %v6585_v26 }
0x1878   : > { %v4531_v43 = vmul.f32 %v8848_v62, %v4529_v44 }
0x187a   : > { %v8859_v17 = vadd.f32 %v8853_v15, %v4531_v43  ;;  %5517 = vmatpush.bf16.msrb.mxu2 %v6584_v2 }
0x187c   : > { %v5432_v46 = vpack.c.bf16 %v8856_v58, %v8859_v17 }
0x187e   : > { %6471 = vmatmul.msk.bf16.vlgmr.msra.gmra.mxu1 %vm858_vm1, %v5432_v46  ;;  %5518 = vmatpush.bf16.msrb.mxu2 %v6583_v0  ;;  %v5381_v0 = vpop.xlane.xlu2 %5380 }
0x18ca   : > { %v5252_v60 = vpop.xlane.xlu0 %5251 }
0x18cb   : > { %v5256_v51 = vmul.f32 %v5252_v60, %v8027_v59 }
0x18cd   : > { %v5258_v56 = vadd.f32 1e-05, %v5256_v51  ;;  %v6791_v51 = vld [vmem:[%s7361_s12 + $0x1] ss:$0 sm:$0xff] }
0x18cf   : > { %7009 = vrsqrt.f32 %v5258_v56  ;;  %vm5266_vm3 = vweird.f32 %v5258_v56 }
0x18d2   : > { %v5255_v3 = vpop.xlane.xlu1 %5254 }
0x18d3   : > { %v5257_v13 = vmul.f32 %v5255_v3, %v8027_v59 }
0x18d5   : > { %v7010_v39 = vpop.eup %7009  ;;  %v5259_v20 = vadd.f32 1e-05, %v5257_v13 }
0x18d6   : > { %v5261_v29 = vmul.f32 %v7010_v39, %v5258_v56  ;;  %vm5267_vm0 = vweird.f32 %v7010_v39 }
0x18d7   : > { %7011 = vrsqrt.f32 %v5259_v20  ;;  %vm5268_vm4 = vmor %vm5266_vm3, %vm5267_vm0  ;;  %vm5276_vm6 = vweird.f32 %v5259_v20 }
0x18d8   : > { %v5262_v14 = vmul.f32 %v7010_v39, %v5261_v29  ;;  %v6591_v29 = vld [vmem:[%s7356_s2 + $0x50] sm:$0xff] }
0x18da   : > { %v5263_v10 = vmul.f32 0.5, %v5262_v14  ;;  %v6590_v14 = vld [vmem:[%s7356_s2 + $0x48] sm:$0xff] }
0x18dc   : > { %v5264_v36 = vsub.f32 1.5, %v5263_v10  ;;  %v6589_v10 = vld [vmem:[%s7356_s2 + $0x40] sm:$0xff] }
0x18dd   : > { %v7012_v24 = vpop.eup %7011 }
0x18de   : > { %v5265_v11 = vmul.f32 %v7010_v39, %v5264_v36  ;;  %v5271_v5 = vmul.f32 %v7012_v24, %v5259_v20  ;;  %vm5277_vm5 = vweird.f32 %v7012_v24  ;;  %v6592_v20 = vld [vmem:[%s7356_s2 + $0x58] sm:$0xff]  ;;  %v6792_v36 = vld [vmem:[%s7361_s12 + $0x2] ss:$0 sm:$0xff]  ;;  %s7168_s12 = smov (!%p6538_p1), 16  }
0x18df   : > { %vm5278_vm8 = vmor %vm5276_vm6, %vm5277_vm5  ;;  %5663 = vmatpush.bf16.msrb.mxu0 %v6592_v20 }
0x18e0   : > { %v5272_v54 = vmul.f32 %v7012_v24, %v5271_v5  ;;  %v5269_v37 = vsel %vm5268_vm4, %v7010_v39, %v5265_v11 }
0x18e1   : > { %v5280_v23 = vmul.f32 %v5269_v37, %v8827_v25 }
0x18e2   : > { %v5273_v18 = vmul.f32 0.5, %v5272_v54 }
0x18e3   : > { %v5282_v38 = vmul.f32 %v8848_v62, %v5280_v23  ;;  %5664 = vmatpush.bf16.msrb.mxu0 %v6591_v29 }
0x18e4   : > { %v5274_v33 = vsub.f32 1.5, %v5273_v18  ;;  %v6793_v18 = vld [vmem:[%s7366_s18 + $0x1] ss:$0 sm:$0xff] }
0x18e5   : > { %v5284_v46 = vadd.f32 %v8853_v15, %v5282_v38  ;;  %v5385_v38 = vmul.f32 %v5381_v0, %v8027_v59 }
0x18e6   : > { %v5275_v9 = vmul.f32 %v7012_v24, %v5274_v33 }
0x18e7   : > { %5665 = vmatpush.bf16.msrb.mxu0 %v6590_v14 }
0x18e8   : > { %v5279_v27 = vsel %vm5278_vm8, %v7012_v24, %v5275_v9 }
0x18e9   : > { %v5281_v44 = vmul.f32 %v5279_v27, %v8837_v49 }
0x18eb   : > { %v5283_v43 = vmul.f32 %v8848_v62, %v5281_v44  ;;  %5666 = vmatpush.bf16.msrb.mxu0 %v6589_v10 }
0x18ed   : > { %v5285_v45 = vadd.f32 %v8853_v15, %v5283_v43 }
0x18ef   : > { %v5580_v25 = vpack.c.bf16 %v5285_v45, %v5284_v46 }
0x18f1   : > { %6511 = vmatmul.msk.bf16.vlgmr.msrb.gmra.mxu3 %vm858_vm1, %v5580_v25  ;;  %v5387_v25 = vsub.f32 %v8806_v19, %v5385_v38 }
0x18fb   : > { %v5462_v60 = vpop.f32.mrf.mxu1 }
0x18fc   : > { %v5463_v56 = vadd.f32 %v6791_v51, %v5462_v60 }
0x18fe   : > { %v5467_v13 = vmax.f32 %v5463_v56, 0.0 }
0x1903   : > { %v5464_v7 = vpop.f32.mrf.mxu1 }
0x1904   : > { %v5465_v3 = vadd.f32 %v6791_v51, %v5464_v7  ;;  %v5389_v51 = vmul.f32 %v5387_v25, %v5387_v25  ;;  %v5384_v7 = vpop.xlane.xlu0 %5383 }
0x1906   : > { %v5468_v49 = vmax.f32 %v5465_v3, 0.0  ;;  %v5391_v56 = vsel %vm858_vm1, %v5389_v51, 0.0 }
0x1908   : > { %v5478_v39 = vpack.c.bf16 %v5468_v49, %v5467_v13  ;;  %v5386_v13 = vmul.f32 %v5384_v7, %v8027_v59 }
0x190a   : > { %6497 = vmatmul.msk.bf16.vlgmr.msrb.gmra.mxu2 %vm5359_vm7, %v5478_v39  ;;  %v8898_v20 = vsub.f32 %v8835_v28, %v5386_v13 }
0x1974   : > { %v5610_v4 = vpop.f32.mrf.mxu3 }
0x1975   : > { %v5611_v24 = vadd.f32 %v6792_v36, %v5610_v4  ;;  %v5390_v4 = vmul.f32 %v8898_v20, %v8898_v20 }
0x1977   : > { %v5615_v26 = vmax.f32 %v5611_v24, 0.0 }
0x197c   : > { %v5612_v11 = vpop.f32.mrf.mxu3 }
0x197d   : > { %v5613_v5 = vadd.f32 %v6792_v36, %v5612_v11 }
0x197f   : > { %v5616_v54 = vmax.f32 %v5613_v5, 0.0 }
0x1981   : > { %v5626_v37 = vpack.c.bf16 %v5616_v54, %v5615_v26 }
0x1983   : > { %6537 = vmatmul.msk.bf16.vlgmr.msrb.gmra.mxu0 %vm5359_vm7, %v5626_v37 }
0x198d   : > { %v5520_v2 = vpop.f32.mrf.mxu2 }
0x198e   : > { %v5521_v33 = vadd.f32 %v6793_v18, %v5520_v2 }
0x1990   : > { %v5525_v23 = vadd.f32 %v5521_v33, %v8859_v17  ;;  %v6794_v17 = vld [vmem:[%s7366_s18 + $0x2] ss:$0 sm:$0xff]  ;;  %s7170_s18 = smov (!%p6538_p1), 24  }
0x1992   : > { %v5527_v9 = vsel %vm858_vm1, %v5525_v23, 0.0 }
0x1993   : > { %5528 = vadd.xlane.f32.xlu1 %v5527_v9 }
0x1995   : > { %v5522_v27 = vpop.f32.mrf.mxu2 }
0x1996   : > { %v5523_v44 = vadd.f32 %v6793_v18, %v5522_v27 }
0x1998   : > { %v5526_v43 = vadd.f32 %v5523_v44, %v8856_v58 }
0x199a   : > { %v5530_v60 = vsel %vm858_vm1, %v5526_v43, 0.0 }
0x199b   : > { %5531 = vadd.xlane.f32.xlu2 %v5530_v60 }
0x19a3   : > { %5392 = vadd.xlane.f32.xlu2 %v5391_v56 }
0x1a00   : > { %v5668_v3 = vpop.f32.mrf.mxu0 }
0x1a01   : > { %v5669_v49 = vadd.f32 %v6794_v17, %v5668_v3 }
0x1a03   : > { %v5673_v39 = vadd.f32 %v5669_v49, %v5284_v46  ;;  %v5394_v46 = vsel %vm858_vm1, %v5390_v4, 0.0 }
0x1a05   : > { %v5675_v58 = vsel %vm858_vm1, %v5673_v39, 0.0 }
0x1a06   : > { %v5529_v19 = vpop.xlane.xlu1 %5528  ;;  %5676 = vadd.xlane.f32.xlu0 %v5675_v58 }
0x1a07   : > { %v5533_v14 = vmul.f32 %v5529_v19, %v8027_v59 }
0x1a08   : > { %v5670_v29 = vpop.f32.mrf.mxu0 }
0x1a09   : > { %v5671_v10 = vadd.f32 %v6794_v17, %v5670_v29  ;;  %v8904_v24 = vsub.f32 %v5525_v23, %v5533_v14 }
0x1a0b   : > { %v5674_v36 = vadd.f32 %v5671_v10, %v5285_v45  ;;  %v5537_v54 = vmul.f32 %v8904_v24, %v8904_v24 }
0x1a0d   : > { %v5678_v11 = vsel %vm858_vm1, %v5674_v36, 0.0  ;;  %v5539_v18 = vsel %vm858_vm1, %v5537_v54, 0.0 }
0x1a0e   : > { %v5532_v28 = vpop.xlane.xlu2 %5531  ;;  %5679 = vadd.xlane.f32.xlu1 %v5678_v11  ;;  %5395 = vadd.xlane.f32.xlu0 %v5394_v46 }
0x1a0f   : > { %v5534_v5 = vmul.f32 %v5532_v28, %v8027_v59 }
0x1a11   : > { %v8909_v26 = vsub.f32 %v5526_v43, %v5534_v5 }
0x1a13   : > { %v5538_v37 = vmul.f32 %v8909_v26, %v8909_v26 }
0x1a15   : > { %v5542_v45 = vsel %vm858_vm1, %v5538_v37, 0.0 }
0x1a16   : > { %5543 = vadd.xlane.f32.xlu2 %v5542_v45  ;;  %v5393_v2 = vpop.xlane.xlu2 %5392  ;;  %5540 = vadd.xlane.f32.xlu1 %v5539_v18 }
0x1a17   : > { %v5397_v33 = vmul.f32 %v5393_v2, %v8027_v59 }
0x1a19   : > { %v5399_v23 = vadd.f32 1e-05, %v5397_v33 }
0x1a1b   : > { %7013 = vrsqrt.f32 %v5399_v23  ;;  %vm5407_vm12 = vweird.f32 %v5399_v23 }
0x1a21   : > { %v7014_v9 = vpop.eup %7013 }
0x1a22   : > { %v5402_v0 = vmul.f32 %v7014_v9, %v5399_v23  ;;  %vm5408_vm9 = vweird.f32 %v7014_v9 }
0x1a23   : > { %vm5409_vm13 = vmor %vm5407_vm12, %vm5408_vm9 }
0x1a24   : > { %v5403_v27 = vmul.f32 %v7014_v9, %v5402_v0 }
0x1a26   : > { %v5404_v38 = vmul.f32 0.5, %v5403_v27 }
0x1a28   : > { %v5405_v44 = vsub.f32 1.5, %v5404_v38 }
0x1a2a   : > { %v5406_v43 = vmul.f32 %v7014_v9, %v5405_v44 }
0x1a2c   : > { %v5410_v60 = vsel %vm5409_vm13, %v7014_v9, %v5406_v43 }
0x1a2d   : > { %v5421_v51 = vmul.f32 %v5410_v60, %v5387_v25 }
0x1a2f   : > { %v5423_v56 = vmul.f32 %v8848_v62, %v5421_v51 }
0x1a31   : > { %v5425_v17 = vadd.f32 %v8853_v15, %v5423_v56 }
0x1a33   : > { %5723 = vst.msk [vmem:[#allocation5] sm:$0xff] %vm858_vm1, %v5425_v17 }
0x1a79   : > { %v5677_v7 = vpop.xlane.xlu0 %5676 }
0x1a7a   : > { %v5681_v3 = vmul.f32 %v5677_v7, %v8027_v59 }
0x1a7c   : > { %v8922_v13 = vsub.f32 %v5673_v39, %v5681_v3 }
0x1a7e   : > { %v5685_v49 = vmul.f32 %v8922_v13, %v8922_v13 }
0x1a80   : > { %v5687_v58 = vsel %vm858_vm1, %v5685_v49, 0.0 }
0x1a81   : > { %v5680_v19 = vpop.xlane.xlu1 %5679  ;;  %5688 = vadd.xlane.f32.xlu0 %v5687_v58  ;;  %v5396_v29 = vpop.xlane.xlu0 %5395 }
0x1a82   : > { %v5682_v25 = vmul.f32 %v5680_v19, %v8027_v59  ;;  %v5398_v14 = vmul.f32 %v5396_v29, %v8027_v59 }
0x1a84   : > { %v8929_v10 = vsub.f32 %v5674_v36, %v5682_v25  ;;  %v5400_v4 = vadd.f32 1e-05, %v5398_v14 }
0x1a86   : > { %7015 = vrsqrt.f32 %v5400_v4  ;;  %v5686_v39 = vmul.f32 %v8929_v10, %v8929_v10  ;;  %vm5417_vm15 = vweird.f32 %v5400_v4 }
0x1a88   : > { %v5690_v11 = vsel %vm858_vm1, %v5686_v39, 0.0 }
0x1a89   : > { %v5544_v46 = vpop.xlane.xlu2 %5543  ;;  %5691 = vadd.xlane.f32.xlu1 %v5690_v11  ;;  %v5541_v28 = vpop.xlane.xlu1 %5540 }
0x1a8a   : > { %v5546_v5 = vmul.f32 %v5544_v46, %v8027_v59  ;;  %v5545_v54 = vmul.f32 %v5541_v28, %v8027_v59 }
0x1a8c   : > { %v7016_v37 = vpop.eup %7015  ;;  %v5548_v45 = vadd.f32 1e-05, %v5546_v5  ;;  %v5547_v18 = vadd.f32 1e-05, %v5545_v54 }
0x1a8d   : > { %v5412_v2 = vmul.f32 %v7016_v37, %v5400_v4  ;;  %vm5418_vm14 = vweird.f32 %v7016_v37 }
0x1a8e   : > { %7017 = vrsqrt.f32 %v5548_v45  ;;  %vm5419_vm0 = vmor %vm5417_vm15, %vm5418_vm14  ;;  %vm5565_vm5 = vweird.f32 %v5548_v45  ;;  %vm5555_vm8 = vweird.f32 %v5547_v18 }
0x1a8f   : > { %v5413_v36 = vmul.f32 %v7016_v37, %v5412_v2  ;;  %7019 = vrsqrt.f32 %v5547_v18 }
0x1a91   : > { %v5414_v33 = vmul.f32 0.5, %v5413_v36 }
0x1a93   : > { %v5415_v23 = vsub.f32 1.5, %v5414_v33 }
0x1a94   : > { %v7018_v9 = vpop.eup %7017 }
0x1a95   : > { %v7020_v0 = vpop.eup %7019  ;;  %v5416_v27 = vmul.f32 %v7016_v37, %v5415_v23  ;;  %v5560_v38 = vmul.f32 %v7018_v9, %v5548_v45  ;;  %vm5566_vm3 = vweird.f32 %v7018_v9 }
0x1a96   : > { %v5550_v44 = vmul.f32 %v7020_v0, %v5547_v18  ;;  %vm5556_vm4 = vweird.f32 %v7020_v0  ;;  %vm5567_vm6 = vmor %vm5565_vm5, %vm5566_vm3 }
0x1a97   : > { %v5420_v43 = vsel %vm5419_vm0, %v7016_v37, %v5416_v27  ;;  %v5561_v60 = vmul.f32 %v7018_v9, %v5560_v38  ;;  %vm5557_vm9 = vmor %vm5555_vm8, %vm5556_vm4 }
0x1a98   : > { %v5422_v51 = vmul.f32 %v5420_v43, %v8898_v20  ;;  %v5551_v56 = vmul.f32 %v7020_v0, %v5550_v44 }
0x1a99   : > { %v5562_v17 = vmul.f32 0.5, %v5561_v60 }
0x1a9a   : > { %v5424_v7 = vmul.f32 %v8848_v62, %v5422_v51  ;;  %v5552_v3 = vmul.f32 0.5, %v5551_v56 }
0x1a9b   : > { %v5563_v49 = vsub.f32 1.5, %v5562_v17 }
0x1a9c   : > { %v5426_v58 = vadd.f32 %v8853_v15, %v5424_v7  ;;  %v5553_v19 = vsub.f32 1.5, %v5552_v3 }
0x1a9d   : > { %v5564_v29 = vmul.f32 %v7018_v9, %v5563_v49 }
0x1a9e   : > { %5724 = vst.msk [vmem:[#allocation5 + $0x8] sm:$0xff] %vm858_vm1, %v5426_v58  ;;  %v5554_v25 = vmul.f32 %v7020_v0, %v5553_v19 }
0x1a9f   : > { %v5568_v14 = vsel %vm5567_vm6, %v7018_v9, %v5564_v29 }
0x1aa0   : > { %v5570_v20 = vmul.f32 %v5568_v14, %v8909_v26  ;;  %v5558_v4 = vsel %vm5557_vm9, %v7020_v0, %v5554_v25 }
0x1aa1   : > { %v5569_v39 = vmul.f32 %v5558_v4, %v8904_v24 }
0x1aa2   : > { %v5572_v11 = vmul.f32 %v8848_v62, %v5570_v20 }
0x1aa3   : > { %v5571_v46 = vmul.f32 %v8848_v62, %v5569_v39 }
0x1aa4   : > { %v5574_v28 = vadd.f32 %v8853_v15, %v5572_v11 }
0x1aa5   : > { %v5573_v5 = vadd.f32 %v8853_v15, %v5571_v46 }
0x1aa6   : > { %5726 = vst.msk [vmem:[%s9139_s11 + $0x10] sm:$0xff] %vm858_vm1, %v5574_v28 }
0x1aa7   : > { %5725 = vst.msk [vmem:[%s9139_s11] sm:$0xff] %vm858_vm1, %v5573_v5 }
0x1af4   : > { %v5689_v26 = vpop.xlane.xlu0 %5688 }
0x1af5   : > { %v5693_v24 = vmul.f32 %v5689_v26, %v8027_v59 }
0x1af7   : > { %v5695_v54 = vadd.f32 1e-05, %v5693_v24 }
0x1af9   : > { %7021 = vrsqrt.f32 %v5695_v54  ;;  %vm5703_vm13 = vweird.f32 %v5695_v54 }
0x1afc   : > { %v5692_v37 = vpop.xlane.xlu1 %5691 }
0x1afd   : > { %v5694_v45 = vmul.f32 %v5692_v37, %v8027_v59 }
0x1aff   : > { %v7022_v18 = vpop.eup %7021  ;;  %v5696_v2 = vadd.f32 1e-05, %v5694_v45 }
0x1b00   : > { %v5698_v36 = vmul.f32 %v7022_v18, %v5695_v54  ;;  %vm5704_vm12 = vweird.f32 %v7022_v18 }
0x1b01   : > { %7023 = vrsqrt.f32 %v5696_v2  ;;  %vm5705_vm14 = vmor %vm5703_vm13, %vm5704_vm12  ;;  %vm5713_vm0 = vweird.f32 %v5696_v2 }
0x1b02   : > { %v5699_v33 = vmul.f32 %v7022_v18, %v5698_v36 }
0x1b04   : > { %v5700_v23 = vmul.f32 0.5, %v5699_v33 }
0x1b06   : > { %v5701_v9 = vsub.f32 1.5, %v5700_v23 }
0x1b07   : > { %v7024_v0 = vpop.eup %7023 }
0x1b08   : > { %v5702_v27 = vmul.f32 %v7022_v18, %v5701_v9  ;;  %v5708_v38 = vmul.f32 %v7024_v0, %v5696_v2  ;;  %vm5714_vm15 = vweird.f32 %v7024_v0 }
0x1b09   : > { %vm5715_vm3 = vmor %vm5713_vm0, %vm5714_vm15 }
0x1b0a   : > { %v5706_v44 = vsel %vm5705_vm14, %v7022_v18, %v5702_v27  ;;  %v5709_v43 = vmul.f32 %v7024_v0, %v5708_v38 }
0x1b0b   : > { %v5717_v60 = vmul.f32 %v5706_v44, %v8922_v13 }
0x1b0c   : > { %v5710_v51 = vmul.f32 0.5, %v5709_v43 }
0x1b0d   : > { %v5719_v59 = vmul.f32 %v8848_v62, %v5717_v60 }
0x1b0e   : > { %v5711_v56 = vsub.f32 1.5, %v5710_v51 }
0x1b0f   : > { %v5721_v17 = vadd.f32 %v8853_v15, %v5719_v59 }
0x1b10   : > { %v5712_v7 = vmul.f32 %v7024_v0, %v5711_v56 }
0x1b11   : > { %5727 = vst.msk [vmem:[%s9139_s11 + $0x8] sm:$0xff] %vm858_vm1, %v5721_v17 }
0x1b12   : > { %v5716_v3 = vsel %vm5715_vm3, %v7024_v0, %v5712_v7 }
0x1b13   : > { %v5718_v49 = vmul.f32 %v5716_v3, %v8929_v10 }
0x1b15   : > { %v5720_v13 = vmul.f32 %v8848_v62, %v5718_v49  ;;  %5732 = sbr.rel (%p6538_p1) target bundleno = 7096 (0x1bb8), region = 80 }
0x1b17   : > { %v5722_v58 = vadd.f32 %v8853_v15, %v5720_v13 }
0x1b19   : > { %5728 = vst.msk [vmem:[%s9139_s11 + $0x18] sm:$0xff] %vm858_vm1, %v5722_v58  ;;  %s9154_s11 = sld [smem:[#allocation26_spill]] (!%p6538_p1) }
0x1b1a   : > { %5768 = vrot.lane.b32.xlu2 %v8533_v61, %s7166_s0  ;;  %5743 = vrot.lane.b32.xlu1 %v8298_v63, %s7167_s20  ;;  %vm5761_vm4 = vcmask 392192  }
0x1b1b   : > { %5735 = vrot.lane.b32.xlu0 %v8282_v42, %s7168_s12 }
0x1b22   : > { %5770 = vrot.lane.b32.xlu2 %v8536_v55, %s7166_s0  ;;  %5745 = vrot.lane.b32.xlu1 %v8313_v22, %s7167_s20 }
0x1b23   : > { %5737 = vrot.lane.b32.xlu0 %v8292_v48, %s7168_s12 }
0x1b2a   : > { %5802 = vrot.lane.b32.xlu1 %v8745_v8, %s7166_s0  ;;  %5776 = vrot.lane.b32.xlu2 %v8560_v41, %s7168_s12 }
0x1b2b   : > { %5800 = vrot.lane.b32.xlu0 %v8732_v47, %s7166_s0 }
0x1b32   : > { %5808 = vrot.lane.b32.xlu1 %v8753_v53, %s7168_s12  ;;  %5810 = vrot.lane.b32.xlu2 %v8760_v50, %s7168_s12 }
0x1b33   : > { %5778 = vrot.lane.b32.xlu0 %v8567_v34, %s7168_s12 }
0x1b3a   : > { %5753 = vrot.lane.b32.xlu1 %v8325_v21, %s7169_s24  ;;  %5784 = vrot.lane.b32.xlu2 %v8578_v1, %s7170_s18 }
0x1b3b   : > { %5751 = vrot.lane.b32.xlu0 %v8318_v30, %s7169_s24 }
0x1b42   : > { %5816 = vrot.lane.b32.xlu1 %v8779_v57, %s7170_s18  ;;  %5818 = vrot.lane.b32.xlu2 %v8773_v6, %s7170_s18 }
0x1b43   : > { %5786 = vrot.lane.b32.xlu0 %v8585_v52, %s7170_s18 }
0x1b74   : > { %v5769_v42 = vpop.permute.xlu2 %5768 }
0x1b75   : > { %v5790_v21 = vsel %vm883_vm2, %v8491_v35, %v5769_v42 }
0x1b7c   : > { %v5771_v48 = vpop.permute.xlu2 %5770 }
0x1b84   : > { %v5777_v63 = vpop.permute.xlu2 %5776 }
0x1b85   : > { %v5792_v41 = vsel %vm1468_vm10, %v5790_v21, %v5777_v63 }
0x1b8c   : > { %v5744_v22 = vpop.permute.xlu1 %5743  ;;  %v5811_v61 = vpop.permute.xlu2 %5810 }
0x1b8d   : > { %v5736_v55 = vpop.permute.xlu0 %5735 }
0x1b8e   : > { %v5757_v10 = vsel %vm1468_vm10, %v8202_v16, %v5736_v55 }
0x1b8f   : > { %v5759_v29 = vsel %vm858_vm1, %v5757_v10, %v5744_v22 }
0x1b94   : > { %v5746_v34 = vpop.permute.xlu1 %5745  ;;  %v5785_v1 = vpop.permute.xlu2 %5784 }
0x1b95   : > { %v5794_v30 = vsel %vm1471_vm11, %v5792_v41, %v5785_v1  ;;  %v5738_v47 = vpop.permute.xlu0 %5737 }
0x1b96   : > { %5796 = vst.msk [vmem:[%s9154_s11] sm:$0xff] %vm858_vm1, %v5794_v30  ;;  %v5758_v15 = vsel %vm1468_vm10, %v8264_v40, %v5738_v47  ;;  %v5791_v40 = vsel %vm883_vm2, %v8499_v31, %v5771_v48 }
0x1b9c   : > { %v5803_v52 = vpop.permute.xlu1 %5802  ;;  %v5819_v8 = vpop.permute.xlu2 %5818 }
0x1b9d   : > { %v5823_v53 = vsel %vm883_vm2, %v8738_v32, %v5803_v52  ;;  %v5801_v50 = vpop.permute.xlu0 %5800  ;;  %v5760_v32 = vsel %vm858_vm1, %v5758_v15, %v5746_v34 }
0x1b9e   : > { %v5825_v35 = vsel %vm1468_vm10, %v5823_v53, %v5811_v61  ;;  %v5822_v16 = vsel %vm883_vm2, %v8701_v12, %v5801_v50 }
0x1b9f   : > { %v5827_v6 = vsel %vm1471_vm11, %v5825_v35, %v5819_v8 }
0x1ba0   : > { %5829 = vst.msk [vmem:[%s9155_s4 + $0x8] sm:$0xff] %vm858_vm1, %v5827_v6 }
0x1ba4   : > { %v5809_v57 = vpop.permute.xlu1 %5808 }
0x1ba5   : > { %v5779_v62 = vpop.permute.xlu0 %5778  ;;  %v5824_v4 = vsel %vm1468_vm10, %v5822_v16, %v5809_v57 }
0x1ba6   : > { %v5793_v11 = vsel %vm1468_vm10, %v5791_v40, %v5779_v62 }
0x1bac   : > { %v5754_v19 = vpop.permute.xlu1 %5753 }
0x1bad   : > { %v5763_v25 = vsel %vm5761_vm4, %v5760_v32, %v5754_v19  ;;  %v5752_v14 = vpop.permute.xlu0 %5751 }
0x1bae   : > { %5765 = vst.msk [vmem:[%s9156_s3 + $0x8] sm:$0xff] %vm5359_vm7, %v5763_v25  ;;  %v5762_v20 = vsel %vm5761_vm4, %v5759_v29, %v5752_v14 }
0x1baf   : > { %5764 = vst.msk [vmem:[%s9156_s3] sm:$0xff] %vm5359_vm7, %v5762_v20 }
0x1bb4   : > { %v5817_v39 = vpop.permute.xlu1 %5816 }
0x1bb5   : > { %v5826_v46 = vsel %vm1471_vm11, %v5824_v4, %v5817_v39  ;;  %v5787_v28 = vpop.permute.xlu0 %5786 }
0x1bb6   : > { %5828 = vst.msk [vmem:[%s9155_s4] sm:$0xff] %vm858_vm1, %v5826_v46  ;;  %v5795_v5 = vsel %vm1471_vm11, %v5793_v11, %v5787_v28 }
0x1bb7   : > { %5797 = vst.msk [vmem:[%s9154_s11 + $0x8] sm:$0xff] %vm858_vm1, %v5795_v5 }
0x1bb8 PF: > { %s9157_s6 = sadd.s32 4294967295, %s7147_s26   ;;  %s9158_s17 = sld [smem:[#allocation23_spill]] }
0x1bb9   : > { %p6611_p2 = scmp.eq.s32.totalorder %s9157_s6, 1  ;;  %s7171_s28 = smov [#allocation5]  }
0x1bba   : > { %s5859_s25 = sshll.u32 %s7171_s28, 4  ;;  %s7172_s0 = smov 128   ;;  %s5860_s25 = int_to_ptr.vmem [resolvable:$true] %s5859_s25 }
0x1bbb   : > { %s9159_s20 = smov 8  }
0x1bbe   : > { %s5861_s14 = sshll.u32 %s9158_s17, 4  ;;  %s5862_s14 = int_to_ptr.hbm [resolvable:$true] %s5861_s14 }
0x1bbf   : > { %6603 = dma.vmem_to_hbm [thread:$0]  (%p6611_p2), %s5860_s25, 256, %s5862_s14, [#allocation4], %s7172_s0, %s7172_s0, %s9159_s20  }
0x1bc0   : > { %7122 = dma.done.wait (%p6611_p2), [#allocation4], 256  }
0x1bc1   : > { %7124 = vsyncadd (%p6611_p2), [#allocation4], 4294967040 }
0x1bc2 PF: > { %s31_s26 = sadd.s32 1, %s7147_s26   ;;  %s9160_s21 = sld [smem:[#allocation8_spill]] }
0x1bc3   : > { %p28_p3 = scmp.ge.s32.totalorder %s31_s26, 4   ;;  %s9161_s22 = sld [smem:[#allocation9_spill]] }
0x1bc4   : > { %s9162_s23 = sld [smem:[#allocation12_spill]] }
0x1bc5   : > { %s9163_s24 = sld [smem:[#allocation10_spill]]  ;;  %30 = sbr.rel (!%p28_p3) target bundleno = 21 (0x15), region = 223 }
0x1bc6   : > { %s9164_s25 = sld [smem:[#allocation11_spill]] }
0x1bca   :  { %5927 = vsyncpa [#allocation3], 1 }
0x1bcb   :  { %5929 = vsyncpa [#allocation3 + $0x1], 1 }
0x1bcc   :  { %5930 = vsyncpa [#allocation4], 1 }
0x1bcd   :  { %5932 = vsyncpa [#allocation4 + $0x1], 1 }

</bundles_post_ra>
